<compile_context>
chip_gen: v7x
topology: tpu7x:2x2x1
jax: 0.10.0
libtpu: 0.0.40
codegen_flags: <defaults>
</compile_context>

<pallas_src>
import numpy as np
import jax
import jax.numpy as jnp
from jax import lax
from jax.experimental import pallas as pl
from jax.experimental.pallas import tpu as pltpu

# ----------------------------------------------------------------------------
# Hyper-parameters (small synthetic config consistent with HashEncoding.__init__)
# ----------------------------------------------------------------------------
NUM_LEVELS = 4
MIN_RES = 4
MAX_RES = 16
LOG2_HASHMAP_SIZE = 8
FEATURES_PER_LEVEL = 2
HASH_INIT_SCALE = 0.001

HASH_TABLE_SIZE = 2 ** LOG2_HASHMAP_SIZE
TOTAL_TABLE = HASH_TABLE_SIZE * NUM_LEVELS
OUT_DIM = NUM_LEVELS * FEATURES_PER_LEVEL

# Rows of the per-level hash table processed per inner chunk.  Chosen so the
# (CHUNK, block_bs) multi-hot accumulator + chunk iota stay vreg-resident
# across the 8 corner updates (CHUNK=16, block_bs=1024 -> 16+16 of 64 vregs).
CHUNK = 16
assert HASH_TABLE_SIZE % CHUNK == 0
CHUNKS_PER_LEVEL = HASH_TABLE_SIZE // CHUNK
TOTAL_CHUNKS = TOTAL_TABLE // CHUNK

_growth = np.exp((np.log(MAX_RES) - np.log(MIN_RES)) / (NUM_LEVELS - 1))
# Static per-level scalings, baked into the kernel as Python constants.
SCALINGS = np.floor(MIN_RES * _growth ** np.arange(NUM_LEVELS)).astype(np.float32)

# Instant-NGP hash primes.  2654435761 does not fit in int32; int32 arithmetic
# wraps (two's complement) so we use its wrapped value.  Low bits / bitwise-AND
# mod-2^k make this exactly equivalent to PyTorch's int64 math.
_C1_I32 = 2654435761 - (1 << 32)   # == -1640531535
_C2_I32 = 805459861


# ----------------------------------------------------------------------------
# Pallas kernel
# ----------------------------------------------------------------------------
def hash_encoding_kernel(xt_ref, tbl_ref, o_ref):
    """xt_ref:  (3, Bt)                         f32 coords, batch on lanes.
       tbl_ref: (TOTAL_CHUNKS, F, CHUNK)        f32 hash table, chunked rows.
       o_ref:   (OUT_DIM, Bt)                   f32 output, batch on lanes."""
    xt = xt_ref[...]
    bt = xt.shape[1]

    xc = xt[0:1, :]            # (1, Bt) — lane-dense rows
    yc = xt[1:2, :]
    zc = xt[2:3, :]

    mask = jnp.int32(HASH_TABLE_SIZE - 1)
    c1 = jnp.int32(_C1_I32)
    c2 = jnp.int32(_C2_I32)

    # One small hoisted iota; per chunk we only add the chunk offset.
    iota_base = lax.broadcasted_iota(jnp.int32, (CHUNK, bt), 0)

    for lvl in range(NUM_LEVELS):
        s = jnp.float32(SCALINGS[lvl])
        sx, sy, sz = xc * s, yc * s, zc * s
        fxf, fyf, fzf = jnp.floor(sx), jnp.floor(sy), jnp.floor(sz)
        cx = jnp.ceil(sx).astype(jnp.int32)
        cy = jnp.ceil(sy).astype(jnp.int32)
        cz = jnp.ceil(sz).astype(jnp.int32)
        fx = fxf.astype(jnp.int32)
        fy = fyf.astype(jnp.int32)
        fz = fzf.astype(jnp.int32)

        ox, oy, oz = sx - fxf, sy - fyf, sz - fzf       # (1, Bt)
        px, py, pz = 1.0 - ox, 1.0 - oy, 1.0 - oz

        # Shared hash partial terms (y/z already multiplied by their prime).
        yc_h, yf_h = cy * c1, fy * c1
        zc_h, zf_h = cz * c2, fz * c2
        # Shared pairwise trilinear weight products.
        oo, op_, po, pp = ox * oy, ox * py, px * oy, px * py

        # (hash, trilinear weight) per corner — identical to the PyTorch
        # lerp tree (corner ordering f_0 .. f_7).
        corners = (
            ((cx ^ yc_h ^ zc_h) & mask, oo * oz),   # f_0
            ((cx ^ yf_h ^ zc_h) & mask, op_ * oz),  # f_1
            ((fx ^ yf_h ^ zc_h) & mask, pp * oz),   # f_2
            ((fx ^ yc_h ^ zc_h) & mask, po * oz),   # f_3
            ((cx ^ yc_h ^ zf_h) & mask, oo * pz),   # f_4
            ((cx ^ yf_h ^ zf_h) & mask, op_ * pz),  # f_5
            ((fx ^ yf_h ^ zf_h) & mask, pp * pz),   # f_6
            ((fx ^ yc_h ^ zf_h) & mask, po * pz),   # f_7
        )

        lvl_chunk0 = lvl * CHUNKS_PER_LEVEL

        def chunk_body(ci, acc, corners=corners, lvl_chunk0=lvl_chunk0):
            cs = ci * CHUNK
            iota_c = iota_base + cs                       # (CHUNK, Bt)
            # Register-resident weighted multi-hot for this chunk: all 8
            # corner compare/select/add updates before any contraction.
            wl = jnp.zeros((CHUNK, bt), jnp.float32)
            for h, w in corners:
                wl = wl + jnp.where(iota_c == h, w, 0.0)
            # Contract against this chunk of the per-level table on the MXU
            # (dynamic index only on the leading, untiled axis).
            tbl_c = tbl_ref[lvl_chunk0 + ci]              # (F, CHUNK)
            return acc + jnp.dot(tbl_c, wl,
                                 preferred_element_type=jnp.float32)

        acc0 = jnp.zeros((FEATURES_PER_LEVEL, bt), jnp.float32)
        acc = lax.fori_loop(0, CHUNKS_PER_LEVEL, chunk_body, acc0)

        # Lane-dense 2-row slice store into the (OUT_DIM, Bt) output block.
        r0 = lvl * FEATURES_PER_LEVEL
        o_ref[r0:r0 + FEATURES_PER_LEVEL, :] = acc


# ----------------------------------------------------------------------------
# Wrapper
# ----------------------------------------------------------------------------
def _chunked_table(hash_table):
    """(TOTAL_TABLE, F) -> (TOTAL_CHUNKS, F, CHUNK).

    Chunk c holds table rows [c*CHUNK, (c+1)*CHUNK) transposed to (F, CHUNK);
    level l owns chunks [l*CHUNKS_PER_LEVEL, (l+1)*CHUNKS_PER_LEVEL)."""
    t = hash_table.astype(jnp.float32).reshape(TOTAL_CHUNKS, CHUNK,
                                               FEATURES_PER_LEVEL)
    return jnp.transpose(t, (0, 2, 1))


def hash_encoding(in_tensor, hash_table, *, block_bs=1024):
    bs = in_tensor.shape[0]
    assert in_tensor.shape[-1] == 3

    # Batch tile: multiple of 128 (vreg/MXU lane width); 1024 default fills
    # the 256-wide MXU N dim on v6e/v7x and amortizes per-grid-step overhead.
    block_bs = min(block_bs, pl.cdiv(bs, 128) * 128)
    block_bs = max(128, (block_bs // 128) * 128)
    bs_pad = pl.cdiv(bs, block_bs) * block_bs

    # Batch onto the lane axis.  (If the consumer can accept (OUT_DIM, bs),
    # both wrapper transposes can be dropped — kept here to preserve the
    # original module's (bs, OUT_DIM) interface.)
    xt = jnp.transpose(in_tensor.astype(jnp.float32))        # (3, bs)
    if bs_pad != bs:
        xt = jnp.pad(xt, ((0, 0), (0, bs_pad - bs)))
    tbl = _chunked_table(hash_table)                          # (TC, F, CHUNK)

    out_t = pl.pallas_call(
        hash_encoding_kernel,
        out_shape=jax.ShapeDtypeStruct((OUT_DIM, bs_pad), jnp.float32),
        grid_spec=pltpu.PrefetchScalarGridSpec(
            num_scalar_prefetch=0,
            grid=(bs_pad // block_bs,),
            in_specs=[
                pl.BlockSpec((3, block_bs), lambda i: (0, i)),
                pl.BlockSpec((TOTAL_CHUNKS, FEATURES_PER_LEVEL, CHUNK),
                             lambda i: (0, 0, 0)),
            ],
            out_specs=pl.BlockSpec((OUT_DIM, block_bs), lambda i: (0, i)),
        ),
        compiler_params=pltpu.CompilerParams(
            # Batch blocks are independent -> shard across TCs on v7x megacore.
            # (If profiling shows only one TC active on v7x, switch this axis
            # to pltpu.CORE_PARALLEL.)
            dimension_semantics=("parallel",),
            # Per-block VMEM use is ~1 MB; leave ample headroom under v7x's
            # 64 MiB physical VMEM.
            vmem_limit_bytes=32 * 1024 * 1024,
        ),
    )(xt, tbl)

    return jnp.transpose(out_t[:, :bs])                      # (bs, OUT_DIM)


# ----------------------------------------------------------------------------
# Pure-numpy reference (mirrors HashEncoding.pytorch_fwd, int64 hash math)
# ----------------------------------------------------------------------------
def reference_forward(in_np, table_np):
    bs = in_np.shape[0]
    scalings = SCALINGS.astype(np.float32)
    scaled = in_np[:, None, :].astype(np.float32) * scalings[None, :, None]  # (bs,L,3)
    scaled_c = np.ceil(scaled).astype(np.int64)
    scaled_f = np.floor(scaled).astype(np.int64)
    offset = scaled - scaled_f
    hash_offset = np.arange(NUM_LEVELS, dtype=np.int64) * HASH_TABLE_SIZE

    def hash_fn(t):  # (bs, L, 3) int64
        t = t * np.array([1, 2654435761, 805459861], dtype=np.int64)
        h = np.bitwise_xor(np.bitwise_xor(t[..., 0], t[..., 1]), t[..., 2])
        h = np.mod(h, HASH_TABLE_SIZE)
        return h + hash_offset

    cc, ff = scaled_c, scaled_f
    sel = lambda a, b, c: np.stack([a, b, c], axis=-1)
    h0 = hash_fn(sel(cc[..., 0], cc[..., 1], cc[..., 2]))
    h1 = hash_fn(sel(cc[..., 0], ff[..., 1], cc[..., 2]))
    h2 = hash_fn(sel(ff[..., 0], ff[..., 1], cc[..., 2]))
    h3 = hash_fn(sel(ff[..., 0], cc[..., 1], cc[..., 2]))
    h4 = hash_fn(sel(cc[..., 0], cc[..., 1], ff[..., 2]))
    h5 = hash_fn(sel(cc[..., 0], ff[..., 1], ff[..., 2]))
    h6 = hash_fn(sel(ff[..., 0], ff[..., 1], ff[..., 2]))
    h7 = hash_fn(sel(ff[..., 0], cc[..., 1], ff[..., 2]))

    g = lambda h: table_np[h]  # (bs, L, F)
    ox, oy, oz = offset[..., 0:1], offset[..., 1:2], offset[..., 2:3]
    f03 = g(h0) * ox + g(h3) * (1 - ox)
    f12 = g(h1) * ox + g(h2) * (1 - ox)
    f56 = g(h5) * ox + g(h6) * (1 - ox)
    f47 = g(h4) * ox + g(h7) * (1 - ox)
    f0312 = f03 * oy + f12 * (1 - oy)
    f4756 = f47 * oy + f56 * (1 - oy)
    enc = f0312 * oz + f4756 * (1 - oz)
    return enc.reshape(bs, -1).astype(np.float32)


# ----------------------------------------------------------------------------
if __name__ == "__main__":
    key = jax.random.PRNGKey(0)
    k_table, k_in = jax.random.split(key)

    # Deterministic parameter init: hash_table ~ (U[0,1)*2 - 1) * hash_init_scale
    hash_table = (jax.random.uniform(k_table, (TOTAL_TABLE, FEATURES_PER_LEVEL),
                                     dtype=jnp.float32) * 2.0 - 1.0) * HASH_INIT_SCALE

    bs = 2000   # not a multiple of the tile -> also exercises the padding path
    in_tensor = jax.random.uniform(k_in, (bs, 3), dtype=jnp.float32,
                                   minval=-0.2, maxval=1.2)

    out = hash_encoding(in_tensor, hash_table, block_bs=1024)
    out = jax.block_until_ready(out)

    ref = reference_forward(np.asarray(in_tensor), np.asarray(hash_table))
    np.testing.assert_allclose(np.asarray(out), ref, rtol=1e-4, atol=1e-6)

    print("KERNEL_OK")
</pallas_src>

<mosaic_0001>
module attributes {stable_mosaic.version = 11 : i64} {
  func.func @hash_encoding_kernel(%arg0: i32, %arg1: memref<3x1024xf32, #tpu.memory_space<vmem>>, %arg2: memref<64x2x16xf32, #tpu.memory_space<vmem>>, %arg3: memref<8x1024xf32, #tpu.memory_space<vmem>>) attributes {dimension_semantics = [#tpu.dimension_semantics<parallel>], iteration_bounds = array<i64: 2>, scalar_prefetch = 0 : i64, scratch_operands = 0 : i64, tpu.core_type = #tpu.core_type<tc>, window_params = [{transform_indices = @transform_0, window_bounds = array<i64: 3, 1024>}, {pipeline_mode = #tpu.pipeline_mode<synchronous>, transform_indices = @transform_1, window_bounds = array<i64: 64, 2, 16>}, {transform_indices = @transform_2, window_bounds = array<i64: 8, 1024>}]} {
    %c0 = arith.constant 0 : index
    %c0_0 = arith.constant 0 : index
    %0 = vector.load %arg1[%c0, %c0_0] : memref<3x1024xf32, #tpu.memory_space<vmem>>, vector<3x1024xf32>
    %1 = vector.extract_strided_slice %0 {offsets = [0, 0], sizes = [1, 1024], strides = [1, 1]} : vector<3x1024xf32> to vector<1x1024xf32>
    %2 = vector.extract_strided_slice %0 {offsets = [1, 0], sizes = [1, 1024], strides = [1, 1]} : vector<3x1024xf32> to vector<1x1024xf32>
    %3 = vector.extract_strided_slice %0 {offsets = [2, 0], sizes = [1, 1024], strides = [1, 1]} : vector<3x1024xf32> to vector<1x1024xf32>
    %4 = tpu.iota {dimensions = array<i32: 0>} : vector<16x1024xi32>
    %cst = arith.constant 4.000000e+00 : f32
    %5 = vector.broadcast %cst : f32 to vector<1x1024xf32>
    %6 = arith.mulf %1, %5 : vector<1x1024xf32>
    %cst_1 = arith.constant 4.000000e+00 : f32
    %7 = vector.broadcast %cst_1 : f32 to vector<1x1024xf32>
    %8 = arith.mulf %2, %7 : vector<1x1024xf32>
    %cst_2 = arith.constant 4.000000e+00 : f32
    %9 = vector.broadcast %cst_2 : f32 to vector<1x1024xf32>
    %10 = arith.mulf %3, %9 : vector<1x1024xf32>
    %11 = math.floor %6 : vector<1x1024xf32>
    %12 = math.floor %8 : vector<1x1024xf32>
    %13 = math.floor %10 : vector<1x1024xf32>
    %14 = math.ceil %6 : vector<1x1024xf32>
    %15 = arith.fptosi %14 : vector<1x1024xf32> to vector<1x1024xi32>
    %16 = math.ceil %8 : vector<1x1024xf32>
    %17 = arith.fptosi %16 : vector<1x1024xf32> to vector<1x1024xi32>
    %18 = math.ceil %10 : vector<1x1024xf32>
    %19 = arith.fptosi %18 : vector<1x1024xf32> to vector<1x1024xi32>
    %20 = arith.fptosi %11 : vector<1x1024xf32> to vector<1x1024xi32>
    %21 = arith.fptosi %12 : vector<1x1024xf32> to vector<1x1024xi32>
    %22 = arith.fptosi %13 : vector<1x1024xf32> to vector<1x1024xi32>
    %23 = arith.subf %6, %11 : vector<1x1024xf32>
    %24 = arith.subf %8, %12 : vector<1x1024xf32>
    %25 = arith.subf %10, %13 : vector<1x1024xf32>
    %cst_3 = arith.constant 1.000000e+00 : f32
    %26 = vector.broadcast %cst_3 : f32 to vector<1x1024xf32>
    %27 = arith.subf %26, %23 : vector<1x1024xf32>
    %cst_4 = arith.constant 1.000000e+00 : f32
    %28 = vector.broadcast %cst_4 : f32 to vector<1x1024xf32>
    %29 = arith.subf %28, %24 : vector<1x1024xf32>
    %cst_5 = arith.constant 1.000000e+00 : f32
    %30 = vector.broadcast %cst_5 : f32 to vector<1x1024xf32>
    %31 = arith.subf %30, %25 : vector<1x1024xf32>
    %c-1640531535_i32 = arith.constant -1640531535 : i32
    %32 = vector.broadcast %c-1640531535_i32 : i32 to vector<1x1024xi32>
    %33 = arith.muli %17, %32 : vector<1x1024xi32>
    %c-1640531535_i32_6 = arith.constant -1640531535 : i32
    %34 = vector.broadcast %c-1640531535_i32_6 : i32 to vector<1x1024xi32>
    %35 = arith.muli %21, %34 : vector<1x1024xi32>
    %c805459861_i32 = arith.constant 805459861 : i32
    %36 = vector.broadcast %c805459861_i32 : i32 to vector<1x1024xi32>
    %37 = arith.muli %19, %36 : vector<1x1024xi32>
    %c805459861_i32_7 = arith.constant 805459861 : i32
    %38 = vector.broadcast %c805459861_i32_7 : i32 to vector<1x1024xi32>
    %39 = arith.muli %22, %38 : vector<1x1024xi32>
    %40 = arith.mulf %23, %24 : vector<1x1024xf32>
    %41 = arith.mulf %23, %29 : vector<1x1024xf32>
    %42 = arith.mulf %27, %24 : vector<1x1024xf32>
    %43 = arith.mulf %27, %29 : vector<1x1024xf32>
    %44 = arith.xori %15, %33 : vector<1x1024xi32>
    %45 = arith.xori %44, %37 : vector<1x1024xi32>
    %c255_i32 = arith.constant 255 : i32
    %46 = vector.broadcast %c255_i32 : i32 to vector<1x1024xi32>
    %47 = arith.andi %45, %46 : vector<1x1024xi32>
    %48 = arith.mulf %40, %25 : vector<1x1024xf32>
    %49 = arith.xori %15, %35 : vector<1x1024xi32>
    %50 = arith.xori %49, %37 : vector<1x1024xi32>
    %c255_i32_8 = arith.constant 255 : i32
    %51 = vector.broadcast %c255_i32_8 : i32 to vector<1x1024xi32>
    %52 = arith.andi %50, %51 : vector<1x1024xi32>
    %53 = arith.mulf %41, %25 : vector<1x1024xf32>
    %54 = arith.xori %20, %35 : vector<1x1024xi32>
    %55 = arith.xori %54, %37 : vector<1x1024xi32>
    %c255_i32_9 = arith.constant 255 : i32
    %56 = vector.broadcast %c255_i32_9 : i32 to vector<1x1024xi32>
    %57 = arith.andi %55, %56 : vector<1x1024xi32>
    %58 = arith.mulf %43, %25 : vector<1x1024xf32>
    %59 = arith.xori %20, %33 : vector<1x1024xi32>
    %60 = arith.xori %59, %37 : vector<1x1024xi32>
    %c255_i32_10 = arith.constant 255 : i32
    %61 = vector.broadcast %c255_i32_10 : i32 to vector<1x1024xi32>
    %62 = arith.andi %60, %61 : vector<1x1024xi32>
    %63 = arith.mulf %42, %25 : vector<1x1024xf32>
    %64 = arith.xori %15, %33 : vector<1x1024xi32>
    %65 = arith.xori %64, %39 : vector<1x1024xi32>
    %c255_i32_11 = arith.constant 255 : i32
    %66 = vector.broadcast %c255_i32_11 : i32 to vector<1x1024xi32>
    %67 = arith.andi %65, %66 : vector<1x1024xi32>
    %68 = arith.mulf %40, %31 : vector<1x1024xf32>
    %69 = arith.xori %15, %35 : vector<1x1024xi32>
    %70 = arith.xori %69, %39 : vector<1x1024xi32>
    %c255_i32_12 = arith.constant 255 : i32
    %71 = vector.broadcast %c255_i32_12 : i32 to vector<1x1024xi32>
    %72 = arith.andi %70, %71 : vector<1x1024xi32>
    %73 = arith.mulf %41, %31 : vector<1x1024xf32>
    %74 = arith.xori %20, %35 : vector<1x1024xi32>
    %75 = arith.xori %74, %39 : vector<1x1024xi32>
    %c255_i32_13 = arith.constant 255 : i32
    %76 = vector.broadcast %c255_i32_13 : i32 to vector<1x1024xi32>
    %77 = arith.andi %75, %76 : vector<1x1024xi32>
    %78 = arith.mulf %43, %31 : vector<1x1024xf32>
    %79 = arith.xori %20, %33 : vector<1x1024xi32>
    %80 = arith.xori %79, %39 : vector<1x1024xi32>
    %c255_i32_14 = arith.constant 255 : i32
    %81 = vector.broadcast %c255_i32_14 : i32 to vector<1x1024xi32>
    %82 = arith.andi %80, %81 : vector<1x1024xi32>
    %83 = arith.mulf %42, %31 : vector<1x1024xf32>
    %cst_15 = arith.constant 0.000000e+00 : f32
    %84 = vector.broadcast %cst_15 : f32 to vector<2x1024xf32>
    %c0_i32 = arith.constant 0 : i32
    %c16_i32 = arith.constant 16 : i32
    %85 = arith.addi %c0_i32, %c16_i32 : i32
    %c1_i32 = arith.constant 1 : i32
    %86 = scf.for %arg4 = %c0_i32 to %85 step %c1_i32 iter_args(%arg5 = %84) -> (vector<2x1024xf32>)  : i32 {
      %c16_i32_91 = arith.constant 16 : i32
      %337 = arith.muli %arg4, %c16_i32_91 : i32
      %338 = vector.broadcast %337 : i32 to vector<16x1024xi32>
      %339 = arith.addi %4, %338 : vector<16x1024xi32>
      %cst_92 = arith.constant 0.000000e+00 : f32
      %340 = vector.broadcast %cst_92 : f32 to vector<16x1024xf32>
      %341 = vector.broadcast %47 : vector<1x1024xi32> to vector<16x1024xi32>
      %342 = arith.cmpi eq, %339, %341 : vector<16x1024xi32>
      %cst_93 = arith.constant 0.000000e+00 : f32
      %343 = vector.shape_cast %48 : vector<1x1024xf32> to vector<1x1024xf32>
      %344 = vector.broadcast %343 : vector<1x1024xf32> to vector<16x1024xf32>
      %345 = vector.broadcast %cst_93 : f32 to vector<16x1024xf32>
      %346 = arith.select %342, %344, %345 : vector<16x1024xi1>, vector<16x1024xf32>
      %347 = arith.addf %340, %346 : vector<16x1024xf32>
      %348 = vector.broadcast %52 : vector<1x1024xi32> to vector<16x1024xi32>
      %349 = arith.cmpi eq, %339, %348 : vector<16x1024xi32>
      %cst_94 = arith.constant 0.000000e+00 : f32
      %350 = vector.shape_cast %53 : vector<1x1024xf32> to vector<1x1024xf32>
      %351 = vector.broadcast %350 : vector<1x1024xf32> to vector<16x1024xf32>
      %352 = vector.broadcast %cst_94 : f32 to vector<16x1024xf32>
      %353 = arith.select %349, %351, %352 : vector<16x1024xi1>, vector<16x1024xf32>
      %354 = arith.addf %347, %353 : vector<16x1024xf32>
      %355 = vector.broadcast %57 : vector<1x1024xi32> to vector<16x1024xi32>
      %356 = arith.cmpi eq, %339, %355 : vector<16x1024xi32>
      %cst_95 = arith.constant 0.000000e+00 : f32
      %357 = vector.shape_cast %58 : vector<1x1024xf32> to vector<1x1024xf32>
      %358 = vector.broadcast %357 : vector<1x1024xf32> to vector<16x1024xf32>
      %359 = vector.broadcast %cst_95 : f32 to vector<16x1024xf32>
      %360 = arith.select %356, %358, %359 : vector<16x1024xi1>, vector<16x1024xf32>
      %361 = arith.addf %354, %360 : vector<16x1024xf32>
      %362 = vector.broadcast %62 : vector<1x1024xi32> to vector<16x1024xi32>
      %363 = arith.cmpi eq, %339, %362 : vector<16x1024xi32>
      %cst_96 = arith.constant 0.000000e+00 : f32
      %364 = vector.shape_cast %63 : vector<1x1024xf32> to vector<1x1024xf32>
      %365 = vector.broadcast %364 : vector<1x1024xf32> to vector<16x1024xf32>
      %366 = vector.broadcast %cst_96 : f32 to vector<16x1024xf32>
      %367 = arith.select %363, %365, %366 : vector<16x1024xi1>, vector<16x1024xf32>
      %368 = arith.addf %361, %367 : vector<16x1024xf32>
      %369 = vector.broadcast %67 : vector<1x1024xi32> to vector<16x1024xi32>
      %370 = arith.cmpi eq, %339, %369 : vector<16x1024xi32>
      %cst_97 = arith.constant 0.000000e+00 : f32
      %371 = vector.shape_cast %68 : vector<1x1024xf32> to vector<1x1024xf32>
      %372 = vector.broadcast %371 : vector<1x1024xf32> to vector<16x1024xf32>
      %373 = vector.broadcast %cst_97 : f32 to vector<16x1024xf32>
      %374 = arith.select %370, %372, %373 : vector<16x1024xi1>, vector<16x1024xf32>
      %375 = arith.addf %368, %374 : vector<16x1024xf32>
      %376 = vector.broadcast %72 : vector<1x1024xi32> to vector<16x1024xi32>
      %377 = arith.cmpi eq, %339, %376 : vector<16x1024xi32>
      %cst_98 = arith.constant 0.000000e+00 : f32
      %378 = vector.shape_cast %73 : vector<1x1024xf32> to vector<1x1024xf32>
      %379 = vector.broadcast %378 : vector<1x1024xf32> to vector<16x1024xf32>
      %380 = vector.broadcast %cst_98 : f32 to vector<16x1024xf32>
      %381 = arith.select %377, %379, %380 : vector<16x1024xi1>, vector<16x1024xf32>
      %382 = arith.addf %375, %381 : vector<16x1024xf32>
      %383 = vector.broadcast %77 : vector<1x1024xi32> to vector<16x1024xi32>
      %384 = arith.cmpi eq, %339, %383 : vector<16x1024xi32>
      %cst_99 = arith.constant 0.000000e+00 : f32
      %385 = vector.shape_cast %78 : vector<1x1024xf32> to vector<1x1024xf32>
      %386 = vector.broadcast %385 : vector<1x1024xf32> to vector<16x1024xf32>
      %387 = vector.broadcast %cst_99 : f32 to vector<16x1024xf32>
      %388 = arith.select %384, %386, %387 : vector<16x1024xi1>, vector<16x1024xf32>
      %389 = arith.addf %382, %388 : vector<16x1024xf32>
      %390 = vector.broadcast %82 : vector<1x1024xi32> to vector<16x1024xi32>
      %391 = arith.cmpi eq, %339, %390 : vector<16x1024xi32>
      %cst_100 = arith.constant 0.000000e+00 : f32
      %392 = vector.shape_cast %83 : vector<1x1024xf32> to vector<1x1024xf32>
      %393 = vector.broadcast %392 : vector<1x1024xf32> to vector<16x1024xf32>
      %394 = vector.broadcast %cst_100 : f32 to vector<16x1024xf32>
      %395 = arith.select %391, %393, %394 : vector<16x1024xi1>, vector<16x1024xf32>
      %396 = arith.addf %389, %395 : vector<16x1024xf32>
      %c0_i32_101 = arith.constant 0 : i32
      %397 = arith.addi %c0_i32_101, %arg4 : i32
      %398 = arith.index_cast %397 : i32 to index
      %c0_102 = arith.constant 0 : index
      %c0_103 = arith.constant 0 : index
      %399 = vector.load %arg2[%398, %c0_102, %c0_103] : memref<64x2x16xf32, #tpu.memory_space<vmem>>, vector<1x2x16xf32>
      %400 = vector.shape_cast %399 : vector<1x2x16xf32> to vector<2x16xf32>
      %cst_104 = arith.constant dense<0.000000e+00> : vector<2x1024xf32>
      %401 = tpu.matmul %400, %396, %cst_104 {dimension_numbers = #tpu.dot_dimension_numbers<[1], [0], [0], [1], [0, 0, 1, 1], [], []>} : vector<2x16xf32>, vector<16x1024xf32>, vector<2x1024xf32> -> vector<2x1024xf32>
      %402 = arith.addf %arg5, %401 : vector<2x1024xf32>
      scf.yield %402 : vector<2x1024xf32>
    }
    %c16_i32_16 = arith.constant 16 : i32
    %c0_17 = arith.constant 0 : index
    %c0_18 = arith.constant 0 : index
    %87 = vector.load %arg3[%c0_17, %c0_18] : memref<8x1024xf32, #tpu.memory_space<vmem>>, vector<2x1024xf32>
    tpu.vector_store %arg3[%c0_17, %c0_18], %86 {strides = array<i32>} : memref<8x1024xf32, #tpu.memory_space<vmem>>, vector<2x1024xf32>,
    %cst_19 = arith.constant 6.000000e+00 : f32
    %88 = vector.broadcast %cst_19 : f32 to vector<1x1024xf32>
    %89 = arith.mulf %1, %88 : vector<1x1024xf32>
    %cst_20 = arith.constant 6.000000e+00 : f32
    %90 = vector.broadcast %cst_20 : f32 to vector<1x1024xf32>
    %91 = arith.mulf %2, %90 : vector<1x1024xf32>
    %cst_21 = arith.constant 6.000000e+00 : f32
    %92 = vector.broadcast %cst_21 : f32 to vector<1x1024xf32>
    %93 = arith.mulf %3, %92 : vector<1x1024xf32>
    %94 = math.floor %89 : vector<1x1024xf32>
    %95 = math.floor %91 : vector<1x1024xf32>
    %96 = math.floor %93 : vector<1x1024xf32>
    %97 = math.ceil %89 : vector<1x1024xf32>
    %98 = arith.fptosi %97 : vector<1x1024xf32> to vector<1x1024xi32>
    %99 = math.ceil %91 : vector<1x1024xf32>
    %100 = arith.fptosi %99 : vector<1x1024xf32> to vector<1x1024xi32>
    %101 = math.ceil %93 : vector<1x1024xf32>
    %102 = arith.fptosi %101 : vector<1x1024xf32> to vector<1x1024xi32>
    %103 = arith.fptosi %94 : vector<1x1024xf32> to vector<1x1024xi32>
    %104 = arith.fptosi %95 : vector<1x1024xf32> to vector<1x1024xi32>
    %105 = arith.fptosi %96 : vector<1x1024xf32> to vector<1x1024xi32>
    %106 = arith.subf %89, %94 : vector<1x1024xf32>
    %107 = arith.subf %91, %95 : vector<1x1024xf32>
    %108 = arith.subf %93, %96 : vector<1x1024xf32>
    %cst_22 = arith.constant 1.000000e+00 : f32
    %109 = vector.broadcast %cst_22 : f32 to vector<1x1024xf32>
    %110 = arith.subf %109, %106 : vector<1x1024xf32>
    %cst_23 = arith.constant 1.000000e+00 : f32
    %111 = vector.broadcast %cst_23 : f32 to vector<1x1024xf32>
    %112 = arith.subf %111, %107 : vector<1x1024xf32>
    %cst_24 = arith.constant 1.000000e+00 : f32
    %113 = vector.broadcast %cst_24 : f32 to vector<1x1024xf32>
    %114 = arith.subf %113, %108 : vector<1x1024xf32>
    %c-1640531535_i32_25 = arith.constant -1640531535 : i32
    %115 = vector.broadcast %c-1640531535_i32_25 : i32 to vector<1x1024xi32>
    %116 = arith.muli %100, %115 : vector<1x1024xi32>
    %c-1640531535_i32_26 = arith.constant -1640531535 : i32
    %117 = vector.broadcast %c-1640531535_i32_26 : i32 to vector<1x1024xi32>
    %118 = arith.muli %104, %117 : vector<1x1024xi32>
    %c805459861_i32_27 = arith.constant 805459861 : i32
    %119 = vector.broadcast %c805459861_i32_27 : i32 to vector<1x1024xi32>
    %120 = arith.muli %102, %119 : vector<1x1024xi32>
    %c805459861_i32_28 = arith.constant 805459861 : i32
    %121 = vector.broadcast %c805459861_i32_28 : i32 to vector<1x1024xi32>
    %122 = arith.muli %105, %121 : vector<1x1024xi32>
    %123 = arith.mulf %106, %107 : vector<1x1024xf32>
    %124 = arith.mulf %106, %112 : vector<1x1024xf32>
    %125 = arith.mulf %110, %107 : vector<1x1024xf32>
    %126 = arith.mulf %110, %112 : vector<1x1024xf32>
    %127 = arith.xori %98, %116 : vector<1x1024xi32>
    %128 = arith.xori %127, %120 : vector<1x1024xi32>
    %c255_i32_29 = arith.constant 255 : i32
    %129 = vector.broadcast %c255_i32_29 : i32 to vector<1x1024xi32>
    %130 = arith.andi %128, %129 : vector<1x1024xi32>
    %131 = arith.mulf %123, %108 : vector<1x1024xf32>
    %132 = arith.xori %98, %118 : vector<1x1024xi32>
    %133 = arith.xori %132, %120 : vector<1x1024xi32>
    %c255_i32_30 = arith.constant 255 : i32
    %134 = vector.broadcast %c255_i32_30 : i32 to vector<1x1024xi32>
    %135 = arith.andi %133, %134 : vector<1x1024xi32>
    %136 = arith.mulf %124, %108 : vector<1x1024xf32>
    %137 = arith.xori %103, %118 : vector<1x1024xi32>
    %138 = arith.xori %137, %120 : vector<1x1024xi32>
    %c255_i32_31 = arith.constant 255 : i32
    %139 = vector.broadcast %c255_i32_31 : i32 to vector<1x1024xi32>
    %140 = arith.andi %138, %139 : vector<1x1024xi32>
    %141 = arith.mulf %126, %108 : vector<1x1024xf32>
    %142 = arith.xori %103, %116 : vector<1x1024xi32>
    %143 = arith.xori %142, %120 : vector<1x1024xi32>
    %c255_i32_32 = arith.constant 255 : i32
    %144 = vector.broadcast %c255_i32_32 : i32 to vector<1x1024xi32>
    %145 = arith.andi %143, %144 : vector<1x1024xi32>
    %146 = arith.mulf %125, %108 : vector<1x1024xf32>
    %147 = arith.xori %98, %116 : vector<1x1024xi32>
    %148 = arith.xori %147, %122 : vector<1x1024xi32>
    %c255_i32_33 = arith.constant 255 : i32
    %149 = vector.broadcast %c255_i32_33 : i32 to vector<1x1024xi32>
    %150 = arith.andi %148, %149 : vector<1x1024xi32>
    %151 = arith.mulf %123, %114 : vector<1x1024xf32>
    %152 = arith.xori %98, %118 : vector<1x1024xi32>
    %153 = arith.xori %152, %122 : vector<1x1024xi32>
    %c255_i32_34 = arith.constant 255 : i32
    %154 = vector.broadcast %c255_i32_34 : i32 to vector<1x1024xi32>
    %155 = arith.andi %153, %154 : vector<1x1024xi32>
    %156 = arith.mulf %124, %114 : vector<1x1024xf32>
    %157 = arith.xori %103, %118 : vector<1x1024xi32>
    %158 = arith.xori %157, %122 : vector<1x1024xi32>
    %c255_i32_35 = arith.constant 255 : i32
    %159 = vector.broadcast %c255_i32_35 : i32 to vector<1x1024xi32>
    %160 = arith.andi %158, %159 : vector<1x1024xi32>
    %161 = arith.mulf %126, %114 : vector<1x1024xf32>
    %162 = arith.xori %103, %116 : vector<1x1024xi32>
    %163 = arith.xori %162, %122 : vector<1x1024xi32>
    %c255_i32_36 = arith.constant 255 : i32
    %164 = vector.broadcast %c255_i32_36 : i32 to vector<1x1024xi32>
    %165 = arith.andi %163, %164 : vector<1x1024xi32>
    %166 = arith.mulf %125, %114 : vector<1x1024xf32>
    %cst_37 = arith.constant 0.000000e+00 : f32
    %167 = vector.broadcast %cst_37 : f32 to vector<2x1024xf32>
    %c0_i32_38 = arith.constant 0 : i32
    %c16_i32_39 = arith.constant 16 : i32
    %168 = arith.addi %c0_i32_38, %c16_i32_39 : i32
    %c1_i32_40 = arith.constant 1 : i32
    %169 = scf.for %arg4 = %c0_i32_38 to %168 step %c1_i32_40 iter_args(%arg5 = %167) -> (vector<2x1024xf32>)  : i32 {
      %c16_i32_91 = arith.constant 16 : i32
      %337 = arith.muli %arg4, %c16_i32_91 : i32
      %338 = vector.broadcast %337 : i32 to vector<16x1024xi32>
      %339 = arith.addi %4, %338 : vector<16x1024xi32>
      %cst_92 = arith.constant 0.000000e+00 : f32
      %340 = vector.broadcast %cst_92 : f32 to vector<16x1024xf32>
      %341 = vector.broadcast %130 : vector<1x1024xi32> to vector<16x1024xi32>
      %342 = arith.cmpi eq, %339, %341 : vector<16x1024xi32>
      %cst_93 = arith.constant 0.000000e+00 : f32
      %343 = vector.shape_cast %131 : vector<1x1024xf32> to vector<1x1024xf32>
      %344 = vector.broadcast %343 : vector<1x1024xf32> to vector<16x1024xf32>
      %345 = vector.broadcast %cst_93 : f32 to vector<16x1024xf32>
      %346 = arith.select %342, %344, %345 : vector<16x1024xi1>, vector<16x1024xf32>
      %347 = arith.addf %340, %346 : vector<16x1024xf32>
      %348 = vector.broadcast %135 : vector<1x1024xi32> to vector<16x1024xi32>
      %349 = arith.cmpi eq, %339, %348 : vector<16x1024xi32>
      %cst_94 = arith.constant 0.000000e+00 : f32
      %350 = vector.shape_cast %136 : vector<1x1024xf32> to vector<1x1024xf32>
      %351 = vector.broadcast %350 : vector<1x1024xf32> to vector<16x1024xf32>
      %352 = vector.broadcast %cst_94 : f32 to vector<16x1024xf32>
      %353 = arith.select %349, %351, %352 : vector<16x1024xi1>, vector<16x1024xf32>
      %354 = arith.addf %347, %353 : vector<16x1024xf32>
      %355 = vector.broadcast %140 : vector<1x1024xi32> to vector<16x1024xi32>
      %356 = arith.cmpi eq, %339, %355 : vector<16x1024xi32>
      %cst_95 = arith.constant 0.000000e+00 : f32
      %357 = vector.shape_cast %141 : vector<1x1024xf32> to vector<1x1024xf32>
      %358 = vector.broadcast %357 : vector<1x1024xf32> to vector<16x1024xf32>
      %359 = vector.broadcast %cst_95 : f32 to vector<16x1024xf32>
      %360 = arith.select %356, %358, %359 : vector<16x1024xi1>, vector<16x1024xf32>
      %361 = arith.addf %354, %360 : vector<16x1024xf32>
      %362 = vector.broadcast %145 : vector<1x1024xi32> to vector<16x1024xi32>
      %363 = arith.cmpi eq, %339, %362 : vector<16x1024xi32>
      %cst_96 = arith.constant 0.000000e+00 : f32
      %364 = vector.shape_cast %146 : vector<1x1024xf32> to vector<1x1024xf32>
      %365 = vector.broadcast %364 : vector<1x1024xf32> to vector<16x1024xf32>
      %366 = vector.broadcast %cst_96 : f32 to vector<16x1024xf32>
      %367 = arith.select %363, %365, %366 : vector<16x1024xi1>, vector<16x1024xf32>
      %368 = arith.addf %361, %367 : vector<16x1024xf32>
      %369 = vector.broadcast %150 : vector<1x1024xi32> to vector<16x1024xi32>
      %370 = arith.cmpi eq, %339, %369 : vector<16x1024xi32>
      %cst_97 = arith.constant 0.000000e+00 : f32
      %371 = vector.shape_cast %151 : vector<1x1024xf32> to vector<1x1024xf32>
      %372 = vector.broadcast %371 : vector<1x1024xf32> to vector<16x1024xf32>
      %373 = vector.broadcast %cst_97 : f32 to vector<16x1024xf32>
      %374 = arith.select %370, %372, %373 : vector<16x1024xi1>, vector<16x1024xf32>
      %375 = arith.addf %368, %374 : vector<16x1024xf32>
      %376 = vector.broadcast %155 : vector<1x1024xi32> to vector<16x1024xi32>
      %377 = arith.cmpi eq, %339, %376 : vector<16x1024xi32>
      %cst_98 = arith.constant 0.000000e+00 : f32
      %378 = vector.shape_cast %156 : vector<1x1024xf32> to vector<1x1024xf32>
      %379 = vector.broadcast %378 : vector<1x1024xf32> to vector<16x1024xf32>
      %380 = vector.broadcast %cst_98 : f32 to vector<16x1024xf32>
      %381 = arith.select %377, %379, %380 : vector<16x1024xi1>, vector<16x1024xf32>
      %382 = arith.addf %375, %381 : vector<16x1024xf32>
      %383 = vector.broadcast %160 : vector<1x1024xi32> to vector<16x1024xi32>
      %384 = arith.cmpi eq, %339, %383 : vector<16x1024xi32>
      %cst_99 = arith.constant 0.000000e+00 : f32
      %385 = vector.shape_cast %161 : vector<1x1024xf32> to vector<1x1024xf32>
      %386 = vector.broadcast %385 : vector<1x1024xf32> to vector<16x1024xf32>
      %387 = vector.broadcast %cst_99 : f32 to vector<16x1024xf32>
      %388 = arith.select %384, %386, %387 : vector<16x1024xi1>, vector<16x1024xf32>
      %389 = arith.addf %382, %388 : vector<16x1024xf32>
      %390 = vector.broadcast %165 : vector<1x1024xi32> to vector<16x1024xi32>
      %391 = arith.cmpi eq, %339, %390 : vector<16x1024xi32>
      %cst_100 = arith.constant 0.000000e+00 : f32
      %392 = vector.shape_cast %166 : vector<1x1024xf32> to vector<1x1024xf32>
      %393 = vector.broadcast %392 : vector<1x1024xf32> to vector<16x1024xf32>
      %394 = vector.broadcast %cst_100 : f32 to vector<16x1024xf32>
      %395 = arith.select %391, %393, %394 : vector<16x1024xi1>, vector<16x1024xf32>
      %396 = arith.addf %389, %395 : vector<16x1024xf32>
      %c16_i32_101 = arith.constant 16 : i32
      %397 = arith.addi %c16_i32_101, %arg4 : i32
      %398 = arith.index_cast %397 : i32 to index
      %c0_102 = arith.constant 0 : index
      %c0_103 = arith.constant 0 : index
      %399 = vector.load %arg2[%398, %c0_102, %c0_103] : memref<64x2x16xf32, #tpu.memory_space<vmem>>, vector<1x2x16xf32>
      %400 = vector.shape_cast %399 : vector<1x2x16xf32> to vector<2x16xf32>
      %cst_104 = arith.constant dense<0.000000e+00> : vector<2x1024xf32>
      %401 = tpu.matmul %400, %396, %cst_104 {dimension_numbers = #tpu.dot_dimension_numbers<[1], [0], [0], [1], [0, 0, 1, 1], [], []>} : vector<2x16xf32>, vector<16x1024xf32>, vector<2x1024xf32> -> vector<2x1024xf32>
      %402 = arith.addf %arg5, %401 : vector<2x1024xf32>
      scf.yield %402 : vector<2x1024xf32>
    }
    %c16_i32_41 = arith.constant 16 : i32
    %c2 = arith.constant 2 : index
    %c0_42 = arith.constant 0 : index
    %170 = vector.load %arg3[%c2, %c0_42] : memref<8x1024xf32, #tpu.memory_space<vmem>>, vector<2x1024xf32>
    tpu.vector_store %arg3[%c2, %c0_42], %169 {strides = array<i32>} : memref<8x1024xf32, #tpu.memory_space<vmem>>, vector<2x1024xf32>,
    %cst_43 = arith.constant 1.000000e+01 : f32
    %171 = vector.broadcast %cst_43 : f32 to vector<1x1024xf32>
    %172 = arith.mulf %1, %171 : vector<1x1024xf32>
    %cst_44 = arith.constant 1.000000e+01 : f32
    %173 = vector.broadcast %cst_44 : f32 to vector<1x1024xf32>
    %174 = arith.mulf %2, %173 : vector<1x1024xf32>
    %cst_45 = arith.constant 1.000000e+01 : f32
    %175 = vector.broadcast %cst_45 : f32 to vector<1x1024xf32>
    %176 = arith.mulf %3, %175 : vector<1x1024xf32>
    %177 = math.floor %172 : vector<1x1024xf32>
    %178 = math.floor %174 : vector<1x1024xf32>
    %179 = math.floor %176 : vector<1x1024xf32>
    %180 = math.ceil %172 : vector<1x1024xf32>
    %181 = arith.fptosi %180 : vector<1x1024xf32> to vector<1x1024xi32>
    %182 = math.ceil %174 : vector<1x1024xf32>
    %183 = arith.fptosi %182 : vector<1x1024xf32> to vector<1x1024xi32>
    %184 = math.ceil %176 : vector<1x1024xf32>
    %185 = arith.fptosi %184 : vector<1x1024xf32> to vector<1x1024xi32>
    %186 = arith.fptosi %177 : vector<1x1024xf32> to vector<1x1024xi32>
    %187 = arith.fptosi %178 : vector<1x1024xf32> to vector<1x1024xi32>
    %188 = arith.fptosi %179 : vector<1x1024xf32> to vector<1x1024xi32>
    %189 = arith.subf %172, %177 : vector<1x1024xf32>
    %190 = arith.subf %174, %178 : vector<1x1024xf32>
    %191 = arith.subf %176, %179 : vector<1x1024xf32>
    %cst_46 = arith.constant 1.000000e+00 : f32
    %192 = vector.broadcast %cst_46 : f32 to vector<1x1024xf32>
    %193 = arith.subf %192, %189 : vector<1x1024xf32>
    %cst_47 = arith.constant 1.000000e+00 : f32
    %194 = vector.broadcast %cst_47 : f32 to vector<1x1024xf32>
    %195 = arith.subf %194, %190 : vector<1x1024xf32>
    %cst_48 = arith.constant 1.000000e+00 : f32
    %196 = vector.broadcast %cst_48 : f32 to vector<1x1024xf32>
    %197 = arith.subf %196, %191 : vector<1x1024xf32>
    %c-1640531535_i32_49 = arith.constant -1640531535 : i32
    %198 = vector.broadcast %c-1640531535_i32_49 : i32 to vector<1x1024xi32>
    %199 = arith.muli %183, %198 : vector<1x1024xi32>
    %c-1640531535_i32_50 = arith.constant -1640531535 : i32
    %200 = vector.broadcast %c-1640531535_i32_50 : i32 to vector<1x1024xi32>
    %201 = arith.muli %187, %200 : vector<1x1024xi32>
    %c805459861_i32_51 = arith.constant 805459861 : i32
    %202 = vector.broadcast %c805459861_i32_51 : i32 to vector<1x1024xi32>
    %203 = arith.muli %185, %202 : vector<1x1024xi32>
    %c805459861_i32_52 = arith.constant 805459861 : i32
    %204 = vector.broadcast %c805459861_i32_52 : i32 to vector<1x1024xi32>
    %205 = arith.muli %188, %204 : vector<1x1024xi32>
    %206 = arith.mulf %189, %190 : vector<1x1024xf32>
    %207 = arith.mulf %189, %195 : vector<1x1024xf32>
    %208 = arith.mulf %193, %190 : vector<1x1024xf32>
    %209 = arith.mulf %193, %195 : vector<1x1024xf32>
    %210 = arith.xori %181, %199 : vector<1x1024xi32>
    %211 = arith.xori %210, %203 : vector<1x1024xi32>
    %c255_i32_53 = arith.constant 255 : i32
    %212 = vector.broadcast %c255_i32_53 : i32 to vector<1x1024xi32>
    %213 = arith.andi %211, %212 : vector<1x1024xi32>
    %214 = arith.mulf %206, %191 : vector<1x1024xf32>
    %215 = arith.xori %181, %201 : vector<1x1024xi32>
    %216 = arith.xori %215, %203 : vector<1x1024xi32>
    %c255_i32_54 = arith.constant 255 : i32
    %217 = vector.broadcast %c255_i32_54 : i32 to vector<1x1024xi32>
    %218 = arith.andi %216, %217 : vector<1x1024xi32>
    %219 = arith.mulf %207, %191 : vector<1x1024xf32>
    %220 = arith.xori %186, %201 : vector<1x1024xi32>
    %221 = arith.xori %220, %203 : vector<1x1024xi32>
    %c255_i32_55 = arith.constant 255 : i32
    %222 = vector.broadcast %c255_i32_55 : i32 to vector<1x1024xi32>
    %223 = arith.andi %221, %222 : vector<1x1024xi32>
    %224 = arith.mulf %209, %191 : vector<1x1024xf32>
    %225 = arith.xori %186, %199 : vector<1x1024xi32>
    %226 = arith.xori %225, %203 : vector<1x1024xi32>
    %c255_i32_56 = arith.constant 255 : i32
    %227 = vector.broadcast %c255_i32_56 : i32 to vector<1x1024xi32>
    %228 = arith.andi %226, %227 : vector<1x1024xi32>
    %229 = arith.mulf %208, %191 : vector<1x1024xf32>
    %230 = arith.xori %181, %199 : vector<1x1024xi32>
    %231 = arith.xori %230, %205 : vector<1x1024xi32>
    %c255_i32_57 = arith.constant 255 : i32
    %232 = vector.broadcast %c255_i32_57 : i32 to vector<1x1024xi32>
    %233 = arith.andi %231, %232 : vector<1x1024xi32>
    %234 = arith.mulf %206, %197 : vector<1x1024xf32>
    %235 = arith.xori %181, %201 : vector<1x1024xi32>
    %236 = arith.xori %235, %205 : vector<1x1024xi32>
    %c255_i32_58 = arith.constant 255 : i32
    %237 = vector.broadcast %c255_i32_58 : i32 to vector<1x1024xi32>
    %238 = arith.andi %236, %237 : vector<1x1024xi32>
    %239 = arith.mulf %207, %197 : vector<1x1024xf32>
    %240 = arith.xori %186, %201 : vector<1x1024xi32>
    %241 = arith.xori %240, %205 : vector<1x1024xi32>
    %c255_i32_59 = arith.constant 255 : i32
    %242 = vector.broadcast %c255_i32_59 : i32 to vector<1x1024xi32>
    %243 = arith.andi %241, %242 : vector<1x1024xi32>
    %244 = arith.mulf %209, %197 : vector<1x1024xf32>
    %245 = arith.xori %186, %199 : vector<1x1024xi32>
    %246 = arith.xori %245, %205 : vector<1x1024xi32>
    %c255_i32_60 = arith.constant 255 : i32
    %247 = vector.broadcast %c255_i32_60 : i32 to vector<1x1024xi32>
    %248 = arith.andi %246, %247 : vector<1x1024xi32>
    %249 = arith.mulf %208, %197 : vector<1x1024xf32>
    %cst_61 = arith.constant 0.000000e+00 : f32
    %250 = vector.broadcast %cst_61 : f32 to vector<2x1024xf32>
    %c0_i32_62 = arith.constant 0 : i32
    %c16_i32_63 = arith.constant 16 : i32
    %251 = arith.addi %c0_i32_62, %c16_i32_63 : i32
    %c1_i32_64 = arith.constant 1 : i32
    %252 = scf.for %arg4 = %c0_i32_62 to %251 step %c1_i32_64 iter_args(%arg5 = %250) -> (vector<2x1024xf32>)  : i32 {
      %c16_i32_91 = arith.constant 16 : i32
      %337 = arith.muli %arg4, %c16_i32_91 : i32
      %338 = vector.broadcast %337 : i32 to vector<16x1024xi32>
      %339 = arith.addi %4, %338 : vector<16x1024xi32>
      %cst_92 = arith.constant 0.000000e+00 : f32
      %340 = vector.broadcast %cst_92 : f32 to vector<16x1024xf32>
      %341 = vector.broadcast %213 : vector<1x1024xi32> to vector<16x1024xi32>
      %342 = arith.cmpi eq, %339, %341 : vector<16x1024xi32>
      %cst_93 = arith.constant 0.000000e+00 : f32
      %343 = vector.shape_cast %214 : vector<1x1024xf32> to vector<1x1024xf32>
      %344 = vector.broadcast %343 : vector<1x1024xf32> to vector<16x1024xf32>
      %345 = vector.broadcast %cst_93 : f32 to vector<16x1024xf32>
      %346 = arith.select %342, %344, %345 : vector<16x1024xi1>, vector<16x1024xf32>
      %347 = arith.addf %340, %346 : vector<16x1024xf32>
      %348 = vector.broadcast %218 : vector<1x1024xi32> to vector<16x1024xi32>
      %349 = arith.cmpi eq, %339, %348 : vector<16x1024xi32>
      %cst_94 = arith.constant 0.000000e+00 : f32
      %350 = vector.shape_cast %219 : vector<1x1024xf32> to vector<1x1024xf32>
      %351 = vector.broadcast %350 : vector<1x1024xf32> to vector<16x1024xf32>
      %352 = vector.broadcast %cst_94 : f32 to vector<16x1024xf32>
      %353 = arith.select %349, %351, %352 : vector<16x1024xi1>, vector<16x1024xf32>
      %354 = arith.addf %347, %353 : vector<16x1024xf32>
      %355 = vector.broadcast %223 : vector<1x1024xi32> to vector<16x1024xi32>
      %356 = arith.cmpi eq, %339, %355 : vector<16x1024xi32>
      %cst_95 = arith.constant 0.000000e+00 : f32
      %357 = vector.shape_cast %224 : vector<1x1024xf32> to vector<1x1024xf32>
      %358 = vector.broadcast %357 : vector<1x1024xf32> to vector<16x1024xf32>
      %359 = vector.broadcast %cst_95 : f32 to vector<16x1024xf32>
      %360 = arith.select %356, %358, %359 : vector<16x1024xi1>, vector<16x1024xf32>
      %361 = arith.addf %354, %360 : vector<16x1024xf32>
      %362 = vector.broadcast %228 : vector<1x1024xi32> to vector<16x1024xi32>
      %363 = arith.cmpi eq, %339, %362 : vector<16x1024xi32>
      %cst_96 = arith.constant 0.000000e+00 : f32
      %364 = vector.shape_cast %229 : vector<1x1024xf32> to vector<1x1024xf32>
      %365 = vector.broadcast %364 : vector<1x1024xf32> to vector<16x1024xf32>
      %366 = vector.broadcast %cst_96 : f32 to vector<16x1024xf32>
      %367 = arith.select %363, %365, %366 : vector<16x1024xi1>, vector<16x1024xf32>
      %368 = arith.addf %361, %367 : vector<16x1024xf32>
      %369 = vector.broadcast %233 : vector<1x1024xi32> to vector<16x1024xi32>
      %370 = arith.cmpi eq, %339, %369 : vector<16x1024xi32>
      %cst_97 = arith.constant 0.000000e+00 : f32
      %371 = vector.shape_cast %234 : vector<1x1024xf32> to vector<1x1024xf32>
      %372 = vector.broadcast %371 : vector<1x1024xf32> to vector<16x1024xf32>
      %373 = vector.broadcast %cst_97 : f32 to vector<16x1024xf32>
      %374 = arith.select %370, %372, %373 : vector<16x1024xi1>, vector<16x1024xf32>
      %375 = arith.addf %368, %374 : vector<16x1024xf32>
      %376 = vector.broadcast %238 : vector<1x1024xi32> to vector<16x1024xi32>
      %377 = arith.cmpi eq, %339, %376 : vector<16x1024xi32>
      %cst_98 = arith.constant 0.000000e+00 : f32
      %378 = vector.shape_cast %239 : vector<1x1024xf32> to vector<1x1024xf32>
      %379 = vector.broadcast %378 : vector<1x1024xf32> to vector<16x1024xf32>
      %380 = vector.broadcast %cst_98 : f32 to vector<16x1024xf32>
      %381 = arith.select %377, %379, %380 : vector<16x1024xi1>, vector<16x1024xf32>
      %382 = arith.addf %375, %381 : vector<16x1024xf32>
      %383 = vector.broadcast %243 : vector<1x1024xi32> to vector<16x1024xi32>
      %384 = arith.cmpi eq, %339, %383 : vector<16x1024xi32>
      %cst_99 = arith.constant 0.000000e+00 : f32
      %385 = vector.shape_cast %244 : vector<1x1024xf32> to vector<1x1024xf32>
      %386 = vector.broadcast %385 : vector<1x1024xf32> to vector<16x1024xf32>
      %387 = vector.broadcast %cst_99 : f32 to vector<16x1024xf32>
      %388 = arith.select %384, %386, %387 : vector<16x1024xi1>, vector<16x1024xf32>
      %389 = arith.addf %382, %388 : vector<16x1024xf32>
      %390 = vector.broadcast %248 : vector<1x1024xi32> to vector<16x1024xi32>
      %391 = arith.cmpi eq, %339, %390 : vector<16x1024xi32>
      %cst_100 = arith.constant 0.000000e+00 : f32
      %392 = vector.shape_cast %249 : vector<1x1024xf32> to vector<1x1024xf32>
      %393 = vector.broadcast %392 : vector<1x1024xf32> to vector<16x1024xf32>
      %394 = vector.broadcast %cst_100 : f32 to vector<16x1024xf32>
      %395 = arith.select %391, %393, %394 : vector<16x1024xi1>, vector<16x1024xf32>
      %396 = arith.addf %389, %395 : vector<16x1024xf32>
      %c32_i32 = arith.constant 32 : i32
      %397 = arith.addi %c32_i32, %arg4 : i32
      %398 = arith.index_cast %397 : i32 to index
      %c0_101 = arith.constant 0 : index
      %c0_102 = arith.constant 0 : index
      %399 = vector.load %arg2[%398, %c0_101, %c0_102] : memref<64x2x16xf32, #tpu.memory_space<vmem>>, vector<1x2x16xf32>
      %400 = vector.shape_cast %399 : vector<1x2x16xf32> to vector<2x16xf32>
      %cst_103 = arith.constant dense<0.000000e+00> : vector<2x1024xf32>
      %401 = tpu.matmul %400, %396, %cst_103 {dimension_numbers = #tpu.dot_dimension_numbers<[1], [0], [0], [1], [0, 0, 1, 1], [], []>} : vector<2x16xf32>, vector<16x1024xf32>, vector<2x1024xf32> -> vector<2x1024xf32>
      %402 = arith.addf %arg5, %401 : vector<2x1024xf32>
      scf.yield %402 : vector<2x1024xf32>
    }
    %c16_i32_65 = arith.constant 16 : i32
    %c4 = arith.constant 4 : index
    %c0_66 = arith.constant 0 : index
    %253 = vector.load %arg3[%c4, %c0_66] : memref<8x1024xf32, #tpu.memory_space<vmem>>, vector<2x1024xf32>
    tpu.vector_store %arg3[%c4, %c0_66], %252 {strides = array<i32>} : memref<8x1024xf32, #tpu.memory_space<vmem>>, vector<2x1024xf32>,
    %cst_67 = arith.constant 1.500000e+01 : f32
    %254 = vector.broadcast %cst_67 : f32 to vector<1x1024xf32>
    %255 = arith.mulf %1, %254 : vector<1x1024xf32>
    %cst_68 = arith.constant 1.500000e+01 : f32
    %256 = vector.broadcast %cst_68 : f32 to vector<1x1024xf32>
    %257 = arith.mulf %2, %256 : vector<1x1024xf32>
    %cst_69 = arith.constant 1.500000e+01 : f32
    %258 = vector.broadcast %cst_69 : f32 to vector<1x1024xf32>
    %259 = arith.mulf %3, %258 : vector<1x1024xf32>
    %260 = math.floor %255 : vector<1x1024xf32>
    %261 = math.floor %257 : vector<1x1024xf32>
    %262 = math.floor %259 : vector<1x1024xf32>
    %263 = math.ceil %255 : vector<1x1024xf32>
    %264 = arith.fptosi %263 : vector<1x1024xf32> to vector<1x1024xi32>
    %265 = math.ceil %257 : vector<1x1024xf32>
    %266 = arith.fptosi %265 : vector<1x1024xf32> to vector<1x1024xi32>
    %267 = math.ceil %259 : vector<1x1024xf32>
    %268 = arith.fptosi %267 : vector<1x1024xf32> to vector<1x1024xi32>
    %269 = arith.fptosi %260 : vector<1x1024xf32> to vector<1x1024xi32>
    %270 = arith.fptosi %261 : vector<1x1024xf32> to vector<1x1024xi32>
    %271 = arith.fptosi %262 : vector<1x1024xf32> to vector<1x1024xi32>
    %272 = arith.subf %255, %260 : vector<1x1024xf32>
    %273 = arith.subf %257, %261 : vector<1x1024xf32>
    %274 = arith.subf %259, %262 : vector<1x1024xf32>
    %cst_70 = arith.constant 1.000000e+00 : f32
    %275 = vector.broadcast %cst_70 : f32 to vector<1x1024xf32>
    %276 = arith.subf %275, %272 : vector<1x1024xf32>
    %cst_71 = arith.constant 1.000000e+00 : f32
    %277 = vector.broadcast %cst_71 : f32 to vector<1x1024xf32>
    %278 = arith.subf %277, %273 : vector<1x1024xf32>
    %cst_72 = arith.constant 1.000000e+00 : f32
    %279 = vector.broadcast %cst_72 : f32 to vector<1x1024xf32>
    %280 = arith.subf %279, %274 : vector<1x1024xf32>
    %c-1640531535_i32_73 = arith.constant -1640531535 : i32
    %281 = vector.broadcast %c-1640531535_i32_73 : i32 to vector<1x1024xi32>
    %282 = arith.muli %266, %281 : vector<1x1024xi32>
    %c-1640531535_i32_74 = arith.constant -1640531535 : i32
    %283 = vector.broadcast %c-1640531535_i32_74 : i32 to vector<1x1024xi32>
    %284 = arith.muli %270, %283 : vector<1x1024xi32>
    %c805459861_i32_75 = arith.constant 805459861 : i32
    %285 = vector.broadcast %c805459861_i32_75 : i32 to vector<1x1024xi32>
    %286 = arith.muli %268, %285 : vector<1x1024xi32>
    %c805459861_i32_76 = arith.constant 805459861 : i32
    %287 = vector.broadcast %c805459861_i32_76 : i32 to vector<1x1024xi32>
    %288 = arith.muli %271, %287 : vector<1x1024xi32>
    %289 = arith.mulf %272, %273 : vector<1x1024xf32>
    %290 = arith.mulf %272, %278 : vector<1x1024xf32>
    %291 = arith.mulf %276, %273 : vector<1x1024xf32>
    %292 = arith.mulf %276, %278 : vector<1x1024xf32>
    %293 = arith.xori %264, %282 : vector<1x1024xi32>
    %294 = arith.xori %293, %286 : vector<1x1024xi32>
    %c255_i32_77 = arith.constant 255 : i32
    %295 = vector.broadcast %c255_i32_77 : i32 to vector<1x1024xi32>
    %296 = arith.andi %294, %295 : vector<1x1024xi32>
    %297 = arith.mulf %289, %274 : vector<1x1024xf32>
    %298 = arith.xori %264, %284 : vector<1x1024xi32>
    %299 = arith.xori %298, %286 : vector<1x1024xi32>
    %c255_i32_78 = arith.constant 255 : i32
    %300 = vector.broadcast %c255_i32_78 : i32 to vector<1x1024xi32>
    %301 = arith.andi %299, %300 : vector<1x1024xi32>
    %302 = arith.mulf %290, %274 : vector<1x1024xf32>
    %303 = arith.xori %269, %284 : vector<1x1024xi32>
    %304 = arith.xori %303, %286 : vector<1x1024xi32>
    %c255_i32_79 = arith.constant 255 : i32
    %305 = vector.broadcast %c255_i32_79 : i32 to vector<1x1024xi32>
    %306 = arith.andi %304, %305 : vector<1x1024xi32>
    %307 = arith.mulf %292, %274 : vector<1x1024xf32>
    %308 = arith.xori %269, %282 : vector<1x1024xi32>
    %309 = arith.xori %308, %286 : vector<1x1024xi32>
    %c255_i32_80 = arith.constant 255 : i32
    %310 = vector.broadcast %c255_i32_80 : i32 to vector<1x1024xi32>
    %311 = arith.andi %309, %310 : vector<1x1024xi32>
    %312 = arith.mulf %291, %274 : vector<1x1024xf32>
    %313 = arith.xori %264, %282 : vector<1x1024xi32>
    %314 = arith.xori %313, %288 : vector<1x1024xi32>
    %c255_i32_81 = arith.constant 255 : i32
    %315 = vector.broadcast %c255_i32_81 : i32 to vector<1x1024xi32>
    %316 = arith.andi %314, %315 : vector<1x1024xi32>
    %317 = arith.mulf %289, %280 : vector<1x1024xf32>
    %318 = arith.xori %264, %284 : vector<1x1024xi32>
    %319 = arith.xori %318, %288 : vector<1x1024xi32>
    %c255_i32_82 = arith.constant 255 : i32
    %320 = vector.broadcast %c255_i32_82 : i32 to vector<1x1024xi32>
    %321 = arith.andi %319, %320 : vector<1x1024xi32>
    %322 = arith.mulf %290, %280 : vector<1x1024xf32>
    %323 = arith.xori %269, %284 : vector<1x1024xi32>
    %324 = arith.xori %323, %288 : vector<1x1024xi32>
    %c255_i32_83 = arith.constant 255 : i32
    %325 = vector.broadcast %c255_i32_83 : i32 to vector<1x1024xi32>
    %326 = arith.andi %324, %325 : vector<1x1024xi32>
    %327 = arith.mulf %292, %280 : vector<1x1024xf32>
    %328 = arith.xori %269, %282 : vector<1x1024xi32>
    %329 = arith.xori %328, %288 : vector<1x1024xi32>
    %c255_i32_84 = arith.constant 255 : i32
    %330 = vector.broadcast %c255_i32_84 : i32 to vector<1x1024xi32>
    %331 = arith.andi %329, %330 : vector<1x1024xi32>
    %332 = arith.mulf %291, %280 : vector<1x1024xf32>
    %cst_85 = arith.constant 0.000000e+00 : f32
    %333 = vector.broadcast %cst_85 : f32 to vector<2x1024xf32>
    %c0_i32_86 = arith.constant 0 : i32
    %c16_i32_87 = arith.constant 16 : i32
    %334 = arith.addi %c0_i32_86, %c16_i32_87 : i32
    %c1_i32_88 = arith.constant 1 : i32
    %335 = scf.for %arg4 = %c0_i32_86 to %334 step %c1_i32_88 iter_args(%arg5 = %333) -> (vector<2x1024xf32>)  : i32 {
      %c16_i32_91 = arith.constant 16 : i32
      %337 = arith.muli %arg4, %c16_i32_91 : i32
      %338 = vector.broadcast %337 : i32 to vector<16x1024xi32>
      %339 = arith.addi %4, %338 : vector<16x1024xi32>
      %cst_92 = arith.constant 0.000000e+00 : f32
      %340 = vector.broadcast %cst_92 : f32 to vector<16x1024xf32>
      %341 = vector.broadcast %296 : vector<1x1024xi32> to vector<16x1024xi32>
      %342 = arith.cmpi eq, %339, %341 : vector<16x1024xi32>
      %cst_93 = arith.constant 0.000000e+00 : f32
      %343 = vector.shape_cast %297 : vector<1x1024xf32> to vector<1x1024xf32>
      %344 = vector.broadcast %343 : vector<1x1024xf32> to vector<16x1024xf32>
      %345 = vector.broadcast %cst_93 : f32 to vector<16x1024xf32>
      %346 = arith.select %342, %344, %345 : vector<16x1024xi1>, vector<16x1024xf32>
      %347 = arith.addf %340, %346 : vector<16x1024xf32>
      %348 = vector.broadcast %301 : vector<1x1024xi32> to vector<16x1024xi32>
      %349 = arith.cmpi eq, %339, %348 : vector<16x1024xi32>
      %cst_94 = arith.constant 0.000000e+00 : f32
      %350 = vector.shape_cast %302 : vector<1x1024xf32> to vector<1x1024xf32>
      %351 = vector.broadcast %350 : vector<1x1024xf32> to vector<16x1024xf32>
      %352 = vector.broadcast %cst_94 : f32 to vector<16x1024xf32>
      %353 = arith.select %349, %351, %352 : vector<16x1024xi1>, vector<16x1024xf32>
      %354 = arith.addf %347, %353 : vector<16x1024xf32>
      %355 = vector.broadcast %306 : vector<1x1024xi32> to vector<16x1024xi32>
      %356 = arith.cmpi eq, %339, %355 : vector<16x1024xi32>
      %cst_95 = arith.constant 0.000000e+00 : f32
      %357 = vector.shape_cast %307 : vector<1x1024xf32> to vector<1x1024xf32>
      %358 = vector.broadcast %357 : vector<1x1024xf32> to vector<16x1024xf32>
      %359 = vector.broadcast %cst_95 : f32 to vector<16x1024xf32>
      %360 = arith.select %356, %358, %359 : vector<16x1024xi1>, vector<16x1024xf32>
      %361 = arith.addf %354, %360 : vector<16x1024xf32>
      %362 = vector.broadcast %311 : vector<1x1024xi32> to vector<16x1024xi32>
      %363 = arith.cmpi eq, %339, %362 : vector<16x1024xi32>
      %cst_96 = arith.constant 0.000000e+00 : f32
      %364 = vector.shape_cast %312 : vector<1x1024xf32> to vector<1x1024xf32>
      %365 = vector.broadcast %364 : vector<1x1024xf32> to vector<16x1024xf32>
      %366 = vector.broadcast %cst_96 : f32 to vector<16x1024xf32>
      %367 = arith.select %363, %365, %366 : vector<16x1024xi1>, vector<16x1024xf32>
      %368 = arith.addf %361, %367 : vector<16x1024xf32>
      %369 = vector.broadcast %316 : vector<1x1024xi32> to vector<16x1024xi32>
      %370 = arith.cmpi eq, %339, %369 : vector<16x1024xi32>
      %cst_97 = arith.constant 0.000000e+00 : f32
      %371 = vector.shape_cast %317 : vector<1x1024xf32> to vector<1x1024xf32>
      %372 = vector.broadcast %371 : vector<1x1024xf32> to vector<16x1024xf32>
      %373 = vector.broadcast %cst_97 : f32 to vector<16x1024xf32>
      %374 = arith.select %370, %372, %373 : vector<16x1024xi1>, vector<16x1024xf32>
      %375 = arith.addf %368, %374 : vector<16x1024xf32>
      %376 = vector.broadcast %321 : vector<1x1024xi32> to vector<16x1024xi32>
      %377 = arith.cmpi eq, %339, %376 : vector<16x1024xi32>
      %cst_98 = arith.constant 0.000000e+00 : f32
      %378 = vector.shape_cast %322 : vector<1x1024xf32> to vector<1x1024xf32>
      %379 = vector.broadcast %378 : vector<1x1024xf32> to vector<16x1024xf32>
      %380 = vector.broadcast %cst_98 : f32 to vector<16x1024xf32>
      %381 = arith.select %377, %379, %380 : vector<16x1024xi1>, vector<16x1024xf32>
      %382 = arith.addf %375, %381 : vector<16x1024xf32>
      %383 = vector.broadcast %326 : vector<1x1024xi32> to vector<16x1024xi32>
      %384 = arith.cmpi eq, %339, %383 : vector<16x1024xi32>
      %cst_99 = arith.constant 0.000000e+00 : f32
      %385 = vector.shape_cast %327 : vector<1x1024xf32> to vector<1x1024xf32>
      %386 = vector.broadcast %385 : vector<1x1024xf32> to vector<16x1024xf32>
      %387 = vector.broadcast %cst_99 : f32 to vector<16x1024xf32>
      %388 = arith.select %384, %386, %387 : vector<16x1024xi1>, vector<16x1024xf32>
      %389 = arith.addf %382, %388 : vector<16x1024xf32>
      %390 = vector.broadcast %331 : vector<1x1024xi32> to vector<16x1024xi32>
      %391 = arith.cmpi eq, %339, %390 : vector<16x1024xi32>
      %cst_100 = arith.constant 0.000000e+00 : f32
      %392 = vector.shape_cast %332 : vector<1x1024xf32> to vector<1x1024xf32>
      %393 = vector.broadcast %392 : vector<1x1024xf32> to vector<16x1024xf32>
      %394 = vector.broadcast %cst_100 : f32 to vector<16x1024xf32>
      %395 = arith.select %391, %393, %394 : vector<16x1024xi1>, vector<16x1024xf32>
      %396 = arith.addf %389, %395 : vector<16x1024xf32>
      %c48_i32 = arith.constant 48 : i32
      %397 = arith.addi %c48_i32, %arg4 : i32
      %398 = arith.index_cast %397 : i32 to index
      %c0_101 = arith.constant 0 : index
      %c0_102 = arith.constant 0 : index
      %399 = vector.load %arg2[%398, %c0_101, %c0_102] : memref<64x2x16xf32, #tpu.memory_space<vmem>>, vector<1x2x16xf32>
      %400 = vector.shape_cast %399 : vector<1x2x16xf32> to vector<2x16xf32>
      %cst_103 = arith.constant dense<0.000000e+00> : vector<2x1024xf32>
      %401 = tpu.matmul %400, %396, %cst_103 {dimension_numbers = #tpu.dot_dimension_numbers<[1], [0], [0], [1], [0, 0, 1, 1], [], []>} : vector<2x16xf32>, vector<16x1024xf32>, vector<2x1024xf32> -> vector<2x1024xf32>
      %402 = arith.addf %arg5, %401 : vector<2x1024xf32>
      scf.yield %402 : vector<2x1024xf32>
    }
    %c16_i32_89 = arith.constant 16 : i32
    %c6 = arith.constant 6 : index
    %c0_90 = arith.constant 0 : index
    %336 = vector.load %arg3[%c6, %c0_90] : memref<8x1024xf32, #tpu.memory_space<vmem>>, vector<2x1024xf32>
    tpu.vector_store %arg3[%c6, %c0_90], %335 {strides = array<i32>} : memref<8x1024xf32, #tpu.memory_space<vmem>>, vector<2x1024xf32>,
    return
  }
  func.func @transform_0(%arg0: i32) -> (i32, i32) {
    %c0_i32 = arith.constant 0 : i32
    %c0_i32_0 = arith.constant 0 : i32
    return %c0_i32, %arg0 : i32, i32
  }
  func.func @transform_1(%arg0: i32) -> (i32, i32, i32) {
    %c0_i32 = arith.constant 0 : i32
    %c0_i32_0 = arith.constant 0 : i32
    %c0_i32_1 = arith.constant 0 : i32
    %c0_i32_2 = arith.constant 0 : i32
    return %c0_i32, %c0_i32_0, %c0_i32_1 : i32, i32, i32
  }
  func.func @transform_2(%arg0: i32) -> (i32, i32) {
    %c0_i32 = arith.constant 0 : i32
    %c0_i32_0 = arith.constant 0 : i32
    return %c0_i32, %arg0 : i32, i32
  }
}

</mosaic_0001>

<bundles_post_ra>
// kernel: tpu_custom_call.1
= control target key start
LH: loop header
LB: loop body
LE: loop exit
PB: predicated region body
PF: predicated region fallthrough
CT: control target
= control target key end

     0   :  { %7 = vsyncpa [#allocation3], 0  ;;  %s14035_s0 = inlined_call_operand.vmem [shape: f32[3,2048], index: 0, kind: input, shape index: {}]   ;;  %s14036_s1 = inlined_call_operand.vmem [shape: f32[64,2,16], index: 1, kind: input, shape index: {}]   ;;  %s14037_s2 = inlined_call_operand.hbm [shape: f32[8,2048], index: 2, kind: output, shape index: {}]  }
   0x1   :  { %9 = vsyncpa [#allocation3 + $0x1], 0  ;;  %s9655_s9 = smov 0   ;;  %s9657_s10 = smov 0  }
   0x2   :  { %s9659_s11 = smov 0   ;;  %s9661_s12 = smov 0  }
   0x3 LB: > { %s9676_s13 = sadd.s32 4294967295, %s9489_s12   ;;  %s8784_s14 = sadd.s32 4294967294, %s9489_s12   ;;  %s9489_s12 = sphi %s9661_s12, %s14935_s12   ;;  %s9485_s11 = sphi %s9659_s11, %s14934_s11   ;;  %s9481_s10 = sphi %s9657_s10, %s14933_s10   ;;  %s9477_s9 = sphi %s9655_s9, %s14932_s9  }
   0x4   : > { %s9680_s15 = sadd.s32 1, %s9489_s12   ;;  %s69_s16 = sadd.s32 1, %s9485_s11 }
   0x5   : > { %s66_s17 = ssub.s32 %s9489_s12, %s9680_s15  ;;  %p79_p0 = scmp.ne.s32.totalorder %s9485_s11, %s9481_s10 }
   0x6   : > { %p67_p1 = scmp.eq.s32.totalorder %s66_s17, 0  ;;  %p80_p2 = scmp.eq.s32.totalorder %s9676_s13, 1 }
   0x7   : > { %p85_p3 = scmp.ne.s32.totalorder %s9481_s10, %s9477_s9  ;;  %p86_p4 = scmp.eq.s32.totalorder %s8784_s14, 1 }
   0x8   : > { %s9691_s18 = scalar_select %p67_p1, %s9485_s11, %s69_s16  }
   0x9   : > { %p9693_p5 = por %p80_p2, %p79_p0  ;;  %p9697_p6 = por %p86_p4, %p85_p3 }
   0xa   : > { %p8787_p7 = scmp.ge.s32.totalorder %s9489_s12, 1  ;;  %p116_p8 = scmp.lt.s32.totalorder %s9489_s12, 3 }
   0xc   : > { %p117_p9 = pnand %p8787_p7, %p116_p8 }
   0xe   : > { %120 = sbr.rel (%p117_p9) target bundleno = 1833 (0x729), region = 28 }
  0x15   : > { %s135_s21 = sand.u32 1, %s9481_s10   ;;  %s8789_s22 = sshll.u32 %s9676_s13, 3  ;;  %v149_v0 = vlaneseq }
  0x16   : > { %s9707_s23 = sshll.u32 %s135_s21, 6  ;;  %p139_p10 = scmp.lt.s32.totalorder %s8789_s22, 15 }
  0x17   : > { %v9709_v1 = vshrl.u32 %v149_v0, 7  ;;  %s10154_s28 = scalar_lea.vmem [#allocation2], %s9707_s23  ;;  %s10172_s29 = smov 0  }
  0x18   : > { %s14937_s22 = smov (!%p139_p10, %s8789_s22), 15 }
  0x19   : > { %14312 = vst [vmem:[#allocation5_spill] sm:$0xff] %v9709_v1  ;;  %v9712_v2 = vadd.s32 8, %v9709_v1  ;;  %s8790_s24 = sshll.u32 %s14937_s22, 2 }
  0x1a   : > { %s142_s27 = scalar_lea.vmem %s14035_s0, %s8790_s24 }
  0x1b   : > { %14313 = vst [vmem:[#allocation6_spill] sm:$0xff] %v9712_v2  ;;  %v9717_v3 = vld [vmem:[%s142_s27] sm:$0x77]  ;;  %v9719_v4 = vld [vmem:[%s142_s27 + $0x8] sm:$0x77] }
  0x1c   : > { %14314 = vst [vmem:[#allocation7_spill] sm:$0xff] %v9717_v3  ;;  %14315 = vst [vmem:[#allocation8_spill] sm:$0xff] %v9719_v4  ;;  %v9721_v5 = vld [vmem:[%s142_s27 + $0x10] sm:$0x77]  ;;  %v9723_v6 = vld [vmem:[%s142_s27 + $0x18] sm:$0x77] }
  0x1d   : > { %14316 = vst [vmem:[#allocation9_spill] sm:$0xff] %v9721_v5  ;;  %14317 = vst [vmem:[#allocation10_spill] sm:$0xff] %v9723_v6  ;;  %v152_v7 = vmul.f32 4.0, %v9717_v3  ;;  %v153_v8 = vmul.f32 4.0, %v9719_v4  ;;  %v154_v9 = vmul.f32 4.0, %v9721_v5  ;;  %v155_v10 = vmul.f32 4.0, %v9723_v6 }
  0x1f   : > { %v156_v11 = vfloor.f32 %v152_v7  ;;  %v157_v12 = vfloor.f32 %v153_v8  ;;  %v158_v13 = vfloor.f32 %v154_v9  ;;  %v160_v14 = vceil.f32 %v152_v7 }
  0x20   : > { %v159_v15 = vfloor.f32 %v155_v10  ;;  %v161_v16 = vceil.f32 %v153_v8  ;;  %v162_v17 = vceil.f32 %v154_v9  ;;  %v163_v18 = vceil.f32 %v155_v10 }
  0x21   : > { %v8888_v19 = vtrunc.f32 %v160_v14  ;;  %v8896_v20 = vtrunc.f32 %v156_v11  ;;  %v8898_v21 = vtrunc.f32 %v157_v12  ;;  %v8900_v22 = vtrunc.f32 %v158_v13 }
  0x22   : > { %v8890_v23 = vtrunc.f32 %v161_v16  ;;  %v8892_v24 = vtrunc.f32 %v162_v17  ;;  %v8894_v25 = vtrunc.f32 %v163_v18  ;;  %v8902_v26 = vtrunc.f32 %v159_v15 }
  0x23   : > { %v9729_v27 = vcvt.f32.s32 %v8888_v19  ;;  %v9731_v28 = vcvt.f32.s32 %v8896_v20  ;;  %v9739_v32 = vcvt.f32.s32 %v8898_v21  ;;  %v9741_v33 = vsub.f32 %v152_v7, %v156_v11 }
  0x24   : > { %v9733_v29 = vcvt.f32.s32 %v8890_v23  ;;  %v9735_v30 = vcvt.f32.s32 %v8892_v24  ;;  %v9737_v31 = vcvt.f32.s32 %v8894_v25  ;;  %v9743_v34 = vsub.f32 %v153_v8, %v157_v12 }
  0x25   : > { %v9745_v35 = vsub.f32 %v154_v9, %v158_v13  ;;  %v9747_v36 = vsub.f32 %v155_v10, %v159_v15  ;;  %v9749_v37 = vcvt.f32.s32 %v8900_v22  ;;  %v9751_v38 = vcvt.f32.s32 %v8902_v26 }
  0x26   : > { %v180_v39 = vmul.u32 2654435761, %v9729_v27  ;;  %v181_v40 = vmul.u32 2654435761, %v9733_v29  ;;  %v9756_v41 = vsub.f32 1.0, %v9741_v33  ;;  %v9759_v42 = vsub.f32 1.0, %v9743_v34 }
  0x27   : > { %v9762_v43 = vsub.f32 1.0, %v9745_v35  ;;  %v9765_v44 = vsub.f32 1.0, %v9747_v36  ;;  %v182_v45 = vmul.u32 2654435761, %v9735_v30  ;;  %v183_v46 = vmul.u32 2654435761, %v9737_v31 }
  0x28   : > { %v200_v47 = vrot.slane %v9741_v33, 5  ;;  %v202_v48 = vrot.slane %v9743_v34, 5  ;;  %v204_v51 = vrot.slane %v9745_v35, 5  ;;  %v206_v52 = vrot.slane %v9747_v36, 5 }
  0x29   : > { %v188_v57 = vmul.u32 805459861, %v9729_v27  ;;  %v189_v58 = vmul.u32 805459861, %v9733_v29  ;;  %v220_v13 = vrot.slane %v9756_v41, 5  ;;  %v222_v14 = vrot.slane %v9759_v42, 5 }
  0x2a   : > { %v201_v55 = vrot.slane %v200_v47, 4  ;;  %v203_v56 = vrot.slane %v202_v48, 4  ;;  %v205_v59 = vrot.slane %v204_v51, 4  ;;  %v207_v60 = vrot.slane %v206_v52, 4 }
  0x2b   : > { %v190_v61 = vmul.u32 805459861, %v9735_v30  ;;  %v191_v62 = vmul.u32 805459861, %v9737_v31  ;;  %v224_v15 = vrot.slane %v9762_v43, 5  ;;  %v226_v16 = vrot.slane %v9765_v44, 5 }
  0x2c   : > { %v9782_v63 = vmul.f32 %v201_v55, %v9741_v33  ;;  %v9785_v0 = vmul.f32 %v203_v56, %v9743_v34  ;;  %v9790_v9 = vmul.f32 %v205_v59, %v9745_v35  ;;  %v9793_v10 = vmul.f32 %v207_v60, %v9747_v36 }
  0x2d   : > { %v9802_v17 = vmul.f32 %v201_v55, %v9756_v41  ;;  %v9805_v18 = vmul.f32 %v203_v56, %v9759_v42  ;;  %v221_v19 = vrot.slane %v220_v13, 4  ;;  %v223_v20 = vrot.slane %v222_v14, 4 }
  0x2e   : > { %v9808_v21 = vmul.f32 %v205_v59, %v9762_v43  ;;  %v9811_v22 = vmul.f32 %v207_v60, %v9765_v44  ;;  %v225_v23 = vrot.slane %v224_v15, 4  ;;  %v227_v24 = vrot.slane %v226_v16, 4 }
  0x2f   : > { %v9813_v25 = vrot.slane %v180_v39, 5  ;;  %v9815_v26 = vrot.slane %v181_v40, 5  ;;  %v9818_v47 = vmul.f32 %v221_v19, %v9741_v33  ;;  %v9821_v48 = vmul.f32 %v223_v20, %v9743_v34 }
  0x30   : > { %v9824_v51 = vmul.f32 %v221_v19, %v9756_v41  ;;  %v9827_v52 = vmul.f32 %v223_v20, %v9759_v42  ;;  %v9830_v55 = vmul.f32 %v225_v23, %v9745_v35  ;;  %v9833_v39 = vmul.f32 %v227_v24, %v9747_v36 }
  0x31   : > { %v9836_v40 = vmul.f32 %v225_v23, %v9762_v43  ;;  %v9839_v56 = vmul.f32 %v227_v24, %v9765_v44  ;;  %v14041_v59 = vrot.slane %v9813_v25, 4  ;;  %v14040_v60 = vrot.slane %v9815_v26, 4 }
  0x32   : > { %14318 = vst [vmem:[#allocation11_spill] sm:$0xff] %v9827_v52  ;;  %v9843_v13 = vrot.slane %v182_v45, 5  ;;  %v9845_v14 = vrot.slane %v183_v46, 5  ;;  %v256_v15 = vrot.slane %v188_v57, 6  ;;  %v258_v16 = vrot.slane %v189_v58, 6 }
  0x33   : > { %v260_v19 = vrot.slane %v190_v61, 6  ;;  %v262_v20 = vrot.slane %v191_v62, 6  ;;  %v9852_v24 = vxor.u32 %v9729_v27, %v14041_v59  ;;  %v9857_v45 = vxor.u32 %v9733_v29, %v14040_v60 }
  0x34   : > { %v14038_v12 = vrot.slane %v9843_v13, 4  ;;  %v14039_v23 = vrot.slane %v9845_v14, 4  ;;  %v9859_v46 = vrot.slane %v256_v15, 4  ;;  %v9861_v57 = vrot.slane %v258_v16, 4 }
  0x35   : > { %v9863_v58 = vrot.slane %v260_v19, 4  ;;  %v9865_v61 = vrot.slane %v262_v20, 4  ;;  %v272_v8 = vrot.slane %v9741_v33, 6  ;;  %v274_v15 = vrot.slane %v9743_v34, 6 }
  0x36   : > { %v9870_v62 = vxor.u32 %v9735_v30, %v14038_v12  ;;  %v9875_v11 = vxor.u32 %v9737_v31, %v14039_v23  ;;  %v264_v16 = vxor.u32 %v9859_v46, %v9852_v24  ;;  %v265_v19 = vxor.u32 %v9861_v57, %v9857_v45 }
  0x37   : > { %v276_v20 = vrot.slane %v9745_v35, 6  ;;  %v278_v7 = vrot.slane %v9747_v36, 6  ;;  %v273_v60 = vrot.slane %v272_v8, 4  ;;  %v275_v33 = vrot.slane %v274_v15, 4 }
  0x38   : > { %v266_v12 = vxor.u32 %v9863_v58, %v9870_v62  ;;  %v267_v23 = vxor.u32 %v9865_v61, %v9875_v11  ;;  %v9889_v59 = vand.u32 255, %v264_v16  ;;  %v9891_v34 = vand.u32 255, %v265_v19 }
  0x39   : > { %v277_v54 = vrot.slane %v276_v20, 4  ;;  %v279_v53 = vrot.slane %v278_v7, 4  ;;  %v9898_v35 = vmul.f32 %v273_v60, %v9782_v63  ;;  %v9901_v36 = vmul.f32 %v275_v33, %v9785_v0 }
  0x3a   : > { %14319 = vst [vmem:[#allocation12_spill] sm:$0xff] %v9889_v59  ;;  %14320 = vst [vmem:[#allocation13_spill] sm:$0xff] %v9891_v34  ;;  %v9893_v50 = vand.u32 255, %v266_v12  ;;  %v9895_v49 = vand.u32 255, %v267_v23  ;;  %v14327_v15 = vmul.u32 2654435761, %v9731_v28  ;;  %v9918_v4 = vmul.f32 %v273_v60, %v9818_v47 }
  0x3b   : > { %14323 = vst [vmem:[#allocation16_spill] sm:$0xff] %v9898_v35  ;;  %14324 = vst [vmem:[#allocation17_spill] sm:$0xff] %v9901_v36  ;;  %v9904_v6 = vmul.f32 %v277_v54, %v9790_v9  ;;  %v9907_v8 = vmul.f32 %v279_v53, %v9793_v10  ;;  %v14328_v7 = vmul.u32 2654435761, %v9739_v32  ;;  %v14329_v23 = vmul.u32 2654435761, %v9749_v37 }
  0x3c   : > { %14321 = vst [vmem:[#allocation14_spill] sm:$0xff] %v9893_v50  ;;  %14322 = vst [vmem:[#allocation15_spill] sm:$0xff] %v9895_v49  ;;  %v288_v16 = vrot.slane %v14327_v15, 5  ;;  %v14330_v20 = vmul.u32 2654435761, %v9751_v38  ;;  %v9921_v3 = vmul.f32 %v275_v33, %v9821_v48  ;;  %v9927_v15 = vmul.f32 %v279_v53, %v9833_v39 }
  0x3d   : > { %14325 = vst [vmem:[#allocation18_spill] sm:$0xff] %v9904_v6  ;;  %14326 = vst [vmem:[#allocation19_spill] sm:$0xff] %v9907_v8  ;;  %v290_v12 = vrot.slane %v14328_v7, 5  ;;  %v292_v19 = vrot.slane %v14329_v23, 5  ;;  %v9924_v6 = vmul.f32 %v277_v54, %v9830_v55  ;;  %v9930_v23 = vmul.f32 %v273_v60, %v9824_v51 }
  0x3e   : > { %v294_v5 = vrot.slane %v14330_v20, 5  ;;  %14331 = vst [vmem:[#allocation20_spill] sm:$0xff] %v9918_v4  ;;  %14332 = vst [vmem:[#allocation21_spill] sm:$0xff] %v9921_v3  ;;  %v289_v49 = vrot.slane %v288_v16, 4  ;;  %v9933_v20 = vmul.f32 %v275_v33, %v9827_v52  ;;  %v9992_v52 = vmul.f32 %v277_v54, %v9836_v40 }
  0x3f   : > { %v291_v8 = vrot.slane %v290_v12, 4  ;;  %14333 = vst [vmem:[#allocation22_spill] sm:$0xff] %v9924_v6  ;;  %14334 = vst [vmem:[#allocation23_spill] sm:$0xff] %v9927_v15  ;;  %v293_v7 = vrot.slane %v292_v19, 4 }
  0x40   : > { %v295_v50 = vrot.slane %v294_v5, 4  ;;  %14335 = vst [vmem:[#allocation24_spill] sm:$0xff] %v9930_v23  ;;  %14336 = vst [vmem:[#allocation25_spill] sm:$0xff] %v9933_v20  ;;  %v9936_v36 = vxor.u32 %v9729_v27, %v289_v49  ;;  %v9942_v12 = vxor.u32 %v9731_v28, %v289_v49 }
  0x41   : > { %v9939_v16 = vxor.u32 %v9733_v29, %v291_v8  ;;  %v9945_v6 = vxor.u32 %v9739_v32, %v291_v8  ;;  %v9948_v5 = vxor.u32 %v9735_v30, %v293_v7  ;;  %v9954_v15 = vxor.u32 %v9749_v37, %v293_v7  ;;  %14344 = vst [vmem:[#allocation33_spill] sm:$0xff] %v9992_v52 }
  0x42   : > { %v9951_v19 = vxor.u32 %v9737_v31, %v295_v50  ;;  %v9957_v27 = vxor.u32 %v9751_v38, %v295_v50  ;;  %v300_v29 = vxor.u32 %v9936_v36, %v9859_v46  ;;  %v316_v8 = vxor.u32 %v9942_v12, %v9859_v46 }
  0x43   : > { %v301_v49 = vxor.u32 %v9939_v16, %v9861_v57  ;;  %v317_v30 = vxor.u32 %v9945_v6, %v9861_v57  ;;  %v302_v31 = vxor.u32 %v9948_v5, %v9863_v58  ;;  %v318_v50 = vxor.u32 %v9954_v15, %v9863_v58 }
  0x44   : > { %v303_v7 = vxor.u32 %v9951_v19, %v9865_v61  ;;  %v319_v20 = vxor.u32 %v9957_v27, %v9865_v61  ;;  %v9975_v3 = vand.u32 255, %v300_v29  ;;  %v9979_v2 = vand.u32 255, %v316_v8 }
  0x45   : > { %v9977_v34 = vand.u32 255, %v301_v49  ;;  %v9981_v23 = vand.u32 255, %v317_v30  ;;  %v9983_v4 = vand.u32 255, %v302_v31  ;;  %v9987_v59 = vand.u32 255, %v318_v50 }
  0x46   : > { %14337 = vst [vmem:[#allocation26_spill] sm:$0xff] %v9975_v3  ;;  %14339 = vst [vmem:[#allocation28_spill] sm:$0xff] %v9979_v2  ;;  %v9985_v35 = vand.u32 255, %v303_v7  ;;  %v9989_v1 = vand.u32 255, %v319_v20  ;;  %v9995_v29 = vmul.f32 %v279_v53, %v9839_v56  ;;  %v14346_v49 = vrot.slane %v9813_v25, 4 }
  0x47   : > { %14338 = vst [vmem:[#allocation27_spill] sm:$0xff] %v9977_v34  ;;  %14340 = vst [vmem:[#allocation29_spill] sm:$0xff] %v9981_v23  ;;  %v14347_v30 = vrot.slane %v9815_v26, 4  ;;  %v14348_v7 = vrot.slane %v9843_v13, 4  ;;  %v14349_v50 = vrot.slane %v9845_v14, 4  ;;  %v10018_v25 = vmul.f32 %v273_v60, %v9802_v17 }
  0x48   : > { %14341 = vst [vmem:[#allocation30_spill] sm:$0xff] %v9985_v35  ;;  %14342 = vst [vmem:[#allocation31_spill] sm:$0xff] %v9987_v59  ;;  %v10000_v8 = vxor.u32 %v9731_v28, %v14346_v49  ;;  %v10021_v49 = vmul.f32 %v275_v33, %v9805_v18  ;;  %v10031_v14 = vmul.f32 %v279_v53, %v9811_v22  ;;  %v14353_v33 = vmul.u32 805459861, %v9731_v28 }
  0x49   : > { %14343 = vst [vmem:[#allocation32_spill] sm:$0xff] %v9989_v1  ;;  %14345 = vst [vmem:[#allocation34_spill] sm:$0xff] %v9995_v29  ;;  %v10005_v31 = vxor.u32 %v9739_v32, %v14347_v30  ;;  %v10010_v20 = vxor.u32 %v9749_v37, %v14348_v7  ;;  %v10015_v1 = vxor.u32 %v9751_v38, %v14349_v50 }
  0x4a   : > { %14350 = vst [vmem:[#allocation35_spill] sm:$0xff] %v10018_v25  ;;  %v332_v26 = vxor.u32 %v10000_v8, %v9859_v46  ;;  %v10028_v30 = vmul.f32 %v277_v54, %v9808_v21  ;;  %14352 = vst [vmem:[#allocation37_spill] sm:$0xff] %v10031_v14  ;;  %v344_v50 = vrot.slane %v14353_v33, 6  ;;  %v14354_v46 = vmul.u32 805459861, %v9739_v32 }
  0x4b   : > { %v333_v13 = vxor.u32 %v10005_v31, %v9861_v57  ;;  %v334_v7 = vxor.u32 %v10010_v20, %v9863_v58  ;;  %v335_v60 = vxor.u32 %v10015_v1, %v9865_v61  ;;  %v14356_v54 = vmul.u32 805459861, %v9749_v37 }
  0x4c   : > { %14351 = vst [vmem:[#allocation36_spill] sm:$0xff] %v10028_v30  ;;  %v346_v29 = vrot.slane %v14354_v46, 6  ;;  %v10041_v35 = vand.u32 255, %v332_v26  ;;  %v14357_v14 = vmul.u32 805459861, %v9751_v38  ;;  %v345_v61 = vrot.slane %v344_v50, 4 }
  0x4d   : > { %v10043_v57 = vand.u32 255, %v333_v13  ;;  %v348_v53 = vrot.slane %v14356_v54, 6  ;;  %v10049_v58 = vand.u32 255, %v334_v7  ;;  %v10051_v52 = vand.u32 255, %v335_v60 }
  0x4e   : > { %14355 = vst [vmem:[#allocation38_spill] sm:$0xff] %v10041_v35  ;;  %v350_v30 = vrot.slane %v14357_v14, 6  ;;  %v347_v28 = vrot.slane %v346_v29, 4  ;;  %v360_v32 = vrot.slane %v9756_v41, 6  ;;  %v362_v26 = vrot.slane %v9759_v42, 6 }
  0x4f   : > { %14358 = vst [vmem:[#allocation39_spill] sm:$0xff] %v10051_v52  ;;  %v349_v33 = vrot.slane %v348_v53, 4  ;;  %v352_v13 = vxor.u32 %v345_v61, %v9852_v24  ;;  %v364_v46 = vrot.slane %v9762_v43, 6  ;;  %v366_v38 = vrot.slane %v9765_v44, 6 }
  0x50   : > { %v351_v59 = vrot.slane %v350_v30, 4  ;;  %v353_v37 = vxor.u32 %v347_v28, %v9857_v45  ;;  %v361_v60 = vrot.slane %v360_v32, 4  ;;  %v363_v29 = vrot.slane %v362_v26, 4 }
  0x51   : > { %v354_v14 = vxor.u32 %v349_v33, %v9870_v62  ;;  %v10061_v50 = vand.u32 255, %v352_v13  ;;  %v365_v41 = vrot.slane %v364_v46, 4  ;;  %v367_v42 = vrot.slane %v366_v38, 4 }
  0x52   : > { %v355_v7 = vxor.u32 %v351_v59, %v9875_v11  ;;  %v10063_v30 = vand.u32 255, %v353_v37  ;;  %v10070_v43 = vmul.f32 %v361_v60, %v9782_v63  ;;  %v10073_v44 = vmul.f32 %v363_v29, %v9785_v0 }
  0x53   : > { %v10065_v54 = vand.u32 255, %v354_v14  ;;  %v10076_v11 = vmul.f32 %v365_v41, %v9790_v9  ;;  %v10079_v45 = vmul.f32 %v367_v42, %v9793_v10  ;;  %v376_v62 = vxor.u32 %v345_v61, %v9936_v36 }
  0x54   : > { %14359 = vst [vmem:[#allocation40_spill] sm:$0xff] %v10063_v30  ;;  %v10067_v24 = vand.u32 255, %v355_v7  ;;  %14361 = vst [vmem:[#allocation42_spill] sm:$0xff] %v10070_v43  ;;  %v377_v53 = vxor.u32 %v347_v28, %v9939_v16  ;;  %v378_v32 = vxor.u32 %v349_v33, %v9948_v5  ;;  %v379_v26 = vxor.u32 %v351_v59, %v9951_v19 }
  0x55   : > { %14362 = vst [vmem:[#allocation43_spill] sm:$0xff] %v10073_v44  ;;  %14363 = vst [vmem:[#allocation44_spill] sm:$0xff] %v10079_v45  ;;  %v10086_v63 = vmul.f32 %v361_v60, %v9818_v47  ;;  %v10089_v0 = vmul.f32 %v363_v29, %v9821_v48  ;;  %v10091_v13 = vand.u32 255, %v376_v62  ;;  %v10096_v10 = vmul.f32 %v365_v41, %v9830_v55  ;;  %v14370_v55 = vld [vmem:[#allocation11_spill] sm:$0xff] }
  0x56   : > { %14360 = vst [vmem:[#allocation41_spill] sm:$0xff] %v10067_v24  ;;  %v10093_v9 = vand.u32 255, %v377_v53  ;;  %v10099_v36 = vmul.f32 %v367_v42, %v9833_v39  ;;  %v10101_v16 = vand.u32 255, %v378_v32  ;;  %v10103_v5 = vand.u32 255, %v379_v26 }
  0x57   : > { %14364 = vst [vmem:[#allocation45_spill] sm:$0xff] %v10089_v0  ;;  %14365 = vst [vmem:[#allocation46_spill] sm:$0xff] %v10091_v13  ;;  %v388_v47 = vxor.u32 %v345_v61, %v9942_v12  ;;  %v389_v19 = vxor.u32 %v347_v28, %v9945_v6  ;;  %v390_v48 = vxor.u32 %v349_v33, %v9954_v15 }
  0x58   : > { %14366 = vst [vmem:[#allocation47_spill] sm:$0xff] %v10093_v9  ;;  %14367 = vst [vmem:[#allocation48_spill] sm:$0xff] %v10099_v36  ;;  %v391_v37 = vxor.u32 %v351_v59, %v9957_v27  ;;  %v10110_v46 = vmul.f32 %v361_v60, %v9824_v51  ;;  %v10113_v38 = vmul.f32 %v363_v29, %v14370_v55 }
  0x59   : > { %14368 = vst [vmem:[#allocation49_spill] sm:$0xff] %v10103_v5  ;;  %v10115_v39 = vand.u32 255, %v388_v47  ;;  %v10117_v14 = vand.u32 255, %v389_v19  ;;  %v10120_v7 = vmul.f32 %v365_v41, %v9836_v40  ;;  %v10123_v6 = vmul.f32 %v367_v42, %v9839_v56 }
  0x5a   : > { %14369 = vst [vmem:[#allocation50_spill] sm:$0xff] %v10110_v46  ;;  %14371 = vst [vmem:[#allocation11_spill] sm:$0xff] %v10113_v38  ;;  %v10125_v15 = vand.u32 255, %v390_v48  ;;  %v10127_v12 = vand.u32 255, %v391_v37  ;;  %v400_v51 = vxor.u32 %v345_v61, %v10000_v8  ;;  %v401_v27 = vxor.u32 %v347_v28, %v10005_v31 }
  0x5b   : > { %14372 = vst [vmem:[#allocation51_spill] sm:$0xff] %v10115_v39  ;;  %14373 = vst [vmem:[#allocation52_spill] sm:$0xff] %v10117_v14  ;;  %v402_v62 = vxor.u32 %v349_v33, %v10010_v20  ;;  %v403_v53 = vxor.u32 %v351_v59, %v10015_v1  ;;  %v10134_v32 = vmul.f32 %v361_v60, %v9802_v17  ;;  %v10156_v1 = vmov 0.0  }
  0x5c   : > { %14374 = vst [vmem:[#allocation53_spill] sm:$0xff] %v10120_v7  ;;  %14375 = vst [vmem:[#allocation54_spill] sm:$0xff] %v10123_v6  ;;  %v10137_v40 = vmul.f32 %v363_v29, %v9805_v18  ;;  %v10139_v56 = vand.u32 255, %v400_v51  ;;  %v10141_v26 = vand.u32 255, %v401_v27  ;;  %v10144_v47 = vmul.f32 %v365_v41, %v9808_v21 }
  0x5d   : > { %14376 = vst [vmem:[#allocation55_spill] sm:$0xff] %v10127_v12  ;;  %14377 = vst [vmem:[#allocation56_spill] sm:$0xff] %v10134_v32  ;;  %v10147_v8 = vmul.f32 %v367_v42, %v9811_v22  ;;  %v10149_v31 = vand.u32 255, %v402_v62  ;;  %v10151_v20 = vand.u32 255, %v403_v53  ;;  %v10158_v17 = vmov 0.0  }
  0x5e   : > { %14378 = vst [vmem:[#allocation57_spill] sm:$0xff] %v10137_v40  ;;  %14379 = vst [vmem:[#allocation58_spill] sm:$0xff] %v10141_v26  ;;  %v10160_v18 = vmov 0.0   ;;  %v10162_v59 = vmov 0.0   ;;  %v10164_v61 = vmov 0.0   ;;  %v10166_v21 = vmov 0.0  }
  0x5f   : > { %14380 = vst [vmem:[#allocation59_spill] sm:$0xff] %v10144_v47  ;;  %14381 = vst [vmem:[#allocation60_spill] sm:$0xff] %v10147_v8  ;;  %v10168_v22 = vmov 0.0   ;;  %v10170_v28 = vmov 0.0  }
  0x60   : > { %14382 = vst [vmem:[#allocation61_spill] sm:$0xff] %v10149_v31  ;;  %14383 = vst [vmem:[#allocation62_spill] sm:$0xff] %v10151_v20 }
  0x61 LB: >> { %v14384_v46 = vld [vmem:[#allocation50_spill] sm:$0xff]  ;;  %v14385_v44 = vld [vmem:[#allocation43_spill] sm:$0xff]  ;;  %v14393_v30 = vld [vmem:[#allocation40_spill] sm:$0xff]  ;;  %14403 = vst [vmem:[#allocation63_spill] sm:$0xff] %v9493_v1  ;;  %v14071_v41 = vmov 0.0   ;;  %s8791_s30 = sshll.u32 %s9525_s29, 4  ;;  %v9493_v1 = vphi %v10156_v1, %v14463_v1   ;;  %s9525_s29 = sphi %s10172_s29, %s417_s29   ;;  %v9521_v28 = vphi %v10170_v28, %v14470_v28   ;;  %v9517_v22 = vphi %v10168_v22, %v14469_v22   ;;  %v9513_v21 = vphi %v10166_v21, %v14468_v21   ;;  %v9509_v61 = vphi %v10164_v61, %v14467_v61   ;;  %v9505_v59 = vphi %v10162_v59, %v14466_v59   ;;  %v9501_v18 = vphi %v10160_v18, %v14465_v18   ;;  %v9497_v17 = vphi %v10158_v17, %v14464_v17  }
  0x62   : >> { %v14386_v43 = vld [vmem:[#allocation42_spill] sm:$0xff]  ;;  %v14388_v39 = vld [vmem:[#allocation51_spill] sm:$0xff]  ;;  %v14396_v23 = vld [vmem:[#allocation29_spill] sm:$0xff]  ;;  %14404 = vst [vmem:[#allocation64_spill] sm:$0xff] %v9497_v17  ;;  %2005 = vmatprep.mubr.f32.mxu0 %v14071_v41  ;;  %2076 = vmatprep.mubr.f32.mxu1 %v14071_v41  ;;  %v427_v62 = vstv %s8791_s30  ;;  %s8792_s3 = sshll.u32 %s9525_s29, 1  ;;  %s417_s29 = sadd.s32 1, %s9525_s29  }
  0x63   : >> { %v14389_v38 = vld [vmem:[#allocation11_spill] sm:$0xff]  ;;  %v14390_v35 = vld [vmem:[#allocation38_spill] sm:$0xff]  ;;  %v14397_v14 = vld [vmem:[#allocation52_spill] sm:$0xff]  ;;  %14405 = vst [vmem:[#allocation65_spill] sm:$0xff] %v9501_v18  ;;  %s1935_s6 = scalar_lea.vmem %s14036_s1, %s8792_s3  ;;  %p414_p11 = scmp.ge.s32.totalorder %s417_s29, 16  }
  0x64   : >> { %v14391_v34 = vld [vmem:[#allocation27_spill] sm:$0xff]  ;;  %v14392_v32 = vld [vmem:[#allocation56_spill] sm:$0xff]  ;;  %v14398_v13 = vld [vmem:[#allocation46_spill] sm:$0xff]  ;;  %14406 = vst [vmem:[#allocation66_spill] sm:$0xff] %v9505_v59  ;;  %s11235_s7 = smov (%p414_p11), 0  }
  0x65   : >> { %v14387_v40 = vld [vmem:[#allocation57_spill] sm:$0xff]  ;;  %v14394_v26 = vld [vmem:[#allocation58_spill] sm:$0xff]  ;;  %v14395_v25 = vld [vmem:[#allocation35_spill] sm:$0xff]  ;;  %14407 = vst [vmem:[#allocation67_spill] sm:$0xff] %v9509_v61 }
  0x66   : >> { %v14399_v9 = vld [vmem:[#allocation47_spill] sm:$0xff]  ;;  %v14400_v3 = vld [vmem:[#allocation26_spill] sm:$0xff]  ;;  %v14401_v2 = vld [vmem:[#allocation28_spill] sm:$0xff]  ;;  %14408 = vst [vmem:[#allocation68_spill] sm:$0xff] %v9513_v21 }
  0x67   : >> { %v14402_v0 = vld [vmem:[#allocation45_spill] sm:$0xff]  ;;  %14409 = vst [vmem:[#allocation69_spill] sm:$0xff] %v9517_v22  ;;  %14410 = vst [vmem:[#allocation70_spill] sm:$0xff] %v9521_v28  ;;  %v14414_v42 = vld [vmem:[#allocation12_spill] sm:$0xff] }
  0x68   : >> { %v14411_v33 = vld [vmem:[#allocation5_spill] sm:$0xff]  ;;  %v14415_v48 = vld [vmem:[#allocation16_spill] sm:$0xff]  ;;  %v14419_v59 = vld [vmem:[#allocation6_spill] sm:$0xff] }
  0x69   : >> { %v10202_v60 = vsub.s32 0, %v14411_v33  ;;  %v10205_v29 = vsub.s32 4, %v14411_v33  ;;  %v14416_v51 = vld [vmem:[#allocation20_spill] sm:$0xff]  ;;  %v10225_v18 = vadd.s32 %v427_v62, %v14411_v33  ;;  %v10228_v61 = vadd.s32 %v427_v62, %v14419_v59  ;;  %v14420_v36 = vld [vmem:[#allocation13_spill] sm:$0xff] }
  0x6a   : >> { %v14417_v1 = vld [vmem:[#allocation24_spill] sm:$0xff] }
  0x6b   : >> { %14412 = vst [vmem:[#allocation71_spill] sm:$0xff] %v10202_v60  ;;  %14413 = vst [vmem:[#allocation72_spill] sm:$0xff] %v10205_v29  ;;  %v437_v19 = vrot.slane %v14414_v42, %v10205_v29  ;;  %v521_v37 = vrot.slane %v14415_v48, %v10205_v29  ;;  %v625_v55 = vrot.slane %v14400_v3, %v10205_v29  ;;  %v14418_v8 = vmov %v14417_v1 }
  0x6c   : >> { %v709_v27 = vrot.slane %v14416_v51, %v10205_v29  ;;  %v813_v53 = vrot.slane %v14401_v2, %v10205_v29  ;;  %v897_v41 = vrot.slane %v14417_v1, %v10205_v29  ;;  %v1001_v17 = vrot.slane %v14390_v35, %v10205_v29 }
  0x6d   : >> { %v469_v21 = vrot.slane %v437_v19, %v10202_v60  ;;  %v561_v22 = vrot.slane %v521_v37, %v10202_v60  ;;  %v657_v28 = vrot.slane %v625_v55, %v10202_v60  ;;  %v1085_v59 = vrot.slane %v14395_v25, %v10205_v29 }
  0x6e   : >> { %v749_v20 = vrot.slane %v709_v27, %v10202_v60  ;;  %v845_v6 = vrot.slane %v813_v53, %v10202_v60  ;;  %v937_v1 = vrot.slane %v897_v41, %v10202_v60  ;;  %v1033_v33 = vrot.slane %v1001_v17, %v10202_v60 }
  0x6f   : >> { %vm495_vm0 = vcmp.eq.s32.totalorder %v10225_v18, %v469_v21  ;;  %vm503_vm1 = vcmp.eq.s32.totalorder %v10228_v61, %v469_v21  ;;  %vm683_vm2 = vcmp.eq.s32.totalorder %v10225_v18, %v657_v28  ;;  %vm691_vm3 = vcmp.eq.s32.totalorder %v10228_v61, %v657_v28 }
  0x70   : >> { %v587_v19 = vsel %vm495_vm0, %v561_v22, 0.0  ;;  %v595_v62 = vsel %vm503_vm1, %v561_v22, 0.0  ;;  %v775_v37 = vsel %vm683_vm2, %v749_v20, 0.0  ;;  %v783_v55 = vsel %vm691_vm3, %v749_v20, 0.0 }
  0x71   : >> { %vm871_vm4 = vcmp.eq.s32.totalorder %v10225_v18, %v845_v6  ;;  %vm879_vm5 = vcmp.eq.s32.totalorder %v10228_v61, %v845_v6  ;;  %v791_v41 = vadd.f32 %v775_v37, %v587_v19  ;;  %v799_v27 = vadd.f32 %v783_v55, %v595_v62 }
  0x72   : >> { %v963_v21 = vsel %vm871_vm4, %v937_v1, 0.0  ;;  %v971_v53 = vsel %vm879_vm5, %v937_v1, 0.0  ;;  %vm1059_vm6 = vcmp.eq.s32.totalorder %v10225_v18, %v1033_v33  ;;  %vm1067_vm7 = vcmp.eq.s32.totalorder %v10228_v61, %v1033_v33 }
  0x73   : >> { %v1125_v17 = vrot.slane %v1085_v59, %v10202_v60  ;;  %v1189_v22 = vrot.slane %v10061_v50, %v10205_v29  ;;  %v979_v28 = vadd.f32 %v963_v21, %v791_v41  ;;  %v987_v12 = vadd.f32 %v971_v53, %v799_v27 }
  0x74   : >> { %v1273_v20 = vrot.slane %v14386_v43, %v10205_v29  ;;  %v1377_v6 = vrot.slane %v14398_v13, %v10205_v29  ;;  %v1461_v33 = vrot.slane %v10086_v63, %v10205_v29  ;;  %v1565_v21 = vrot.slane %v14388_v39, %v10205_v29 }
  0x75   : >> { %v1151_v19 = vsel %vm1059_vm6, %v1125_v17, 0.0  ;;  %v1159_v62 = vsel %vm1067_vm7, %v1125_v17, 0.0  ;;  %v1221_v1 = vrot.slane %v1189_v22, %v10202_v60 }
  0x76   : >> { %v1167_v37 = vadd.f32 %v1151_v19, %v979_v28  ;;  %v1175_v59 = vadd.f32 %v1159_v62, %v987_v12  ;;  %v1313_v55 = vrot.slane %v1273_v20, %v10202_v60  ;;  %v1409_v41 = vrot.slane %v1377_v6, %v10202_v60 }
  0x77   : >> { %vm1247_vm8 = vcmp.eq.s32.totalorder %v10225_v18, %v1221_v1  ;;  %vm1255_vm9 = vcmp.eq.s32.totalorder %v10228_v61, %v1221_v1  ;;  %v1501_v27 = vrot.slane %v1461_v33, %v10202_v60  ;;  %v1597_v6 = vrot.slane %v1565_v21, %v10202_v60 }
  0x78   : >> { %v1339_v53 = vsel %vm1247_vm8, %v1313_v55, 0.0  ;;  %v1347_v17 = vsel %vm1255_vm9, %v1313_v55, 0.0  ;;  %vm1435_vm10 = vcmp.eq.s32.totalorder %v10225_v18, %v1409_v41  ;;  %vm1443_vm11 = vcmp.eq.s32.totalorder %v10228_v61, %v1409_v41 }
  0x79   : >> { %v1355_v12 = vadd.f32 %v1339_v53, %v1167_v37  ;;  %v1363_v22 = vadd.f32 %v1347_v17, %v1175_v59  ;;  %v1527_v28 = vsel %vm1435_vm10, %v1501_v27, 0.0  ;;  %v1535_v20 = vsel %vm1443_vm11, %v1501_v27, 0.0  ;;  %v14421_v37 = vld [vmem:[#allocation17_spill] sm:$0xff] }
  0x7a   : >> { %v1649_v19 = vrot.slane %v14384_v46, %v10205_v29  ;;  %v1753_v62 = vrot.slane %v10139_v56, %v10205_v29  ;;  %v1837_v1 = vrot.slane %v14392_v32, %v10205_v29  ;;  %v445_v41 = vrot.slane %v14420_v36, %v10205_v29 }
  0x7b   : >> { %v1543_v33 = vadd.f32 %v1527_v28, %v1355_v12  ;;  %v1551_v55 = vadd.f32 %v1535_v20, %v1363_v22  ;;  %v529_v59 = vrot.slane %v14421_v37, %v10205_v29  ;;  %vm1623_vm12 = vcmp.eq.s32.totalorder %v10225_v18, %v1597_v6 }
  0x7c   : >> { %vm1631_vm13 = vcmp.eq.s32.totalorder %v10228_v61, %v1597_v6  ;;  %v1689_v27 = vrot.slane %v1649_v19, %v10202_v60  ;;  %v1785_v21 = vrot.slane %v1753_v62, %v10202_v60  ;;  %v1877_v53 = vrot.slane %v1837_v1, %v10202_v60  ;;  %v14422_v1 = vld [vmem:[#allocation21_spill] sm:$0xff] }
  0x7d   : >> { %v477_v17 = vrot.slane %v445_v41, %v10202_v60  ;;  %v569_v12 = vrot.slane %v529_v59, %v10202_v60  ;;  %v633_v22 = vrot.slane %v14391_v34, %v10205_v29  ;;  %v14423_v41 = vmov %v14422_v1 }
  0x7e   : >> { %v1715_v28 = vsel %vm1623_vm12, %v1689_v27, 0.0  ;;  %v1723_v20 = vsel %vm1631_vm13, %v1689_v27, 0.0  ;;  %vm1811_vm14 = vcmp.eq.s32.totalorder %v10225_v18, %v1785_v21  ;;  %vm1819_vm15 = vcmp.eq.s32.totalorder %v10228_v61, %v1785_v21 }
  0x7f   : >> { %v1731_v6 = vadd.f32 %v1715_v28, %v1543_v33  ;;  %v1739_v5 = vadd.f32 %v1723_v20, %v1551_v55  ;;  %v1903_v19 = vsel %vm1811_vm14, %v1877_v53, 0.0  ;;  %v1911_v45 = vsel %vm1819_vm15, %v1877_v53, 0.0  ;;  %v14424_v53 = vld [vmem:[#allocation25_spill] sm:$0xff] }
  0x80   : >> { %vm497_vm0 = vcmp.eq.s32.totalorder %v10225_v18, %v477_v17  ;;  %vm505_vm1 = vcmp.eq.s32.totalorder %v10228_v61, %v477_v17  ;;  %v665_v62 = vrot.slane %v633_v22, %v10202_v60  ;;  %v717_v59 = vrot.slane %v14422_v1, %v10205_v29 }
  0x81   : >> { %v1919_v24 = vadd.f32 %v1903_v19, %v1731_v6  ;;  %v1927_v52 = vadd.f32 %v1911_v45, %v1739_v5  ;;  %v589_v27 = vsel %vm497_vm0, %v569_v12, 0.0  ;;  %v597_v47 = vsel %vm505_vm1, %v569_v12, 0.0 }
  0x82   : >> { %vm685_vm2 = vcmp.eq.s32.totalorder %v10225_v18, %v665_v62  ;;  %vm693_vm3 = vcmp.eq.s32.totalorder %v10228_v61, %v665_v62  ;;  %v757_v33 = vrot.slane %v717_v59, %v10202_v60  ;;  %v821_v55 = vrot.slane %v14396_v23, %v10205_v29 }
  0x83   : >> { %v8824_v21 = vpack.c.bf16 %v1927_v52, %v1919_v24  ;;  %v905_v17 = vrot.slane %v14424_v53, %v10205_v29  ;;  %v1009_v22 = vrot.slane %v10043_v57, %v10205_v29  ;;  %v1093_v45 = vrot.slane %v10021_v49, %v10205_v29 }
  0x84   : >> { %v777_v5 = vsel %vm685_vm2, %v757_v33, 0.0  ;;  %v785_v12 = vsel %vm693_vm3, %v757_v33, 0.0  ;;  %v853_v28 = vrot.slane %v821_v55, %v10202_v60  ;;  %v1197_v20 = vrot.slane %v14393_v30, %v10205_v29 }
  0x85   : >> { %8825 = vmatprep.subr.bf16.mxu0 %v8824_v21  ;;  %v793_v6 = vadd.f32 %v777_v5, %v589_v27  ;;  %v801_v19 = vadd.f32 %v785_v12, %v597_v47  ;;  %v945_v52 = vrot.slane %v905_v17, %v10202_v60  ;;  %v1041_v24 = vrot.slane %v1009_v22, %v10202_v60 }
  0x86   : >> { %vm873_vm4 = vcmp.eq.s32.totalorder %v10225_v18, %v853_v28  ;;  %vm881_vm5 = vcmp.eq.s32.totalorder %v10228_v61, %v853_v28  ;;  %v1133_v62 = vrot.slane %v1093_v45, %v10202_v60  ;;  %v1229_v1 = vrot.slane %v1197_v20, %v10202_v60 }
  0x87   : >> { %v965_v59 = vsel %vm873_vm4, %v945_v52, 0.0  ;;  %v973_v33 = vsel %vm881_vm5, %v945_v52, 0.0  ;;  %vm1061_vm6 = vcmp.eq.s32.totalorder %v10225_v18, %v1041_v24  ;;  %vm1069_vm7 = vcmp.eq.s32.totalorder %v10228_v61, %v1041_v24 }
  0x88   : >> { %v981_v27 = vadd.f32 %v965_v59, %v793_v6  ;;  %v989_v47 = vadd.f32 %v973_v33, %v801_v19  ;;  %v1153_v55 = vsel %vm1061_vm6, %v1133_v62, 0.0  ;;  %v1161_v21 = vsel %vm1069_vm7, %v1133_v62, 0.0 }
  0x89   : >> { %vm1249_vm8 = vcmp.eq.s32.totalorder %v10225_v18, %v1229_v1  ;;  %vm1257_vm9 = vcmp.eq.s32.totalorder %v10228_v61, %v1229_v1  ;;  %v1281_v17 = vrot.slane %v14385_v44, %v10205_v29  ;;  %v1385_v22 = vrot.slane %v14399_v9, %v10205_v29 }
  0x8a   : >> { %v1169_v45 = vadd.f32 %v1153_v55, %v981_v27  ;;  %v1177_v5 = vadd.f32 %v1161_v21, %v989_v47  ;;  %v1469_v12 = vrot.slane %v14402_v0, %v10205_v29  ;;  %v1573_v28 = vrot.slane %v14397_v14, %v10205_v29 }
  0x8b   : >> { %v1321_v20 = vrot.slane %v1281_v17, %v10202_v60  ;;  %v1417_v6 = vrot.slane %v1385_v22, %v10202_v60  ;;  %v1657_v19 = vrot.slane %v14389_v38, %v10205_v29  ;;  %v1761_v52 = vrot.slane %v14394_v26, %v10205_v29 }
  0x8c   : >> { %v1509_v24 = vrot.slane %v1469_v12, %v10202_v60  ;;  %v1605_v62 = vrot.slane %v1573_v28, %v10202_v60  ;;  %v1845_v59 = vrot.slane %v14387_v40, %v10205_v29  ;;  %v433_v33 = vrot.slane %v14414_v42, %v10202_v60 }
  0x8d   : >> { %v1341_v27 = vsel %vm1249_vm8, %v1321_v20, 0.0  ;;  %v1349_v47 = vsel %vm1257_vm9, %v1321_v20, 0.0  ;;  %vm1437_vm10 = vcmp.eq.s32.totalorder %v10225_v18, %v1417_v6  ;;  %vm1445_vm11 = vcmp.eq.s32.totalorder %v10228_v61, %v1417_v6 }
  0x8e   : >> { %v1357_v55 = vadd.f32 %v1341_v27, %v1169_v45  ;;  %v1365_v21 = vadd.f32 %v1349_v47, %v1177_v5  ;;  %v1529_v17 = vsel %vm1437_vm10, %v1509_v24, 0.0  ;;  %v1537_v22 = vsel %vm1445_vm11, %v1509_v24, 0.0 }
  0x8f   : >> { %vm1625_vm12 = vcmp.eq.s32.totalorder %v10225_v18, %v1605_v62  ;;  %vm1633_vm13 = vcmp.eq.s32.totalorder %v10228_v61, %v1605_v62  ;;  %v1697_v12 = vrot.slane %v1657_v19, %v10202_v60  ;;  %v1793_v28 = vrot.slane %v1761_v52, %v10202_v60 }
  0x90   : >> { %v1545_v42 = vadd.f32 %v1529_v17, %v1357_v55  ;;  %v1553_v31 = vadd.f32 %v1537_v22, %v1365_v21  ;;  %v1885_v1 = vrot.slane %v1845_v59, %v10202_v60  ;;  %v465_v20 = vrot.slane %v433_v33, %v10202_v60 }
  0x91   : >> { %v1717_v7 = vsel %vm1625_vm12, %v1697_v12, 0.0  ;;  %v1725_v6 = vsel %vm1633_vm13, %v1697_v12, 0.0  ;;  %vm1813_vm14 = vcmp.eq.s32.totalorder %v10225_v18, %v1793_v28  ;;  %vm1821_vm15 = vcmp.eq.s32.totalorder %v10228_v61, %v1793_v28 }
  0x92   : >> { %v1733_v45 = vadd.f32 %v1717_v7, %v1545_v42  ;;  %v1741_v5 = vadd.f32 %v1725_v6, %v1553_v31  ;;  %v1905_v24 = vsel %vm1813_vm14, %v1885_v1, 0.0  ;;  %v1913_v62 = vsel %vm1821_vm15, %v1885_v1, 0.0 }
  0x93   : >> { %vm494_vm0 = vcmp.eq.s32.totalorder %v10225_v18, %v465_v20  ;;  %vm502_vm1 = vcmp.eq.s32.totalorder %v10228_v61, %v465_v20  ;;  %v517_v19 = vrot.slane %v14415_v48, %v10202_v60  ;;  %v621_v52 = vrot.slane %v14400_v3, %v10202_v60 }
  0x94   : >> { %v1921_v59 = vadd.f32 %v1905_v24, %v1733_v45  ;;  %v1929_v33 = vadd.f32 %v1913_v62, %v1741_v5  ;;  %v705_v27 = vrot.slane %v14416_v51, %v10202_v60  ;;  %v809_v7 = vrot.slane %v14401_v2, %v10202_v60 }
  0x95   : >> { %v557_v31 = vrot.slane %v517_v19, %v10202_v60  ;;  %v653_v42 = vrot.slane %v621_v52, %v10202_v60  ;;  %v893_v47 = vrot.slane %v14418_v8, %v10202_v60  ;;  %v997_v55 = vrot.slane %v14390_v35, %v10202_v60 }
  0x96   : >> { %v8828_v21 = vpack.c.bf16 %v1929_v33, %v1921_v59  ;;  %v745_v17 = vrot.slane %v705_v27, %v10202_v60  ;;  %v841_v22 = vrot.slane %v809_v7, %v10202_v60  ;;  %v1081_v12 = vrot.slane %v14395_v25, %v10202_v60 }
  0x97   : >> { %v586_v28 = vsel %vm494_vm0, %v557_v31, 0.0  ;;  %v594_v1 = vsel %vm502_vm1, %v557_v31, 0.0  ;;  %vm682_vm2 = vcmp.eq.s32.totalorder %v10225_v18, %v653_v42  ;;  %vm690_vm3 = vcmp.eq.s32.totalorder %v10228_v61, %v653_v42 }
  0x98   : >> { %8829 = vmatprep.subr.bf16.mxu1 %v8828_v21  ;;  %v774_v6 = vsel %vm682_vm2, %v745_v17, 0.0  ;;  %v782_v45 = vsel %vm690_vm3, %v745_v17, 0.0  ;;  %vm870_vm4 = vcmp.eq.s32.totalorder %v10225_v18, %v841_v22  ;;  %vm878_vm5 = vcmp.eq.s32.totalorder %v10228_v61, %v841_v22 }
  0x99   : >> { %v790_v5 = vadd.f32 %v774_v6, %v586_v28  ;;  %v798_v24 = vadd.f32 %v782_v45, %v594_v1  ;;  %v933_v62 = vrot.slane %v893_v47, %v10202_v60  ;;  %v1029_v19 = vrot.slane %v997_v55, %v10202_v60 }
  0x9a   : >> { %v1121_v20 = vrot.slane %v1081_v12, %v10202_v60  ;;  %v1185_v52 = vrot.slane %v10061_v50, %v10202_v60  ;;  %v1269_v59 = vrot.slane %v14386_v43, %v10202_v60  ;;  %v1373_v33 = vrot.slane %v14398_v13, %v10202_v60 }
  0x9b   : >> { %v962_v27 = vsel %vm870_vm4, %v933_v62, 0.0  ;;  %v970_v7 = vsel %vm878_vm5, %v933_v62, 0.0  ;;  %vm1058_vm6 = vcmp.eq.s32.totalorder %v10225_v18, %v1029_v19  ;;  %vm1066_vm7 = vcmp.eq.s32.totalorder %v10228_v61, %v1029_v19 }
  0x9c   : >> { %v978_v31 = vadd.f32 %v962_v27, %v790_v5  ;;  %v986_v42 = vadd.f32 %v970_v7, %v798_v24  ;;  %v1150_v47 = vsel %vm1058_vm6, %v1121_v20, 0.0  ;;  %v1158_v55 = vsel %vm1066_vm7, %v1121_v20, 0.0 }
  0x9d   : >> { %v1217_v21 = vrot.slane %v1185_v52, %v10202_v60  ;;  %v1309_v17 = vrot.slane %v1269_v59, %v10202_v60  ;;  %v1405_v22 = vrot.slane %v1373_v33, %v10202_v60  ;;  %v1457_v12 = vrot.slane %v10086_v63, %v10202_v60 }
  0x9e   : >> { %v1166_v28 = vadd.f32 %v1150_v47, %v978_v31  ;;  %v1174_v1 = vadd.f32 %v1158_v55, %v986_v42  ;;  %v1561_v6 = vrot.slane %v14388_v39, %v10202_v60  ;;  %v1645_v45 = vrot.slane %v14384_v46, %v10202_v60 }
  0x9f   : >> { %vm1246_vm8 = vcmp.eq.s32.totalorder %v10225_v18, %v1217_v21  ;;  %vm1254_vm9 = vcmp.eq.s32.totalorder %v10228_v61, %v1217_v21  ;;  %vm1434_vm10 = vcmp.eq.s32.totalorder %v10225_v18, %v1405_v22  ;;  %vm1442_vm11 = vcmp.eq.s32.totalorder %v10228_v61, %v1405_v22 }
  0xa0   : >> { %v1338_v5 = vsel %vm1246_vm8, %v1309_v17, 0.0  ;;  %v1346_v24 = vsel %vm1254_vm9, %v1309_v17, 0.0  ;;  %v1497_v62 = vrot.slane %v1457_v12, %v10202_v60  ;;  %v1593_v19 = vrot.slane %v1561_v6, %v10202_v60 }
  0xa1   : >> { %v1354_v20 = vadd.f32 %v1338_v5, %v1166_v28  ;;  %v1362_v52 = vadd.f32 %v1346_v24, %v1174_v1  ;;  %v1685_v59 = vrot.slane %v1645_v45, %v10202_v60  ;;  %v1749_v33 = vrot.slane %v10139_v56, %v10202_v60 }
  0xa2   : >> { %v1526_v27 = vsel %vm1434_vm10, %v1497_v62, 0.0  ;;  %v1534_v7 = vsel %vm1442_vm11, %v1497_v62, 0.0  ;;  %vm1622_vm12 = vcmp.eq.s32.totalorder %v10225_v18, %v1593_v19  ;;  %vm1630_vm13 = vcmp.eq.s32.totalorder %v10228_v61, %v1593_v19 }
  0xa3   : >> { %v1542_v31 = vadd.f32 %v1526_v27, %v1354_v20  ;;  %v1550_v42 = vadd.f32 %v1534_v7, %v1362_v52  ;;  %v1714_v47 = vsel %vm1622_vm12, %v1685_v59, 0.0  ;;  %v1722_v55 = vsel %vm1630_vm13, %v1685_v59, 0.0 }
  0xa4   : >> { %v1781_v21 = vrot.slane %v1749_v33, %v10202_v60  ;;  %v1833_v17 = vrot.slane %v14392_v32, %v10202_v60  ;;  %v441_v22 = vrot.slane %v14420_v36, %v10202_v60  ;;  %v525_v12 = vrot.slane %v14421_v37, %v10202_v60  ;;  %v14446_v32 = vld [vmem:[#allocation41_spill] sm:$0xff] }
  0xa5   : >> { %v1730_v28 = vadd.f32 %v1714_v47, %v1542_v31  ;;  %v1738_v1 = vadd.f32 %v1722_v55, %v1550_v42  ;;  %v629_v6 = vrot.slane %v14391_v34, %v10202_v60  ;;  %v713_v45 = vrot.slane %v14423_v41, %v10202_v60 }
  0xa6   : >> { %vm1937_vm14 = vcmask 130048   ;;  %vm1810_vm15 = vcmp.eq.s32.totalorder %v10225_v18, %v1781_v21  ;;  %vm1818_vm0 = vcmp.eq.s32.totalorder %v10228_v61, %v1781_v21  ;;  %v1873_v5 = vrot.slane %v1833_v17, %v10202_v60 }
  0xa7   : >> { %v473_v24 = vrot.slane %v441_v22, %v10202_v60  ;;  %v565_v62 = vrot.slane %v525_v12, %v10202_v60  ;;  %v661_v19 = vrot.slane %v629_v6, %v10202_v60  ;;  %v753_v20 = vrot.slane %v713_v45, %v10202_v60 }
  0xa8   : >> { %v817_v52 = vrot.slane %v14396_v23, %v10202_v60  ;;  %v1902_v59 = vsel %vm1810_vm15, %v1873_v5, 0.0  ;;  %v1910_v33 = vsel %vm1818_vm0, %v1873_v5, 0.0  ;;  %v901_v55 = vrot.slane %v14424_v53, %v10202_v60  ;;  %v14440_v23 = vld [vmem:[#allocation23_spill] sm:$0xff] }
  0xa9   : >> { %vm496_vm1 = vcmp.eq.s32.totalorder %v10225_v18, %v473_v24  ;;  %vm504_vm2 = vcmp.eq.s32.totalorder %v10228_v61, %v473_v24  ;;  %v1918_v27 = vadd.f32 %v1902_v59, %v1730_v28  ;;  %v1926_v7 = vadd.f32 %v1910_v33, %v1738_v1 }
  0xaa   : >> { %v588_v31 = vsel %vm496_vm1, %v565_v62, 0.0  ;;  %v596_v42 = vsel %vm504_vm2, %v565_v62, 0.0  ;;  %vm684_vm3 = vcmp.eq.s32.totalorder %v10225_v18, %v661_v19  ;;  %vm692_vm4 = vcmp.eq.s32.totalorder %v10228_v61, %v661_v19  ;;  %v10451_v62 = vld [vmem:[%s1935_s6] sm:$0x3] }
  0xab   : >> { %v849_v47 = vrot.slane %v817_v52, %v10202_v60  ;;  %v8826_v21 = vpack.c.bf16 %v1926_v7, %v1918_v27  ;;  %v776_v17 = vsel %vm684_vm3, %v753_v20, 0.0  ;;  %v784_v22 = vsel %vm692_vm4, %v753_v20, 0.0 }
  0xac   : >> { %v1005_v12 = vrot.slane %v10043_v57, %v10202_v60  ;;  %v792_v28 = vadd.f32 %v776_v17, %v588_v31  ;;  %v800_v1 = vadd.f32 %v784_v22, %v596_v42  ;;  %v941_v6 = vrot.slane %v901_v55, %v10202_v60 }
  0xad   : >> { %vm872_vm5 = vcmp.eq.s32.totalorder %v10225_v18, %v849_v47  ;;  %vm880_vm6 = vcmp.eq.s32.totalorder %v10228_v61, %v849_v47  ;;  %8827 = vmatpush1.bf16.msra.mxu0 %v8826_v21  ;;  %v1089_v5 = vrot.slane %v10021_v49, %v10202_v60  ;;  %v1193_v24 = vrot.slane %v14393_v30, %v10202_v60  ;;  %v14441_v30 = vld [vmem:[#allocation32_spill] sm:$0xff]  ;;  %v14474_v49 = vld [vmem:[#allocation10_spill] sm:$0xff] (%p414_p11) }
  0xae   : >> { %v1037_v45 = vrot.slane %v1005_v12, %v10202_v60  ;;  %v1277_v19 = vrot.slane %v14385_v44, %v10202_v60  ;;  %v1381_v20 = vrot.slane %v14399_v9, %v10202_v60  ;;  %v1465_v52 = vrot.slane %v14402_v0, %v10202_v60 }
  0xaf   : >> { %v1569_v59 = vrot.slane %v14397_v14, %v10202_v60  ;;  %v964_v33 = vsel %vm872_vm5, %v941_v6, 0.0  ;;  %v972_v27 = vsel %vm880_vm6, %v941_v6, 0.0  ;;  %v1129_v42 = vrot.slane %v1089_v5, %v10202_v60 }
  0xb0   : >> { %vm1060_vm7 = vcmp.eq.s32.totalorder %v10225_v18, %v1037_v45  ;;  %vm1068_vm8 = vcmp.eq.s32.totalorder %v10228_v61, %v1037_v45  ;;  %v980_v7 = vadd.f32 %v964_v33, %v792_v28  ;;  %v988_v31 = vadd.f32 %v972_v27, %v800_v1  ;;  %8793 = vmatmul.mubr.msk.f32.vlgmr.msra.gmra.mrb[0].mxu0 %vm1937_vm14, %v10451_v62 }
  0xb1   : >> { %v1225_v47 = vrot.slane %v1193_v24, %v10202_v60  ;;  %v1317_v55 = vrot.slane %v1277_v19, %v10202_v60  ;;  %v1413_v21 = vrot.slane %v1381_v20, %v10202_v60  ;;  %v1505_v17 = vrot.slane %v1465_v52, %v10202_v60 }
  0xb2   : >> { %v1601_v22 = vrot.slane %v1569_v59, %v10202_v60  ;;  %v14425_v12 = vmov 0.0   ;;  %v1152_v6 = vsel %vm1060_vm7, %v1129_v42, 0.0  ;;  %v1160_v28 = vsel %vm1068_vm8, %v1129_v42, 0.0 }
  0xb3   : >> { %2147 = vmatprep.mubr.f32.mxu0 %v14425_v12  ;;  %vm1248_vm9 = vcmp.eq.s32.totalorder %v10225_v18, %v1225_v47  ;;  %vm1256_vm10 = vcmp.eq.s32.totalorder %v10228_v61, %v1225_v47  ;;  %v1168_v1 = vadd.f32 %v1152_v6, %v980_v7  ;;  %v1176_v45 = vadd.f32 %v1160_v28, %v988_v31  ;;  %v14426_v31 = vld [vmem:[#allocation14_spill] sm:$0xff] }
  0xb4   : >> { %v1340_v5 = vsel %vm1248_vm9, %v1317_v55, 0.0  ;;  %v1348_v24 = vsel %vm1256_vm10, %v1317_v55, 0.0  ;;  %vm1436_vm11 = vcmp.eq.s32.totalorder %v10225_v18, %v1413_v21  ;;  %vm1444_vm12 = vcmp.eq.s32.totalorder %v10228_v61, %v1413_v21  ;;  %v14427_v21 = vld [vmem:[#allocation18_spill] sm:$0xff] }
  0xb5   : >> { %vm1624_vm13 = vcmp.eq.s32.totalorder %v10225_v18, %v1601_v22  ;;  %vm1632_vm15 = vcmp.eq.s32.totalorder %v10228_v61, %v1601_v22  ;;  %v1356_v19 = vadd.f32 %v1340_v5, %v1168_v1  ;;  %v1364_v20 = vadd.f32 %v1348_v24, %v1176_v45 }
  0xb6   : >> { %v1528_v52 = vsel %vm1436_vm11, %v1505_v17, 0.0  ;;  %v1536_v59 = vsel %vm1444_vm12, %v1505_v17, 0.0  ;;  %v1653_v33 = vrot.slane %v14389_v38, %v10202_v60  ;;  %v1757_v27 = vrot.slane %v14394_v26, %v10202_v60 }
  0xb7   : >> { %v1841_v7 = vrot.slane %v14387_v40, %v10202_v60  ;;  %v453_v42 = vrot.slane %v14426_v31, %v10205_v29  ;;  %v1544_v47 = vadd.f32 %v1528_v52, %v1356_v19  ;;  %v1552_v55 = vadd.f32 %v1536_v59, %v1364_v20  ;;  %v14429_v19 = vld [vmem:[#allocation22_spill] sm:$0xff]  ;;  %v14430_v52 = vld [vmem:[#allocation31_spill] sm:$0xff] }
  0xb8   : >> { %v14428_v6 = vmov %v14427_v21  ;;  %v537_v28 = vrot.slane %v14427_v21, %v10205_v29  ;;  %v641_v17 = vrot.slane %v9983_v4, %v10205_v29  ;;  %v1693_v1 = vrot.slane %v1653_v33, %v10202_v60 }
  0xb9   : >> { %v1789_v45 = vrot.slane %v1757_v27, %v10202_v60  ;;  %v1881_v5 = vrot.slane %v1841_v7, %v10202_v60  ;;  %v485_v24 = vrot.slane %v453_v42, %v10202_v60  ;;  %v725_v20 = vrot.slane %v14429_v19, %v10205_v29 }
  0xba   : >> { %v577_v0 = vrot.slane %v537_v28, %v10202_v60  ;;  %v673_v2 = vrot.slane %v641_v17, %v10202_v60  ;;  %v829_v59 = vrot.slane %v14430_v52, %v10205_v29  ;;  %v1716_v21 = vsel %vm1624_vm13, %v1693_v1, 0.0 }
  0xbb   : >> { %v1724_v33 = vsel %vm1632_vm15, %v1693_v1, 0.0  ;;  %vm1812_vm0 = vcmp.eq.s32.totalorder %v10225_v18, %v1789_v45  ;;  %vm1820_vm1 = vcmp.eq.s32.totalorder %v10228_v61, %v1789_v45  ;;  %v1732_v27 = vadd.f32 %v1716_v21, %v1544_v47  ;;  %v14431_v47 = vld [vmem:[#allocation33_spill] sm:$0xff] }
  0xbc   : >> { %v1740_v7 = vadd.f32 %v1724_v33, %v1552_v55  ;;  %v1904_v42 = vsel %vm1812_vm0, %v1881_v5, 0.0  ;;  %v1912_v28 = vsel %vm1820_vm1, %v1881_v5, 0.0  ;;  %vm499_vm2 = vcmp.eq.s32.totalorder %v10225_v18, %v485_v24 }
  0xbd   : >> { %vm507_vm3 = vcmp.eq.s32.totalorder %v10228_v61, %v485_v24  ;;  %vm687_vm4 = vcmp.eq.s32.totalorder %v10225_v18, %v673_v2  ;;  %vm695_vm5 = vcmp.eq.s32.totalorder %v10228_v61, %v673_v2  ;;  %v1920_v17 = vadd.f32 %v1904_v42, %v1732_v27  ;;  %v14432_v24 = vld [vmem:[#allocation36_spill] sm:$0xff] }
  0xbe   : >> { %v1928_v3 = vadd.f32 %v1912_v28, %v1740_v7  ;;  %v591_v22 = vsel %vm499_vm2, %v577_v0, 0.0  ;;  %v599_v1 = vsel %vm507_vm3, %v577_v0, 0.0  ;;  %v765_v8 = vrot.slane %v725_v20, %v10202_v60 }
  0xbf   : >> { %v861_v45 = vrot.slane %v829_v59, %v10202_v60  ;;  %v913_v55 = vrot.slane %v14431_v47, %v10205_v29  ;;  %v1017_v5 = vrot.slane %v10049_v58, %v10205_v29  ;;  %v1101_v33 = vrot.slane %v14432_v24, %v10205_v29 }
  0xc0   : >> { %v8830_v21 = vpack.c.bf16 %v1928_v3, %v1920_v17  ;;  %v1205_v2 = vrot.slane %v10065_v54, %v10205_v29  ;;  %v1289_v0 = vrot.slane %v10076_v11, %v10205_v29  ;;  %v779_v27 = vsel %vm687_vm4, %v765_v8, 0.0 }
  0xc1   : >> { %v787_v20 = vsel %vm695_vm5, %v765_v8, 0.0  ;;  %vm875_vm6 = vcmp.eq.s32.totalorder %v10225_v18, %v861_v45  ;;  %vm883_vm7 = vcmp.eq.s32.totalorder %v10228_v61, %v861_v45  ;;  %v795_v59 = vadd.f32 %v779_v27, %v591_v22 }
  0xc2   : >> { %8831 = vmatpush1.bf16.msra.mxu1 %v8830_v21  ;;  %v803_v7 = vadd.f32 %v787_v20, %v599_v1  ;;  %v953_v3 = vrot.slane %v913_v55, %v10202_v60  ;;  %v1049_v42 = vrot.slane %v1017_v5, %v10202_v60  ;;  %v1141_v28 = vrot.slane %v1101_v33, %v10202_v60 }
  0xc3   : >> { %v1237_v17 = vrot.slane %v1205_v2, %v10202_v60  ;;  %v1329_v9 = vrot.slane %v1289_v0, %v10202_v60  ;;  %v1393_v8 = vrot.slane %v10101_v16, %v10205_v29  ;;  %v1477_v21 = vrot.slane %v10096_v10, %v10205_v29 }
  0xc4   : >> { %v967_v13 = vsel %vm875_vm6, %v953_v3, 0.0  ;;  %v975_v14 = vsel %vm883_vm7, %v953_v3, 0.0  ;;  %vm1063_vm8 = vcmp.eq.s32.totalorder %v10225_v18, %v1049_v42  ;;  %vm1071_vm9 = vcmp.eq.s32.totalorder %v10228_v61, %v1049_v42 }
  0xc5   : >> { %8794 = vmatmul.mubr.msk.f32.vlgmr.msra.gmra.mrb[0].mxu1 %vm1937_vm14, %v10451_v62  ;;  %v983_v22 = vadd.f32 %v967_v13, %v795_v59  ;;  %v991_v1 = vadd.f32 %v975_v14, %v803_v7  ;;  %v1155_v45 = vsel %vm1063_vm8, %v1141_v28, 0.0  ;;  %v1163_v55 = vsel %vm1071_vm9, %v1141_v28, 0.0  ;;  %v14433_v7 = vld [vmem:[#allocation53_spill] sm:$0xff] }
  0xc6   : >> { %vm1251_vm10 = vcmp.eq.s32.totalorder %v10225_v18, %v1237_v17  ;;  %vm1259_vm11 = vcmp.eq.s32.totalorder %v10228_v61, %v1237_v17  ;;  %v1425_v5 = vrot.slane %v1393_v8, %v10202_v60  ;;  %2218 = vmatprep.mubr.f32.mxu1 %v14425_v12  ;;  %v1517_v13 = vrot.slane %v1477_v21, %v10202_v60  ;;  %v14434_v12 = vld [vmem:[#allocation61_spill] sm:$0xff]  ;;  %v14435_v8 = vld [vmem:[#allocation59_spill] sm:$0xff] }
  0xc7   : >> { %v1171_v33 = vadd.f32 %v1155_v45, %v983_v22  ;;  %v1179_v2 = vadd.f32 %v1163_v55, %v991_v1  ;;  %v1343_v0 = vsel %vm1251_vm10, %v1329_v9, 0.0  ;;  %v1351_v27 = vsel %vm1259_vm11, %v1329_v9, 0.0 }
  0xc8   : >> { %vm1439_vm12 = vcmp.eq.s32.totalorder %v10225_v18, %v1425_v5  ;;  %vm1447_vm13 = vcmp.eq.s32.totalorder %v10228_v61, %v1425_v5  ;;  %v1581_v14 = vrot.slane %v10125_v15, %v10205_v29  ;;  %v1665_v3 = vrot.slane %v14433_v7, %v10205_v29 }
  0xc9   : >> { %v1359_v20 = vadd.f32 %v1343_v0, %v1171_v33  ;;  %v1367_v59 = vadd.f32 %v1351_v27, %v1179_v2  ;;  %v1769_v42 = vrot.slane %v14434_v12, %v10205_v29  ;;  %v1531_v28 = vsel %vm1439_vm12, %v1517_v13, 0.0  ;;  %v14436_v33 = vld [vmem:[#allocation15_spill] sm:$0xff] }
  0xca   : >> { %v1539_v17 = vsel %vm1447_vm13, %v1517_v13, 0.0  ;;  %v1613_v9 = vrot.slane %v1581_v14, %v10202_v60  ;;  %v1853_v22 = vrot.slane %v14435_v8, %v10205_v29  ;;  %v1705_v55 = vrot.slane %v1665_v3, %v10202_v60 }
  0xcb   : >> { %v1547_v1 = vadd.f32 %v1531_v28, %v1359_v20  ;;  %v1555_v45 = vadd.f32 %v1539_v17, %v1367_v59  ;;  %v1801_v5 = vrot.slane %v1769_v42, %v10202_v60  ;;  %v461_v2 = vrot.slane %v14436_v33, %v10205_v29  ;;  %v14437_v42 = vld [vmem:[#allocation19_spill] sm:$0xff]  ;;  %v14438_v17 = vld [vmem:[#allocation30_spill] sm:$0xff] }
  0xcc   : >> { %vm1627_vm15 = vcmp.eq.s32.totalorder %v10225_v18, %v1613_v9  ;;  %vm1635_vm0 = vcmp.eq.s32.totalorder %v10228_v61, %v1613_v9  ;;  %v1893_v21 = vrot.slane %v1853_v22, %v10202_v60  ;;  %v545_v28 = vrot.slane %v14437_v42, %v10205_v29 }
  0xcd   : >> { %v1719_v0 = vsel %vm1627_vm15, %v1705_v55, 0.0  ;;  %v1727_v27 = vsel %vm1635_vm0, %v1705_v55, 0.0  ;;  %vm1815_vm1 = vcmp.eq.s32.totalorder %v10225_v18, %v1801_v5  ;;  %vm1823_vm2 = vcmp.eq.s32.totalorder %v10228_v61, %v1801_v5 }
  0xce   : >> { %v1735_v13 = vadd.f32 %v1719_v0, %v1547_v1  ;;  %v1743_v14 = vadd.f32 %v1727_v27, %v1555_v45  ;;  %v1907_v20 = vsel %vm1815_vm1, %v1893_v21, 0.0  ;;  %v1915_v59 = vsel %vm1823_vm2, %v1893_v21, 0.0  ;;  %v14442_v1 = vld [vmem:[#allocation34_spill] sm:$0xff] }
  0xcf   : >> { %v493_v3 = vrot.slane %v461_v2, %v10202_v60  ;;  %v14439_v9 = vmov %v14438_v17  ;;  %v649_v22 = vrot.slane %v14438_v17, %v10205_v29  ;;  %v733_v25 = vrot.slane %v14440_v23, %v10205_v29 }
  0xd0   : >> { %v1923_v55 = vadd.f32 %v1907_v20, %v1735_v13  ;;  %v1931_v26 = vadd.f32 %v1915_v59, %v1743_v14  ;;  %v837_v5 = vrot.slane %v14441_v30, %v10205_v29  ;;  %v14443_v45 = vmov %v14442_v1 }
  0xd1   : >> { %v921_v0 = vrot.slane %v14442_v1, %v10205_v29  ;;  %vm501_vm3 = vcmp.eq.s32.totalorder %v10225_v18, %v493_v3  ;;  %vm509_vm4 = vcmp.eq.s32.totalorder %v10228_v61, %v493_v3  ;;  %v585_v21 = vrot.slane %v545_v28, %v10202_v60 }
  0xd2   : >> { %v681_v2 = vrot.slane %v649_v22, %v10202_v60  ;;  %v8832_v27 = vpack.c.bf16 %v1931_v26, %v1923_v55  ;;  %v773_v17 = vrot.slane %v733_v25, %v10202_v60  ;;  %v869_v13 = vrot.slane %v837_v5, %v10202_v60  ;;  %v14444_v55 = vld [vmem:[#allocation39_spill] sm:$0xff] }
  0xd3   : >> { %v961_v14 = vrot.slane %v921_v0, %v10202_v60  ;;  %v593_v20 = vsel %vm501_vm3, %v585_v21, 0.0  ;;  %v601_v59 = vsel %vm509_vm4, %v585_v21, 0.0  ;;  %v1025_v5 = vrot.slane %v14444_v55, %v10205_v29  ;;  %v14445_v0 = vld [vmem:[#allocation37_spill] sm:$0xff] }
  0xd4   : >> { %vm689_vm5 = vcmp.eq.s32.totalorder %v10225_v18, %v681_v2  ;;  %vm697_vm6 = vcmp.eq.s32.totalorder %v10228_v61, %v681_v2  ;;  %8833 = vmatprep.subr.bf16.mxu0 %v8832_v27  ;;  %vm877_vm7 = vcmp.eq.s32.totalorder %v10225_v18, %v869_v13  ;;  %vm885_vm8 = vcmp.eq.s32.totalorder %v10228_v61, %v869_v13  ;;  %v14447_v27 = vld [vmem:[#allocation44_spill] sm:$0xff]  ;;  %v14448_v13 = vld [vmem:[#allocation49_spill] sm:$0xff] }
  0xd5   : >> { %v781_v1 = vsel %vm689_vm5, %v773_v17, 0.0  ;;  %v789_v3 = vsel %vm697_vm6, %v773_v17, 0.0  ;;  %v969_v25 = vsel %vm877_vm7, %v961_v14, 0.0  ;;  %v977_v22 = vsel %vm885_vm8, %v961_v14, 0.0 }
  0xd6   : >> { %v797_v26 = vadd.f32 %v781_v1, %v593_v20  ;;  %v805_v28 = vadd.f32 %v789_v3, %v601_v59  ;;  %v1109_v21 = vrot.slane %v14445_v0, %v10205_v29  ;;  %v1213_v2 = vrot.slane %v14446_v32, %v10205_v29  ;;  %v14449_v59 = vld [vmem:[#allocation48_spill] sm:$0xff] }
  0xd7   : >> { %v1297_v17 = vrot.slane %v14447_v27, %v10205_v29  ;;  %v1401_v20 = vrot.slane %v14448_v13, %v10205_v29  ;;  %v14450_v3 = vmov %v14449_v59  ;;  %v1485_v14 = vrot.slane %v14449_v59, %v10205_v29 }
  0xd8   : >> { %v985_v34 = vadd.f32 %v969_v25, %v797_v26  ;;  %v993_v35 = vadd.f32 %v977_v22, %v805_v28  ;;  %v1057_v1 = vrot.slane %v1025_v5, %v10202_v60  ;;  %v1149_v36 = vrot.slane %v1109_v21, %v10202_v60  ;;  %v14451_v26 = vld [vmem:[#allocation55_spill] sm:$0xff]  ;;  %v14452_v25 = vld [vmem:[#allocation54_spill] sm:$0xff] }
  0xd9   : >> { %v1245_v37 = vrot.slane %v1213_v2, %v10202_v60  ;;  %v1337_v38 = vrot.slane %v1297_v17, %v10202_v60  ;;  %v1433_v39 = vrot.slane %v1401_v20, %v10202_v60  ;;  %v1525_v40 = vrot.slane %v1485_v14, %v10202_v60 }
  0xda   : >> { %v1589_v28 = vrot.slane %v14451_v26, %v10205_v29  ;;  %v1673_v22 = vrot.slane %v14452_v25, %v10205_v29  ;;  %vm1065_vm9 = vcmp.eq.s32.totalorder %v10225_v18, %v1057_v1  ;;  %vm1073_vm10 = vcmp.eq.s32.totalorder %v10228_v61, %v1057_v1 }
  0xdb   : >> { %vm1253_vm11 = vcmp.eq.s32.totalorder %v10225_v18, %v1245_v37  ;;  %vm1261_vm12 = vcmp.eq.s32.totalorder %v10228_v61, %v1245_v37  ;;  %v1157_v5 = vsel %vm1065_vm9, %v1149_v36, 0.0  ;;  %v1165_v21 = vsel %vm1073_vm10, %v1149_v36, 0.0  ;;  %v14453_v37 = vld [vmem:[#allocation62_spill] sm:$0xff]  ;;  %v14454_v36 = vld [vmem:[#allocation60_spill] sm:$0xff] }
  0xdc   : >> { %v1345_v2 = vsel %vm1253_vm11, %v1337_v38, 0.0  ;;  %v1353_v17 = vsel %vm1261_vm12, %v1337_v38, 0.0  ;;  %v1173_v20 = vadd.f32 %v1157_v5, %v985_v34  ;;  %v1181_v59 = vadd.f32 %v1165_v21, %v993_v35 }
  0xdd   : >> { %vm1441_vm13 = vcmp.eq.s32.totalorder %v10225_v18, %v1433_v39  ;;  %vm1449_vm15 = vcmp.eq.s32.totalorder %v10228_v61, %v1433_v39  ;;  %v1621_v43 = vrot.slane %v1589_v28, %v10202_v60  ;;  %v1713_v1 = vrot.slane %v1673_v22, %v10202_v60 }
  0xde   : >> { %v1533_v14 = vsel %vm1441_vm13, %v1525_v40, 0.0  ;;  %v1541_v41 = vsel %vm1449_vm15, %v1525_v40, 0.0  ;;  %v1361_v44 = vadd.f32 %v1345_v2, %v1173_v20  ;;  %v1369_v46 = vadd.f32 %v1353_v17, %v1181_v59 }
  0xdf   : >> { %v1777_v48 = vrot.slane %v14453_v37, %v10205_v29  ;;  %v1861_v38 = vrot.slane %v14454_v36, %v10205_v29  ;;  %vm1629_vm0 = vcmp.eq.s32.totalorder %v10225_v18, %v1621_v43  ;;  %vm1637_vm1 = vcmp.eq.s32.totalorder %v10228_v61, %v1621_v43 }
  0xe0   : >> { %v449_v34 = vrot.slane %v14426_v31, %v10202_v60  ;;  %v533_v35 = vrot.slane %v14428_v6, %v10202_v60  ;;  %v1549_v39 = vadd.f32 %v1533_v14, %v1361_v44  ;;  %v1557_v40 = vadd.f32 %v1541_v41, %v1369_v46 }
  0xe1   : >> { %v1721_v28 = vsel %vm1629_vm0, %v1713_v1, 0.0  ;;  %v1729_v22 = vsel %vm1637_vm1, %v1713_v1, 0.0  ;;  %v1809_v5 = vrot.slane %v1777_v48, %v10202_v60  ;;  %v1901_v21 = vrot.slane %v1861_v38, %v10202_v60 }
  0xe2   : >> { %v481_v2 = vrot.slane %v449_v34, %v10202_v60  ;;  %v573_v17 = vrot.slane %v533_v35, %v10202_v60  ;;  %v1737_v20 = vadd.f32 %v1721_v28, %v1549_v39  ;;  %v1745_v43 = vadd.f32 %v1729_v22, %v1557_v40 }
  0xe3   : >> { %v637_v59 = vrot.slane %v9983_v4, %v10202_v60  ;;  %v721_v6 = vrot.slane %v14429_v19, %v10202_v60  ;;  %vm1817_vm2 = vcmp.eq.s32.totalorder %v10225_v18, %v1809_v5  ;;  %vm1825_vm3 = vcmp.eq.s32.totalorder %v10228_v61, %v1809_v5  ;;  %v14473_v4 = vld [vmem:[#allocation9_spill] sm:$0xff] (%p414_p11) }
  0xe4   : >> { %vm498_vm4 = vcmp.eq.s32.totalorder %v10225_v18, %v481_v2  ;;  %vm506_vm5 = vcmp.eq.s32.totalorder %v10228_v61, %v481_v2  ;;  %v1909_v44 = vsel %vm1817_vm2, %v1901_v21, 0.0  ;;  %v1917_v46 = vsel %vm1825_vm3, %v1901_v21, 0.0 }
  0xe5   : >> { %v590_v48 = vsel %vm498_vm4, %v573_v17, 0.0  ;;  %v598_v41 = vsel %vm506_vm5, %v573_v17, 0.0  ;;  %v1925_v14 = vadd.f32 %v1909_v44, %v1737_v20  ;;  %v1933_v1 = vadd.f32 %v1917_v46, %v1745_v43 }
  0xe6   : >> { %v669_v38 = vrot.slane %v637_v59, %v10202_v60  ;;  %v761_v34 = vrot.slane %v721_v6, %v10202_v60  ;;  %v825_v35 = vrot.slane %v14430_v52, %v10202_v60  ;;  %v909_v39 = vrot.slane %v14431_v47, %v10202_v60 }
  0xe7   : >> { %v1013_v40 = vrot.slane %v10049_v58, %v10202_v60  ;;  %v1097_v28 = vrot.slane %v14432_v24, %v10202_v60  ;;  %v8836_v22 = vpack.c.bf16 %v1933_v1, %v1925_v14  ;;  %v1201_v6 = vrot.slane %v10065_v54, %v10202_v60 }
  0xe8   : >> { %vm686_vm6 = vcmp.eq.s32.totalorder %v10225_v18, %v669_v38  ;;  %vm694_vm7 = vcmp.eq.s32.totalorder %v10228_v61, %v669_v38  ;;  %v857_v2 = vrot.slane %v825_v35, %v10202_v60  ;;  %v949_v17 = vrot.slane %v909_v39, %v10202_v60 }
  0xe9   : >> { %v778_v5 = vsel %vm686_vm6, %v761_v34, 0.0  ;;  %v786_v21 = vsel %vm694_vm7, %v761_v34, 0.0  ;;  %8837 = vmatprep.subr.bf16.mxu1 %v8836_v22  ;;  %v1045_v59 = vrot.slane %v1013_v40, %v10202_v60  ;;  %v1137_v44 = vrot.slane %v1097_v28, %v10202_v60 }
  0xea   : >> { %v794_v20 = vadd.f32 %v778_v5, %v590_v48  ;;  %v802_v43 = vadd.f32 %v786_v21, %v598_v41  ;;  %vm874_vm8 = vcmp.eq.s32.totalorder %v10225_v18, %v857_v2  ;;  %vm882_vm9 = vcmp.eq.s32.totalorder %v10228_v61, %v857_v2 }
  0xeb   : >> { %v1233_v46 = vrot.slane %v1201_v6, %v10202_v60  ;;  %v1285_v14 = vrot.slane %v10076_v11, %v10202_v60  ;;  %v966_v1 = vsel %vm874_vm8, %v949_v17, 0.0  ;;  %v974_v38 = vsel %vm882_vm9, %v949_v17, 0.0 }
  0xec   : >> { %vm1062_vm10 = vcmp.eq.s32.totalorder %v10225_v18, %v1045_v59  ;;  %vm1070_vm11 = vcmp.eq.s32.totalorder %v10228_v61, %v1045_v59  ;;  %v982_v48 = vadd.f32 %v966_v1, %v794_v20  ;;  %v990_v41 = vadd.f32 %v974_v38, %v802_v43 }
  0xed   : >> { %v1154_v34 = vsel %vm1062_vm10, %v1137_v44, 0.0  ;;  %v1162_v35 = vsel %vm1070_vm11, %v1137_v44, 0.0  ;;  %vm1250_vm12 = vcmp.eq.s32.totalorder %v10225_v18, %v1233_v46  ;;  %vm1258_vm13 = vcmp.eq.s32.totalorder %v10228_v61, %v1233_v46 }
  0xee   : >> { %v1325_v39 = vrot.slane %v1285_v14, %v10202_v60  ;;  %v1389_v40 = vrot.slane %v10101_v16, %v10202_v60  ;;  %v1170_v28 = vadd.f32 %v1154_v34, %v982_v48  ;;  %v1178_v22 = vadd.f32 %v1162_v35, %v990_v41 }
  0xef   : >> { %v1473_v6 = vrot.slane %v10096_v10, %v10202_v60  ;;  %v1577_v5 = vrot.slane %v10125_v15, %v10202_v60  ;;  %v1661_v20 = vrot.slane %v14433_v7, %v10202_v60  ;;  %v1765_v1 = vrot.slane %v14434_v12, %v10202_v60 }
  0xf0   : >> { %v1342_v21 = vsel %vm1250_vm12, %v1325_v39, 0.0  ;;  %v1350_v2 = vsel %vm1258_vm13, %v1325_v39, 0.0  ;;  %v1421_v17 = vrot.slane %v1389_v40, %v10202_v60  ;;  %v2244_v57 = vmul.f32 (%p414_p11), 6.0, %v14474_v49 }
  0xf1   : >> { %v1358_v43 = vadd.f32 %v1342_v21, %v1170_v28  ;;  %v1366_v59 = vadd.f32 %v1350_v2, %v1178_v22  ;;  %v1513_v44 = vrot.slane %v1473_v6, %v10202_v60  ;;  %v1609_v46 = vrot.slane %v1577_v5, %v10202_v60 }
  0xf2   : >> { %vm1438_vm15 = vcmp.eq.s32.totalorder %v10225_v18, %v1421_v17  ;;  %vm1446_vm0 = vcmp.eq.s32.totalorder %v10228_v61, %v1421_v17  ;;  %v1701_v14 = vrot.slane %v1661_v20, %v10202_v60  ;;  %v1797_v40 = vrot.slane %v1765_v1, %v10202_v60 }
  0xf3   : >> { %v1530_v38 = vsel %vm1438_vm15, %v1513_v44, 0.0  ;;  %v1538_v48 = vsel %vm1446_vm0, %v1513_v44, 0.0  ;;  %vm1626_vm1 = vcmp.eq.s32.totalorder %v10225_v18, %v1609_v46  ;;  %vm1634_vm2 = vcmp.eq.s32.totalorder %v10228_v61, %v1609_v46 }
  0xf4   : >> { %v1546_v41 = vadd.f32 %v1530_v38, %v1358_v43  ;;  %v1554_v34 = vadd.f32 %v1538_v48, %v1366_v59  ;;  %v1718_v35 = vsel %vm1626_vm1, %v1701_v14, 0.0  ;;  %v1726_v39 = vsel %vm1634_vm2, %v1701_v14, 0.0 }
  0xf5   : >> { %v1849_v28 = vrot.slane %v14435_v8, %v10202_v60  ;;  %v457_v22 = vrot.slane %v14436_v33, %v10202_v60  ;;  %v541_v6 = vrot.slane %v14437_v42, %v10202_v60  ;;  %v645_v2 = vrot.slane %v14439_v9, %v10202_v60 }
  0xf6   : >> { %v1734_v5 = vadd.f32 %v1718_v35, %v1546_v41  ;;  %v1742_v21 = vadd.f32 %v1726_v39, %v1554_v34  ;;  %v729_v17 = vrot.slane %v14440_v23, %v10202_v60  ;;  %vm1814_vm3 = vcmp.eq.s32.totalorder %v10225_v18, %v1797_v40 }
  0xf7   : >> { %vm1822_vm4 = vcmp.eq.s32.totalorder %v10228_v61, %v1797_v40  ;;  %v1889_v20 = vrot.slane %v1849_v28, %v10202_v60  ;;  %v489_v43 = vrot.slane %v457_v22, %v10202_v60  ;;  %v581_v59 = vrot.slane %v541_v6, %v10202_v60 }
  0xf8   : >> { %v677_v44 = vrot.slane %v645_v2, %v10202_v60  ;;  %v769_v46 = vrot.slane %v729_v17, %v10202_v60  ;;  %v833_v14 = vrot.slane %v14441_v30, %v10202_v60  ;;  %v917_v40 = vrot.slane %v14443_v45, %v10202_v60 }
  0xf9   : >> { %v1906_v1 = vsel %vm1814_vm3, %v1889_v20, 0.0  ;;  %v1914_v38 = vsel %vm1822_vm4, %v1889_v20, 0.0  ;;  %vm500_vm5 = vcmp.eq.s32.totalorder %v10225_v18, %v489_v43  ;;  %vm508_vm6 = vcmp.eq.s32.totalorder %v10228_v61, %v489_v43 }
  0xfa   : >> { %v1922_v48 = vadd.f32 %v1906_v1, %v1734_v5  ;;  %v1930_v41 = vadd.f32 %v1914_v38, %v1742_v21  ;;  %v592_v34 = vsel %vm500_vm5, %v581_v59, 0.0  ;;  %v600_v35 = vsel %vm508_vm6, %v581_v59, 0.0 }
  0xfb   : >> { %vm688_vm7 = vcmp.eq.s32.totalorder %v10225_v18, %v677_v44  ;;  %vm696_vm8 = vcmp.eq.s32.totalorder %v10228_v61, %v677_v44  ;;  %v865_v39 = vrot.slane %v833_v14, %v10202_v60  ;;  %v1021_v2 = vrot.slane %v14444_v55, %v10202_v60 }
  0xfc   : >> { %v8834_v28 = vpack.c.bf16 %v1930_v41, %v1922_v48  ;;  %v780_v22 = vsel %vm688_vm7, %v769_v46, 0.0  ;;  %v788_v6 = vsel %vm696_vm8, %v769_v46, 0.0  ;;  %v957_v21 = vrot.slane %v917_v40, %v10202_v60 }
  0xfd   : >> { %v796_v17 = vadd.f32 %v780_v22, %v592_v34  ;;  %v804_v5 = vadd.f32 %v788_v6, %v600_v35  ;;  %vm876_vm9 = vcmp.eq.s32.totalorder %v10225_v18, %v865_v39  ;;  %vm884_vm10 = vcmp.eq.s32.totalorder %v10228_v61, %v865_v39 }
  0xfe   : >> { %8835 = vmatpush1.bf16.msra.mxu0 %v8834_v28  ;;  %v1053_v20 = vrot.slane %v1021_v2, %v10202_v60  ;;  %v1105_v43 = vrot.slane %v14445_v0, %v10202_v60  ;;  %v1209_v59 = vrot.slane %v14446_v32, %v10202_v60  ;;  %v1293_v44 = vrot.slane %v14447_v27, %v10202_v60 }
  0xff   : >> { %v1397_v46 = vrot.slane %v14448_v13, %v10202_v60  ;;  %v1481_v14 = vrot.slane %v14450_v3, %v10202_v60  ;;  %v1585_v1 = vrot.slane %v14451_v26, %v10202_v60  ;;  %v968_v38 = vsel %vm876_vm9, %v957_v21, 0.0 }
 0x100   : >> { %v976_v48 = vsel %vm884_vm10, %v957_v21, 0.0  ;;  %vm1064_vm11 = vcmp.eq.s32.totalorder %v10225_v18, %v1053_v20  ;;  %vm1072_vm12 = vcmp.eq.s32.totalorder %v10228_v61, %v1053_v20  ;;  %v984_v41 = vadd.f32 %v968_v38, %v796_v17 }
 0x101   : >> { %v992_v34 = vadd.f32 %v976_v48, %v804_v5  ;;  %v1145_v35 = vrot.slane %v1105_v43, %v10202_v60  ;;  %v1241_v39 = vrot.slane %v1209_v59, %v10202_v60  ;;  %8795 = vmatmul.mubr.msk.f32.vlgmr.msra.gmra.mrb[2].mxu0 %vm1937_vm14, %v10451_v62  ;;  %v1333_v40 = vrot.slane %v1293_v44, %v10202_v60 }
 0x102   : >> { %v1429_v28 = vrot.slane %v1397_v46, %v10202_v60  ;;  %v1521_v22 = vrot.slane %v1481_v14, %v10202_v60  ;;  %v1617_v6 = vrot.slane %v1585_v1, %v10202_v60  ;;  %v1669_v1 = vrot.slane %v14452_v25, %v10202_v60 }
 0x103   : >> { %v1156_v2 = vsel %vm1064_vm11, %v1145_v35, 0.0  ;;  %v1164_v21 = vsel %vm1072_vm12, %v1145_v35, 0.0  ;;  %vm1252_vm13 = vcmp.eq.s32.totalorder %v10225_v18, %v1241_v39  ;;  %vm1260_vm15 = vcmp.eq.s32.totalorder %v10228_v61, %v1241_v39 }
 0x104   : >> { %v1172_v17 = vadd.f32 %v1156_v2, %v984_v41  ;;  %v1180_v5 = vadd.f32 %v1164_v21, %v992_v34  ;;  %v1344_v20 = vsel %vm1252_vm13, %v1333_v40, 0.0  ;;  %v1352_v43 = vsel %vm1260_vm15, %v1333_v40, 0.0 }
 0x105   : >> { %vm1440_vm0 = vcmp.eq.s32.totalorder %v10225_v18, %v1429_v28  ;;  %vm1448_vm1 = vcmp.eq.s32.totalorder %v10228_v61, %v1429_v28  ;;  %v1773_v38 = vrot.slane %v14453_v37, %v10202_v60  ;;  %v1857_v48 = vrot.slane %v14454_v36, %v10202_v60 }
 0x106   : >> { %v1360_v59 = vadd.f32 %v1344_v20, %v1172_v17  ;;  %v1368_v44 = vadd.f32 %v1352_v43, %v1180_v5  ;;  %v1532_v46 = vsel %vm1440_vm0, %v1521_v22, 0.0  ;;  %v1540_v14 = vsel %vm1448_vm1, %v1521_v22, 0.0 }
 0x107   : >> { %vm1628_vm2 = vcmp.eq.s32.totalorder %v10225_v18, %v1617_v6  ;;  %vm1636_vm3 = vcmp.eq.s32.totalorder %v10228_v61, %v1617_v6  ;;  %v1709_v35 = vrot.slane %v1669_v1, %v10202_v60  ;;  %v1805_v39 = vrot.slane %v1773_v38, %v10202_v60  ;;  %v14456_v1 = vld [vmem:[#allocation69_spill] sm:$0xff] }
 0x108   : >> { %v1548_v41 = vadd.f32 %v1532_v46, %v1360_v59  ;;  %v1556_v34 = vadd.f32 %v1540_v14, %v1368_v44  ;;  %v1897_v40 = vrot.slane %v1857_v48, %v10202_v60  ;;  %v14455_v44 = vld [vmem:[#allocation70_spill] sm:$0xff]  ;;  %v14457_v48 = vld [vmem:[#allocation68_spill] sm:$0xff]  ;;  %v2243_v23 = vmul.f32 (%p414_p11), 6.0, %v14473_v4 }
 0x109   : >> { %v1720_v28 = vsel %vm1628_vm2, %v1709_v35, 0.0  ;;  %v1728_v22 = vsel %vm1636_vm3, %v1709_v35, 0.0  ;;  %vm1816_vm4 = vcmp.eq.s32.totalorder %v10225_v18, %v1805_v39  ;;  %vm1824_vm5 = vcmp.eq.s32.totalorder %v10228_v61, %v1805_v39 }
 0x10a   : >> { %v1736_v2 = vadd.f32 %v1720_v28, %v1548_v41  ;;  %v1744_v21 = vadd.f32 %v1728_v22, %v1556_v34  ;;  %v1908_v17 = vsel %vm1816_vm4, %v1897_v40, 0.0  ;;  %v1916_v5 = vsel %vm1824_vm5, %v1897_v40, 0.0  ;;  %v14458_v41 = vld [vmem:[#allocation67_spill] sm:$0xff]  ;;  %v14459_v40 = vld [vmem:[#allocation66_spill] sm:$0xff]  ;;  %v14460_v22 = vld [vmem:[#allocation65_spill] sm:$0xff] }
 0x10b   : > { %v2247_v30 = vfloor.f32 (%p414_p11), %v2243_v23  ;;  %v2248_v54 = vfloor.f32 (%p414_p11), %v2244_v57  ;;  %v2251_v10 = vceil.f32 (%p414_p11), %v2243_v23  ;;  %v2252_v16 = vceil.f32 (%p414_p11), %v2244_v57 }
 0x10c   : >> { %v1924_v20 = vadd.f32 %v1908_v17, %v1736_v2  ;;  %v1932_v43 = vadd.f32 %v1916_v5, %v1744_v21 }
 0x10d   : > { %v8916_v56 = vtrunc.f32 (%p414_p11), %v2247_v30  ;;  %v8918_v51 = vtrunc.f32 (%p414_p11), %v2248_v54  ;;  %v8908_v19 = vtrunc.f32 (%p414_p11), %v2251_v10  ;;  %v8910_v52 = vtrunc.f32 (%p414_p11), %v2252_v16 }
 0x10e   : >> { %v8838_v59 = vpack.c.bf16 %v1932_v43, %v1924_v20  ;;  %v14462_v43 = vld [vmem:[#allocation63_spill] sm:$0xff]  ;;  %v10811_v45 = vsub.f32 (%p414_p11), %v2243_v23, %v2247_v30  ;;  %v10813_v55 = vsub.f32 (%p414_p11), %v2244_v57, %v2248_v54 }
 0x10f   : > { %v10803_v8 = vcvt.f32.s32 (%p414_p11), %v8908_v19  ;;  %v10805_v33 = vcvt.f32.s32 (%p414_p11), %v8910_v52  ;;  %v10815_v0 = vcvt.f32.s32 (%p414_p11), %v8916_v56  ;;  %v10817_v27 = vcvt.f32.s32 (%p414_p11), %v8918_v51 }
 0x110   : >> { %8839 = vmatpush1.bf16.msra.mxu1 %v8838_v59  ;;  %v10828_v37 = vsub.f32 (%p414_p11), 1.0, %v10811_v45  ;;  %v10831_v36 = vsub.f32 (%p414_p11), 1.0, %v10813_v55 }
 0x113   : >> { %8796 = vmatmul.mubr.msk.f32.vlgmr.msra.gmra.mrb[2].mxu1 %vm1937_vm14, %v10451_v62  ;;  %v14461_v62 = vld [vmem:[#allocation64_spill] sm:$0xff] }
 0x183   : >> { %v2007_v6 = vpop.f32.mrb[0].mxu0 }
 0x184   : >> { %v2225_v46 = vadd.f32 %v14455_v44, %v2007_v6   ;;  %v2009_v14 = vpop.f32.mrb[1].mxu0  ;;  %v14471_v44 = vld [vmem:[#allocation7_spill] sm:$0xff] (%p414_p11) }
 0x185   : >> { %v2226_v38 = vadd.f32 %v14456_v1, %v2009_v14   ;;  %v2241_v14 = vmul.f32 (%p414_p11), 6.0, %v14471_v44 }
 0x186   : > { %2233 = vst [vmem:[%s10154_s28] sm:$0x3] (%p414_p11), %v2225_v46 }
 0x187   : > { %2234 = vst [vmem:[%s10154_s28 + $0x8] sm:$0x3] (%p414_p11), %v2226_v38  ;;  %v2245_v58 = vfloor.f32 (%p414_p11), %v2241_v14  ;;  %v2249_v11 = vceil.f32 (%p414_p11), %v2241_v14 }
 0x189   : > { %v8912_v15 = vtrunc.f32 (%p414_p11), %v2245_v58  ;;  %v8904_v53 = vtrunc.f32 (%p414_p11), %v2249_v11  ;;  %v10807_v42 = vsub.f32 (%p414_p11), %v2241_v14, %v2245_v58  ;;  %v2313_v58 = vrot.slane (%p414_p11), %v10828_v37, 5 }
 0x18b   : > { %v10795_v47 = vcvt.f32.s32 (%p414_p11), %v8912_v15  ;;  %v10799_v7 = vcvt.f32.s32 (%p414_p11), %v8904_v53  ;;  %v10822_v26 = vsub.f32 (%p414_p11), 1.0, %v10807_v42  ;;  %v2314_v15 = vrot.slane (%p414_p11), %v2313_v58, 4 }
 0x18d   : > { %v2269_v13 = vmul.u32 (%p414_p11), 2654435761, %v10799_v7  ;;  %v2309_v49 = vrot.slane (%p414_p11), %v10822_v26, 5 }
 0x18f   : > { %v2310_v11 = vrot.slane (%p414_p11), %v2309_v49, 4  ;;  %v10879_v56 = vrot.slane (%p414_p11), %v2269_v13, 5 }
 0x191   : > { %v10884_v53 = vmul.f32 (%p414_p11), %v2310_v11, %v10807_v42  ;;  %v10890_v19 = vmul.f32 (%p414_p11), %v2310_v11, %v10822_v26 }
 0x198   : >> { %v2078_v18 = vpop.f32.mrb[0].mxu1 }
 0x199   : >> { %v2227_v35 = vadd.f32 %v14457_v48, %v2078_v18   ;;  %v2080_v61 = vpop.f32.mrb[1].mxu1  ;;  %v14472_v48 = vld [vmem:[#allocation8_spill] sm:$0xff] (%p414_p11) }
 0x19a   : >> { %v2228_v34 = vadd.f32 %v14458_v41, %v2080_v61   ;;  %v2242_v41 = vmul.f32 (%p414_p11), 6.0, %v14472_v48 }
 0x19b   : > { %2235 = vst [vmem:[%s10154_s28 + $0x10] sm:$0x3] (%p414_p11), %v2227_v35 }
 0x19c   : >> { %v14467_v61 = vmov %v2228_v34  ;;  %2236 = vst [vmem:[%s10154_s28 + $0x18] sm:$0x3] (%p414_p11), %v2228_v34  ;;  %v2246_v50 = vfloor.f32 (%p414_p11), %v2242_v41  ;;  %v2250_v63 = vceil.f32 (%p414_p11), %v2242_v41  ;;  %v2295_v34 = vrot.slane (%p414_p11), %v10813_v55, 5 }
 0x19d   : > { %v2293_v61 = vrot.slane (%p414_p11), %v10811_v45, 5 }
 0x19e   : > { %v8914_v32 = vtrunc.f32 (%p414_p11), %v2246_v50  ;;  %v8906_v31 = vtrunc.f32 (%p414_p11), %v2250_v63  ;;  %v10809_v9 = vsub.f32 (%p414_p11), %v2242_v41, %v2246_v50  ;;  %v2315_v50 = vrot.slane (%p414_p11), %v10831_v36, 5 }
 0x1a0   : > { %v10797_v24 = vcvt.f32.s32 (%p414_p11), %v8914_v32  ;;  %v10801_v12 = vcvt.f32.s32 (%p414_p11), %v8906_v31  ;;  %v10825_v25 = vsub.f32 (%p414_p11), 1.0, %v10809_v9  ;;  %v2316_v32 = vrot.slane (%p414_p11), %v2315_v50, 4 }
 0x1a2   : > { %v2270_v3 = vmul.u32 (%p414_p11), 2654435761, %v10801_v12  ;;  %v2311_v57 = vrot.slane (%p414_p11), %v10825_v25, 5  ;;  %v10899_v13 = vmul.f32 (%p414_p11), %v2316_v32, %v10813_v55 }
 0x1a4   : > { %v2312_v63 = vrot.slane (%p414_p11), %v2311_v57, 4  ;;  %v10881_v51 = vrot.slane (%p414_p11), %v2270_v3, 5  ;;  %v10902_v3 = vmul.f32 (%p414_p11), %v2314_v15, %v10828_v37 }
 0x1a6   : > { %v10887_v31 = vmul.f32 (%p414_p11), %v2312_v63, %v10809_v9  ;;  %v10893_v52 = vmul.f32 (%p414_p11), %v2312_v63, %v10825_v25 }
 0x1a8   : > { %14475 = vst [vmem:[#allocation11_spill] sm:$0xff] (%p414_p11), %v10893_v52 }
 0x1d4   : >> { %v2149_v39 = vpop.f32.mrb[2].mxu0 }
 0x1d5   : >> { %v2229_v2 = vadd.f32 %v14459_v40, %v2149_v39   ;;  %v2151_v28 = vpop.f32.mrb[3].mxu0  ;;  %v2275_v39 = vmul.u32 (%p414_p11), 2654435761, %v10815_v0 }
 0x1d6   : >> { %v2230_v5 = vadd.f32 %v14460_v22, %v2151_v28   ;;  %v14469_v22 = vmov %v2226_v38  ;;  %v14470_v28 = vmov %v2225_v46  ;;  %v2272_v46 = vmul.u32 (%p414_p11), 2654435761, %v10805_v33 }
 0x1d7   : >> { %v14466_v59 = vmov %v2229_v2  ;;  %2237 = vst [vmem:[%s10154_s28 + $0x20] sm:$0x3] (%p414_p11), %v2229_v2  ;;  %v2291_v38 = vrot.slane (%p414_p11), %v10809_v9, 5  ;;  %v2277_v22 = vmul.u32 (%p414_p11), 805459861, %v10799_v7 }
 0x1d8   : >> { %v14465_v18 = vmov %v2230_v5  ;;  %2238 = vst [vmem:[%s10154_s28 + $0x28] sm:$0x3] (%p414_p11), %v2230_v5  ;;  %v2271_v59 = vmul.u32 (%p414_p11), 2654435761, %v10803_v8  ;;  %v2278_v5 = vmul.u32 (%p414_p11), 805459861, %v10801_v12 }
 0x1d9   : > { %v2273_v18 = vmul.u32 (%p414_p11), 2654435761, %v10795_v47  ;;  %v2292_v28 = vrot.slane (%p414_p11), %v2291_v38, 4  ;;  %v10905_v38 = vmul.f32 (%p414_p11), %v2316_v32, %v10831_v36  ;;  %v2363_v32 = vrot.slane (%p414_p11), %v10809_v9, 6 }
 0x1db   : > { %v10871_v54 = vmul.f32 (%p414_p11), %v2292_v28, %v10825_v25 }
 0x1e4   : > { %416 = sbr.rel (!%p414_p11) target bundleno = 97 (0x61), region = 95 }
 0x1e6   : >> { %v2220_v21 = vpop.f32.mrb[2].mxu1 }
 0x1e7   : >> { %v2231_v20 = vadd.f32 %v14461_v62, %v2220_v21   ;;  %v2222_v17 = vpop.f32.mrb[3].mxu1  ;;  %v14468_v21 = vmov %v2227_v35  ;;  %v2274_v35 = vmul.u32 (%p414_p11), 2654435761, %v10797_v24  ;;  %v2296_v62 = vrot.slane (%p414_p11), %v2295_v34, 4 }
 0x1e8   : >> { %v2232_v6 = vadd.f32 %v14462_v43, %v2222_v17   ;;  %v2294_v21 = vrot.slane (%p414_p11), %v2293_v61, 4  ;;  %v14113_v61 = vrot.slane (%p414_p11), %v10879_v56, 4  ;;  %v14112_v34 = vrot.slane (%p414_p11), %v10881_v51, 4 }
 0x1e9   : >> { %v14464_v17 = vmov %v2231_v20  ;;  %2239 = vst [vmem:[%s10154_s28 + $0x30] sm:$0x3] (%p414_p11), %v2231_v20  ;;  %v2279_v20 = vmul.u32 (%p414_p11), 805459861, %v10803_v8  ;;  %v10859_v41 = vmul.f32 (%p414_p11), %v2296_v62, %v10813_v55  ;;  %v10877_v16 = vmul.f32 (%p414_p11), %v2296_v62, %v10831_v36 }
 0x1ea   : >> { %v14463_v1 = vmov %v2232_v6  ;;  %2240 = vst [vmem:[%s10154_s28 + $0x38] sm:$0x3] (%p414_p11), %v2232_v6  ;;  %v2280_v17 = vmul.u32 (%p414_p11), 805459861, %v10805_v33  ;;  %v10851_v6 = vmul.f32 (%p414_p11), %v2292_v28, %v10809_v9  ;;  %v10856_v48 = vmul.f32 (%p414_p11), %v2294_v21, %v10811_v45 }
 0x1eb   : > { %v2289_v1 = vrot.slane %v10807_v42, 5  ;;  %v10874_v10 = vmul.f32 %v2294_v21, %v10828_v37  ;;  %v10911_v28 = vrot.slane %v2272_v46, 5  ;;  %v2345_v21 = vrot.slane %v2277_v22, 6 }
 0x1ec   : > { %v2347_v62 = vrot.slane %v2278_v5, 6  ;;  %v2349_v49 = vrot.slane %v2279_v20, 6  ;;  %v2351_v57 = vrot.slane %v2280_v17, 6  ;;  %v10918_v11 = vxor.u32 %v10799_v7, %v14113_v61 }
 0x1ed   : > { %v2290_v2 = vrot.slane %v2289_v1, 4  ;;  %v10896_v1 = vmul.f32 %v2314_v15, %v10811_v45  ;;  %v14110_v50 = vrot.slane %v10911_v28, 4  ;;  %v10925_v46 = vrot.slane %v2345_v21, 4 }
 0x1ee   : > { %v10927_v22 = vrot.slane %v2347_v62, 4  ;;  %v10929_v5 = vrot.slane %v2349_v49, 4  ;;  %v10931_v20 = vrot.slane %v2351_v57, 4  ;;  %v2361_v15 = vrot.slane %v10807_v42, 6 }
 0x1ef   : > { %v10848_v43 = vmul.f32 %v2290_v2, %v10807_v42  ;;  %v10868_v30 = vmul.f32 %v2290_v2, %v10822_v26  ;;  %v10909_v2 = vrot.slane %v2271_v59, 5  ;;  %v10923_v59 = vxor.u32 %v10801_v12, %v14112_v34 }
 0x1f0   : > { %v10941_v63 = vxor.u32 %v10805_v33, %v14110_v50  ;;  %v2353_v21 = vxor.u32 %v10925_v46, %v10918_v11  ;;  %v2365_v49 = vrot.slane %v10811_v45, 6  ;;  %v2367_v57 = vrot.slane %v10813_v55, 6 }
 0x1f1   : > { %v14111_v58 = vrot.slane %v10909_v2, 4  ;;  %v2354_v62 = vxor.u32 %v10927_v22, %v10923_v59  ;;  %v2362_v14 = vrot.slane %v2361_v15, 4  ;;  %v2364_v42 = vrot.slane %v2363_v32, 4 }
 0x1f2   : > { %v2356_v4 = vxor.u32 %v10931_v20, %v10941_v63  ;;  %v10955_v44 = vand.u32 255, %v2353_v21  ;;  %v2366_v50 = vrot.slane %v2365_v49, 4  ;;  %v2377_v32 = vrot.slane %v2273_v18, 5 }
 0x1f3   : > { %v10936_v17 = vxor.u32 %v10803_v8, %v14111_v58  ;;  %v10957_v9 = vand.u32 255, %v2354_v62  ;;  %v2368_v58 = vrot.slane %v2367_v57, 4  ;;  %v10964_v45 = vmul.f32 %v2362_v14, %v10848_v43 }
 0x1f4   : > { %14476 = vst [vmem:[#allocation12_spill] sm:$0xff] %v10955_v44  ;;  %v10961_v61 = vand.u32 255, %v2356_v4  ;;  %v10967_v55 = vmul.f32 %v2364_v42, %v10851_v6  ;;  %v10970_v40 = vmul.f32 %v2366_v50, %v10856_v48  ;;  %v2381_v4 = vrot.slane %v2275_v39, 5 }
 0x1f5   : > { %v2355_v23 = vxor.u32 %v10929_v5, %v10936_v17  ;;  %14477 = vst [vmem:[#allocation13_spill] sm:$0xff] %v10957_v9  ;;  %14480 = vst [vmem:[#allocation16_spill] sm:$0xff] %v10964_v45  ;;  %v10973_v15 = vmul.f32 %v2368_v58, %v10859_v41  ;;  %v14484_v21 = vmul.u32 2654435761, %v10817_v27  ;;  %v10984_v49 = vmul.f32 %v2362_v14, %v10884_v53 }
 0x1f6   : > { %14479 = vst [vmem:[#allocation15_spill] sm:$0xff] %v10961_v61  ;;  %14481 = vst [vmem:[#allocation17_spill] sm:$0xff] %v10967_v55  ;;  %v10987_v57 = vmul.f32 %v2364_v42, %v10887_v31  ;;  %v2378_v61 = vrot.slane %v2377_v32, 4  ;;  %v10993_v18 = vmul.f32 %v2368_v58, %v10899_v13  ;;  %v10996_v39 = vmul.f32 %v2362_v14, %v10890_v19 }
 0x1f7   : > { %v10959_v34 = vand.u32 255, %v2355_v23  ;;  %14482 = vst [vmem:[#allocation18_spill] sm:$0xff] %v10970_v40  ;;  %14483 = vst [vmem:[#allocation19_spill] sm:$0xff] %v10973_v15  ;;  %v2379_v23 = vrot.slane %v2274_v35, 5  ;;  %v2383_v62 = vrot.slane %v14484_v21, 5  ;;  %v10990_v40 = vmul.f32 %v2366_v50, %v10896_v1 }
 0x1f8   : > { %14485 = vst [vmem:[#allocation20_spill] sm:$0xff] %v10984_v49  ;;  %14486 = vst [vmem:[#allocation21_spill] sm:$0xff] %v10987_v57  ;;  %v2382_v35 = vrot.slane %v2381_v4, 4  ;;  %v10999_v21 = vmul.f32 %v2364_v42, %v10893_v52  ;;  %v11002_v55 = vxor.u32 %v10799_v7, %v2378_v61  ;;  %v11058_v52 = vmul.f32 %v2366_v50, %v10902_v3 }
 0x1f9   : > { %14478 = vst [vmem:[#allocation14_spill] sm:$0xff] %v10959_v34  ;;  %v2380_v15 = vrot.slane %v2379_v23, 4  ;;  %14487 = vst [vmem:[#allocation22_spill] sm:$0xff] %v10990_v40  ;;  %v2384_v34 = vrot.slane %v2383_v62, 4  ;;  %v11008_v23 = vxor.u32 %v10795_v47, %v2378_v61 }
 0x1fa   : > { %14488 = vst [vmem:[#allocation23_spill] sm:$0xff] %v10993_v18  ;;  %14489 = vst [vmem:[#allocation24_spill] sm:$0xff] %v10996_v39  ;;  %v11014_v4 = vxor.u32 %v10803_v8, %v2382_v35  ;;  %v11020_v18 = vxor.u32 %v10815_v0, %v2382_v35 }
 0x1fb   : > { %14490 = vst [vmem:[#allocation25_spill] sm:$0xff] %v10999_v21  ;;  %v11005_v32 = vxor.u32 %v10801_v12, %v2380_v15  ;;  %v11011_v40 = vxor.u32 %v10797_v24, %v2380_v15  ;;  %v11017_v62 = vxor.u32 %v10805_v33, %v2384_v34  ;;  %v11023_v7 = vxor.u32 %v10817_v27, %v2384_v34 }
 0x1fc   : > { %v2389_v12 = vxor.u32 %v11002_v55, %v10925_v46  ;;  %v2405_v15 = vxor.u32 %v11008_v23, %v10925_v46  ;;  %v2391_v33 = vxor.u32 %v11014_v4, %v10929_v5  ;;  %v2407_v34 = vxor.u32 %v11020_v18, %v10929_v5  ;;  %14496 = vst [vmem:[#allocation31_spill] sm:$0xff] %v11058_v52 }
 0x1fd   : > { %v2390_v61 = vxor.u32 %v11005_v32, %v10927_v22  ;;  %v2406_v8 = vxor.u32 %v11011_v40, %v10927_v22  ;;  %v2392_v35 = vxor.u32 %v11017_v62, %v10931_v20  ;;  %v2408_v21 = vxor.u32 %v11023_v7, %v10931_v20 }
 0x1fe   : > { %v11041_v57 = vand.u32 255, %v2389_v12  ;;  %v11045_v60 = vand.u32 255, %v2405_v15  ;;  %v11049_v49 = vand.u32 255, %v2391_v33  ;;  %v11053_v44 = vand.u32 255, %v2407_v34 }
 0x1ff   : > { %v11043_v9 = vand.u32 255, %v2390_v61  ;;  %v11047_v39 = vand.u32 255, %v2406_v8  ;;  %v11051_v45 = vand.u32 255, %v2392_v35  ;;  %v11055_v29 = vand.u32 255, %v2408_v21 }
 0x200   : > { %14494 = vst [vmem:[#allocation29_spill] sm:$0xff] %v11053_v44  ;;  %v11061_v12 = vmul.f32 %v2368_v58, %v10905_v38  ;;  %v14498_v61 = vrot.slane %v10879_v56, 4  ;;  %v14499_v8 = vrot.slane %v10881_v51, 4  ;;  %v14500_v35 = vrot.slane %v10909_v2, 4 }
 0x201   : > { %14491 = vst [vmem:[#allocation26_spill] sm:$0xff] %v11043_v9  ;;  %14492 = vst [vmem:[#allocation27_spill] sm:$0xff] %v11047_v39  ;;  %v14501_v34 = vrot.slane %v10911_v28, 4  ;;  %v11084_v56 = vmul.f32 %v2362_v14, %v10868_v30  ;;  %v11097_v28 = vmul.f32 %v2368_v58, %v10877_v16 }
 0x202   : > { %14493 = vst [vmem:[#allocation28_spill] sm:$0xff] %v11051_v45  ;;  %14495 = vst [vmem:[#allocation30_spill] sm:$0xff] %v11055_v29  ;;  %v11066_v15 = vxor.u32 %v10795_v47, %v14498_v61  ;;  %v11071_v33 = vxor.u32 %v10797_v24, %v14499_v8  ;;  %v11076_v21 = vxor.u32 %v10815_v0, %v14500_v35 }
 0x203   : > { %14497 = vst [vmem:[#allocation32_spill] sm:$0xff] %v11061_v12  ;;  %v11081_v29 = vxor.u32 %v10817_v27, %v14501_v34  ;;  %v11087_v61 = vmul.f32 %v2364_v42, %v10871_v54  ;;  %v11094_v8 = vmul.f32 %v2366_v50, %v10874_v10  ;;  %14503 = vst [vmem:[#allocation34_spill] sm:$0xff] %v11097_v28  ;;  %v14504_v42 = vmul.u32 805459861, %v10795_v47 }
 0x204   : > { %v2421_v51 = vxor.u32 %v11066_v15, %v10925_v46  ;;  %v2422_v2 = vxor.u32 %v11071_v33, %v10927_v22  ;;  %v2423_v35 = vxor.u32 %v11076_v21, %v10929_v5  ;;  %v14505_v46 = vmul.u32 805459861, %v10797_v24 }
 0x205   : > { %14502 = vst [vmem:[#allocation33_spill] sm:$0xff] %v11094_v8  ;;  %v2424_v14 = vxor.u32 %v11081_v29, %v10931_v20  ;;  %v2433_v34 = vrot.slane %v14504_v42, 6  ;;  %v14507_v50 = vmul.u32 805459861, %v10815_v0  ;;  %v14508_v28 = vmul.u32 805459861, %v10817_v27 }
 0x206   : > { %v2435_v12 = vrot.slane %v14505_v46, 6  ;;  %v11107_v45 = vand.u32 255, %v2421_v51  ;;  %v11109_v22 = vand.u32 255, %v2422_v2  ;;  %v11115_v5 = vand.u32 255, %v2423_v35 }
 0x207   : > { %v2437_v58 = vrot.slane %v14507_v50, 6  ;;  %v2439_v8 = vrot.slane %v14508_v28, 6  ;;  %v11117_v52 = vand.u32 255, %v2424_v14  ;;  %v2434_v20 = vrot.slane %v2433_v34, 4 }
 0x208   : > { %14506 = vst [vmem:[#allocation35_spill] sm:$0xff] %v11109_v22  ;;  %v2436_v47 = vrot.slane %v2435_v12, 4  ;;  %v2449_v24 = vrot.slane %v10822_v26, 6  ;;  %v2451_v51 = vrot.slane %v10825_v25, 6  ;;  %v2453_v46 = vrot.slane %v10828_v37, 6 }
 0x209   : > { %14509 = vst [vmem:[#allocation36_spill] sm:$0xff] %v11117_v52  ;;  %v2438_v42 = vrot.slane %v2437_v58, 4  ;;  %v2440_v44 = vrot.slane %v2439_v8, 4  ;;  %v2441_v2 = vxor.u32 %v2434_v20, %v10918_v11  ;;  %v2455_v27 = vrot.slane %v10831_v36, 6 }
 0x20a   : > { %v2442_v0 = vxor.u32 %v2436_v47, %v10923_v59  ;;  %v2450_v14 = vrot.slane %v2449_v24, 4  ;;  %v2452_v12 = vrot.slane %v2451_v51, 4  ;;  %v2454_v26 = vrot.slane %v2453_v46, 4 }
 0x20b   : > { %v2443_v28 = vxor.u32 %v2438_v42, %v10936_v17  ;;  %v2444_v35 = vxor.u32 %v2440_v44, %v10941_v63  ;;  %v11127_v34 = vand.u32 255, %v2441_v2  ;;  %v2456_v25 = vrot.slane %v2455_v27, 4 }
 0x20c   : > { %v11129_v8 = vand.u32 255, %v2442_v0  ;;  %v11136_v37 = vmul.f32 %v2450_v14, %v10848_v43  ;;  %v11139_v36 = vmul.f32 %v2452_v12, %v10851_v6  ;;  %v11142_v59 = vmul.f32 %v2454_v26, %v10856_v48 }
 0x20d   : > { %14510 = vst [vmem:[#allocation37_spill] sm:$0xff] %v11127_v34  ;;  %v11131_v50 = vand.u32 255, %v2443_v28  ;;  %v11133_v11 = vand.u32 255, %v2444_v35  ;;  %v11145_v17 = vmul.f32 %v2456_v25, %v10859_v41  ;;  %v2465_v63 = vxor.u32 %v2434_v20, %v11002_v55 }
 0x20e   : > { %14511 = vst [vmem:[#allocation38_spill] sm:$0xff] %v11129_v8  ;;  %14513 = vst [vmem:[#allocation40_spill] sm:$0xff] %v11136_v37  ;;  %v2466_v58 = vxor.u32 %v2436_v47, %v11005_v32  ;;  %v2467_v24 = vxor.u32 %v2438_v42, %v11014_v4  ;;  %v2468_v51 = vxor.u32 %v2440_v44, %v11017_v62 }
 0x20f   : > { %14512 = vst [vmem:[#allocation39_spill] sm:$0xff] %v11133_v11  ;;  %14514 = vst [vmem:[#allocation41_spill] sm:$0xff] %v11139_v36  ;;  %v11152_v43 = vmul.f32 %v2450_v14, %v10884_v53  ;;  %v11155_v6 = vmul.f32 %v2452_v12, %v10887_v31  ;;  %v11157_v2 = vand.u32 255, %v2465_v63  ;;  %v11162_v41 = vmul.f32 %v2454_v26, %v10896_v1  ;;  %v14520_v1 = vld [vmem:[#allocation11_spill] sm:$0xff] }
 0x210   : > { %14515 = vst [vmem:[#allocation42_spill] sm:$0xff] %v11145_v17  ;;  %v11159_v48 = vand.u32 255, %v2466_v58  ;;  %v11165_v55 = vmul.f32 %v2456_v25, %v10899_v13  ;;  %v11167_v32 = vand.u32 255, %v2467_v24  ;;  %v11169_v4 = vand.u32 255, %v2468_v51 }
 0x211   : > { %14516 = vst [vmem:[#allocation43_spill] sm:$0xff] %v11155_v6  ;;  %14517 = vst [vmem:[#allocation44_spill] sm:$0xff] %v11157_v2  ;;  %v2477_v53 = vxor.u32 %v2434_v20, %v11008_v23  ;;  %v2478_v62 = vxor.u32 %v2436_v47, %v11011_v40  ;;  %v2479_v31 = vxor.u32 %v2438_v42, %v11020_v18 }
 0x212   : > { %14518 = vst [vmem:[#allocation45_spill] sm:$0xff] %v11165_v55  ;;  %14519 = vst [vmem:[#allocation46_spill] sm:$0xff] %v11169_v4  ;;  %v2480_v0 = vxor.u32 %v2440_v44, %v11023_v7  ;;  %v11176_v46 = vmul.f32 %v2450_v14, %v10890_v19  ;;  %v11179_v27 = vmul.f32 %v2452_v12, %v14520_v1 }
 0x213   : > { %v11181_v13 = vand.u32 255, %v2477_v53  ;;  %v11183_v28 = vand.u32 255, %v2478_v62  ;;  %v11186_v35 = vmul.f32 %v2454_v26, %v10902_v3  ;;  %v11189_v23 = vmul.f32 %v2456_v25, %v10905_v38 }
 0x214   : > { %14521 = vst [vmem:[#allocation47_spill] sm:$0xff] %v11179_v27  ;;  %v11191_v40 = vand.u32 255, %v2479_v31  ;;  %v11193_v18 = vand.u32 255, %v2480_v0  ;;  %v2489_v19 = vxor.u32 %v2434_v20, %v11066_v15  ;;  %v2490_v7 = vxor.u32 %v2436_v47, %v11071_v33 }
 0x215   : > { %14522 = vst [vmem:[#allocation48_spill] sm:$0xff] %v11181_v13  ;;  %14523 = vst [vmem:[#allocation49_spill] sm:$0xff] %v11183_v28  ;;  %v2491_v63 = vxor.u32 %v2438_v42, %v11076_v21  ;;  %v2492_v58 = vxor.u32 %v2440_v44, %v11081_v29  ;;  %v11200_v24 = vmul.f32 %v2450_v14, %v10868_v30  ;;  %v11219_v29 = vmov 0.0  }
 0x216   : > { %14524 = vst [vmem:[#allocation50_spill] sm:$0xff] %v11186_v35  ;;  %14525 = vst [vmem:[#allocation51_spill] sm:$0xff] %v11189_v23  ;;  %v11203_v3 = vmul.f32 %v2452_v12, %v10871_v54  ;;  %v11205_v38 = vand.u32 255, %v2489_v19  ;;  %v11207_v51 = vand.u32 255, %v2490_v7  ;;  %v11210_v53 = vmul.f32 %v2454_v26, %v10874_v10 }
 0x217   : > { %14526 = vst [vmem:[#allocation52_spill] sm:$0xff] %v11193_v18  ;;  %14527 = vst [vmem:[#allocation53_spill] sm:$0xff] %v11200_v24  ;;  %v11213_v15 = vmul.f32 %v2456_v25, %v10877_v16  ;;  %v11215_v33 = vand.u32 255, %v2491_v63  ;;  %v11217_v21 = vand.u32 255, %v2492_v58  ;;  %v11221_v44 = vmov 0.0  }
 0x218   : > { %14528 = vst [vmem:[#allocation54_spill] sm:$0xff] %v11203_v3  ;;  %14529 = vst [vmem:[#allocation55_spill] sm:$0xff] %v11205_v38  ;;  %v11223_v30 = vmov 0.0   ;;  %v11225_v54 = vmov 0.0   ;;  %v11227_v20 = vmov 0.0   ;;  %v11229_v47 = vmov 0.0  }
 0x219   : > { %14530 = vst [vmem:[#allocation56_spill] sm:$0xff] %v11210_v53  ;;  %14531 = vst [vmem:[#allocation57_spill] sm:$0xff] %v11213_v15  ;;  %v11231_v10 = vmov 0.0   ;;  %v11233_v16 = vmov 0.0  }
 0x21a   : > { %14532 = vst [vmem:[#allocation58_spill] sm:$0xff] %v11215_v33  ;;  %14533 = vst [vmem:[#allocation59_spill] sm:$0xff] %v11217_v21 }
 0x21b LB: >> { %v14534_v39 = vld [vmem:[#allocation27_spill] sm:$0xff]  ;;  %v14536_v37 = vld [vmem:[#allocation40_spill] sm:$0xff]  ;;  %v14537_v36 = vld [vmem:[#allocation41_spill] sm:$0xff]  ;;  %14549 = vst [vmem:[#allocation73_spill] sm:$0xff] %v9529_v29  ;;  %s8797_s8 = sshll.u32 %s9561_s7, 4  ;;  %s8798_s14 = sshll.u32 %s9561_s7, 1  ;;  %v9549_v47 = vphi %v11229_v47, %v14619_v47   ;;  %v9545_v20 = vphi %v11227_v20, %v14618_v20   ;;  %v9541_v54 = vphi %v11225_v54, %v14617_v54   ;;  %v9537_v30 = vphi %v11223_v30, %v14616_v30   ;;  %v9533_v44 = vphi %v11221_v44, %v14615_v44   ;;  %v9529_v29 = vphi %v11219_v29, %v14614_v29   ;;  %s9561_s7 = sphi %s11235_s7, %s2506_s7   ;;  %v9557_v16 = vphi %v11233_v16, %v14621_v16   ;;  %v9553_v10 = vphi %v11231_v10, %v14620_v10  }
 0x21c   : >> { %v14538_v34 = vld [vmem:[#allocation37_spill] sm:$0xff]  ;;  %v14540_v27 = vld [vmem:[#allocation47_spill] sm:$0xff]  ;;  %v14543_v13 = vld [vmem:[#allocation48_spill] sm:$0xff]  ;;  %14550 = vst [vmem:[#allocation74_spill] sm:$0xff] %v9533_v44  ;;  %s8631_s22 = scalar_lea.vmem %s14036_s1, %s8798_s14  ;;  %s2506_s7 = sadd.s32 1, %s9561_s7  }
 0x21d   : >> { %v14539_v28 = vld [vmem:[#allocation49_spill] sm:$0xff]  ;;  %v14542_v22 = vld [vmem:[#allocation35_spill] sm:$0xff]  ;;  %v14544_v9 = vld [vmem:[#allocation26_spill] sm:$0xff]  ;;  %14551 = vst [vmem:[#allocation75_spill] sm:$0xff] %v9537_v30  ;;  %p2503_p12 = scmp.ge.s32.totalorder %s2506_s7, 16  }
 0x21e   : >> { %v14541_v24 = vld [vmem:[#allocation53_spill] sm:$0xff]  ;;  %v14545_v8 = vld [vmem:[#allocation38_spill] sm:$0xff]  ;;  %v14546_v6 = vld [vmem:[#allocation43_spill] sm:$0xff]  ;;  %14552 = vst [vmem:[#allocation76_spill] sm:$0xff] %v9541_v54  ;;  %s12300_s23 = smov (%p2503_p12), 0  }
 0x21f   : >> { %v14535_v38 = vld [vmem:[#allocation55_spill] sm:$0xff]  ;;  %v14547_v3 = vld [vmem:[#allocation54_spill] sm:$0xff]  ;;  %v14548_v2 = vld [vmem:[#allocation44_spill] sm:$0xff]  ;;  %14553 = vst [vmem:[#allocation77_spill] sm:$0xff] %v9545_v20 }
 0x220   : >> { %14554 = vst [vmem:[#allocation78_spill] sm:$0xff] %v9549_v47  ;;  %14555 = vst [vmem:[#allocation79_spill] sm:$0xff] %v9553_v10  ;;  %v14557_v42 = vld [vmem:[#allocation72_spill] sm:$0xff]  ;;  %v14562_v29 = vld [vmem:[#allocation71_spill] sm:$0xff]  ;;  %v2516_v47 = vstv %s8797_s8 }
 0x221   : >> { %14556 = vst [vmem:[#allocation80_spill] sm:$0xff] %v9557_v16  ;;  %v14558_v14 = vld [vmem:[#allocation12_spill] sm:$0xff]  ;;  %v2714_v62 = vrot.slane %v11041_v57, %v14557_v42  ;;  %v2902_v1 = vrot.slane %v11045_v60, %v14557_v42  ;;  %v3090_v63 = vrot.slane %v11107_v45, %v14557_v42  ;;  %v3174_v58 = vrot.slane %v11084_v56, %v14557_v42  ;;  %v14563_v21 = vld [vmem:[#allocation5_spill] sm:$0xff]  ;;  %v14564_v18 = vld [vmem:[#allocation6_spill] sm:$0xff] }
 0x222   : >> { %v2526_v12 = vrot.slane %v14558_v14, %v14557_v42  ;;  %v14559_v26 = vld [vmem:[#allocation16_spill] sm:$0xff]  ;;  %v11289_v23 = vadd.s32 %v2516_v47, %v14563_v21  ;;  %v11292_v55 = vadd.s32 %v2516_v47, %v14564_v18  ;;  %v3654_v21 = vrot.slane %v14543_v13, %v14557_v42 }
 0x223   : >> { %v2610_v25 = vrot.slane %v14559_v26, %v14557_v42  ;;  %v14560_v31 = vld [vmem:[#allocation20_spill] sm:$0xff]  ;;  %v2746_v54 = vrot.slane %v2714_v62, %v14562_v29  ;;  %v2934_v10 = vrot.slane %v2902_v1, %v14562_v29  ;;  %v3122_v15 = vrot.slane %v3090_v63, %v14562_v29 }
 0x224   : >> { %v2798_v0 = vrot.slane %v14560_v31, %v14557_v42  ;;  %v14561_v19 = vld [vmem:[#allocation24_spill] sm:$0xff]  ;;  %v2558_v44 = vrot.slane %v2526_v12, %v14562_v29  ;;  %v3214_v12 = vrot.slane %v3174_v58, %v14562_v29  ;;  %v3362_v62 = vrot.slane %v14536_v37, %v14557_v42 }
 0x225   : >> { %v2986_v7 = vrot.slane %v14561_v19, %v14557_v42  ;;  %v2650_v30 = vrot.slane %v2610_v25, %v14562_v29  ;;  %v3278_v25 = vrot.slane %v14538_v34, %v14557_v42  ;;  %v3550_v1 = vrot.slane %v11152_v43, %v14557_v42 }
 0x226   : >> { %v2838_v20 = vrot.slane %v2798_v0, %v14562_v29  ;;  %v3466_v0 = vrot.slane %v14548_v2, %v14557_v42  ;;  %vm2584_vm6 = vcmp.eq.s32.totalorder %v11289_v23, %v2558_v44  ;;  %vm2592_vm7 = vcmp.eq.s32.totalorder %v11292_v55, %v2558_v44 }
 0x227   : >> { %v3026_v16 = vrot.slane %v2986_v7, %v14562_v29  ;;  %vm2772_vm8 = vcmp.eq.s32.totalorder %v11289_v23, %v2746_v54  ;;  %vm2780_vm9 = vcmp.eq.s32.totalorder %v11292_v55, %v2746_v54  ;;  %v2676_v18 = vsel %vm2584_vm6, %v2650_v30, 0.0 }
 0x228   : >> { %v2684_v47 = vsel %vm2592_vm7, %v2650_v30, 0.0  ;;  %v2864_v7 = vsel %vm2772_vm8, %v2838_v20, 0.0  ;;  %v2872_v63 = vsel %vm2780_vm9, %v2838_v20, 0.0  ;;  %vm2960_vm10 = vcmp.eq.s32.totalorder %v11289_v23, %v2934_v10 }
 0x229   : >> { %v2880_v58 = vadd.f32 %v2864_v7, %v2676_v18  ;;  %v2888_v4 = vadd.f32 %v2872_v63, %v2684_v47  ;;  %vm2968_vm11 = vcmp.eq.s32.totalorder %v11292_v55, %v2934_v10  ;;  %v3052_v17 = vsel %vm2960_vm10, %v3026_v16, 0.0 }
 0x22a   : >> { %v3060_v11 = vsel %vm2968_vm11, %v3026_v16, 0.0  ;;  %vm3148_vm12 = vcmp.eq.s32.totalorder %v11289_v23, %v3122_v15  ;;  %vm3156_vm13 = vcmp.eq.s32.totalorder %v11292_v55, %v3122_v15  ;;  %v3310_v30 = vrot.slane %v3278_v25, %v14562_v29 }
 0x22b   : >> { %v3068_v44 = vadd.f32 %v3052_v17, %v2880_v58  ;;  %v3076_v52 = vadd.f32 %v3060_v11, %v2888_v4  ;;  %v3240_v53 = vsel %vm3148_vm12, %v3214_v12, 0.0  ;;  %v3248_v54 = vsel %vm3156_vm13, %v3214_v12, 0.0 }
 0x22c   : >> { %v3402_v20 = vrot.slane %v3362_v62, %v14562_v29  ;;  %v3498_v18 = vrot.slane %v3466_v0, %v14562_v29  ;;  %v3590_v47 = vrot.slane %v3550_v1, %v14562_v29  ;;  %v3686_v16 = vrot.slane %v3654_v21, %v14562_v29  ;;  %v14565_v0 = vld [vmem:[#allocation13_spill] sm:$0xff] }
 0x22d   : >> { %v3256_v7 = vadd.f32 %v3240_v53, %v3068_v44  ;;  %v3264_v10 = vadd.f32 %v3248_v54, %v3076_v52  ;;  %v3738_v63 = vrot.slane %v11176_v46, %v14557_v42  ;;  %vm3336_vm15 = vcmp.eq.s32.totalorder %v11289_v23, %v3310_v30  ;;  %v14566_v44 = vld [vmem:[#allocation17_spill] sm:$0xff] }
 0x22e   : >> { %vm3344_vm0 = vcmp.eq.s32.totalorder %v11292_v55, %v3310_v30  ;;  %vm3524_vm1 = vcmp.eq.s32.totalorder %v11289_v23, %v3498_v18  ;;  %vm3532_vm2 = vcmp.eq.s32.totalorder %v11292_v55, %v3498_v18  ;;  %v3428_v11 = vsel %vm3336_vm15, %v3402_v20, 0.0 }
 0x22f   : >> { %v3436_v17 = vsel %vm3344_vm0, %v3402_v20, 0.0  ;;  %v3616_v4 = vsel %vm3524_vm1, %v3590_v47, 0.0  ;;  %v3624_v15 = vsel %vm3532_vm2, %v3590_v47, 0.0  ;;  %v3444_v12 = vadd.f32 %v3428_v11, %v3256_v7 }
 0x230   : >> { %v3452_v53 = vadd.f32 %v3436_v17, %v3264_v10  ;;  %vm3712_vm3 = vcmp.eq.s32.totalorder %v11289_v23, %v3686_v16  ;;  %vm3720_vm4 = vcmp.eq.s32.totalorder %v11292_v55, %v3686_v16  ;;  %v3778_v52 = vrot.slane %v3738_v63, %v14562_v29 }
 0x231   : >> { %v3842_v25 = vrot.slane %v14535_v38, %v14557_v42  ;;  %v3926_v62 = vrot.slane %v14541_v24, %v14557_v42  ;;  %v2534_v1 = vrot.slane %v14565_v0, %v14557_v42  ;;  %v3632_v21 = vadd.f32 %v3616_v4, %v3444_v12 }
 0x232   : >> { %v3640_v58 = vadd.f32 %v3624_v15, %v3452_v53  ;;  %v14567_v18 = vmov %v14566_v44  ;;  %v2618_v54 = vrot.slane %v14566_v44, %v14557_v42  ;;  %v2722_v30 = vrot.slane %v14544_v9, %v14557_v42  ;;  %v14568_v15 = vld [vmem:[#allocation21_spill] sm:$0xff] }
 0x233   : >> { %v3804_v20 = vsel %vm3712_vm3, %v3778_v52, 0.0  ;;  %v3812_v47 = vsel %vm3720_vm4, %v3778_v52, 0.0  ;;  %v3874_v7 = vrot.slane %v3842_v25, %v14562_v29  ;;  %v3966_v10 = vrot.slane %v3926_v62, %v14562_v29 }
 0x234   : >> { %v3820_v16 = vadd.f32 %v3804_v20, %v3632_v21  ;;  %v3828_v63 = vadd.f32 %v3812_v47, %v3640_v58  ;;  %v2566_v11 = vrot.slane %v2534_v1, %v14562_v29  ;;  %v2658_v17 = vrot.slane %v2618_v54, %v14562_v29 }
 0x235   : >> { %vm3900_vm5 = vcmp.eq.s32.totalorder %v11289_v23, %v3874_v7  ;;  %vm3908_vm6 = vcmp.eq.s32.totalorder %v11292_v55, %v3874_v7  ;;  %v2754_v4 = vrot.slane %v2722_v30, %v14562_v29  ;;  %v2806_v12 = vrot.slane %v14568_v15, %v14557_v42  ;;  %v14569_v30 = vld [vmem:[#allocation25_spill] sm:$0xff] }
 0x236   : >> { %v3992_v53 = vsel %vm3900_vm5, %v3966_v10, 0.0  ;;  %v4000_v52 = vsel %vm3908_vm6, %v3966_v10, 0.0  ;;  %vm2586_vm7 = vcmp.eq.s32.totalorder %v11289_v23, %v2566_v11  ;;  %vm2594_vm8 = vcmp.eq.s32.totalorder %v11292_v55, %v2566_v11 }
 0x237   : >> { %v4008_v25 = vadd.f32 %v3992_v53, %v3820_v16  ;;  %v4016_v62 = vadd.f32 %v4000_v52, %v3828_v63  ;;  %v2678_v1 = vsel %vm2586_vm7, %v2658_v17, 0.0  ;;  %v2686_v21 = vsel %vm2594_vm8, %v2658_v17, 0.0 }
 0x238   : >> { %vm2774_vm9 = vcmp.eq.s32.totalorder %v11289_v23, %v2754_v4  ;;  %vm2782_vm10 = vcmp.eq.s32.totalorder %v11292_v55, %v2754_v4  ;;  %v2846_v58 = vrot.slane %v2806_v12, %v14562_v29  ;;  %v2910_v44 = vrot.slane %v14534_v39, %v14557_v42 }
 0x239   : >> { %v8840_v54 = vpack.c.bf16 %v4016_v62, %v4008_v25  ;;  %v14570_v7 = vmov %v14569_v30  ;;  %v2994_v20 = vrot.slane %v14569_v30, %v14557_v42  ;;  %v3098_v47 = vrot.slane %v14542_v22, %v14557_v42 }
 0x23a   : >> { %v3182_v10 = vrot.slane %v11087_v61, %v14557_v42  ;;  %v2866_v16 = vsel %vm2774_vm9, %v2846_v58, 0.0  ;;  %v2874_v63 = vsel %vm2782_vm10, %v2846_v58, 0.0  ;;  %v2942_v11 = vrot.slane %v2910_v44, %v14562_v29 }
 0x23b   : >> { %v3286_v17 = vrot.slane %v14545_v8, %v14557_v42  ;;  %8841 = vmatprep.subr.bf16.mxu0 %v8840_v54  ;;  %v2882_v4 = vadd.f32 %v2866_v16, %v2678_v1  ;;  %v2890_v12 = vadd.f32 %v2874_v63, %v2686_v21  ;;  %v3034_v53 = vrot.slane %v2994_v20, %v14562_v29 }
 0x23c   : >> { %v3130_v52 = vrot.slane %v3098_v47, %v14562_v29  ;;  %vm2962_vm11 = vcmp.eq.s32.totalorder %v11289_v23, %v2942_v11  ;;  %vm2970_vm12 = vcmp.eq.s32.totalorder %v11292_v55, %v2942_v11  ;;  %v3222_v25 = vrot.slane %v3182_v10, %v14562_v29 }
 0x23d   : >> { %v3318_v62 = vrot.slane %v3286_v17, %v14562_v29  ;;  %v3054_v58 = vsel %vm2962_vm11, %v3034_v53, 0.0  ;;  %v3062_v44 = vsel %vm2970_vm12, %v3034_v53, 0.0  ;;  %v3370_v20 = vrot.slane %v14537_v36, %v14557_v42 }
 0x23e   : >> { %vm3150_vm13 = vcmp.eq.s32.totalorder %v11289_v23, %v3130_v52  ;;  %vm3158_vm15 = vcmp.eq.s32.totalorder %v11292_v55, %v3130_v52  ;;  %v3070_v1 = vadd.f32 %v3054_v58, %v2882_v4  ;;  %v3078_v21 = vadd.f32 %v3062_v44, %v2890_v12 }
 0x23f   : >> { %v3242_v54 = vsel %vm3150_vm13, %v3222_v25, 0.0  ;;  %v3250_v30 = vsel %vm3158_vm15, %v3222_v25, 0.0  ;;  %vm3338_vm0 = vcmp.eq.s32.totalorder %v11289_v23, %v3318_v62  ;;  %vm3346_vm1 = vcmp.eq.s32.totalorder %v11292_v55, %v3318_v62 }
 0x240   : >> { %v3474_v47 = vrot.slane %v11159_v48, %v14557_v42  ;;  %v3258_v10 = vadd.f32 %v3242_v54, %v3070_v1  ;;  %v3266_v16 = vadd.f32 %v3250_v30, %v3078_v21  ;;  %v3558_v63 = vrot.slane %v14546_v6, %v14557_v42 }
 0x241   : >> { %v3662_v11 = vrot.slane %v14539_v28, %v14557_v42  ;;  %v3410_v17 = vrot.slane %v3370_v20, %v14562_v29  ;;  %v3746_v12 = vrot.slane %v14540_v27, %v14557_v42  ;;  %v3850_v53 = vrot.slane %v11207_v51, %v14557_v42 }
 0x242   : >> { %v3506_v4 = vrot.slane %v3474_v47, %v14562_v29  ;;  %v3598_v52 = vrot.slane %v3558_v63, %v14562_v29  ;;  %v3934_v58 = vrot.slane %v14547_v3, %v14557_v42  ;;  %v2522_v44 = vrot.slane %v14558_v14, %v14562_v29 }
 0x243   : >> { %v3694_v25 = vrot.slane %v3662_v11, %v14562_v29  ;;  %v3430_v1 = vsel %vm3338_vm0, %v3410_v17, 0.0  ;;  %v3438_v21 = vsel %vm3346_vm1, %v3410_v17, 0.0  ;;  %v3786_v63 = vrot.slane %v3746_v12, %v14562_v29 }
 0x244   : >> { %vm3526_vm2 = vcmp.eq.s32.totalorder %v11289_v23, %v3506_v4  ;;  %vm3534_vm3 = vcmp.eq.s32.totalorder %v11292_v55, %v3506_v4  ;;  %v3446_v54 = vadd.f32 %v3430_v1, %v3258_v10  ;;  %v3454_v30 = vadd.f32 %v3438_v21, %v3266_v16 }
 0x245   : >> { %v3618_v20 = vsel %vm3526_vm2, %v3598_v52, 0.0  ;;  %v3626_v47 = vsel %vm3534_vm3, %v3598_v52, 0.0  ;;  %vm3714_vm4 = vcmp.eq.s32.totalorder %v11289_v23, %v3694_v25  ;;  %vm3722_vm5 = vcmp.eq.s32.totalorder %v11292_v55, %v3694_v25 }
 0x246   : >> { %v3882_v11 = vrot.slane %v3850_v53, %v14562_v29  ;;  %v3634_v14 = vadd.f32 %v3618_v20, %v3446_v54  ;;  %v3642_v33 = vadd.f32 %v3626_v47, %v3454_v30  ;;  %v3974_v62 = vrot.slane %v3934_v58, %v14562_v29 }
 0x247   : >> { %v2554_v17 = vrot.slane %v2522_v44, %v14562_v29  ;;  %v3806_v35 = vsel %vm3714_vm4, %v3786_v63, 0.0  ;;  %v3814_v4 = vsel %vm3722_vm5, %v3786_v63, 0.0  ;;  %v2606_v12 = vrot.slane %v14559_v26, %v14562_v29 }
 0x248   : >> { %vm3902_vm6 = vcmp.eq.s32.totalorder %v11289_v23, %v3882_v11  ;;  %vm3910_vm7 = vcmp.eq.s32.totalorder %v11292_v55, %v3882_v11  ;;  %v3822_v10 = vadd.f32 %v3806_v35, %v3634_v14  ;;  %v3830_v16 = vadd.f32 %v3814_v4, %v3642_v33 }
 0x249   : >> { %v3994_v52 = vsel %vm3902_vm6, %v3974_v62, 0.0  ;;  %v4002_v25 = vsel %vm3910_vm7, %v3974_v62, 0.0  ;;  %vm2583_vm8 = vcmp.eq.s32.totalorder %v11289_v23, %v2554_v17  ;;  %vm2591_vm9 = vcmp.eq.s32.totalorder %v11292_v55, %v2554_v17 }
 0x24a   : >> { %v2710_v53 = vrot.slane %v11041_v57, %v14562_v29  ;;  %v4010_v58 = vadd.f32 %v3994_v52, %v3822_v10  ;;  %v4018_v44 = vadd.f32 %v4002_v25, %v3830_v16  ;;  %v2794_v1 = vrot.slane %v14560_v31, %v14562_v29  ;;  %v14624_v57 = vld [vmem:[#allocation9_spill] sm:$0xff] (%p2503_p12) }
 0x24b   : >> { %v2898_v35 = vrot.slane %v11045_v60, %v14562_v29  ;;  %v2646_v33 = vrot.slane %v2606_v12, %v14562_v29  ;;  %v2982_v21 = vrot.slane %v14561_v19, %v14562_v29  ;;  %v3086_v54 = vrot.slane %v11107_v45, %v14562_v29  ;;  %v14622_v60 = vld [vmem:[#allocation7_spill] sm:$0xff] (%p2503_p12)  ;;  %v14623_v45 = vld [vmem:[#allocation8_spill] sm:$0xff] (%p2503_p12) }
 0x24c   : >> { %v2742_v14 = vrot.slane %v2710_v53, %v14562_v29  ;;  %v8844_v30 = vpack.c.bf16 %v4018_v44, %v4010_v58  ;;  %v2834_v20 = vrot.slane %v2794_v1, %v14562_v29  ;;  %v3170_v63 = vrot.slane %v11084_v56, %v14562_v29 }
 0x24d   : >> { %v2930_v47 = vrot.slane %v2898_v35, %v14562_v29  ;;  %v2675_v11 = vsel %vm2583_vm8, %v2646_v33, 0.0  ;;  %v2683_v62 = vsel %vm2591_vm9, %v2646_v33, 0.0  ;;  %v3022_v25 = vrot.slane %v2982_v21, %v14562_v29 }
 0x24e   : >> { %vm2771_vm10 = vcmp.eq.s32.totalorder %v11289_v23, %v2742_v14  ;;  %vm2779_vm11 = vcmp.eq.s32.totalorder %v11292_v55, %v2742_v14  ;;  %8845 = vmatprep.subr.bf16.mxu1 %v8844_v30  ;;  %v3118_v12 = vrot.slane %v3086_v54, %v14562_v29  ;;  %v3210_v17 = vrot.slane %v3170_v63, %v14562_v29 }
 0x24f   : >> { %v2863_v4 = vsel %vm2771_vm10, %v2834_v20, 0.0  ;;  %v2871_v10 = vsel %vm2779_vm11, %v2834_v20, 0.0  ;;  %vm2959_vm12 = vcmp.eq.s32.totalorder %v11289_v23, %v2930_v47  ;;  %vm2967_vm13 = vcmp.eq.s32.totalorder %v11292_v55, %v2930_v47 }
 0x250   : >> { %v2879_v16 = vadd.f32 %v2863_v4, %v2675_v11  ;;  %v2887_v52 = vadd.f32 %v2871_v10, %v2683_v62  ;;  %v3274_v53 = vrot.slane %v14538_v34, %v14562_v29  ;;  %v3358_v58 = vrot.slane %v14536_v37, %v14562_v29  ;;  %v14603_v37 = vld [vmem:[#allocation51_spill] sm:$0xff] }
 0x251   : >> { %v3462_v44 = vrot.slane %v14548_v2, %v14562_v29  ;;  %v3051_v1 = vsel %vm2959_vm12, %v3022_v25, 0.0  ;;  %v3059_v35 = vsel %vm2967_vm13, %v3022_v25, 0.0  ;;  %vm3147_vm15 = vcmp.eq.s32.totalorder %v11289_v23, %v3118_v12 }
 0x252   : >> { %vm3155_vm0 = vcmp.eq.s32.totalorder %v11292_v55, %v3118_v12  ;;  %v3067_v33 = vadd.f32 %v3051_v1, %v2879_v16  ;;  %v3075_v14 = vadd.f32 %v3059_v35, %v2887_v52  ;;  %v3239_v21 = vsel %vm3147_vm15, %v3210_v17, 0.0 }
 0x253   : >> { %v3247_v54 = vsel %vm3155_vm0, %v3210_v17, 0.0  ;;  %v3306_v30 = vrot.slane %v3274_v53, %v14562_v29  ;;  %v3398_v20 = vrot.slane %v3358_v58, %v14562_v29  ;;  %v3494_v47 = vrot.slane %v3462_v44, %v14562_v29 }
 0x254   : >> { %v3546_v63 = vrot.slane %v11152_v43, %v14562_v29  ;;  %v3255_v11 = vadd.f32 %v3239_v21, %v3067_v33  ;;  %v3263_v62 = vadd.f32 %v3247_v54, %v3075_v14  ;;  %v3650_v4 = vrot.slane %v14543_v13, %v14562_v29 }
 0x255   : >> { %v3734_v10 = vrot.slane %v11176_v46, %v14562_v29  ;;  %vm3335_vm1 = vcmp.eq.s32.totalorder %v11289_v23, %v3306_v30  ;;  %vm3343_vm2 = vcmp.eq.s32.totalorder %v11292_v55, %v3306_v30  ;;  %vm3523_vm3 = vcmp.eq.s32.totalorder %v11289_v23, %v3494_v47 }
 0x256   : >> { %vm3531_vm4 = vcmp.eq.s32.totalorder %v11292_v55, %v3494_v47  ;;  %v3427_v16 = vsel %vm3335_vm1, %v3398_v20, 0.0  ;;  %v3435_v52 = vsel %vm3343_vm2, %v3398_v20, 0.0  ;;  %v3586_v25 = vrot.slane %v3546_v63, %v14562_v29 }
 0x257   : >> { %v3682_v12 = vrot.slane %v3650_v4, %v14562_v29  ;;  %v3443_v17 = vadd.f32 %v3427_v16, %v3255_v11  ;;  %v3451_v53 = vadd.f32 %v3435_v52, %v3263_v62  ;;  %v3774_v58 = vrot.slane %v3734_v10, %v14562_v29 }
 0x258   : >> { %v3838_v44 = vrot.slane %v14535_v38, %v14562_v29  ;;  %v3615_v1 = vsel %vm3523_vm3, %v3586_v25, 0.0  ;;  %v3623_v35 = vsel %vm3531_vm4, %v3586_v25, 0.0  ;;  %v3922_v20 = vrot.slane %v14541_v24, %v14562_v29  ;;  %v14594_v24 = vld [vmem:[#allocation36_spill] sm:$0xff] }
 0x259   : >> { %vm3711_vm5 = vcmp.eq.s32.totalorder %v11289_v23, %v3682_v12  ;;  %vm3719_vm6 = vcmp.eq.s32.totalorder %v11292_v55, %v3682_v12  ;;  %v3631_v33 = vadd.f32 %v3615_v1, %v3443_v17  ;;  %v3639_v14 = vadd.f32 %v3623_v35, %v3451_v53 }
 0x25a   : >> { %v3803_v21 = vsel %vm3711_vm5, %v3774_v58, 0.0  ;;  %v3811_v54 = vsel %vm3719_vm6, %v3774_v58, 0.0  ;;  %v3870_v30 = vrot.slane %v3838_v44, %v14562_v29  ;;  %v2530_v47 = vrot.slane %v14565_v0, %v14562_v29 }
 0x25b   : >> { %v2614_v63 = vrot.slane %v14567_v18, %v14562_v29  ;;  %v3819_v11 = vadd.f32 %v3803_v21, %v3631_v33  ;;  %v3827_v62 = vadd.f32 %v3811_v54, %v3639_v14  ;;  %v2718_v4 = vrot.slane %v14544_v9, %v14562_v29  ;;  %v14585_v9 = vld [vmem:[#allocation15_spill] sm:$0xff] }
 0x25c   : >> { %v2802_v10 = vrot.slane %v14568_v15, %v14562_v29  ;;  %vm3899_vm7 = vcmp.eq.s32.totalorder %v11289_v23, %v3870_v30  ;;  %vm3907_vm8 = vcmp.eq.s32.totalorder %v11292_v55, %v3870_v30  ;;  %v3962_v16 = vrot.slane %v3922_v20, %v14562_v29 }
 0x25d   : >> { %v2562_v52 = vrot.slane %v2530_v47, %v14562_v29  ;;  %v2654_v25 = vrot.slane %v2614_v63, %v14562_v29  ;;  %v2750_v12 = vrot.slane %v2718_v4, %v14562_v29  ;;  %v2906_v53 = vrot.slane %v14534_v39, %v14562_v29 }
 0x25e   : >> { %v2842_v17 = vrot.slane %v2802_v10, %v14562_v29  ;;  %v3991_v58 = vsel %vm3899_vm7, %v3962_v16, 0.0  ;;  %v3999_v44 = vsel %vm3907_vm8, %v3962_v16, 0.0  ;;  %v2990_v54 = vrot.slane %v14570_v7, %v14562_v29 }
 0x25f   : >> { %vm2585_vm9 = vcmp.eq.s32.totalorder %v11289_v23, %v2562_v52  ;;  %vm2593_vm10 = vcmp.eq.s32.totalorder %v11292_v55, %v2562_v52  ;;  %v4007_v1 = vadd.f32 %v3991_v58, %v3819_v11  ;;  %v4015_v35 = vadd.f32 %v3999_v44, %v3827_v62 }
 0x260   : >> { %v2677_v33 = vsel %vm2585_vm9, %v2654_v25, 0.0  ;;  %v2685_v14 = vsel %vm2593_vm10, %v2654_v25, 0.0  ;;  %vm2773_vm11 = vcmp.eq.s32.totalorder %v11289_v23, %v2750_v12  ;;  %vm2781_vm12 = vcmp.eq.s32.totalorder %v11292_v55, %v2750_v12 }
 0x261   : >> { %v2938_v21 = vrot.slane %v2906_v53, %v14562_v29  ;;  %v8842_v30 = vpack.c.bf16 %v4015_v35, %v4007_v1  ;;  %v2865_v20 = vsel %vm2773_vm11, %v2842_v17, 0.0  ;;  %v2873_v47 = vsel %vm2781_vm12, %v2842_v17, 0.0 }
 0x262   : >> { %v3094_v63 = vrot.slane %v14542_v22, %v14562_v29  ;;  %v2881_v4 = vadd.f32 %v2865_v20, %v2677_v33  ;;  %v2889_v11 = vadd.f32 %v2873_v47, %v2685_v14  ;;  %v3030_v62 = vrot.slane %v2990_v54, %v14562_v29 }
 0x263   : >> { %vm2961_vm13 = vcmp.eq.s32.totalorder %v11289_v23, %v2938_v21  ;;  %vm2969_vm15 = vcmp.eq.s32.totalorder %v11292_v55, %v2938_v21  ;;  %8843 = vmatpush1.bf16.msra.mxu0 %v8842_v30  ;;  %v3178_v16 = vrot.slane %v11087_v61, %v14562_v29  ;;  %v3282_v52 = vrot.slane %v14545_v8, %v14562_v29  ;;  %v14625_v61 = vld [vmem:[#allocation10_spill] sm:$0xff] (%p2503_p12) }
 0x264   : >> { %v3126_v10 = vrot.slane %v3094_v63, %v14562_v29  ;;  %v3366_v25 = vrot.slane %v14537_v36, %v14562_v29  ;;  %v3470_v12 = vrot.slane %v11159_v48, %v14562_v29  ;;  %v3554_v17 = vrot.slane %v14546_v6, %v14562_v29 }
 0x265   : >> { %v3658_v53 = vrot.slane %v14539_v28, %v14562_v29  ;;  %v3053_v58 = vsel %vm2961_vm13, %v3030_v62, 0.0  ;;  %v3061_v44 = vsel %vm2969_vm15, %v3030_v62, 0.0  ;;  %v3218_v33 = vrot.slane %v3178_v16, %v14562_v29 }
 0x266   : >> { %vm3149_vm0 = vcmp.eq.s32.totalorder %v11289_v23, %v3126_v10  ;;  %vm3157_vm1 = vcmp.eq.s32.totalorder %v11292_v55, %v3126_v10  ;;  %v3069_v1 = vadd.f32 %v3053_v58, %v2881_v4  ;;  %v3077_v35 = vadd.f32 %v3061_v44, %v2889_v11 }
 0x267   : >> { %v3314_v14 = vrot.slane %v3282_v52, %v14562_v29  ;;  %v3406_v21 = vrot.slane %v3366_v25, %v14562_v29  ;;  %v3502_v54 = vrot.slane %v3470_v12, %v14562_v29  ;;  %v3594_v30 = vrot.slane %v3554_v17, %v14562_v29  ;;  %v11528_v17 = vld [vmem:[%s8631_s22 + $0x20] sm:$0x3] }
 0x268   : >> { %v3690_v20 = vrot.slane %v3658_v53, %v14562_v29  ;;  %v3241_v47 = vsel %vm3149_vm0, %v3218_v33, 0.0  ;;  %v3249_v63 = vsel %vm3157_vm1, %v3218_v33, 0.0  ;;  %v3742_v53 = vrot.slane %v14540_v27, %v14562_v29 }
 0x269   : >> { %vm3337_vm2 = vcmp.eq.s32.totalorder %v11289_v23, %v3314_v14  ;;  %vm3345_vm3 = vcmp.eq.s32.totalorder %v11292_v55, %v3314_v14  ;;  %v3257_v4 = vadd.f32 %v3241_v47, %v3069_v1  ;;  %v3265_v11 = vadd.f32 %v3249_v63, %v3077_v35  ;;  %v14571_v14 = vld [vmem:[#allocation14_spill] sm:$0xff] }
 0x26a   : >> { %v3429_v62 = vsel %vm3337_vm2, %v3406_v21, 0.0  ;;  %v3437_v10 = vsel %vm3345_vm3, %v3406_v21, 0.0  ;;  %vm3525_vm4 = vcmp.eq.s32.totalorder %v11289_v23, %v3502_v54  ;;  %vm3533_vm5 = vcmp.eq.s32.totalorder %v11292_v55, %v3502_v54  ;;  %v14572_v63 = vld [vmem:[#allocation18_spill] sm:$0xff] }
 0x26b   : >> { %vm3713_vm6 = vcmp.eq.s32.totalorder %v11289_v23, %v3690_v20  ;;  %vm3721_vm7 = vcmp.eq.s32.totalorder %v11292_v55, %v3690_v20  ;;  %v3445_v16 = vadd.f32 %v3429_v62, %v3257_v4  ;;  %v3453_v52 = vadd.f32 %v3437_v10, %v3265_v11  ;;  %v14573_v10 = vld [vmem:[#allocation22_spill] sm:$0xff] }
 0x26c   : >> { %v3617_v25 = vsel %vm3525_vm4, %v3594_v30, 0.0  ;;  %v3625_v12 = vsel %vm3533_vm5, %v3594_v30, 0.0  ;;  %v3846_v58 = vrot.slane %v11207_v51, %v14562_v29  ;;  %v3930_v44 = vrot.slane %v14547_v3, %v14562_v29 }
 0x26d   : >> { %v3633_v1 = vadd.f32 %v3617_v25, %v3445_v16  ;;  %v3641_v35 = vadd.f32 %v3625_v12, %v3453_v52  ;;  %v14159_v33 = vmov 0.0   ;;  %v2542_v21 = vrot.slane %v14571_v14, %v14557_v42  ;;  %v14575_v25 = vld [vmem:[#allocation29_spill] sm:$0xff] }
 0x26e   : >> { %4095 = vmatprep.mubr.f32.mxu0 %v14159_v33  ;;  %4166 = vmatprep.mubr.f32.mxu1 %v14159_v33  ;;  %v3782_v54 = vrot.slane %v3742_v53, %v14562_v29  ;;  %v3878_v30 = vrot.slane %v3846_v58, %v14562_v29  ;;  %v3970_v47 = vrot.slane %v3930_v44, %v14562_v29  ;;  %v4357_v56 = vmul.f32 (%p2503_p12), 10.0, %v14624_v57 }
 0x26f   : >> { %8800 = vmatmul.mubr.msk.f32.vlgmr.msra.gmra.mrb[0].mxu0 %vm1937_vm14, %v11528_v17  ;;  %v2626_v4 = vrot.slane %v14572_v63, %v14557_v42  ;;  %v2574_v11 = vrot.slane %v2542_v21, %v14562_v29  ;;  %v2730_v62 = vrot.slane %v11049_v49, %v14557_v42  ;;  %v14574_v52 = vmov %v14573_v10 }
 0x270   : >> { %v2814_v16 = vrot.slane %v14573_v10, %v14557_v42  ;;  %v2918_v12 = vrot.slane %v14575_v25, %v14557_v42  ;;  %4237 = vmatprep.mubr.f32.mxu0 %v14159_v33  ;;  %v3805_v53 = vsel %vm3713_vm6, %v3782_v54, 0.0  ;;  %v3813_v58 = vsel %vm3721_vm7, %v3782_v54, 0.0 }
 0x271   : >> { %vm3901_vm8 = vcmp.eq.s32.totalorder %v11289_v23, %v3878_v30  ;;  %vm3909_vm9 = vcmp.eq.s32.totalorder %v11292_v55, %v3878_v30  ;;  %v3821_v44 = vadd.f32 %v3805_v53, %v3633_v1  ;;  %v3829_v21 = vadd.f32 %v3813_v58, %v3641_v35 }
 0x272   : >> { %v3993_v0 = vsel %vm3901_vm8, %v3970_v47, 0.0  ;;  %v4001_v2 = vsel %vm3909_vm9, %v3970_v47, 0.0  ;;  %vm2588_vm10 = vcmp.eq.s32.totalorder %v11289_v23, %v2574_v11  ;;  %vm2596_vm11 = vcmp.eq.s32.totalorder %v11292_v55, %v2574_v11 }
 0x273   : >> { %v2666_v10 = vrot.slane %v2626_v4, %v14562_v29  ;;  %v2762_v33 = vrot.slane %v2730_v62, %v14562_v29  ;;  %v4009_v3 = vadd.f32 %v3993_v0, %v3821_v44  ;;  %v4017_v6 = vadd.f32 %v4001_v2, %v3829_v21  ;;  %v14576_v2 = vld [vmem:[#allocation31_spill] sm:$0xff] }
 0x274   : >> { %v2854_v20 = vrot.slane %v2814_v16, %v14562_v29  ;;  %v2950_v54 = vrot.slane %v2918_v12, %v14562_v29  ;;  %v3002_v0 = vrot.slane %v14576_v2, %v14557_v42  ;;  %v3106_v62 = vrot.slane %v11115_v5, %v14557_v42  ;;  %v14577_v16 = vld [vmem:[#allocation33_spill] sm:$0xff] }
 0x275   : >> { %v2680_v7 = vsel %vm2588_vm10, %v2666_v10, 0.0  ;;  %v2688_v30 = vsel %vm2596_vm11, %v2666_v10, 0.0  ;;  %vm2776_vm12 = vcmp.eq.s32.totalorder %v11289_v23, %v2762_v33  ;;  %vm2784_vm13 = vcmp.eq.s32.totalorder %v11292_v55, %v2762_v33 }
 0x276   : >> { %v8846_v1 = vpack.c.bf16 %v4017_v6, %v4009_v3  ;;  %v2868_v35 = vsel %vm2776_vm12, %v2854_v20, 0.0  ;;  %v2876_v47 = vsel %vm2784_vm13, %v2854_v20, 0.0  ;;  %vm2964_vm15 = vcmp.eq.s32.totalorder %v11289_v23, %v2950_v54 }
 0x277   : >> { %v2884_v4 = vadd.f32 %v2868_v35, %v2680_v7  ;;  %v2892_v11 = vadd.f32 %v2876_v47, %v2688_v30  ;;  %vm2972_vm0 = vcmp.eq.s32.totalorder %v11292_v55, %v2950_v54  ;;  %v14578_v12 = vmov %v14577_v16 }
 0x278   : >> { %8847 = vmatpush1.bf16.msra.mxu1 %v8846_v1  ;;  %v3190_v53 = vrot.slane %v14577_v16, %v14557_v42  ;;  %v3294_v6 = vrot.slane %v11131_v50, %v14557_v42  ;;  %v3378_v3 = vrot.slane %v11142_v59, %v14557_v42  ;;  %v3042_v7 = vrot.slane %v3002_v0, %v14562_v29 }
 0x279   : >> { %v3482_v33 = vrot.slane %v11167_v32, %v14557_v42  ;;  %v3566_v58 = vrot.slane %v11162_v41, %v14557_v42  ;;  %v3670_v44 = vrot.slane %v11191_v40, %v14557_v42  ;;  %v3138_v21 = vrot.slane %v3106_v62, %v14562_v29 }
 0x27a   : >> { %v3230_v10 = vrot.slane %v3190_v53, %v14562_v29  ;;  %v3326_v20 = vrot.slane %v3294_v6, %v14562_v29  ;;  %v3418_v30 = vrot.slane %v3378_v3, %v14562_v29  ;;  %v3056_v1 = vsel %vm2964_vm15, %v3042_v7, 0.0 }
 0x27b   : >> { %8801 = vmatmul.mubr.msk.f32.vlgmr.msra.gmra.mrb[0].mxu1 %vm1937_vm14, %v11528_v17  ;;  %v3064_v35 = vsel %vm2972_vm0, %v3042_v7, 0.0  ;;  %v3514_v47 = vrot.slane %v3482_v33, %v14562_v29  ;;  %v3606_v0 = vrot.slane %v3566_v58, %v14562_v29  ;;  %v3072_v62 = vadd.f32 %v3056_v1, %v2884_v4 }
 0x27c   : >> { %v3080_v16 = vadd.f32 %v3064_v35, %v2892_v11  ;;  %vm3152_vm1 = vcmp.eq.s32.totalorder %v11289_v23, %v3138_v21  ;;  %vm3160_vm2 = vcmp.eq.s32.totalorder %v11292_v55, %v3138_v21  ;;  %v14579_v53 = vmov 0.0   ;;  %v14580_v11 = vld [vmem:[#allocation50_spill] sm:$0xff] }
 0x27d   : >> { %4308 = vmatprep.mubr.f32.mxu1 %v14579_v53  ;;  %v3244_v6 = vsel %vm3152_vm1, %v3230_v10, 0.0  ;;  %v3252_v3 = vsel %vm3160_vm2, %v3230_v10, 0.0  ;;  %vm3340_vm3 = vcmp.eq.s32.totalorder %v11289_v23, %v3326_v20  ;;  %vm3348_vm4 = vcmp.eq.s32.totalorder %v11292_v55, %v3326_v20 }
 0x27e   : >> { %v3260_v54 = vadd.f32 %v3244_v6, %v3072_v62  ;;  %v3268_v7 = vadd.f32 %v3252_v3, %v3080_v16  ;;  %v3432_v8 = vsel %vm3340_vm3, %v3418_v30, 0.0  ;;  %v3440_v33 = vsel %vm3348_vm4, %v3418_v30, 0.0  ;;  %v14581_v30 = vld [vmem:[#allocation58_spill] sm:$0xff] }
 0x27f   : >> { %vm3528_vm5 = vcmp.eq.s32.totalorder %v11289_v23, %v3514_v47  ;;  %vm3536_vm6 = vcmp.eq.s32.totalorder %v11292_v55, %v3514_v47  ;;  %v3702_v4 = vrot.slane %v3670_v44, %v14562_v29  ;;  %v3754_v58 = vrot.slane %v14580_v11, %v14557_v42  ;;  %v14583_v44 = vld [vmem:[#allocation56_spill] sm:$0xff] }
 0x280   : >> { %v3448_v21 = vadd.f32 %v3432_v8, %v3260_v54  ;;  %v3456_v1 = vadd.f32 %v3440_v33, %v3268_v7  ;;  %v3620_v10 = vsel %vm3528_vm5, %v3606_v0, 0.0  ;;  %v3628_v35 = vsel %vm3536_vm6, %v3606_v0, 0.0  ;;  %v14586_v33 = vld [vmem:[#allocation19_spill] sm:$0xff] }
 0x281   : >> { %vm3716_vm7 = vcmp.eq.s32.totalorder %v11289_v23, %v3702_v4  ;;  %vm3724_vm8 = vcmp.eq.s32.totalorder %v11292_v55, %v3702_v4  ;;  %v3794_v20 = vrot.slane %v3754_v58, %v14562_v29  ;;  %v14582_v62 = vmov %v14581_v30 }
 0x282   : >> { %v3858_v16 = vrot.slane %v14581_v30, %v14557_v42  ;;  %v3636_v53 = vadd.f32 %v3620_v10, %v3448_v21  ;;  %v3644_v47 = vadd.f32 %v3628_v35, %v3456_v1  ;;  %v14584_v6 = vmov %v14583_v44  ;;  %v14587_v10 = vld [vmem:[#allocation28_spill] sm:$0xff] }
 0x283   : >> { %v3942_v3 = vrot.slane %v14583_v44, %v14557_v42  ;;  %v2550_v8 = vrot.slane %v14585_v9, %v14557_v42  ;;  %v3808_v54 = vsel %vm3716_vm7, %v3794_v20, 0.0  ;;  %v3816_v7 = vsel %vm3724_vm8, %v3794_v20, 0.0 }
 0x284   : >> { %v3890_v0 = vrot.slane %v3858_v16, %v14562_v29  ;;  %v2634_v4 = vrot.slane %v14586_v33, %v14557_v42  ;;  %v3824_v13 = vadd.f32 %v3808_v54, %v3636_v53  ;;  %v3832_v58 = vadd.f32 %v3816_v7, %v3644_v47  ;;  %v14589_v54 = vld [vmem:[#allocation23_spill] sm:$0xff] }
 0x285   : >> { %v3982_v15 = vrot.slane %v3942_v3, %v14562_v29  ;;  %v2582_v21 = vrot.slane %v2550_v8, %v14562_v29  ;;  %v14588_v35 = vmov %v14587_v10  ;;  %v2738_v20 = vrot.slane %v14587_v10, %v14557_v42  ;;  %v14592_v10 = vld [vmem:[#allocation32_spill] sm:$0xff] }
 0x286   : >> { %vm3904_vm9 = vcmp.eq.s32.totalorder %v11289_v23, %v3890_v0  ;;  %vm3912_vm10 = vcmp.eq.s32.totalorder %v11292_v55, %v3890_v0  ;;  %v2674_v1 = vrot.slane %v2634_v4, %v14562_v29  ;;  %v14590_v7 = vmov %v14589_v54  ;;  %v14591_v4 = vld [vmem:[#allocation30_spill] sm:$0xff] }
 0x287   : >> { %v3996_v30 = vsel %vm3904_vm9, %v3982_v15, 0.0  ;;  %v4004_v16 = vsel %vm3912_vm10, %v3982_v15, 0.0  ;;  %vm2590_vm11 = vcmp.eq.s32.totalorder %v11289_v23, %v2582_v21  ;;  %vm2598_vm12 = vcmp.eq.s32.totalorder %v11292_v55, %v2582_v21  ;;  %v14596_v21 = vld [vmem:[#allocation39_spill] sm:$0xff] }
 0x288   : >> { %v4012_v53 = vadd.f32 %v3996_v30, %v3824_v13  ;;  %v4020_v47 = vadd.f32 %v4004_v16, %v3832_v58  ;;  %v2682_v44 = vsel %vm2590_vm11, %v2674_v1, 0.0  ;;  %v2690_v3 = vsel %vm2598_vm12, %v2674_v1, 0.0  ;;  %v14595_v13 = vld [vmem:[#allocation34_spill] sm:$0xff] }
 0x289   : >> { %v2770_v8 = vrot.slane %v2738_v20, %v14562_v29  ;;  %v2822_v0 = vrot.slane %v14589_v54, %v14557_v42  ;;  %v2926_v18 = vrot.slane %v14591_v4, %v14557_v42  ;;  %v14593_v19 = vmov %v14592_v10 }
 0x28a   : >> { %v3010_v22 = vrot.slane %v14592_v10, %v14557_v42  ;;  %v8848_v15 = vpack.c.bf16 %v4020_v47, %v4012_v53  ;;  %v3114_v26 = vrot.slane %v14594_v24, %v14557_v42  ;;  %v3198_v58 = vrot.slane %v14595_v13, %v14557_v42 }
 0x28b   : >> { %v3302_v1 = vrot.slane %v14596_v21, %v14557_v42  ;;  %vm2778_vm13 = vcmp.eq.s32.totalorder %v11289_v23, %v2770_v8  ;;  %vm2786_vm15 = vcmp.eq.s32.totalorder %v11292_v55, %v2770_v8  ;;  %v2862_v20 = vrot.slane %v2822_v0, %v14562_v29 }
 0x28c   : >> { %v2958_v30 = vrot.slane %v2926_v18, %v14562_v29  ;;  %8849 = vmatprep.subr.bf16.mxu0 %v8848_v15  ;;  %v3050_v16 = vrot.slane %v3010_v22, %v14562_v29  ;;  %v3146_v53 = vrot.slane %v3114_v26, %v14562_v29  ;;  %v3238_v47 = vrot.slane %v3198_v58, %v14562_v29  ;;  %v14597_v58 = vld [vmem:[#allocation42_spill] sm:$0xff] }
 0x28d   : >> { %v3334_v54 = vrot.slane %v3302_v1, %v14562_v29  ;;  %v2870_v10 = vsel %vm2778_vm13, %v2862_v20, 0.0  ;;  %v2878_v27 = vsel %vm2786_vm15, %v2862_v20, 0.0  ;;  %v3386_v1 = vrot.slane %v14597_v58, %v14557_v42 }
 0x28e   : >> { %vm2966_vm0 = vcmp.eq.s32.totalorder %v11289_v23, %v2958_v30  ;;  %vm2974_vm1 = vcmp.eq.s32.totalorder %v11292_v55, %v2958_v30  ;;  %v2886_v8 = vadd.f32 %v2870_v10, %v2682_v44  ;;  %v2894_v28 = vadd.f32 %v2878_v27, %v2690_v3  ;;  %v14598_v44 = vld [vmem:[#allocation46_spill] sm:$0xff]  ;;  %v14600_v3 = vld [vmem:[#allocation45_spill] sm:$0xff]  ;;  %v14601_v30 = vld [vmem:[#allocation52_spill] sm:$0xff] }
 0x28f   : >> { %v3058_v0 = vsel %vm2966_vm0, %v3050_v16, 0.0  ;;  %v3066_v31 = vsel %vm2974_vm1, %v3050_v16, 0.0  ;;  %vm3154_vm2 = vcmp.eq.s32.totalorder %v11289_v23, %v3146_v53  ;;  %vm3162_vm3 = vcmp.eq.s32.totalorder %v11292_v55, %v3146_v53 }
 0x290   : >> { %vm3342_vm4 = vcmp.eq.s32.totalorder %v11289_v23, %v3334_v54  ;;  %vm3350_vm5 = vcmp.eq.s32.totalorder %v11292_v55, %v3334_v54  ;;  %v3074_v22 = vadd.f32 %v3058_v0, %v2886_v8  ;;  %v3082_v26 = vadd.f32 %v3066_v31, %v2894_v28  ;;  %v14604_v28 = vld [vmem:[#allocation59_spill] sm:$0xff] }
 0x291   : >> { %v3246_v18 = vsel %vm3154_vm2, %v3238_v47, 0.0  ;;  %v3254_v15 = vsel %vm3162_vm3, %v3238_v47, 0.0  ;;  %v14599_v34 = vmov %v14598_v44  ;;  %v3490_v27 = vrot.slane %v14598_v44, %v14557_v42 }
 0x292   : >> { %v3574_v20 = vrot.slane %v14600_v3, %v14557_v42  ;;  %v14602_v36 = vmov %v14601_v30  ;;  %v3678_v16 = vrot.slane %v14601_v30, %v14557_v42  ;;  %v3262_v53 = vadd.f32 %v3246_v18, %v3074_v22  ;;  %v14605_v22 = vld [vmem:[#allocation57_spill] sm:$0xff] }
 0x293   : >> { %v3270_v10 = vadd.f32 %v3254_v15, %v3082_v26  ;;  %v3762_v8 = vrot.slane %v14603_v37, %v14557_v42  ;;  %v3866_v31 = vrot.slane %v14604_v28, %v14557_v42  ;;  %v3426_v47 = vrot.slane %v3386_v1, %v14562_v29 }
 0x294   : >> { %v3522_v0 = vrot.slane %v3490_v27, %v14562_v29  ;;  %v3614_v44 = vrot.slane %v3574_v20, %v14562_v29  ;;  %v3710_v38 = vrot.slane %v3678_v16, %v14562_v29  ;;  %v3950_v26 = vrot.slane %v14605_v22, %v14557_v42 }
 0x295   : >> { %v3802_v39 = vrot.slane %v3762_v8, %v14562_v29  ;;  %v3898_v30 = vrot.slane %v3866_v31, %v14562_v29  ;;  %v2538_v18 = vrot.slane %v14571_v14, %v14562_v29  ;;  %v3434_v15 = vsel %vm3342_vm4, %v3426_v47, 0.0 }
 0x296   : >> { %v3442_v1 = vsel %vm3350_vm5, %v3426_v47, 0.0  ;;  %vm3530_vm6 = vcmp.eq.s32.totalorder %v11289_v23, %v3522_v0  ;;  %vm3538_vm7 = vcmp.eq.s32.totalorder %v11292_v55, %v3522_v0  ;;  %v3450_v27 = vadd.f32 %v3434_v15, %v3262_v53 }
 0x297   : >> { %v3458_v20 = vadd.f32 %v3442_v1, %v3270_v10  ;;  %v3622_v16 = vsel %vm3530_vm6, %v3614_v44, 0.0  ;;  %v3630_v8 = vsel %vm3538_vm7, %v3614_v44, 0.0  ;;  %vm3718_vm8 = vcmp.eq.s32.totalorder %v11289_v23, %v3710_v38 }
 0x298   : >> { %vm3726_vm9 = vcmp.eq.s32.totalorder %v11292_v55, %v3710_v38  ;;  %vm3906_vm10 = vcmp.eq.s32.totalorder %v11289_v23, %v3898_v30  ;;  %vm3914_vm11 = vcmp.eq.s32.totalorder %v11292_v55, %v3898_v30  ;;  %v3638_v42 = vadd.f32 %v3622_v16, %v3450_v27 }
 0x299   : >> { %v3646_v31 = vadd.f32 %v3630_v8, %v3458_v20  ;;  %v3810_v54 = vsel %vm3718_vm8, %v3802_v39, 0.0  ;;  %v3818_v47 = vsel %vm3726_vm9, %v3802_v39, 0.0  ;;  %v3990_v14 = vrot.slane %v3950_v26, %v14562_v29 }
 0x29a   : >> { %v2570_v0 = vrot.slane %v2538_v18, %v14562_v29  ;;  %v2622_v53 = vrot.slane %v14572_v63, %v14562_v29  ;;  %v2726_v10 = vrot.slane %v11049_v49, %v14562_v29  ;;  %v3826_v44 = vadd.f32 %v3810_v54, %v3638_v42 }
 0x29b   : >> { %v3834_v38 = vadd.f32 %v3818_v47, %v3646_v31  ;;  %v2810_v15 = vrot.slane %v14574_v52, %v14562_v29  ;;  %v2914_v30 = vrot.slane %v14575_v25, %v14562_v29  ;;  %v3998_v1 = vsel %vm3906_vm10, %v3990_v14, 0.0 }
 0x29c   : >> { %v4006_v39 = vsel %vm3914_vm11, %v3990_v14, 0.0  ;;  %vm2587_vm12 = vcmp.eq.s32.totalorder %v11289_v23, %v2570_v0  ;;  %vm2595_vm13 = vcmp.eq.s32.totalorder %v11292_v55, %v2570_v0  ;;  %v4014_v26 = vadd.f32 %v3998_v1, %v3826_v44 }
 0x29d   : >> { %v4022_v18 = vadd.f32 %v4006_v39, %v3834_v38  ;;  %v2662_v27 = vrot.slane %v2622_v53, %v14562_v29  ;;  %v2758_v20 = vrot.slane %v2726_v10, %v14562_v29  ;;  %v2850_v16 = vrot.slane %v2810_v15, %v14562_v29 }
 0x29e   : >> { %v2946_v8 = vrot.slane %v2914_v30, %v14562_v29  ;;  %v2998_v42 = vrot.slane %v14576_v2, %v14562_v29  ;;  %v3102_v14 = vrot.slane %v11115_v5, %v14562_v29  ;;  %v3186_v30 = vrot.slane %v14578_v12, %v14562_v29 }
 0x29f   : >> { %v8852_v31 = vpack.c.bf16 %v4022_v18, %v4014_v26  ;;  %v2679_v54 = vsel %vm2587_vm12, %v2662_v27, 0.0  ;;  %v2687_v47 = vsel %vm2595_vm13, %v2662_v27, 0.0  ;;  %vm2775_vm15 = vcmp.eq.s32.totalorder %v11289_v23, %v2758_v20 }
 0x2a0   : >> { %vm2783_vm0 = vcmp.eq.s32.totalorder %v11292_v55, %v2758_v20  ;;  %v2867_v0 = vsel %vm2775_vm15, %v2850_v16, 0.0  ;;  %vm2963_vm1 = vcmp.eq.s32.totalorder %v11289_v23, %v2946_v8  ;;  %vm2971_vm2 = vcmp.eq.s32.totalorder %v11292_v55, %v2946_v8 }
 0x2a1   : >> { %8853 = vmatprep.subr.bf16.mxu1 %v8852_v31  ;;  %v2875_v53 = vsel %vm2783_vm0, %v2850_v16, 0.0  ;;  %v2883_v10 = vadd.f32 %v2867_v0, %v2679_v54  ;;  %v3038_v44 = vrot.slane %v2998_v42, %v14562_v29  ;;  %v3134_v38 = vrot.slane %v3102_v14, %v14562_v29 }
 0x2a2   : >> { %v2891_v15 = vadd.f32 %v2875_v53, %v2687_v47  ;;  %v3290_v1 = vrot.slane %v11131_v50, %v14562_v29  ;;  %v3374_v39 = vrot.slane %v11142_v59, %v14562_v29  ;;  %v3226_v16 = vrot.slane %v3186_v30, %v14562_v29 }
 0x2a3   : >> { %v3055_v26 = vsel %vm2963_vm1, %v3038_v44, 0.0  ;;  %v3063_v18 = vsel %vm2971_vm2, %v3038_v44, 0.0  ;;  %vm3151_vm3 = vcmp.eq.s32.totalorder %v11289_v23, %v3134_v38  ;;  %vm3159_vm4 = vcmp.eq.s32.totalorder %v11292_v55, %v3134_v38 }
 0x2a4   : >> { %v3071_v27 = vadd.f32 %v3055_v26, %v2883_v10  ;;  %v3079_v20 = vadd.f32 %v3063_v18, %v2891_v15  ;;  %v3322_v8 = vrot.slane %v3290_v1, %v14562_v29  ;;  %v3414_v42 = vrot.slane %v3374_v39, %v14562_v29 }
 0x2a5   : >> { %v3478_v14 = vrot.slane %v11167_v32, %v14562_v29  ;;  %v3562_v31 = vrot.slane %v11162_v41, %v14562_v29  ;;  %v3666_v54 = vrot.slane %v11191_v40, %v14562_v29  ;;  %v3243_v47 = vsel %vm3151_vm3, %v3226_v16, 0.0 }
 0x2a6   : >> { %v3251_v0 = vsel %vm3159_vm4, %v3226_v16, 0.0  ;;  %vm3339_vm5 = vcmp.eq.s32.totalorder %v11289_v23, %v3322_v8  ;;  %vm3347_vm6 = vcmp.eq.s32.totalorder %v11292_v55, %v3322_v8  ;;  %v3259_v53 = vadd.f32 %v3243_v47, %v3071_v27 }
 0x2a7   : >> { %v3267_v10 = vadd.f32 %v3251_v0, %v3079_v20  ;;  %v3431_v44 = vsel %vm3339_vm5, %v3414_v42, 0.0  ;;  %v3439_v38 = vsel %vm3347_vm6, %v3414_v42, 0.0  ;;  %v3510_v15 = vrot.slane %v3478_v14, %v14562_v29 }
 0x2a8   : >> { %v3602_v30 = vrot.slane %v3562_v31, %v14562_v29  ;;  %v3698_v1 = vrot.slane %v3666_v54, %v14562_v29  ;;  %v3750_v39 = vrot.slane %v14580_v11, %v14562_v29  ;;  %v3447_v26 = vadd.f32 %v3431_v44, %v3259_v53 }
 0x2a9   : >> { %v3455_v18 = vadd.f32 %v3439_v38, %v3267_v10  ;;  %v3854_v16 = vrot.slane %v14582_v62, %v14562_v29  ;;  %v3938_v27 = vrot.slane %v14584_v6, %v14562_v29  ;;  %vm3527_vm7 = vcmp.eq.s32.totalorder %v11289_v23, %v3510_v15 }
 0x2aa   : >> { %vm3535_vm8 = vcmp.eq.s32.totalorder %v11292_v55, %v3510_v15  ;;  %vm3715_vm9 = vcmp.eq.s32.totalorder %v11289_v23, %v3698_v1  ;;  %vm3723_vm10 = vcmp.eq.s32.totalorder %v11292_v55, %v3698_v1  ;;  %v3619_v20 = vsel %vm3527_vm7, %v3602_v30, 0.0 }
 0x2ab   : >> { %v3627_v8 = vsel %vm3535_vm8, %v3602_v30, 0.0  ;;  %v3790_v42 = vrot.slane %v3750_v39, %v14562_v29  ;;  %v3886_v14 = vrot.slane %v3854_v16, %v14562_v29  ;;  %v3635_v31 = vadd.f32 %v3619_v20, %v3447_v26 }
 0x2ac   : >> { %v3643_v54 = vadd.f32 %v3627_v8, %v3455_v18  ;;  %v3978_v47 = vrot.slane %v3938_v27, %v14562_v29  ;;  %v2546_v0 = vrot.slane %v14585_v9, %v14562_v29  ;;  %v2630_v39 = vrot.slane %v14586_v33, %v14562_v29 }
 0x2ad   : >> { %v3807_v53 = vsel %vm3715_vm9, %v3790_v42, 0.0  ;;  %v3815_v10 = vsel %vm3723_vm10, %v3790_v42, 0.0  ;;  %vm3903_vm11 = vcmp.eq.s32.totalorder %v11289_v23, %v3886_v14  ;;  %vm3911_vm12 = vcmp.eq.s32.totalorder %v11292_v55, %v3886_v14 }
 0x2ae   : >> { %v3823_v44 = vadd.f32 %v3807_v53, %v3635_v31  ;;  %v3831_v38 = vadd.f32 %v3815_v10, %v3643_v54  ;;  %v3995_v15 = vsel %vm3903_vm11, %v3978_v47, 0.0  ;;  %v4003_v30 = vsel %vm3911_vm12, %v3978_v47, 0.0 }
 0x2af   : >> { %v2578_v1 = vrot.slane %v2546_v0, %v14562_v29  ;;  %v2734_v26 = vrot.slane %v14588_v35, %v14562_v29  ;;  %v2818_v18 = vrot.slane %v14590_v7, %v14562_v29  ;;  %v2922_v20 = vrot.slane %v14591_v4, %v14562_v29 }
 0x2b0   : >> { %v4011_v16 = vadd.f32 %v3995_v15, %v3823_v44  ;;  %v4019_v27 = vadd.f32 %v4003_v30, %v3831_v38  ;;  %v3006_v8 = vrot.slane %v14593_v19, %v14562_v29  ;;  %v2670_v42 = vrot.slane %v2630_v39, %v14562_v29 }
 0x2b1   : >> { %vm2589_vm13 = vcmp.eq.s32.totalorder %v11289_v23, %v2578_v1  ;;  %vm2597_vm15 = vcmp.eq.s32.totalorder %v11292_v55, %v2578_v1  ;;  %v2766_v14 = vrot.slane %v2734_v26, %v14562_v29  ;;  %v2858_v54 = vrot.slane %v2818_v18, %v14562_v29 }
 0x2b2   : >> { %v8850_v31 = vpack.c.bf16 %v4019_v27, %v4011_v16  ;;  %v2954_v47 = vrot.slane %v2922_v20, %v14562_v29  ;;  %v3046_v0 = vrot.slane %v3006_v8, %v14562_v29  ;;  %v2681_v53 = vsel %vm2589_vm13, %v2670_v42, 0.0 }
 0x2b3   : >> { %v2689_v10 = vsel %vm2597_vm15, %v2670_v42, 0.0  ;;  %vm2777_vm0 = vcmp.eq.s32.totalorder %v11289_v23, %v2766_v14  ;;  %vm2785_vm1 = vcmp.eq.s32.totalorder %v11292_v55, %v2766_v14  ;;  %v3110_v26 = vrot.slane %v14594_v24, %v14562_v29 }
 0x2b4   : >> { %8851 = vmatpush1.bf16.msra.mxu0 %v8850_v31  ;;  %v2869_v44 = vsel %vm2777_vm0, %v2858_v54, 0.0  ;;  %v2877_v38 = vsel %vm2785_vm1, %v2858_v54, 0.0  ;;  %vm2965_vm2 = vcmp.eq.s32.totalorder %v11289_v23, %v2954_v47  ;;  %vm2973_vm3 = vcmp.eq.s32.totalorder %v11292_v55, %v2954_v47 }
 0x2b5   : >> { %v2885_v15 = vadd.f32 %v2869_v44, %v2681_v53  ;;  %v2893_v30 = vadd.f32 %v2877_v38, %v2689_v10  ;;  %v3057_v1 = vsel %vm2965_vm2, %v3046_v0, 0.0  ;;  %v3065_v39 = vsel %vm2973_vm3, %v3046_v0, 0.0 }
 0x2b6   : >> { %v3194_v18 = vrot.slane %v14595_v13, %v14562_v29  ;;  %v3298_v16 = vrot.slane %v14596_v21, %v14562_v29  ;;  %v3382_v27 = vrot.slane %v14597_v58, %v14562_v29  ;;  %v3486_v42 = vrot.slane %v14599_v34, %v14562_v29 }
 0x2b7   : >> { %v3073_v20 = vadd.f32 %v3057_v1, %v2885_v15  ;;  %v3081_v8 = vadd.f32 %v3065_v39, %v2893_v30  ;;  %v3570_v14 = vrot.slane %v14600_v3, %v14562_v29  ;;  %8802 = vmatmul.mubr.msk.f32.vlgmr.msra.gmra.mrb[2].mxu0 %vm1937_vm14, %v11528_v17  ;;  %v3142_v31 = vrot.slane %v3110_v26, %v14562_v29 }
 0x2b8   : >> { %v3234_v54 = vrot.slane %v3194_v18, %v14562_v29  ;;  %v3330_v47 = vrot.slane %v3298_v16, %v14562_v29  ;;  %v3422_v0 = vrot.slane %v3382_v27, %v14562_v29  ;;  %v3518_v53 = vrot.slane %v3486_v42, %v14562_v29 }
 0x2b9   : >> { %v3610_v10 = vrot.slane %v3570_v14, %v14562_v29  ;;  %v3674_v44 = vrot.slane %v14602_v36, %v14562_v29  ;;  %v3758_v38 = vrot.slane %v14603_v37, %v14562_v29  ;;  %vm3153_vm4 = vcmp.eq.s32.totalorder %v11289_v23, %v3142_v31 }
 0x2ba   : >> { %vm3161_vm5 = vcmp.eq.s32.totalorder %v11292_v55, %v3142_v31  ;;  %vm3341_vm6 = vcmp.eq.s32.totalorder %v11289_v23, %v3330_v47  ;;  %vm3349_vm7 = vcmp.eq.s32.totalorder %v11292_v55, %v3330_v47  ;;  %v3245_v15 = vsel %vm3153_vm4, %v3234_v54, 0.0 }
 0x2bb   : >> { %v3253_v30 = vsel %vm3161_vm5, %v3234_v54, 0.0  ;;  %v3433_v1 = vsel %vm3341_vm6, %v3422_v0, 0.0  ;;  %v3441_v39 = vsel %vm3349_vm7, %v3422_v0, 0.0  ;;  %v3261_v26 = vadd.f32 %v3245_v15, %v3073_v20 }
 0x2bc   : >> { %v3269_v18 = vadd.f32 %v3253_v30, %v3081_v8  ;;  %vm3529_vm8 = vcmp.eq.s32.totalorder %v11289_v23, %v3518_v53  ;;  %vm3537_vm9 = vcmp.eq.s32.totalorder %v11292_v55, %v3518_v53  ;;  %v3706_v42 = vrot.slane %v3674_v44, %v14562_v29 }
 0x2bd   : >> { %v3621_v16 = vsel %vm3529_vm8, %v3610_v10, 0.0  ;;  %v3629_v27 = vsel %vm3537_vm9, %v3610_v10, 0.0  ;;  %v3798_v14 = vrot.slane %v3758_v38, %v14562_v29  ;;  %v3449_v31 = vadd.f32 %v3433_v1, %v3261_v26 }
 0x2be   : >> { %v3457_v2 = vadd.f32 %v3441_v39, %v3269_v18  ;;  %v3862_v47 = vrot.slane %v14604_v28, %v14562_v29  ;;  %v3946_v54 = vrot.slane %v14605_v22, %v14562_v29  ;;  %vm3717_vm10 = vcmp.eq.s32.totalorder %v11289_v23, %v3706_v42 }
 0x2bf   : >> { %vm3725_vm11 = vcmp.eq.s32.totalorder %v11292_v55, %v3706_v42  ;;  %v3637_v20 = vadd.f32 %v3621_v16, %v3449_v31  ;;  %v3809_v0 = vsel %vm3717_vm10, %v3798_v14, 0.0  ;;  %v14606_v16 = vld [vmem:[#allocation80_spill] sm:$0xff]  ;;  %v4355_v9 = vmul.f32 (%p2503_p12), 10.0, %v14622_v60 }
 0x2c0   : >> { %v3645_v8 = vadd.f32 %v3629_v27, %v3457_v2  ;;  %v3817_v53 = vsel %vm3725_vm11, %v3798_v14, 0.0  ;;  %v3894_v10 = vrot.slane %v3862_v47, %v14562_v29  ;;  %v3986_v44 = vrot.slane %v3946_v54, %v14562_v29  ;;  %v14607_v29 = vld [vmem:[#allocation79_spill] sm:$0xff]  ;;  %v14608_v47 = vld [vmem:[#allocation78_spill] sm:$0xff] }
 0x2c1   : >> { %v3825_v38 = vadd.f32 %v3809_v0, %v3637_v20  ;;  %v14610_v0 = vld [vmem:[#allocation76_spill] sm:$0xff]  ;;  %v4356_v49 = vmul.f32 (%p2503_p12), 10.0, %v14623_v45  ;;  %v4358_v5 = vmul.f32 (%p2503_p12), 10.0, %v14625_v61  ;;  %v4359_v34 = vfloor.f32 (%p2503_p12), %v4355_v9 }
 0x2c2   : >> { %v3833_v15 = vadd.f32 %v3817_v53, %v3645_v8  ;;  %vm3905_vm12 = vcmp.eq.s32.totalorder %v11289_v23, %v3894_v10  ;;  %vm3913_vm13 = vcmp.eq.s32.totalorder %v11292_v55, %v3894_v10  ;;  %v14609_v55 = vld [vmem:[#allocation77_spill] sm:$0xff]  ;;  %v4361_v37 = vfloor.f32 (%p2503_p12), %v4357_v56 }
 0x2c3   : >> { %v3997_v30 = vsel %vm3905_vm12, %v3986_v44, 0.0  ;;  %v4005_v1 = vsel %vm3913_vm13, %v3986_v44, 0.0  ;;  %v14611_v44 = vld [vmem:[#allocation75_spill] sm:$0xff]  ;;  %v4360_v50 = vfloor.f32 (%p2503_p12), %v4356_v49  ;;  %v4362_v36 = vfloor.f32 (%p2503_p12), %v4358_v5 }
 0x2c4   : >> { %v4013_v39 = vadd.f32 %v3997_v30, %v3825_v38  ;;  %v4021_v26 = vadd.f32 %v4005_v1, %v3833_v15  ;;  %v4363_v59 = vceil.f32 (%p2503_p12), %v4355_v9  ;;  %v4364_v43 = vceil.f32 (%p2503_p12), %v4356_v49 }
 0x2c5   : > { %v4365_v48 = vceil.f32 (%p2503_p12), %v4357_v56  ;;  %v4366_v41 = vceil.f32 (%p2503_p12), %v4358_v5  ;;  %v8928_v32 = vtrunc.f32 (%p2503_p12), %v4359_v34  ;;  %v8930_v46 = vtrunc.f32 (%p2503_p12), %v4360_v50 }
 0x2c6   : >> { %v8854_v18 = vpack.c.bf16 %v4021_v26, %v4013_v39  ;;  %v14613_v39 = vld [vmem:[#allocation73_spill] sm:$0xff]  ;;  %v8932_v40 = vtrunc.f32 (%p2503_p12), %v4361_v37  ;;  %v8934_v24 = vtrunc.f32 (%p2503_p12), %v4362_v36  ;;  %v8920_v51 = vtrunc.f32 (%p2503_p12), %v4363_v59 }
 0x2c7   : > { %v8922_v19 = vtrunc.f32 (%p2503_p12), %v4364_v43  ;;  %v8924_v63 = vtrunc.f32 (%p2503_p12), %v4365_v48  ;;  %v8926_v52 = vtrunc.f32 (%p2503_p12), %v4366_v41  ;;  %v11860_v25 = vcvt.f32.s32 (%p2503_p12), %v8928_v32 }
 0x2c8   : >> { %8855 = vmatpush1.bf16.msra.mxu1 %v8854_v18  ;;  %v11862_v12 = vcvt.f32.s32 (%p2503_p12), %v8930_v46  ;;  %v11864_v11 = vcvt.f32.s32 (%p2503_p12), %v8920_v51  ;;  %v11872_v35 = vsub.f32 (%p2503_p12), %v4355_v9, %v4359_v34  ;;  %v11874_v7 = vsub.f32 (%p2503_p12), %v4356_v49, %v4360_v50 }
 0x2c9   : > { %v11866_v62 = vcvt.f32.s32 (%p2503_p12), %v8922_v19  ;;  %v11868_v6 = vcvt.f32.s32 (%p2503_p12), %v8924_v63  ;;  %v11870_v33 = vcvt.f32.s32 (%p2503_p12), %v8926_v52  ;;  %v11876_v4 = vsub.f32 (%p2503_p12), %v4357_v56, %v4361_v37 }
 0x2ca   : > { %v11878_v13 = vsub.f32 (%p2503_p12), %v4358_v5, %v4362_v36  ;;  %v11880_v21 = vcvt.f32.s32 (%p2503_p12), %v8932_v40  ;;  %v11882_v58 = vcvt.f32.s32 (%p2503_p12), %v8934_v24  ;;  %v4383_v3 = vmul.u32 (%p2503_p12), 2654435761, %v11864_v11 }
 0x2cb   : >> { %8803 = vmatmul.mubr.msk.f32.vlgmr.msra.gmra.mrb[2].mxu1 %vm1937_vm14, %v11528_v17  ;;  %v14612_v17 = vld [vmem:[#allocation74_spill] sm:$0xff]  ;;  %v4384_v28 = vmul.u32 (%p2503_p12), 2654435761, %v11866_v62  ;;  %v11887_v22 = vsub.f32 (%p2503_p12), 1.0, %v11872_v35 }
 0x2cc   : > { %v11944_v32 = vrot.slane (%p2503_p12), %v4383_v3, 5 }
 0x2cd   : > { %v4423_v57 = vrot.slane (%p2503_p12), %v11887_v22, 5  ;;  %v11946_v46 = vrot.slane (%p2503_p12), %v4384_v28, 5 }
 0x2cf   : > { %v4424_v37 = vrot.slane (%p2503_p12), %v4423_v57, 4 }
 0x2d1   : > { %v11949_v40 = vmul.f32 (%p2503_p12), %v4424_v37, %v11872_v35  ;;  %v11955_v51 = vmul.f32 (%p2503_p12), %v4424_v37, %v11887_v22  ;;  %v4475_v37 = vrot.slane (%p2503_p12), %v11872_v35, 6 }
 0x2d3   : > { %v4476_v49 = vrot.slane (%p2503_p12), %v4475_v37, 4 }
 0x342   : >> { %v4097_v2 = vpop.f32.mrb[0].mxu0 }
 0x343   : >> { %v4315_v27 = vadd.f32 %v14606_v16, %v4097_v2   ;;  %v4099_v42 = vpop.f32.mrb[1].mxu0 }
 0x344   : >> { %v4316_v14 = vadd.f32 %v14607_v29, %v4099_v42  }
 0x345   : >> { %v14621_v16 = vmov %v4315_v27  ;;  %v4331_v18 = vrot.slane (%p2503_p12), %v4315_v27, 6  ;;  %v11890_v27 = vsub.f32 (%p2503_p12), 1.0, %v11874_v7 }
 0x346   : > { %v4332_v2 = vrot.slane (%p2503_p12), %v4316_v14, 6 }
 0x347   : > { %4347 = vst [vmem:[%s10154_s28] sm:$0xc] (%p2503_p12), %v4331_v18  ;;  %v4425_v56 = vrot.slane (%p2503_p12), %v11890_v27, 5 }
 0x348   : > { %4348 = vst [vmem:[%s10154_s28 + $0x8] sm:$0xc] (%p2503_p12), %v4332_v2 }
 0x349   : > { %v4426_v36 = vrot.slane (%p2503_p12), %v4425_v56, 4 }
 0x34b   : > { %v11952_v24 = vmul.f32 (%p2503_p12), %v4426_v36, %v11874_v7  ;;  %v11958_v19 = vmul.f32 (%p2503_p12), %v4426_v36, %v11890_v27  ;;  %v4477_v36 = vrot.slane (%p2503_p12), %v11874_v7, 6 }
 0x34d   : > { %14626 = vst [vmem:[#allocation60_spill] sm:$0xff] (%p2503_p12), %v11958_v19 }
 0x34e   : >> { %v4168_v31 = vpop.f32.mrb[0].mxu1 }
 0x34f   : >> { %v4317_v23 = vadd.f32 %v14608_v47, %v4168_v31   ;;  %v4170_v54 = vpop.f32.mrb[1].mxu1 }
 0x350   : >> { %v4318_v8 = vadd.f32 %v14609_v55, %v4170_v54  }
 0x351   : >> { %v14619_v47 = vmov %v4317_v23  ;;  %v4333_v16 = vrot.slane (%p2503_p12), %v4317_v23, 6  ;;  %v4386_v23 = vmul.u32 (%p2503_p12), 2654435761, %v11870_v33 }
 0x352   : > { %v4334_v42 = vrot.slane (%p2503_p12), %v4318_v8, 6  ;;  %v4385_v47 = vmul.u32 (%p2503_p12), 2654435761, %v11868_v6 }
 0x353   : > { %4349 = vst [vmem:[%s10154_s28 + $0x10] sm:$0xc] (%p2503_p12), %v4333_v16  ;;  %v4393_v16 = vmul.u32 (%p2503_p12), 805459861, %v11868_v6 }
 0x354   : > { %4350 = vst [vmem:[%s10154_s28 + $0x18] sm:$0xc] (%p2503_p12), %v4334_v42  ;;  %v4394_v42 = vmul.u32 (%p2503_p12), 805459861, %v11870_v33 }
 0x38a   : >> { %v4239_v20 = vpop.f32.mrb[2].mxu0 }
 0x38b   : >> { %v4319_v53 = vadd.f32 %v14610_v0, %v4239_v20   ;;  %v4241_v10 = vpop.f32.mrb[3].mxu0  ;;  %v14618_v20 = vmov %v4318_v8  ;;  %v4405_v8 = vrot.slane (%p2503_p12), %v11874_v7, 5 }
 0x38c   : >> { %v4320_v38 = vadd.f32 %v14611_v44, %v4241_v10   ;;  %v14620_v10 = vmov %v4316_v14  ;;  %v11896_v14 = vsub.f32 (%p2503_p12), 1.0, %v11878_v13  ;;  %v4387_v20 = vmul.u32 (%p2503_p12), 2654435761, %v11860_v25 }
 0x38d   : >> { %v14617_v54 = vmov %v4319_v53  ;;  %v4335_v31 = vrot.slane (%p2503_p12), %v4319_v53, 6  ;;  %v4388_v53 = vmul.u32 (%p2503_p12), 2654435761, %v11862_v12  ;;  %v4407_v10 = vrot.slane (%p2503_p12), %v11876_v4, 5 }
 0x38e   : > { %v4336_v55 = vrot.slane (%p2503_p12), %v4320_v38, 6  ;;  %v4403_v54 = vrot.slane (%p2503_p12), %v11872_v35, 5  ;;  %v4429_v5 = vrot.slane (%p2503_p12), %v11896_v14, 5 }
 0x38f   : > { %4351 = vst [vmem:[%s10154_s28 + $0x20] sm:$0xc] (%p2503_p12), %v4335_v31  ;;  %v4408_v18 = vrot.slane (%p2503_p12), %v4407_v10, 4  ;;  %v11974_v10 = vrot.slane (%p2503_p12), %v4385_v47, 5 }
 0x390   : > { %4352 = vst [vmem:[%s10154_s28 + $0x28] sm:$0xc] (%p2503_p12), %v4336_v55  ;;  %v4430_v41 = vrot.slane (%p2503_p12), %v4429_v5, 4 }
 0x391   : > { %v11921_v60 = vmul.f32 (%p2503_p12), %v4408_v18, %v11876_v4  ;;  %v14183_v57 = vrot.slane (%p2503_p12), %v11974_v10, 4 }
 0x392   : > { %v11964_v52 = vmul.f32 (%p2503_p12), %v4430_v41, %v11878_v13  ;;  %v11970_v28 = vmul.f32 (%p2503_p12), %v4430_v41, %v11896_v14 }
 0x39c   : > { %2505 = sbr.rel (!%p2503_p12) target bundleno = 539 (0x21b), region = 106 }
 0x39e   : >> { %v4310_v15 = vpop.f32.mrb[2].mxu1 }
 0x39f   : >> { %v4321_v1 = vadd.f32 %v14612_v17, %v4310_v15   ;;  %v4312_v30 = vpop.f32.mrb[3].mxu1  ;;  %v4390_v17 = vmul.u32 (%p2503_p12), 2654435761, %v11882_v58 }
 0x3a0   : >> { %v4322_v26 = vadd.f32 %v14613_v39, %v4312_v30   ;;  %v14616_v30 = vmov %v4320_v38  ;;  %v4389_v38 = vmul.u32 (%p2503_p12), 2654435761, %v11880_v21  ;;  %v4391_v39 = vmul.u32 (%p2503_p12), 805459861, %v11864_v11 }
 0x3a1   : >> { %v14615_v44 = vmov %v4321_v1  ;;  %v4337_v0 = vrot.slane (%p2503_p12), %v4321_v1, 6  ;;  %v4404_v1 = vrot.slane (%p2503_p12), %v4403_v54, 4  ;;  %v4406_v30 = vrot.slane (%p2503_p12), %v4405_v8, 4 }
 0x3a2   : >> { %v14614_v29 = vmov %v4322_v26  ;;  %v4338_v15 = vrot.slane (%p2503_p12), %v4322_v26, 6  ;;  %v4409_v44 = vrot.slane (%p2503_p12), %v11878_v13, 5  ;;  %v4392_v26 = vmul.u32 (%p2503_p12), 805459861, %v11866_v62 }
 0x3a3   : > { %4353 = vst [vmem:[%s10154_s28 + $0x30] sm:$0xc] %v4337_v0  ;;  %v11893_v29 = vsub.f32 1.0, %v11876_v4  ;;  %v11913_v31 = vmul.f32 %v4404_v1, %v11872_v35  ;;  %v11916_v55 = vmul.f32 %v4406_v30, %v11874_v7  ;;  %v11933_v34 = vmul.f32 %v4404_v1, %v11887_v22 }
 0x3a4   : > { %4354 = vst [vmem:[%s10154_s28 + $0x38] sm:$0xc] %v4338_v15  ;;  %v4410_v2 = vrot.slane %v4409_v44, 4  ;;  %v11936_v50 = vmul.f32 %v4406_v30, %v11890_v27  ;;  %v14185_v54 = vrot.slane %v11944_v32, 4  ;;  %v14184_v8 = vrot.slane %v11946_v46, 4 }
 0x3a5   : > { %v4427_v61 = vrot.slane %v11893_v29, 5  ;;  %v11939_v59 = vmul.f32 %v4408_v18, %v11893_v29  ;;  %v11976_v44 = vrot.slane %v4386_v23, 5  ;;  %v4459_v1 = vrot.slane %v4391_v39, 6 }
 0x3a6   : > { %v11924_v9 = vmul.f32 %v4410_v2, %v11878_v13  ;;  %v11942_v43 = vmul.f32 %v4410_v2, %v11896_v14  ;;  %v4461_v30 = vrot.slane %v4392_v26, 6  ;;  %v4463_v18 = vrot.slane %v4393_v16, 6 }
 0x3a7   : > { %v4428_v48 = vrot.slane %v4427_v61, 4  ;;  %v4465_v2 = vrot.slane %v4394_v42, 6  ;;  %v14182_v56 = vrot.slane %v11976_v44, 4  ;;  %v11983_v61 = vxor.u32 %v11864_v11, %v14185_v54 }
 0x3a8   : > { %v11988_v47 = vxor.u32 %v11866_v62, %v14184_v8  ;;  %v11990_v23 = vrot.slane %v4459_v1, 4  ;;  %v11992_v39 = vrot.slane %v4461_v30, 4  ;;  %v11994_v26 = vrot.slane %v4463_v18, 4 }
 0x3a9   : > { %v11961_v63 = vmul.f32 %v4428_v48, %v11876_v4  ;;  %v11967_v3 = vmul.f32 %v4428_v48, %v11893_v29  ;;  %v11996_v16 = vrot.slane %v4465_v2, 4  ;;  %v12001_v42 = vxor.u32 %v11868_v6, %v14183_v57 }
 0x3aa   : > { %v12006_v5 = vxor.u32 %v11870_v33, %v14182_v56  ;;  %v4467_v48 = vxor.u32 %v11990_v23, %v11983_v61  ;;  %v4468_v41 = vxor.u32 %v11992_v39, %v11988_v47  ;;  %v4479_v1 = vrot.slane %v11876_v4, 6 }
 0x3ab   : > { %v4481_v30 = vrot.slane %v11878_v13, 6  ;;  %v4469_v18 = vxor.u32 %v11994_v26, %v12001_v42  ;;  %v4478_v35 = vrot.slane %v4477_v36, 4  ;;  %v12029_v4 = vmul.f32 %v4476_v49, %v11913_v31 }
 0x3ac   : > { %v4470_v2 = vxor.u32 %v11996_v16, %v12006_v5  ;;  %v12020_v45 = vand.u32 255, %v4467_v48  ;;  %v12022_v7 = vand.u32 255, %v4468_v41  ;;  %v4480_v15 = vrot.slane %v4479_v1, 4 }
 0x3ad   : > { %v4482_v0 = vrot.slane %v4481_v30, 4  ;;  %v12024_v56 = vand.u32 255, %v4469_v18  ;;  %14631 = vst [vmem:[#allocation13_spill] sm:$0xff] %v12029_v4  ;;  %v12032_v13 = vmul.f32 %v4478_v35, %v11916_v55  ;;  %v4491_v36 = vrot.slane %v4387_v20, 5 }
 0x3ae   : > { %14627 = vst [vmem:[#allocation61_spill] sm:$0xff] %v12020_v45  ;;  %14628 = vst [vmem:[#allocation62_spill] sm:$0xff] %v12022_v7  ;;  %v12026_v57 = vand.u32 255, %v4470_v2  ;;  %v12035_v8 = vmul.f32 %v4480_v15, %v11921_v60  ;;  %v4493_v48 = vrot.slane %v4388_v53, 5  ;;  %v4495_v41 = vrot.slane %v4389_v38, 5 }
 0x3af   : > { %14629 = vst [vmem:[#allocation11_spill] sm:$0xff] %v12024_v56  ;;  %14632 = vst [vmem:[#allocation14_spill] sm:$0xff] %v12032_v13  ;;  %v12038_v37 = vmul.f32 %v4482_v0, %v11924_v9  ;;  %v4497_v1 = vrot.slane %v4390_v17, 5  ;;  %v12049_v30 = vmul.f32 %v4476_v49, %v11949_v40  ;;  %v12052_v18 = vmul.f32 %v4478_v35, %v11952_v24 }
 0x3b0   : > { %14630 = vst [vmem:[#allocation12_spill] sm:$0xff] %v12026_v57  ;;  %14633 = vst [vmem:[#allocation15_spill] sm:$0xff] %v12035_v8  ;;  %v4492_v2 = vrot.slane %v4491_v36, 4  ;;  %v4494_v54 = vrot.slane %v4493_v48, 4  ;;  %v12058_v20 = vmul.f32 %v4482_v0, %v11964_v52  ;;  %v4496_v53 = vrot.slane %v4495_v41, 4 }
 0x3b1   : > { %14634 = vst [vmem:[#allocation16_spill] sm:$0xff] %v12038_v37  ;;  %14635 = vst [vmem:[#allocation17_spill] sm:$0xff] %v12049_v30  ;;  %v12055_v37 = vmul.f32 %v4480_v15, %v11961_v63  ;;  %v4498_v57 = vrot.slane %v4497_v1, 4  ;;  %v12061_v38 = vmul.f32 %v4476_v49, %v11955_v51  ;;  %v12064_v17 = vmul.f32 %v4478_v35, %v11958_v19 }
 0x3b2   : > { %14636 = vst [vmem:[#allocation18_spill] sm:$0xff] %v12052_v18  ;;  %14638 = vst [vmem:[#allocation20_spill] sm:$0xff] %v12058_v20  ;;  %v12067_v8 = vxor.u32 %v11864_v11, %v4492_v2  ;;  %v12070_v36 = vxor.u32 %v11866_v62, %v4494_v54  ;;  %v12073_v48 = vxor.u32 %v11860_v25, %v4492_v2 }
 0x3b3   : > { %14637 = vst [vmem:[#allocation19_spill] sm:$0xff] %v12055_v37  ;;  %14639 = vst [vmem:[#allocation21_spill] sm:$0xff] %v12061_v38  ;;  %v12076_v37 = vxor.u32 %v11862_v12, %v4494_v54  ;;  %v12079_v41 = vxor.u32 %v11868_v6, %v4496_v53  ;;  %v12082_v1 = vxor.u32 %v11870_v33, %v4498_v57 }
 0x3b4   : > { %14640 = vst [vmem:[#allocation22_spill] sm:$0xff] %v12064_v17  ;;  %v12085_v20 = vxor.u32 %v11880_v21, %v4496_v53  ;;  %v12088_v11 = vxor.u32 %v11882_v58, %v4498_v57  ;;  %v4503_v62 = vxor.u32 %v12067_v8, %v11990_v23  ;;  %v4504_v2 = vxor.u32 %v12070_v36, %v11992_v39 }
 0x3b5   : > { %v4519_v54 = vxor.u32 %v12073_v48, %v11990_v23  ;;  %v4520_v6 = vxor.u32 %v12076_v37, %v11992_v39  ;;  %v4505_v33 = vxor.u32 %v12079_v41, %v11994_v26  ;;  %v4506_v53 = vxor.u32 %v12082_v1, %v11996_v16 }
 0x3b6   : > { %v4521_v57 = vxor.u32 %v12085_v20, %v11994_v26  ;;  %v4522_v56 = vxor.u32 %v12088_v11, %v11996_v16  ;;  %v12106_v17 = vand.u32 255, %v4503_v62  ;;  %v12108_v18 = vand.u32 255, %v4504_v2 }
 0x3b7   : > { %v12110_v13 = vand.u32 255, %v4519_v54  ;;  %v12112_v7 = vand.u32 255, %v4520_v6  ;;  %v12114_v38 = vand.u32 255, %v4505_v33  ;;  %v12116_v30 = vand.u32 255, %v4506_v53 }
 0x3b8   : > { %14641 = vst [vmem:[#allocation23_spill] sm:$0xff] %v12106_v17  ;;  %14642 = vst [vmem:[#allocation24_spill] sm:$0xff] %v12108_v18  ;;  %v12118_v4 = vand.u32 255, %v4521_v57  ;;  %v12120_v45 = vand.u32 255, %v4522_v56  ;;  %v12123_v19 = vmul.f32 %v4480_v15, %v11967_v3  ;;  %v12126_v62 = vmul.f32 %v4482_v0, %v11970_v28 }
 0x3b9   : > { %14643 = vst [vmem:[#allocation25_spill] sm:$0xff] %v12110_v13  ;;  %14644 = vst [vmem:[#allocation26_spill] sm:$0xff] %v12112_v7  ;;  %v14650_v2 = vrot.slane %v11944_v32, 4  ;;  %v14651_v6 = vrot.slane %v11946_v46, 4  ;;  %v14652_v53 = vrot.slane %v11974_v10, 4  ;;  %v14653_v57 = vrot.slane %v11976_v44, 4 }
 0x3ba   : > { %14645 = vst [vmem:[#allocation27_spill] sm:$0xff] %v12116_v30  ;;  %14646 = vst [vmem:[#allocation28_spill] sm:$0xff] %v12118_v4  ;;  %v12149_v32 = vmul.f32 %v4476_v49, %v11933_v34  ;;  %v12162_v44 = vmul.f32 %v4482_v0, %v11942_v43 }
 0x3bb   : > { %14647 = vst [vmem:[#allocation29_spill] sm:$0xff] %v12120_v45  ;;  %14648 = vst [vmem:[#allocation30_spill] sm:$0xff] %v12123_v19  ;;  %v12131_v54 = vxor.u32 %v11860_v25, %v14650_v2  ;;  %v12136_v33 = vxor.u32 %v11862_v12, %v14651_v6  ;;  %v12141_v56 = vxor.u32 %v11880_v21, %v14652_v53 }
 0x3bc   : > { %14649 = vst [vmem:[#allocation31_spill] sm:$0xff] %v12126_v62  ;;  %v12146_v45 = vxor.u32 %v11882_v58, %v14653_v57  ;;  %14654 = vst [vmem:[#allocation32_spill] sm:$0xff] %v12149_v32  ;;  %v12152_v2 = vmul.f32 %v4478_v35, %v11936_v50  ;;  %v12159_v6 = vmul.f32 %v4480_v15, %v11939_v59  ;;  %v14658_v35 = vmul.u32 805459861, %v11860_v25 }
 0x3bd   : > { %v4535_v46 = vxor.u32 %v12131_v54, %v11990_v23  ;;  %v4536_v10 = vxor.u32 %v12136_v33, %v11992_v39  ;;  %14657 = vst [vmem:[#allocation35_spill] sm:$0xff] %v12162_v44  ;;  %v4537_v53 = vxor.u32 %v12141_v56, %v11994_v26  ;;  %v14659_v23 = vmul.u32 805459861, %v11862_v12 }
 0x3be   : > { %14655 = vst [vmem:[#allocation33_spill] sm:$0xff] %v12152_v2  ;;  %14656 = vst [vmem:[#allocation34_spill] sm:$0xff] %v12159_v6  ;;  %v4538_v49 = vxor.u32 %v12146_v45, %v11996_v16  ;;  %v4547_v57 = vrot.slane %v14658_v35, 6  ;;  %v14662_v15 = vmul.u32 805459861, %v11880_v21  ;;  %v4563_v12 = vrot.slane %v11887_v22, 6 }
 0x3bf   : > { %v4549_v62 = vrot.slane %v14659_v23, 6  ;;  %v12172_v30 = vand.u32 255, %v4535_v46  ;;  %v12174_v39 = vand.u32 255, %v4536_v10  ;;  %v14663_v44 = vmul.u32 805459861, %v11882_v58 }
 0x3c0   : > { %v4551_v0 = vrot.slane %v14662_v15, 6  ;;  %v12180_v26 = vand.u32 255, %v4537_v53  ;;  %v12182_v19 = vand.u32 255, %v4538_v49  ;;  %v4548_v16 = vrot.slane %v4547_v57, 4 }
 0x3c1   : > { %14660 = vst [vmem:[#allocation36_spill] sm:$0xff] %v12172_v30  ;;  %14661 = vst [vmem:[#allocation37_spill] sm:$0xff] %v12174_v39  ;;  %v4553_v6 = vrot.slane %v14663_v44, 6  ;;  %v4550_v25 = vrot.slane %v4549_v62, 4  ;;  %v4565_v46 = vrot.slane %v11890_v27, 6  ;;  %v4567_v23 = vrot.slane %v11893_v29, 6 }
 0x3c2   : > { %14664 = vst [vmem:[#allocation38_spill] sm:$0xff] %v12182_v19  ;;  %v4552_v35 = vrot.slane %v4551_v0, 4  ;;  %v4555_v10 = vxor.u32 %v4548_v16, %v11983_v61  ;;  %v4569_v58 = vrot.slane %v11896_v14, 6  ;;  %v4564_v49 = vrot.slane %v4563_v12, 4 }
 0x3c3   : > { %v4554_v4 = vrot.slane %v4553_v6, 4  ;;  %v4556_v21 = vxor.u32 %v4550_v25, %v11988_v47  ;;  %v4566_v62 = vrot.slane %v4565_v46, 4  ;;  %v4568_v22 = vrot.slane %v4567_v23, 4 }
 0x3c4   : > { %v4557_v44 = vxor.u32 %v4552_v35, %v12001_v42  ;;  %v12192_v57 = vand.u32 255, %v4555_v10  ;;  %v4570_v27 = vrot.slane %v4569_v58, 4  ;;  %v12201_v29 = vmul.f32 %v4564_v49, %v11913_v31 }
 0x3c5   : > { %v4558_v53 = vxor.u32 %v4554_v4, %v12006_v5  ;;  %v12194_v6 = vand.u32 255, %v4556_v21  ;;  %v12204_v14 = vmul.f32 %v4566_v62, %v11916_v55  ;;  %v12207_v47 = vmul.f32 %v4568_v22, %v11921_v60 }
 0x3c6   : > { %v12196_v15 = vand.u32 255, %v4557_v44  ;;  %14667 = vst [vmem:[#allocation41_spill] sm:$0xff] %v12201_v29  ;;  %v12210_v42 = vmul.f32 %v4570_v27, %v11924_v9  ;;  %v4579_v5 = vxor.u32 %v4548_v16, %v12067_v8  ;;  %v4580_v0 = vxor.u32 %v4550_v25, %v12070_v36 }
 0x3c7   : > { %14665 = vst [vmem:[#allocation39_spill] sm:$0xff] %v12194_v6  ;;  %v12198_v61 = vand.u32 255, %v4558_v53  ;;  %14668 = vst [vmem:[#allocation42_spill] sm:$0xff] %v12204_v14  ;;  %v4581_v12 = vxor.u32 %v4552_v35, %v12079_v41  ;;  %v4582_v46 = vxor.u32 %v4554_v4, %v12082_v1  ;;  %v12217_v31 = vmul.f32 %v4564_v49, %v11949_v40 }
 0x3c8   : > { %14669 = vst [vmem:[#allocation43_spill] sm:$0xff] %v12210_v42  ;;  %v12220_v55 = vmul.f32 %v4566_v62, %v11952_v24  ;;  %v12222_v10 = vand.u32 255, %v4579_v5  ;;  %v12224_v60 = vand.u32 255, %v4580_v0  ;;  %v12227_v9 = vmul.f32 %v4568_v22, %v11961_v63  ;;  %v14675_v63 = vld [vmem:[#allocation60_spill] sm:$0xff] }
 0x3c9   : > { %14666 = vst [vmem:[#allocation40_spill] sm:$0xff] %v12198_v61  ;;  %14670 = vst [vmem:[#allocation44_spill] sm:$0xff] %v12217_v31  ;;  %v12230_v8 = vmul.f32 %v4570_v27, %v11964_v52  ;;  %v12232_v36 = vand.u32 255, %v4581_v12  ;;  %v12234_v41 = vand.u32 255, %v4582_v46  ;;  %v4591_v40 = vxor.u32 %v4548_v16, %v12073_v48 }
 0x3ca   : > { %14671 = vst [vmem:[#allocation45_spill] sm:$0xff] %v12222_v10  ;;  %v4592_v1 = vxor.u32 %v4550_v25, %v12076_v37  ;;  %v4593_v24 = vxor.u32 %v4552_v35, %v12085_v20  ;;  %v4594_v21 = vxor.u32 %v4554_v4, %v12088_v11  ;;  %v12241_v23 = vmul.f32 %v4564_v49, %v11955_v51 }
 0x3cb   : > { %14672 = vst [vmem:[#allocation46_spill] sm:$0xff] %v12230_v8  ;;  %14673 = vst [vmem:[#allocation47_spill] sm:$0xff] %v12234_v41  ;;  %v12244_v58 = vmul.f32 %v4566_v62, %v14675_v63  ;;  %v12246_v52 = vand.u32 255, %v4591_v40  ;;  %v12251_v53 = vmul.f32 %v4568_v22, %v11967_v3  ;;  %v12254_v48 = vmul.f32 %v4570_v27, %v11970_v28 }
 0x3cc   : > { %14674 = vst [vmem:[#allocation48_spill] sm:$0xff] %v12241_v23  ;;  %v12248_v44 = vand.u32 255, %v4592_v1  ;;  %v12256_v37 = vand.u32 255, %v4593_v24  ;;  %v12258_v20 = vand.u32 255, %v4594_v21  ;;  %v4603_v51 = vxor.u32 %v4548_v16, %v12131_v54 }
 0x3cd   : > { %14677 = vst [vmem:[#allocation50_spill] sm:$0xff] %v12251_v53  ;;  %14678 = vst [vmem:[#allocation51_spill] sm:$0xff] %v12254_v48  ;;  %v4604_v11 = vxor.u32 %v4550_v25, %v12136_v33  ;;  %v4605_v5 = vxor.u32 %v4552_v35, %v12141_v56  ;;  %v4606_v0 = vxor.u32 %v4554_v4, %v12146_v45  ;;  %v12284_v45 = vmov 0.0  }
 0x3ce   : > { %14676 = vst [vmem:[#allocation49_spill] sm:$0xff] %v12248_v44  ;;  %14679 = vst [vmem:[#allocation52_spill] sm:$0xff] %v12258_v20  ;;  %v12265_v12 = vmul.f32 %v4564_v49, %v11933_v34  ;;  %v12268_v3 = vmul.f32 %v4566_v62, %v11936_v50  ;;  %v12270_v28 = vand.u32 255, %v4603_v51  ;;  %v12275_v40 = vmul.f32 %v4568_v22, %v11939_v59 }
 0x3cf   : > { %v12272_v46 = vand.u32 255, %v4604_v11  ;;  %v12278_v54 = vmul.f32 %v4570_v27, %v11942_v43  ;;  %v12280_v33 = vand.u32 255, %v4605_v5  ;;  %v12282_v56 = vand.u32 255, %v4606_v0 }
 0x3d0   : > { %14680 = vst [vmem:[#allocation53_spill] sm:$0xff] %v12265_v12  ;;  %14681 = vst [vmem:[#allocation54_spill] sm:$0xff] %v12268_v3  ;;  %v12286_v34 = vmov 0.0   ;;  %v12288_v50 = vmov 0.0   ;;  %v12290_v4 = vmov 0.0   ;;  %v12292_v16 = vmov 0.0  }
 0x3d1   : > { %14682 = vst [vmem:[#allocation55_spill] sm:$0xff] %v12270_v28  ;;  %14683 = vst [vmem:[#allocation56_spill] sm:$0xff] %v12275_v40  ;;  %v12294_v25 = vmov 0.0   ;;  %v12296_v59 = vmov 0.0   ;;  %v12298_v43 = vmov 0.0  }
 0x3d2   : > { %14684 = vst [vmem:[#allocation57_spill] sm:$0xff] %v12278_v54  ;;  %14685 = vst [vmem:[#allocation58_spill] sm:$0xff] %v12280_v33 }
 0x3d3   : > { %14686 = vst [vmem:[#allocation59_spill] sm:$0xff] %v12282_v56 }
 0x3d4 LB: >> { %v14688_v39 = vld [vmem:[#allocation37_spill] sm:$0xff]  ;;  %v14689_v32 = vld [vmem:[#allocation32_spill] sm:$0xff]  ;;  %v14696_v17 = vld [vmem:[#allocation23_spill] sm:$0xff]  ;;  %14705 = vst [vmem:[#allocation81_spill] sm:$0xff] %v9565_v45  ;;  %s8804_s24 = sshll.u32 %s9597_s23, 4  ;;  %s8805_s25 = sshll.u32 %s9597_s23, 1  ;;  %s9597_s23 = sphi %s12300_s23, %s4620_s23   ;;  %v9593_v43 = vphi %v12298_v43, %v14777_v43   ;;  %v9589_v59 = vphi %v12296_v59, %v14776_v59   ;;  %v9585_v25 = vphi %v12294_v25, %v14775_v25   ;;  %v9581_v16 = vphi %v12292_v16, %v14774_v16   ;;  %v9577_v4 = vphi %v12290_v4, %v14773_v4   ;;  %v9573_v50 = vphi %v12288_v50, %v14772_v50   ;;  %v9569_v34 = vphi %v12286_v34, %v14771_v34   ;;  %v9565_v45 = vphi %v12284_v45, %v14770_v45  }
 0x3d5   : >> { %v14687_v44 = vld [vmem:[#allocation49_spill] sm:$0xff]  ;;  %v14690_v31 = vld [vmem:[#allocation44_spill] sm:$0xff]  ;;  %v14697_v14 = vld [vmem:[#allocation42_spill] sm:$0xff]  ;;  %14706 = vst [vmem:[#allocation82_spill] sm:$0xff] %v9569_v34  ;;  %s8634_s29 = scalar_lea.vmem %s14036_s1, %s8805_s25  ;;  %s4620_s23 = sadd.s32 1, %s9597_s23  }
 0x3d6   : >> { %v14691_v30 = vld [vmem:[#allocation36_spill] sm:$0xff]  ;;  %v14692_v29 = vld [vmem:[#allocation41_spill] sm:$0xff]  ;;  %v14701_v7 = vld [vmem:[#allocation26_spill] sm:$0xff]  ;;  %14707 = vst [vmem:[#allocation83_spill] sm:$0xff] %v9573_v50  ;;  %p4617_p13 = scmp.ge.s32.totalorder %s4620_s23, 16  }
 0x3d7   : >> { %v14694_v23 = vld [vmem:[#allocation48_spill] sm:$0xff]  ;;  %v14698_v13 = vld [vmem:[#allocation25_spill] sm:$0xff]  ;;  %v14702_v6 = vld [vmem:[#allocation39_spill] sm:$0xff]  ;;  %14708 = vst [vmem:[#allocation84_spill] sm:$0xff] %v9577_v4  ;;  %s13365_s30 = smov (%p4617_p13), 0  }
 0x3d8   : >> { %v14693_v28 = vld [vmem:[#allocation55_spill] sm:$0xff]  ;;  %v14695_v18 = vld [vmem:[#allocation24_spill] sm:$0xff]  ;;  %v14699_v12 = vld [vmem:[#allocation53_spill] sm:$0xff]  ;;  %14709 = vst [vmem:[#allocation85_spill] sm:$0xff] %v9581_v16 }
 0x3d9   : >> { %v14700_v10 = vld [vmem:[#allocation45_spill] sm:$0xff]  ;;  %v14703_v3 = vld [vmem:[#allocation54_spill] sm:$0xff]  ;;  %14710 = vst [vmem:[#allocation86_spill] sm:$0xff] %v9585_v25  ;;  %14711 = vst [vmem:[#allocation87_spill] sm:$0xff] %v9589_v59  ;;  %v4630_v25 = vstv %s8804_s24 }
 0x3da   : >> { %v14704_v2 = vld [vmem:[#allocation33_spill] sm:$0xff]  ;;  %14712 = vst [vmem:[#allocation88_spill] sm:$0xff] %v9593_v43  ;;  %v14713_v35 = vld [vmem:[#allocation72_spill] sm:$0xff]  ;;  %v14718_v45 = vld [vmem:[#allocation71_spill] sm:$0xff] }
 0x3db   : >> { %v14714_v49 = vld [vmem:[#allocation61_spill] sm:$0xff]  ;;  %v4828_v1 = vrot.slane %v14696_v17, %v14713_v35  ;;  %v5016_v63 = vrot.slane %v14698_v13, %v14713_v35  ;;  %v5204_v5 = vrot.slane %v14691_v30, %v14713_v35  ;;  %v5288_v0 = vrot.slane %v14689_v32, %v14713_v35  ;;  %v14720_v20 = vld [vmem:[#allocation6_spill] sm:$0xff] }
 0x3dc   : >> { %v4640_v62 = vrot.slane %v14714_v49, %v14713_v35  ;;  %v14715_v22 = vld [vmem:[#allocation13_spill] sm:$0xff]  ;;  %v12357_v8 = vadd.s32 %v4630_v25, %v14720_v20 }
 0x3dd   : >> { %v4724_v27 = vrot.slane %v14715_v22, %v14713_v35  ;;  %v14716_v24 = vld [vmem:[#allocation17_spill] sm:$0xff]  ;;  %v4860_v4 = vrot.slane %v4828_v1, %v14718_v45  ;;  %v5048_v59 = vrot.slane %v5016_v63, %v14718_v45  ;;  %v5236_v54 = vrot.slane %v5204_v5, %v14718_v45 }
 0x3de   : >> { %v4912_v21 = vrot.slane %v14716_v24, %v14713_v35  ;;  %v14717_v51 = vld [vmem:[#allocation21_spill] sm:$0xff]  ;;  %v4672_v34 = vrot.slane %v4640_v62, %v14718_v45  ;;  %v5328_v62 = vrot.slane %v5288_v0, %v14718_v45  ;;  %v5476_v1 = vrot.slane %v14692_v29, %v14713_v35 }
 0x3df   : >> { %v5100_v11 = vrot.slane %v14717_v51, %v14713_v35  ;;  %v4764_v50 = vrot.slane %v4724_v27, %v14718_v45  ;;  %v14719_v56 = vld [vmem:[#allocation5_spill] sm:$0xff]  ;;  %v5392_v27 = vrot.slane %v12192_v57, %v14713_v35  ;;  %v5664_v63 = vrot.slane %v14690_v31, %v14713_v35 }
 0x3e0   : >> { %v4952_v16 = vrot.slane %v4912_v21, %v14718_v45  ;;  %v12354_v48 = vadd.s32 %v4630_v25, %v14719_v56  ;;  %v5580_v21 = vrot.slane %v14700_v10, %v14713_v35  ;;  %v5768_v56 = vrot.slane %v12246_v52, %v14713_v35 }
 0x3e1   : >> { %v5140_v43 = vrot.slane %v5100_v11, %v14718_v45  ;;  %vm4706_vm0 = vcmp.eq.s32.totalorder %v12357_v8, %v4672_v34  ;;  %vm4894_vm2 = vcmp.eq.s32.totalorder %v12357_v8, %v4860_v4  ;;  %vm5082_vm4 = vcmp.eq.s32.totalorder %v12357_v8, %v5048_v59 }
 0x3e2   : >> { %vm4698_vm15 = vcmp.eq.s32.totalorder %v12354_v48, %v4672_v34  ;;  %vm4886_vm1 = vcmp.eq.s32.totalorder %v12354_v48, %v4860_v4  ;;  %v4798_v25 = vsel %vm4706_vm0, %v4764_v50, 0.0  ;;  %v4986_v5 = vsel %vm4894_vm2, %v4952_v16, 0.0 }
 0x3e3   : >> { %v4790_v20 = vsel %vm4698_vm15, %v4764_v50, 0.0  ;;  %v4978_v11 = vsel %vm4886_vm1, %v4952_v16, 0.0  ;;  %v5002_v41 = vadd.f32 %v4986_v5, %v4798_v25  ;;  %vm5074_vm3 = vcmp.eq.s32.totalorder %v12354_v48, %v5048_v59 }
 0x3e4   : >> { %v4994_v0 = vadd.f32 %v4978_v11, %v4790_v20  ;;  %v5166_v42 = vsel %vm5074_vm3, %v5140_v43, 0.0  ;;  %v5174_v61 = vsel %vm5082_vm4, %v5140_v43, 0.0  ;;  %vm5262_vm5 = vcmp.eq.s32.totalorder %v12354_v48, %v5236_v54 }
 0x3e5   : >> { %vm5270_vm6 = vcmp.eq.s32.totalorder %v12357_v8, %v5236_v54  ;;  %v5190_v19 = vadd.f32 %v5174_v61, %v5002_v41  ;;  %v5354_v40 = vsel %vm5262_vm5, %v5328_v62, 0.0  ;;  %v5424_v50 = vrot.slane %v5392_v27, %v14718_v45 }
 0x3e6   : >> { %v5182_v34 = vadd.f32 %v5166_v42, %v4994_v0  ;;  %v5362_v4 = vsel %vm5270_vm6, %v5328_v62, 0.0  ;;  %v5516_v16 = vrot.slane %v5476_v1, %v14718_v45  ;;  %v5612_v20 = vrot.slane %v5580_v21, %v14718_v45  ;;  %v14721_v21 = vld [vmem:[#allocation62_spill] sm:$0xff] }
 0x3e7   : >> { %v5704_v25 = vrot.slane %v5664_v63, %v14718_v45  ;;  %v5378_v59 = vadd.f32 %v5362_v4, %v5190_v19  ;;  %v5800_v43 = vrot.slane %v5768_v56, %v14718_v45  ;;  %v5852_v5 = vrot.slane %v14694_v23, %v14713_v35 }
 0x3e8   : >> { %v5370_v11 = vadd.f32 %v5354_v40, %v5182_v34  ;;  %vm5450_vm7 = vcmp.eq.s32.totalorder %v12354_v48, %v5424_v50  ;;  %vm5458_vm8 = vcmp.eq.s32.totalorder %v12357_v8, %v5424_v50  ;;  %vm5638_vm9 = vcmp.eq.s32.totalorder %v12354_v48, %v5612_v20  ;;  %v14722_v34 = vld [vmem:[#allocation14_spill] sm:$0xff] }
 0x3e9   : >> { %vm5646_vm10 = vcmp.eq.s32.totalorder %v12357_v8, %v5612_v20  ;;  %v5542_v61 = vsel %vm5450_vm7, %v5516_v16, 0.0  ;;  %v5550_v42 = vsel %vm5458_vm8, %v5516_v16, 0.0  ;;  %v5730_v41 = vsel %vm5638_vm9, %v5704_v25, 0.0 }
 0x3ea   : >> { %v5738_v54 = vsel %vm5646_vm10, %v5704_v25, 0.0  ;;  %v5558_v62 = vadd.f32 %v5542_v61, %v5370_v11  ;;  %v5566_v40 = vadd.f32 %v5550_v42, %v5378_v59  ;;  %vm5826_vm11 = vcmp.eq.s32.totalorder %v12354_v48, %v5800_v43 }
 0x3eb   : >> { %vm5834_vm12 = vcmp.eq.s32.totalorder %v12357_v8, %v5800_v43  ;;  %v5892_v19 = vrot.slane %v5852_v5, %v14718_v45  ;;  %v5956_v27 = vrot.slane %v14693_v28, %v14713_v35  ;;  %v6040_v1 = vrot.slane %v14699_v12, %v14713_v35 }
 0x3ec   : >> { %v4648_v63 = vrot.slane %v14721_v21, %v14713_v35  ;;  %v5746_v56 = vadd.f32 %v5730_v41, %v5558_v62  ;;  %v5754_v0 = vadd.f32 %v5738_v54, %v5566_v40  ;;  %v14723_v20 = vmov %v14722_v34  ;;  %v14724_v54 = vld [vmem:[#allocation18_spill] sm:$0xff] }
 0x3ed   : >> { %v4732_v4 = vrot.slane %v14722_v34, %v14713_v35  ;;  %v4836_v50 = vrot.slane %v14695_v18, %v14713_v35  ;;  %v5918_v16 = vsel %vm5826_vm11, %v5892_v19, 0.0  ;;  %v5926_v25 = vsel %vm5834_vm12, %v5892_v19, 0.0 }
 0x3ee   : >> { %v5988_v11 = vrot.slane %v5956_v27, %v14718_v45  ;;  %v6080_v59 = vrot.slane %v6040_v1, %v14718_v45  ;;  %v5934_v43 = vadd.f32 %v5918_v16, %v5746_v56  ;;  %v5942_v5 = vadd.f32 %v5926_v25, %v5754_v0 }
 0x3ef   : >> { %v4680_v61 = vrot.slane %v4648_v63, %v14718_v45  ;;  %v4772_v42 = vrot.slane %v4732_v4, %v14718_v45  ;;  %v4868_v41 = vrot.slane %v4836_v50, %v14718_v45  ;;  %v4920_v62 = vrot.slane %v14724_v54, %v14713_v35  ;;  %v14725_v50 = vld [vmem:[#allocation22_spill] sm:$0xff] }
 0x3f0   : >> { %vm6014_vm13 = vcmp.eq.s32.totalorder %v12354_v48, %v5988_v11  ;;  %vm6022_vm15 = vcmp.eq.s32.totalorder %v12357_v8, %v5988_v11  ;;  %v5024_v34 = vrot.slane %v14701_v7, %v14713_v35  ;;  %v14726_v11 = vmov %v14725_v50 }
 0x3f1   : >> { %v6106_v40 = vsel %vm6014_vm13, %v6080_v59, 0.0  ;;  %v6114_v19 = vsel %vm6022_vm15, %v6080_v59, 0.0  ;;  %vm4700_vm0 = vcmp.eq.s32.totalorder %v12354_v48, %v4680_v61  ;;  %vm4708_vm1 = vcmp.eq.s32.totalorder %v12357_v8, %v4680_v61 }
 0x3f2   : >> { %v6122_v27 = vadd.f32 %v6106_v40, %v5934_v43  ;;  %v6130_v1 = vadd.f32 %v6114_v19, %v5942_v5  ;;  %v4792_v63 = vsel %vm4700_vm0, %v4772_v42, 0.0  ;;  %v4800_v56 = vsel %vm4708_vm1, %v4772_v42, 0.0 }
 0x3f3   : >> { %vm4888_vm2 = vcmp.eq.s32.totalorder %v12354_v48, %v4868_v41  ;;  %vm4896_vm3 = vcmp.eq.s32.totalorder %v12357_v8, %v4868_v41  ;;  %v4960_v0 = vrot.slane %v4920_v62, %v14718_v45  ;;  %v5108_v16 = vrot.slane %v14725_v50, %v14713_v35 }
 0x3f4   : >> { %v8856_v4 = vpack.c.bf16 %v6130_v1, %v6122_v27  ;;  %v5212_v25 = vrot.slane %v14688_v39, %v14713_v35  ;;  %v5296_v59 = vrot.slane %v14704_v2, %v14713_v35  ;;  %v5056_v61 = vrot.slane %v5024_v34, %v14718_v45 }
 0x3f5   : >> { %v4980_v43 = vsel %vm4888_vm2, %v4960_v0, 0.0  ;;  %v4988_v5 = vsel %vm4896_vm3, %v4960_v0, 0.0  ;;  %v5400_v42 = vrot.slane %v14702_v6, %v14713_v35  ;;  %v5148_v40 = vrot.slane %v5108_v16, %v14718_v45 }
 0x3f6   : >> { %8857 = vmatprep.subr.bf16.mxu0 %v8856_v4  ;;  %v4996_v41 = vadd.f32 %v4980_v43, %v4792_v63  ;;  %v5004_v62 = vadd.f32 %v4988_v5, %v4800_v56  ;;  %v5244_v19 = vrot.slane %v5212_v25, %v14718_v45  ;;  %vm5076_vm4 = vcmp.eq.s32.totalorder %v12354_v48, %v5056_v61 }
 0x3f7   : >> { %vm5084_vm5 = vcmp.eq.s32.totalorder %v12357_v8, %v5056_v61  ;;  %v5336_v27 = vrot.slane %v5296_v59, %v14718_v45  ;;  %v5432_v1 = vrot.slane %v5400_v42, %v14718_v45  ;;  %v5168_v0 = vsel %vm5076_vm4, %v5148_v40, 0.0 }
 0x3f8   : >> { %v5176_v34 = vsel %vm5084_vm5, %v5148_v40, 0.0  ;;  %vm5264_vm6 = vcmp.eq.s32.totalorder %v12354_v48, %v5244_v19  ;;  %vm5272_vm7 = vcmp.eq.s32.totalorder %v12357_v8, %v5244_v19  ;;  %v5184_v63 = vadd.f32 %v5168_v0, %v4996_v41 }
 0x3f9   : >> { %v5192_v56 = vadd.f32 %v5176_v34, %v5004_v62  ;;  %v5356_v4 = vsel %vm5264_vm6, %v5336_v27, 0.0  ;;  %v5364_v50 = vsel %vm5272_vm7, %v5336_v27, 0.0  ;;  %vm5452_vm8 = vcmp.eq.s32.totalorder %v12354_v48, %v5432_v1 }
 0x3fa   : >> { %vm5460_vm9 = vcmp.eq.s32.totalorder %v12357_v8, %v5432_v1  ;;  %v5484_v16 = vrot.slane %v14697_v14, %v14713_v35  ;;  %v5588_v25 = vrot.slane %v12224_v60, %v14713_v35  ;;  %v5372_v59 = vadd.f32 %v5356_v4, %v5184_v63 }
 0x3fb   : >> { %v5380_v43 = vadd.f32 %v5364_v50, %v5192_v56  ;;  %v5672_v5 = vrot.slane %v12220_v55, %v14713_v35  ;;  %v5776_v61 = vrot.slane %v14687_v44, %v14713_v35  ;;  %v5860_v62 = vrot.slane %v12244_v58, %v14713_v35 }
 0x3fc   : >> { %v5524_v42 = vrot.slane %v5484_v16, %v14718_v45  ;;  %v5620_v41 = vrot.slane %v5588_v25, %v14718_v45  ;;  %v5964_v40 = vrot.slane %v12272_v46, %v14713_v35  ;;  %v6048_v0 = vrot.slane %v14703_v3, %v14713_v35 }
 0x3fd   : >> { %v5712_v19 = vrot.slane %v5672_v5, %v14718_v45  ;;  %v5808_v27 = vrot.slane %v5776_v61, %v14718_v45  ;;  %v4636_v34 = vrot.slane %v14714_v49, %v14718_v45  ;;  %v5900_v5 = vrot.slane %v5860_v62, %v14718_v45 }
 0x3fe   : >> { %v5544_v63 = vsel %vm5452_vm8, %v5524_v42, 0.0  ;;  %v5552_v56 = vsel %vm5460_vm9, %v5524_v42, 0.0  ;;  %vm5640_vm10 = vcmp.eq.s32.totalorder %v12354_v48, %v5620_v41  ;;  %vm5648_vm11 = vcmp.eq.s32.totalorder %v12357_v8, %v5620_v41 }
 0x3ff   : >> { %v5560_v4 = vadd.f32 %v5544_v63, %v5372_v59  ;;  %v5568_v50 = vadd.f32 %v5552_v56, %v5380_v43  ;;  %v5732_v16 = vsel %vm5640_vm10, %v5712_v19, 0.0  ;;  %v5740_v25 = vsel %vm5648_vm11, %v5712_v19, 0.0 }
 0x400   : >> { %vm5828_vm12 = vcmp.eq.s32.totalorder %v12354_v48, %v5808_v27  ;;  %vm5836_vm13 = vcmp.eq.s32.totalorder %v12357_v8, %v5808_v27  ;;  %v5996_v61 = vrot.slane %v5964_v40, %v14718_v45  ;;  %v6088_v1 = vrot.slane %v6048_v0, %v14718_v45 }
 0x401   : >> { %v5748_v49 = vadd.f32 %v5732_v16, %v5560_v4  ;;  %v5756_v33 = vadd.f32 %v5740_v25, %v5568_v50  ;;  %v4668_v42 = vrot.slane %v4636_v34, %v14718_v45  ;;  %v5920_v53 = vsel %vm5828_vm12, %v5900_v5, 0.0 }
 0x402   : >> { %v5928_v41 = vsel %vm5836_vm13, %v5900_v5, 0.0  ;;  %vm6016_vm15 = vcmp.eq.s32.totalorder %v12354_v48, %v5996_v61  ;;  %vm6024_vm0 = vcmp.eq.s32.totalorder %v12357_v8, %v5996_v61  ;;  %v4720_v62 = vrot.slane %v14715_v22, %v14718_v45 }
 0x403   : >> { %v5936_v59 = vadd.f32 %v5920_v53, %v5748_v49  ;;  %v5944_v43 = vadd.f32 %v5928_v41, %v5756_v33  ;;  %v6108_v19 = vsel %vm6016_vm15, %v6088_v1, 0.0  ;;  %v6116_v27 = vsel %vm6024_vm0, %v6088_v1, 0.0 }
 0x404   : >> { %vm4697_vm1 = vcmp.eq.s32.totalorder %v12354_v48, %v4668_v42  ;;  %vm4705_vm2 = vcmp.eq.s32.totalorder %v12357_v8, %v4668_v42  ;;  %v4824_v40 = vrot.slane %v14696_v17, %v14718_v45  ;;  %v4908_v63 = vrot.slane %v14716_v24, %v14718_v45 }
 0x405   : >> { %v6124_v0 = vadd.f32 %v6108_v19, %v5936_v59  ;;  %v6132_v34 = vadd.f32 %v6116_v27, %v5944_v43  ;;  %v5012_v53 = vrot.slane %v14698_v13, %v14718_v45  ;;  %v4760_v33 = vrot.slane %v4720_v62, %v14718_v45 }
 0x406   : >> { %v4856_v49 = vrot.slane %v4824_v40, %v14718_v45  ;;  %v5096_v56 = vrot.slane %v14717_v51, %v14718_v45  ;;  %v5200_v4 = vrot.slane %v14691_v30, %v14718_v45  ;;  %v4948_v16 = vrot.slane %v4908_v63, %v14718_v45 }
 0x407   : >> { %v8860_v50 = vpack.c.bf16 %v6132_v34, %v6124_v0  ;;  %v5044_v25 = vrot.slane %v5012_v53, %v14718_v45  ;;  %v5284_v5 = vrot.slane %v14689_v32, %v14718_v45  ;;  %v4789_v61 = vsel %vm4697_vm1, %v4760_v33, 0.0 }
 0x408   : >> { %v4797_v1 = vsel %vm4705_vm2, %v4760_v33, 0.0  ;;  %vm4885_vm3 = vcmp.eq.s32.totalorder %v12354_v48, %v4856_v49  ;;  %vm4893_vm4 = vcmp.eq.s32.totalorder %v12357_v8, %v4856_v49  ;;  %v5136_v27 = vrot.slane %v5096_v56, %v14718_v45 }
 0x409   : >> { %8861 = vmatprep.subr.bf16.mxu1 %v8860_v50  ;;  %v4977_v41 = vsel %vm4885_vm3, %v4948_v16, 0.0  ;;  %v4985_v59 = vsel %vm4893_vm4, %v4948_v16, 0.0  ;;  %vm5073_vm5 = vcmp.eq.s32.totalorder %v12354_v48, %v5044_v25  ;;  %vm5081_vm6 = vcmp.eq.s32.totalorder %v12357_v8, %v5044_v25 }
 0x40a   : >> { %v4993_v43 = vadd.f32 %v4977_v41, %v4789_v61  ;;  %v5001_v19 = vadd.f32 %v4985_v59, %v4797_v1  ;;  %v5232_v62 = vrot.slane %v5200_v4, %v14718_v45  ;;  %v5324_v42 = vrot.slane %v5284_v5, %v14718_v45 }
 0x40b   : >> { %v5388_v40 = vrot.slane %v12192_v57, %v14718_v45  ;;  %v5472_v0 = vrot.slane %v14692_v29, %v14718_v45  ;;  %v5576_v34 = vrot.slane %v14700_v10, %v14718_v45  ;;  %v5165_v63 = vsel %vm5073_vm5, %v5136_v27, 0.0  ;;  %v14780_v57 = vld [vmem:[#allocation9_spill] sm:$0xff] (%p4617_p13) }
 0x40c   : >> { %v5173_v53 = vsel %vm5081_vm6, %v5136_v27, 0.0  ;;  %vm5261_vm7 = vcmp.eq.s32.totalorder %v12354_v48, %v5232_v62  ;;  %vm5269_vm8 = vcmp.eq.s32.totalorder %v12357_v8, %v5232_v62  ;;  %v5181_v33 = vadd.f32 %v5165_v63, %v4993_v43 }
 0x40d   : >> { %v5189_v49 = vadd.f32 %v5173_v53, %v5001_v19  ;;  %v5353_v56 = vsel %vm5261_vm7, %v5324_v42, 0.0  ;;  %v5361_v4 = vsel %vm5269_vm8, %v5324_v42, 0.0  ;;  %v5420_v50 = vrot.slane %v5388_v40, %v14718_v45 }
 0x40e   : >> { %v5512_v16 = vrot.slane %v5472_v0, %v14718_v45  ;;  %v5608_v25 = vrot.slane %v5576_v34, %v14718_v45  ;;  %v5660_v5 = vrot.slane %v14690_v31, %v14718_v45  ;;  %v5369_v61 = vadd.f32 %v5353_v56, %v5181_v33  ;;  %v14759_v31 = vld [vmem:[#allocation51_spill] sm:$0xff] }
 0x40f   : >> { %v5377_v1 = vadd.f32 %v5361_v4, %v5189_v49  ;;  %v5764_v41 = vrot.slane %v12246_v52, %v14718_v45  ;;  %v5848_v59 = vrot.slane %v14694_v23, %v14718_v45  ;;  %vm5449_vm9 = vcmp.eq.s32.totalorder %v12354_v48, %v5420_v50 }
 0x410   : >> { %vm5457_vm10 = vcmp.eq.s32.totalorder %v12357_v8, %v5420_v50  ;;  %vm5637_vm11 = vcmp.eq.s32.totalorder %v12354_v48, %v5608_v25  ;;  %vm5645_vm12 = vcmp.eq.s32.totalorder %v12357_v8, %v5608_v25  ;;  %v5541_v43 = vsel %vm5449_vm9, %v5512_v16, 0.0 }
 0x411   : >> { %v5549_v19 = vsel %vm5457_vm10, %v5512_v16, 0.0  ;;  %v5700_v27 = vrot.slane %v5660_v5, %v14718_v45  ;;  %v5796_v62 = vrot.slane %v5764_v41, %v14718_v45  ;;  %v5557_v42 = vadd.f32 %v5541_v43, %v5369_v61 }
 0x412   : >> { %v5565_v40 = vadd.f32 %v5549_v19, %v5377_v1  ;;  %v5888_v0 = vrot.slane %v5848_v59, %v14718_v45  ;;  %v5952_v34 = vrot.slane %v14693_v28, %v14718_v45  ;;  %v6036_v16 = vrot.slane %v14699_v12, %v14718_v45  ;;  %v14741_v12 = vld [vmem:[#allocation12_spill] sm:$0xff] }
 0x413   : >> { %v5729_v63 = vsel %vm5637_vm11, %v5700_v27, 0.0  ;;  %v5737_v53 = vsel %vm5645_vm12, %v5700_v27, 0.0  ;;  %vm5825_vm13 = vcmp.eq.s32.totalorder %v12354_v48, %v5796_v62  ;;  %vm5833_vm15 = vcmp.eq.s32.totalorder %v12357_v8, %v5796_v62 }
 0x414   : >> { %v5745_v33 = vadd.f32 %v5729_v63, %v5557_v42  ;;  %v5753_v49 = vadd.f32 %v5737_v53, %v5565_v40  ;;  %v5917_v56 = vsel %vm5825_vm13, %v5888_v0, 0.0  ;;  %v5925_v4 = vsel %vm5833_vm15, %v5888_v0, 0.0 }
 0x415   : >> { %v5984_v50 = vrot.slane %v5952_v34, %v14718_v45  ;;  %v4644_v25 = vrot.slane %v14721_v21, %v14718_v45  ;;  %v4728_v5 = vrot.slane %v14723_v20, %v14718_v45  ;;  %v4832_v41 = vrot.slane %v14695_v18, %v14718_v45  ;;  %v14750_v21 = vld [vmem:[#allocation38_spill] sm:$0xff] }
 0x416   : >> { %v5933_v61 = vadd.f32 %v5917_v56, %v5745_v33  ;;  %v5941_v1 = vadd.f32 %v5925_v4, %v5753_v49  ;;  %v4916_v59 = vrot.slane %v14724_v54, %v14718_v45  ;;  %v6076_v43 = vrot.slane %v6036_v16, %v14718_v45 }
 0x417   : >> { %vm6013_vm0 = vcmp.eq.s32.totalorder %v12354_v48, %v5984_v50  ;;  %vm6021_vm1 = vcmp.eq.s32.totalorder %v12357_v8, %v5984_v50  ;;  %v4676_v19 = vrot.slane %v4644_v25, %v14718_v45  ;;  %v4768_v27 = vrot.slane %v4728_v5, %v14718_v45 }
 0x418   : >> { %v4864_v62 = vrot.slane %v4832_v41, %v14718_v45  ;;  %v4956_v42 = vrot.slane %v4916_v59, %v14718_v45  ;;  %v5020_v40 = vrot.slane %v14701_v7, %v14718_v45  ;;  %v6105_v0 = vsel %vm6013_vm0, %v6076_v43, 0.0 }
 0x419   : >> { %v6113_v34 = vsel %vm6021_vm1, %v6076_v43, 0.0  ;;  %vm4699_vm2 = vcmp.eq.s32.totalorder %v12354_v48, %v4676_v19  ;;  %vm4707_vm3 = vcmp.eq.s32.totalorder %v12357_v8, %v4676_v19  ;;  %v6121_v63 = vadd.f32 %v6105_v0, %v5933_v61 }
 0x41a   : >> { %v6129_v53 = vadd.f32 %v6113_v34, %v5941_v1  ;;  %v4791_v33 = vsel %vm4699_vm2, %v4768_v27, 0.0  ;;  %v4799_v49 = vsel %vm4707_vm3, %v4768_v27, 0.0  ;;  %vm4887_vm4 = vcmp.eq.s32.totalorder %v12354_v48, %v4864_v62 }
 0x41b   : >> { %vm4895_vm5 = vcmp.eq.s32.totalorder %v12357_v8, %v4864_v62  ;;  %v5052_v56 = vrot.slane %v5020_v40, %v14718_v45  ;;  %v5104_v4 = vrot.slane %v14726_v11, %v14718_v45  ;;  %v4979_v16 = vsel %vm4887_vm4, %v4956_v42, 0.0 }
 0x41c   : >> { %v8858_v50 = vpack.c.bf16 %v6129_v53, %v6121_v63  ;;  %v4987_v25 = vsel %vm4895_vm5, %v4956_v42, 0.0  ;;  %v5208_v5 = vrot.slane %v14688_v39, %v14718_v45  ;;  %v4995_v41 = vadd.f32 %v4979_v16, %v4791_v33 }
 0x41d   : >> { %v5003_v61 = vadd.f32 %v4987_v25, %v4799_v49  ;;  %vm5075_vm6 = vcmp.eq.s32.totalorder %v12354_v48, %v5052_v56  ;;  %vm5083_vm7 = vcmp.eq.s32.totalorder %v12357_v8, %v5052_v56  ;;  %v5144_v1 = vrot.slane %v5104_v4, %v14718_v45 }
 0x41e   : >> { %8859 = vmatpush1.bf16.msra.mxu0 %v8858_v50  ;;  %v5240_v59 = vrot.slane %v5208_v5, %v14718_v45  ;;  %v5292_v43 = vrot.slane %v14704_v2, %v14718_v45  ;;  %v5396_v19 = vrot.slane %v14702_v6, %v14718_v45  ;;  %v5480_v27 = vrot.slane %v14697_v14, %v14718_v45 }
 0x41f   : >> { %v5584_v62 = vrot.slane %v12224_v60, %v14718_v45  ;;  %v5668_v42 = vrot.slane %v12220_v55, %v14718_v45  ;;  %v5772_v40 = vrot.slane %v14687_v44, %v14718_v45  ;;  %v5167_v0 = vsel %vm5075_vm6, %v5144_v1, 0.0 }
 0x420   : >> { %v5175_v34 = vsel %vm5083_vm7, %v5144_v1, 0.0  ;;  %vm5263_vm8 = vcmp.eq.s32.totalorder %v12354_v48, %v5240_v59  ;;  %vm5271_vm9 = vcmp.eq.s32.totalorder %v12357_v8, %v5240_v59  ;;  %v5183_v63 = vadd.f32 %v5167_v0, %v4995_v41 }
 0x421   : >> { %v5191_v53 = vadd.f32 %v5175_v34, %v5003_v61  ;;  %v5332_v33 = vrot.slane %v5292_v43, %v14718_v45  ;;  %v5428_v49 = vrot.slane %v5396_v19, %v14718_v45  ;;  %v5520_v56 = vrot.slane %v5480_v27, %v14718_v45 }
 0x422   : >> { %v5616_v4 = vrot.slane %v5584_v62, %v14718_v45  ;;  %v5708_v50 = vrot.slane %v5668_v42, %v14718_v45  ;;  %v5804_v16 = vrot.slane %v5772_v40, %v14718_v45  ;;  %v12593_v42 = vld [vmem:[%s8634_s29 + $0x40] sm:$0x3]  ;;  %v5856_v40 = vrot.slane %v12244_v58, %v14718_v45 }
 0x423   : >> { %v5355_v25 = vsel %vm5263_vm8, %v5332_v33, 0.0  ;;  %v5363_v5 = vsel %vm5271_vm9, %v5332_v33, 0.0  ;;  %vm5451_vm10 = vcmp.eq.s32.totalorder %v12354_v48, %v5428_v49  ;;  %vm5459_vm11 = vcmp.eq.s32.totalorder %v12357_v8, %v5428_v49  ;;  %v14727_v49 = vld [vmem:[#allocation11_spill] sm:$0xff] }
 0x424   : >> { %v5371_v41 = vadd.f32 %v5355_v25, %v5183_v63  ;;  %v5379_v61 = vadd.f32 %v5363_v5, %v5191_v53  ;;  %v5543_v1 = vsel %vm5451_vm10, %v5520_v56, 0.0  ;;  %v5551_v59 = vsel %vm5459_vm11, %v5520_v56, 0.0  ;;  %v14728_v5 = vld [vmem:[#allocation15_spill] sm:$0xff] }
 0x425   : >> { %vm5639_vm12 = vcmp.eq.s32.totalorder %v12354_v48, %v5616_v4  ;;  %vm5647_vm13 = vcmp.eq.s32.totalorder %v12357_v8, %v5616_v4  ;;  %vm5827_vm15 = vcmp.eq.s32.totalorder %v12354_v48, %v5804_v16  ;;  %vm5835_vm0 = vcmp.eq.s32.totalorder %v12357_v8, %v5804_v16 }
 0x426   : >> { %v5559_v43 = vadd.f32 %v5543_v1, %v5371_v41  ;;  %v5567_v19 = vadd.f32 %v5551_v59, %v5379_v61  ;;  %v5731_v27 = vsel %vm5639_vm12, %v5708_v50, 0.0  ;;  %v5739_v62 = vsel %vm5647_vm13, %v5708_v50, 0.0  ;;  %v14729_v59 = vld [vmem:[#allocation19_spill] sm:$0xff] }
 0x427   : >> { %v5960_v0 = vrot.slane %v12272_v46, %v14718_v45  ;;  %v6044_v34 = vrot.slane %v14703_v3, %v14718_v45  ;;  %v14223_v33 = vmov 0.0   ;;  %v4656_v56 = vrot.slane %v14727_v49, %v14713_v35 }
 0x428   : >> { %v5747_v63 = vadd.f32 %v5731_v27, %v5559_v43  ;;  %v5755_v53 = vadd.f32 %v5739_v62, %v5567_v19  ;;  %6209 = vmatprep.mubr.f32.mxu0 %v14223_v33  ;;  %6280 = vmatprep.mubr.f32.mxu1 %v14223_v33  ;;  %v5896_v4 = vrot.slane %v5856_v40, %v14718_v45  ;;  %v14731_v27 = vld [vmem:[#allocation28_spill] sm:$0xff] }
 0x429   : >> { %v5992_v50 = vrot.slane %v5960_v0, %v14718_v45  ;;  %v6084_v25 = vrot.slane %v6044_v34, %v14718_v45  ;;  %8807 = vmatmul.mubr.msk.f32.vlgmr.msra.gmra.mrb[0].mxu0 %vm1937_vm14, %v12593_v42  ;;  %v4740_v41 = vrot.slane %v14728_v5, %v14713_v35  ;;  %v4688_v61 = vrot.slane %v4656_v56, %v14718_v45 }
 0x42a   : >> { %v4844_v1 = vrot.slane %v12114_v38, %v14713_v35  ;;  %v14730_v19 = vmov %v14729_v59  ;;  %v4928_v43 = vrot.slane %v14729_v59, %v14713_v35  ;;  %v5032_v62 = vrot.slane %v14731_v27, %v14713_v35  ;;  %6351 = vmatprep.mubr.f32.mxu0 %v14223_v33 }
 0x42b   : >> { %v5919_v40 = vsel %vm5827_vm15, %v5896_v4, 0.0  ;;  %v5927_v0 = vsel %vm5835_vm0, %v5896_v4, 0.0  ;;  %vm6015_vm1 = vcmp.eq.s32.totalorder %v12354_v48, %v5992_v50  ;;  %vm6023_vm2 = vcmp.eq.s32.totalorder %v12357_v8, %v5992_v50 }
 0x42c   : >> { %v5935_v34 = vadd.f32 %v5919_v40, %v5747_v63  ;;  %v5943_v56 = vadd.f32 %v5927_v0, %v5755_v53  ;;  %v6107_v2 = vsel %vm6015_vm1, %v6084_v25, 0.0  ;;  %v6115_v3 = vsel %vm6023_vm2, %v6084_v25, 0.0 }
 0x42d   : >> { %vm4702_vm3 = vcmp.eq.s32.totalorder %v12354_v48, %v4688_v61  ;;  %vm4710_vm4 = vcmp.eq.s32.totalorder %v12357_v8, %v4688_v61  ;;  %v4780_v59 = vrot.slane %v4740_v41, %v14718_v45  ;;  %v4876_v33 = vrot.slane %v4844_v1, %v14718_v45 }
 0x42e   : >> { %v6123_v6 = vadd.f32 %v6107_v2, %v5935_v34  ;;  %v6131_v7 = vadd.f32 %v6115_v3, %v5943_v56  ;;  %v4968_v16 = vrot.slane %v4928_v43, %v14718_v45  ;;  %v5064_v4 = vrot.slane %v5032_v62, %v14718_v45  ;;  %v14732_v2 = vld [vmem:[#allocation30_spill] sm:$0xff] }
 0x42f   : >> { %v4794_v10 = vsel %vm4702_vm3, %v4780_v59, 0.0  ;;  %v4802_v50 = vsel %vm4710_vm4, %v4780_v59, 0.0  ;;  %vm4890_vm5 = vcmp.eq.s32.totalorder %v12354_v48, %v4876_v33  ;;  %vm4898_vm6 = vcmp.eq.s32.totalorder %v12357_v8, %v4876_v33  ;;  %v14733_v43 = vld [vmem:[#allocation34_spill] sm:$0xff] }
 0x430   : >> { %v8862_v63 = vpack.c.bf16 %v6131_v7, %v6123_v6  ;;  %v4982_v53 = vsel %vm4890_vm5, %v4968_v16, 0.0  ;;  %v4990_v25 = vsel %vm4898_vm6, %v4968_v16, 0.0  ;;  %vm5078_vm7 = vcmp.eq.s32.totalorder %v12354_v48, %v5064_v4 }
 0x431   : >> { %v4998_v41 = vadd.f32 %v4982_v53, %v4794_v10  ;;  %v5006_v61 = vadd.f32 %v4990_v25, %v4802_v50  ;;  %vm5086_vm8 = vcmp.eq.s32.totalorder %v12357_v8, %v5064_v4  ;;  %v5116_v3 = vrot.slane %v14732_v2, %v14713_v35 }
 0x432   : >> { %8863 = vmatpush1.bf16.msra.mxu1 %v8862_v63  ;;  %v5220_v1 = vrot.slane %v12180_v26, %v14713_v35  ;;  %v14734_v62 = vmov %v14733_v43  ;;  %v5304_v40 = vrot.slane %v14733_v43, %v14713_v35  ;;  %v5408_v7 = vrot.slane %v12196_v15, %v14713_v35 }
 0x433   : >> { %v5492_v6 = vrot.slane %v12207_v47, %v14713_v35  ;;  %v5156_v10 = vrot.slane %v5116_v3, %v14718_v45  ;;  %v5596_v33 = vrot.slane %v12232_v36, %v14713_v35  ;;  %v5680_v0 = vrot.slane %v12227_v9, %v14713_v35 }
 0x434   : >> { %v5784_v34 = vrot.slane %v12256_v37, %v14713_v35  ;;  %v5252_v56 = vrot.slane %v5220_v1, %v14718_v45  ;;  %v5344_v59 = vrot.slane %v5304_v40, %v14718_v45  ;;  %v5440_v16 = vrot.slane %v5408_v7, %v14718_v45 }
 0x435   : >> { %v5532_v50 = vrot.slane %v5492_v6, %v14718_v45  ;;  %8808 = vmatmul.mubr.msk.f32.vlgmr.msra.gmra.mrb[0].mxu1 %vm1937_vm14, %v12593_v42  ;;  %v5170_v63 = vsel %vm5078_vm7, %v5156_v10, 0.0  ;;  %v5178_v53 = vsel %vm5086_vm8, %v5156_v10, 0.0  ;;  %v5628_v25 = vrot.slane %v5596_v33, %v14718_v45 }
 0x436   : >> { %v5720_v3 = vrot.slane %v5680_v0, %v14718_v45  ;;  %v5186_v1 = vadd.f32 %v5170_v63, %v4998_v41  ;;  %v5194_v43 = vadd.f32 %v5178_v53, %v5006_v61  ;;  %vm5266_vm9 = vcmp.eq.s32.totalorder %v12354_v48, %v5252_v56  ;;  %v14736_v61 = vld [vmem:[#allocation50_spill] sm:$0xff] }
 0x437   : >> { %vm5274_vm10 = vcmp.eq.s32.totalorder %v12357_v8, %v5252_v56  ;;  %v14735_v40 = vmov 0.0   ;;  %v5358_v7 = vsel %vm5266_vm9, %v5344_v59, 0.0  ;;  %vm5454_vm11 = vcmp.eq.s32.totalorder %v12354_v48, %v5440_v16 }
 0x438   : >> { %6422 = vmatprep.mubr.f32.mxu1 %v14735_v40  ;;  %v5366_v6 = vsel %vm5274_vm10, %v5344_v59, 0.0  ;;  %vm5462_vm12 = vcmp.eq.s32.totalorder %v12357_v8, %v5440_v16  ;;  %v5374_v4 = vadd.f32 %v5358_v7, %v5186_v1  ;;  %v5546_v11 = vsel %vm5454_vm11, %v5532_v50, 0.0 }
 0x439   : >> { %v5382_v10 = vadd.f32 %v5366_v6, %v5194_v43  ;;  %v5554_v33 = vsel %vm5462_vm12, %v5532_v50, 0.0  ;;  %vm5642_vm13 = vcmp.eq.s32.totalorder %v12354_v48, %v5628_v25  ;;  %vm5650_vm15 = vcmp.eq.s32.totalorder %v12357_v8, %v5628_v25  ;;  %v14737_v50 = vld [vmem:[#allocation58_spill] sm:$0xff] }
 0x43a   : >> { %v5816_v41 = vrot.slane %v5784_v34, %v14718_v45  ;;  %v5868_v0 = vrot.slane %v14736_v61, %v14713_v35  ;;  %v5562_v56 = vadd.f32 %v5546_v11, %v5374_v4  ;;  %v5734_v59 = vsel %vm5642_vm13, %v5720_v3, 0.0  ;;  %v14739_v34 = vld [vmem:[#allocation56_spill] sm:$0xff] }
 0x43b   : >> { %v5570_v63 = vadd.f32 %v5554_v33, %v5382_v10  ;;  %v5742_v53 = vsel %vm5650_vm15, %v5720_v3, 0.0  ;;  %v14738_v1 = vmov %v14737_v50  ;;  %v5972_v43 = vrot.slane %v14737_v50, %v14713_v35  ;;  %v14742_v33 = vld [vmem:[#allocation16_spill] sm:$0xff] }
 0x43c   : >> { %vm5830_vm0 = vcmp.eq.s32.totalorder %v12354_v48, %v5816_v41  ;;  %vm5838_vm1 = vcmp.eq.s32.totalorder %v12357_v8, %v5816_v41  ;;  %v5908_v16 = vrot.slane %v5868_v0, %v14718_v45  ;;  %v5750_v40 = vadd.f32 %v5734_v59, %v5562_v56  ;;  %v14743_v59 = vld [vmem:[#allocation27_spill] sm:$0xff] }
 0x43d   : >> { %v5758_v25 = vadd.f32 %v5742_v53, %v5570_v63  ;;  %v14740_v7 = vmov %v14739_v34  ;;  %v6056_v6 = vrot.slane %v14739_v34, %v14713_v35  ;;  %v4664_v11 = vrot.slane %v14741_v12, %v14713_v35 }
 0x43e   : >> { %v5922_v4 = vsel %vm5830_vm0, %v5908_v16, 0.0  ;;  %v5930_v10 = vsel %vm5838_vm1, %v5908_v16, 0.0  ;;  %v6004_v3 = vrot.slane %v5972_v43, %v14718_v45  ;;  %v4748_v41 = vrot.slane %v14742_v33, %v14713_v35 }
 0x43f   : >> { %v5938_v13 = vadd.f32 %v5922_v4, %v5750_v40  ;;  %v5946_v0 = vadd.f32 %v5930_v10, %v5758_v25  ;;  %v6096_v14 = vrot.slane %v6056_v6, %v14718_v45  ;;  %v4696_v56 = vrot.slane %v4664_v11, %v14718_v45  ;;  %v14745_v4 = vld [vmem:[#allocation20_spill] sm:$0xff] }
 0x440   : >> { %vm6018_vm2 = vcmp.eq.s32.totalorder %v12354_v48, %v6004_v3  ;;  %vm6026_vm3 = vcmp.eq.s32.totalorder %v12357_v8, %v6004_v3  ;;  %v4788_v63 = vrot.slane %v4748_v41, %v14718_v45  ;;  %v14744_v53 = vmov %v14743_v59  ;;  %v14747_v41 = vld [vmem:[#allocation29_spill] sm:$0xff] }
 0x441   : >> { %v4852_v16 = vrot.slane %v14743_v59, %v14713_v35  ;;  %v6110_v50 = vsel %vm6018_vm2, %v6096_v14, 0.0  ;;  %v6118_v43 = vsel %vm6026_vm3, %v6096_v14, 0.0  ;;  %vm4704_vm4 = vcmp.eq.s32.totalorder %v12354_v48, %v4696_v56  ;;  %v14748_v59 = vld [vmem:[#allocation31_spill] sm:$0xff] }
 0x442   : >> { %vm4712_vm5 = vcmp.eq.s32.totalorder %v12357_v8, %v4696_v56  ;;  %v6126_v40 = vadd.f32 %v6110_v50, %v5938_v13  ;;  %v6134_v25 = vadd.f32 %v6118_v43, %v5946_v0  ;;  %v4796_v34 = vsel %vm4704_vm4, %v4788_v63, 0.0  ;;  %v14751_v13 = vld [vmem:[#allocation35_spill] sm:$0xff]  ;;  %v14752_v56 = vld [vmem:[#allocation40_spill] sm:$0xff] }
 0x443   : >> { %v4804_v6 = vsel %vm4712_vm5, %v4788_v63, 0.0  ;;  %v4884_v11 = vrot.slane %v4852_v16, %v14718_v45  ;;  %v14746_v10 = vmov %v14745_v4  ;;  %v4936_v3 = vrot.slane %v14745_v4, %v14713_v35 }
 0x444   : >> { %v5040_v17 = vrot.slane %v14747_v41, %v14713_v35  ;;  %v14749_v18 = vmov %v14748_v59  ;;  %v5124_v20 = vrot.slane %v14748_v59, %v14713_v35  ;;  %v8864_v14 = vpack.c.bf16 %v6134_v25, %v6126_v40 }
 0x445   : >> { %v5228_v22 = vrot.slane %v14750_v21, %v14713_v35  ;;  %v5312_v0 = vrot.slane %v14751_v13, %v14713_v35  ;;  %v5416_v63 = vrot.slane %v14752_v56, %v14713_v35  ;;  %vm4892_vm6 = vcmp.eq.s32.totalorder %v12354_v48, %v4884_v11 }
 0x446   : >> { %vm4900_vm7 = vcmp.eq.s32.totalorder %v12357_v8, %v4884_v11  ;;  %v4976_v16 = vrot.slane %v4936_v3, %v14718_v45  ;;  %v5072_v50 = vrot.slane %v5040_v17, %v14718_v45  ;;  %8865 = vmatprep.subr.bf16.mxu0 %v8864_v14  ;;  %v5164_v43 = vrot.slane %v5124_v20, %v14718_v45 }
 0x447   : >> { %v5260_v40 = vrot.slane %v5228_v22, %v14718_v45  ;;  %v5352_v25 = vrot.slane %v5312_v0, %v14718_v45  ;;  %v5448_v4 = vrot.slane %v5416_v63, %v14718_v45  ;;  %v14753_v0 = vld [vmem:[#allocation43_spill] sm:$0xff] }
 0x448   : >> { %v4984_v59 = vsel %vm4892_vm6, %v4976_v16, 0.0  ;;  %v4992_v23 = vsel %vm4900_vm7, %v4976_v16, 0.0  ;;  %vm5080_vm8 = vcmp.eq.s32.totalorder %v12354_v48, %v5072_v50  ;;  %vm5088_vm9 = vcmp.eq.s32.totalorder %v12357_v8, %v5072_v50  ;;  %v14757_v50 = vld [vmem:[#allocation52_spill] sm:$0xff] }
 0x449   : >> { %v5000_v11 = vadd.f32 %v4984_v59, %v4796_v34  ;;  %v5008_v24 = vadd.f32 %v4992_v23, %v4804_v6  ;;  %v5172_v3 = vsel %vm5080_vm8, %v5164_v43, 0.0  ;;  %v5180_v28 = vsel %vm5088_vm9, %v5164_v43, 0.0  ;;  %v14754_v34 = vld [vmem:[#allocation47_spill] sm:$0xff]  ;;  %v14756_v6 = vld [vmem:[#allocation46_spill] sm:$0xff] }
 0x44a   : >> { %vm5268_vm10 = vcmp.eq.s32.totalorder %v12354_v48, %v5260_v40  ;;  %vm5276_vm11 = vcmp.eq.s32.totalorder %v12357_v8, %v5260_v40  ;;  %vm5456_vm12 = vcmp.eq.s32.totalorder %v12354_v48, %v5448_v4  ;;  %vm5464_vm13 = vcmp.eq.s32.totalorder %v12357_v8, %v5448_v4 }
 0x44b   : >> { %v5188_v17 = vadd.f32 %v5172_v3, %v5000_v11  ;;  %v5196_v22 = vadd.f32 %v5180_v28, %v5008_v24  ;;  %v5360_v20 = vsel %vm5268_vm10, %v5352_v25, 0.0  ;;  %v5368_v14 = vsel %vm5276_vm11, %v5352_v25, 0.0  ;;  %v14760_v28 = vld [vmem:[#allocation59_spill] sm:$0xff] }
 0x44c   : >> { %v5500_v63 = vrot.slane %v14753_v0, %v14713_v35  ;;  %v14755_v29 = vmov %v14754_v34  ;;  %v5604_v23 = vrot.slane %v14754_v34, %v14713_v35  ;;  %v5688_v16 = vrot.slane %v14756_v6, %v14713_v35 }
 0x44d   : >> { %v14758_v30 = vmov %v14757_v50  ;;  %v5792_v43 = vrot.slane %v14757_v50, %v14713_v35  ;;  %v5376_v40 = vadd.f32 %v5360_v20, %v5188_v17  ;;  %v5384_v59 = vadd.f32 %v5368_v14, %v5196_v22  ;;  %v14761_v17 = vld [vmem:[#allocation57_spill] sm:$0xff] }
 0x44e   : >> { %v5876_v11 = vrot.slane %v14759_v31, %v14713_v35  ;;  %v5980_v24 = vrot.slane %v14760_v28, %v14713_v35  ;;  %v5540_v25 = vrot.slane %v5500_v63, %v14718_v45  ;;  %v5636_v3 = vrot.slane %v5604_v23, %v14718_v45 }
 0x44f   : >> { %v5728_v34 = vrot.slane %v5688_v16, %v14718_v45  ;;  %v5824_v32 = vrot.slane %v5792_v43, %v14718_v45  ;;  %v6064_v22 = vrot.slane %v14761_v17, %v14713_v35  ;;  %v4652_v20 = vrot.slane %v14727_v49, %v14718_v45 }
 0x450   : >> { %v5916_v39 = vrot.slane %v5876_v11, %v14718_v45  ;;  %v6012_v50 = vrot.slane %v5980_v24, %v14718_v45  ;;  %v5548_v14 = vsel %vm5456_vm12, %v5540_v25, 0.0  ;;  %v5556_v63 = vsel %vm5464_vm13, %v5540_v25, 0.0 }
 0x451   : >> { %vm5644_vm15 = vcmp.eq.s32.totalorder %v12354_v48, %v5636_v3  ;;  %vm5652_vm0 = vcmp.eq.s32.totalorder %v12357_v8, %v5636_v3  ;;  %v5564_v23 = vadd.f32 %v5548_v14, %v5376_v40  ;;  %v5572_v16 = vadd.f32 %v5556_v63, %v5384_v59 }
 0x452   : >> { %v5736_v43 = vsel %vm5644_vm15, %v5728_v34, 0.0  ;;  %v5744_v11 = vsel %vm5652_vm0, %v5728_v34, 0.0  ;;  %vm5832_vm1 = vcmp.eq.s32.totalorder %v12354_v48, %v5824_v32  ;;  %vm5840_vm2 = vcmp.eq.s32.totalorder %v12357_v8, %v5824_v32 }
 0x453   : >> { %vm6020_vm3 = vcmp.eq.s32.totalorder %v12354_v48, %v6012_v50  ;;  %vm6028_vm4 = vcmp.eq.s32.totalorder %v12357_v8, %v6012_v50  ;;  %v5752_v35 = vadd.f32 %v5736_v43, %v5564_v23  ;;  %v5760_v24 = vadd.f32 %v5744_v11, %v5572_v16 }
 0x454   : >> { %v5924_v4 = vsel %vm5832_vm1, %v5916_v39, 0.0  ;;  %v5932_v25 = vsel %vm5840_vm2, %v5916_v39, 0.0  ;;  %v6104_v44 = vrot.slane %v6064_v22, %v14718_v45  ;;  %v4684_v3 = vrot.slane %v4652_v20, %v14718_v45 }
 0x455   : >> { %v4736_v40 = vrot.slane %v14728_v5, %v14718_v45  ;;  %v4840_v59 = vrot.slane %v12114_v38, %v14718_v45  ;;  %v5940_v34 = vadd.f32 %v5924_v4, %v5752_v35  ;;  %v5948_v32 = vadd.f32 %v5932_v25, %v5760_v24  ;;  %v14779_v38 = vld [vmem:[#allocation8_spill] sm:$0xff] (%p4617_p13) }
 0x456   : >> { %v4924_v14 = vrot.slane %v14730_v19, %v14718_v45  ;;  %v5028_v50 = vrot.slane %v14731_v27, %v14718_v45  ;;  %v6112_v63 = vsel %vm6020_vm3, %v6104_v44, 0.0  ;;  %v6120_v39 = vsel %vm6028_vm4, %v6104_v44, 0.0 }
 0x457   : >> { %vm4701_vm5 = vcmp.eq.s32.totalorder %v12354_v48, %v4684_v3  ;;  %vm4709_vm6 = vcmp.eq.s32.totalorder %v12357_v8, %v4684_v3  ;;  %v6128_v22 = vadd.f32 %v6112_v63, %v5940_v34  ;;  %v6136_v20 = vadd.f32 %v6120_v39, %v5948_v32 }
 0x458   : >> { %v4776_v23 = vrot.slane %v4736_v40, %v14718_v45  ;;  %v4872_v16 = vrot.slane %v4840_v59, %v14718_v45  ;;  %v4964_v43 = vrot.slane %v4924_v14, %v14718_v45  ;;  %v5060_v11 = vrot.slane %v5028_v50, %v14718_v45 }
 0x459   : >> { %v5112_v35 = vrot.slane %v14732_v2, %v14718_v45  ;;  %v5216_v44 = vrot.slane %v12180_v26, %v14718_v45  ;;  %v8868_v24 = vpack.c.bf16 %v6136_v20, %v6128_v22  ;;  %v5300_v50 = vrot.slane %v14734_v62, %v14718_v45 }
 0x45a   : >> { %v4793_v4 = vsel %vm4701_vm5, %v4776_v23, 0.0  ;;  %v4801_v25 = vsel %vm4709_vm6, %v4776_v23, 0.0  ;;  %vm4889_vm7 = vcmp.eq.s32.totalorder %v12354_v48, %v4872_v16  ;;  %vm4897_vm8 = vcmp.eq.s32.totalorder %v12357_v8, %v4872_v16 }
 0x45b   : >> { %v4981_v3 = vsel %vm4889_vm7, %v4964_v43, 0.0  ;;  %vm5077_vm9 = vcmp.eq.s32.totalorder %v12354_v48, %v5060_v11  ;;  %vm5085_vm10 = vcmp.eq.s32.totalorder %v12357_v8, %v5060_v11  ;;  %8869 = vmatprep.subr.bf16.mxu1 %v8868_v24  ;;  %v4989_v40 = vsel %vm4897_vm8, %v4964_v43, 0.0 }
 0x45c   : >> { %v4997_v59 = vadd.f32 %v4981_v3, %v4793_v4  ;;  %v5152_v34 = vrot.slane %v5112_v35, %v14718_v45  ;;  %v5248_v32 = vrot.slane %v5216_v44, %v14718_v45  ;;  %v5005_v14 = vadd.f32 %v4989_v40, %v4801_v25 }
 0x45d   : >> { %v5404_v63 = vrot.slane %v12196_v15, %v14718_v45  ;;  %v5488_v39 = vrot.slane %v12207_v47, %v14718_v45  ;;  %v5340_v43 = vrot.slane %v5300_v50, %v14718_v45  ;;  %v5592_v44 = vrot.slane %v12232_v36, %v14718_v45 }
 0x45e   : >> { %v5169_v22 = vsel %vm5077_vm9, %v5152_v34, 0.0  ;;  %v5177_v20 = vsel %vm5085_vm10, %v5152_v34, 0.0  ;;  %vm5265_vm11 = vcmp.eq.s32.totalorder %v12354_v48, %v5248_v32  ;;  %vm5273_vm12 = vcmp.eq.s32.totalorder %v12357_v8, %v5248_v32 }
 0x45f   : >> { %v5185_v23 = vadd.f32 %v5169_v22, %v4997_v59  ;;  %v5193_v16 = vadd.f32 %v5177_v20, %v5005_v14  ;;  %v5436_v11 = vrot.slane %v5404_v63, %v14718_v45  ;;  %v5528_v35 = vrot.slane %v5488_v39, %v14718_v45 }
 0x460   : >> { %v5676_v24 = vrot.slane %v12227_v9, %v14718_v45  ;;  %v5780_v4 = vrot.slane %v12256_v37, %v14718_v45  ;;  %v5357_v25 = vsel %vm5265_vm11, %v5340_v43, 0.0  ;;  %v5365_v3 = vsel %vm5273_vm12, %v5340_v43, 0.0 }
 0x461   : >> { %vm5453_vm13 = vcmp.eq.s32.totalorder %v12354_v48, %v5436_v11  ;;  %vm5461_vm15 = vcmp.eq.s32.totalorder %v12357_v8, %v5436_v11  ;;  %v5373_v40 = vadd.f32 %v5357_v25, %v5185_v23  ;;  %v5381_v59 = vadd.f32 %v5365_v3, %v5193_v16 }
 0x462   : >> { %v5545_v34 = vsel %vm5453_vm13, %v5528_v35, 0.0  ;;  %v5553_v32 = vsel %vm5461_vm15, %v5528_v35, 0.0  ;;  %v5624_v14 = vrot.slane %v5592_v44, %v14718_v45  ;;  %v5716_v50 = vrot.slane %v5676_v24, %v14718_v45 }
 0x463   : >> { %v5812_v63 = vrot.slane %v5780_v4, %v14718_v45  ;;  %v5864_v39 = vrot.slane %v14736_v61, %v14718_v45  ;;  %v5561_v22 = vadd.f32 %v5545_v34, %v5373_v40  ;;  %v5569_v20 = vadd.f32 %v5553_v32, %v5381_v59 }
 0x464   : >> { %v5968_v43 = vrot.slane %v14738_v1, %v14718_v45  ;;  %v6052_v23 = vrot.slane %v14740_v7, %v14718_v45  ;;  %vm5641_vm0 = vcmp.eq.s32.totalorder %v12354_v48, %v5624_v14  ;;  %vm5649_vm1 = vcmp.eq.s32.totalorder %v12357_v8, %v5624_v14 }
 0x465   : >> { %vm5829_vm2 = vcmp.eq.s32.totalorder %v12354_v48, %v5812_v63  ;;  %vm5837_vm3 = vcmp.eq.s32.totalorder %v12357_v8, %v5812_v63  ;;  %v5733_v16 = vsel %vm5641_vm0, %v5716_v50, 0.0  ;;  %v5741_v11 = vsel %vm5649_vm1, %v5716_v50, 0.0 }
 0x466   : >> { %v5904_v35 = vrot.slane %v5864_v39, %v14718_v45  ;;  %v6000_v44 = vrot.slane %v5968_v43, %v14718_v45  ;;  %v5749_v24 = vadd.f32 %v5733_v16, %v5561_v22  ;;  %v5757_v4 = vadd.f32 %v5741_v11, %v5569_v20 }
 0x467   : >> { %v6092_v25 = vrot.slane %v6052_v23, %v14718_v45  ;;  %v4660_v3 = vrot.slane %v14741_v12, %v14718_v45  ;;  %v4744_v39 = vrot.slane %v14742_v33, %v14718_v45  ;;  %v4848_v22 = vrot.slane %v14744_v53, %v14718_v45 }
 0x468   : >> { %v5921_v40 = vsel %vm5829_vm2, %v5904_v35, 0.0  ;;  %v5929_v59 = vsel %vm5837_vm3, %v5904_v35, 0.0  ;;  %vm6017_vm4 = vcmp.eq.s32.totalorder %v12354_v48, %v6000_v44  ;;  %vm6025_vm5 = vcmp.eq.s32.totalorder %v12357_v8, %v6000_v44 }
 0x469   : >> { %v5937_v34 = vadd.f32 %v5921_v40, %v5749_v24  ;;  %v5945_v32 = vadd.f32 %v5929_v59, %v5757_v4  ;;  %v6109_v14 = vsel %vm6017_vm4, %v6092_v25, 0.0  ;;  %v6117_v50 = vsel %vm6025_vm5, %v6092_v25, 0.0 }
 0x46a   : >> { %v4692_v63 = vrot.slane %v4660_v3, %v14718_v45  ;;  %v4932_v20 = vrot.slane %v14746_v10, %v14718_v45  ;;  %v5036_v16 = vrot.slane %v14747_v41, %v14718_v45  ;;  %v5120_v11 = vrot.slane %v14749_v18, %v14718_v45 }
 0x46b   : >> { %v6125_v43 = vadd.f32 %v6109_v14, %v5937_v34  ;;  %v6133_v23 = vadd.f32 %v6117_v50, %v5945_v32  ;;  %v4784_v35 = vrot.slane %v4744_v39, %v14718_v45  ;;  %v4880_v44 = vrot.slane %v4848_v22, %v14718_v45 }
 0x46c   : >> { %vm4703_vm6 = vcmp.eq.s32.totalorder %v12354_v48, %v4692_v63  ;;  %vm4711_vm7 = vcmp.eq.s32.totalorder %v12357_v8, %v4692_v63  ;;  %v4972_v4 = vrot.slane %v4932_v20, %v14718_v45  ;;  %v5068_v25 = vrot.slane %v5036_v16, %v14718_v45 }
 0x46d   : >> { %v8866_v24 = vpack.c.bf16 %v6133_v23, %v6125_v43  ;;  %v5160_v3 = vrot.slane %v5120_v11, %v14718_v45  ;;  %v4795_v40 = vsel %vm4703_vm6, %v4784_v35, 0.0  ;;  %v4803_v59 = vsel %vm4711_vm7, %v4784_v35, 0.0 }
 0x46e   : >> { %vm4891_vm8 = vcmp.eq.s32.totalorder %v12354_v48, %v4880_v44  ;;  %vm4899_vm9 = vcmp.eq.s32.totalorder %v12357_v8, %v4880_v44  ;;  %vm5079_vm10 = vcmp.eq.s32.totalorder %v12354_v48, %v5068_v25  ;;  %vm5087_vm11 = vcmp.eq.s32.totalorder %v12357_v8, %v5068_v25 }
 0x46f   : >> { %8867 = vmatpush1.bf16.msra.mxu0 %v8866_v24  ;;  %v4983_v34 = vsel %vm4891_vm8, %v4972_v4, 0.0  ;;  %v4991_v32 = vsel %vm4899_vm9, %v4972_v4, 0.0  ;;  %v5171_v63 = vsel %vm5079_vm10, %v5160_v3, 0.0  ;;  %v5179_v39 = vsel %vm5087_vm11, %v5160_v3, 0.0 }
 0x470   : >> { %v4999_v14 = vadd.f32 %v4983_v34, %v4795_v40  ;;  %v5007_v50 = vadd.f32 %v4991_v32, %v4803_v59  ;;  %v5224_v22 = vrot.slane %v14750_v21, %v14718_v45  ;;  %v5308_v20 = vrot.slane %v14751_v13, %v14718_v45 }
 0x471   : >> { %v5412_v43 = vrot.slane %v14752_v56, %v14718_v45  ;;  %v5496_v23 = vrot.slane %v14753_v0, %v14718_v45  ;;  %v5600_v35 = vrot.slane %v14755_v29, %v14718_v45  ;;  %v5684_v44 = vrot.slane %v14756_v6, %v14718_v45  ;;  %v14781_v29 = vld [vmem:[#allocation10_spill] sm:$0xff] (%p4617_p13) }
 0x472   : >> { %v5187_v16 = vadd.f32 %v5171_v63, %v4999_v14  ;;  %v5195_v11 = vadd.f32 %v5179_v39, %v5007_v50  ;;  %8809 = vmatmul.mubr.msk.f32.vlgmr.msra.gmra.mrb[2].mxu0 %vm1937_vm14, %v12593_v42  ;;  %v5256_v24 = vrot.slane %v5224_v22, %v14718_v45  ;;  %v5348_v4 = vrot.slane %v5308_v20, %v14718_v45 }
 0x473   : >> { %v5444_v25 = vrot.slane %v5412_v43, %v14718_v45  ;;  %v5536_v3 = vrot.slane %v5496_v23, %v14718_v45  ;;  %v5632_v40 = vrot.slane %v5600_v35, %v14718_v45  ;;  %v5724_v59 = vrot.slane %v5684_v44, %v14718_v45 }
 0x474   : >> { %v5788_v34 = vrot.slane %v14758_v30, %v14718_v45  ;;  %v5872_v32 = vrot.slane %v14759_v31, %v14718_v45  ;;  %vm5267_vm12 = vcmp.eq.s32.totalorder %v12354_v48, %v5256_v24  ;;  %vm5275_vm13 = vcmp.eq.s32.totalorder %v12357_v8, %v5256_v24  ;;  %v14778_v30 = vld [vmem:[#allocation7_spill] sm:$0xff] (%p4617_p13) }
 0x475   : >> { %vm5455_vm15 = vcmp.eq.s32.totalorder %v12354_v48, %v5444_v25  ;;  %vm5463_vm0 = vcmp.eq.s32.totalorder %v12357_v8, %v5444_v25  ;;  %v5359_v14 = vsel %vm5267_vm12, %v5348_v4, 0.0  ;;  %v5367_v50 = vsel %vm5275_vm13, %v5348_v4, 0.0 }
 0x476   : >> { %v5547_v63 = vsel %vm5455_vm15, %v5536_v3, 0.0  ;;  %v5555_v39 = vsel %vm5463_vm0, %v5536_v3, 0.0  ;;  %v5375_v22 = vadd.f32 %v5359_v14, %v5187_v16  ;;  %v5383_v20 = vadd.f32 %v5367_v50, %v5195_v11 }
 0x477   : >> { %vm5643_vm1 = vcmp.eq.s32.totalorder %v12354_v48, %v5632_v40  ;;  %vm5651_vm2 = vcmp.eq.s32.totalorder %v12357_v8, %v5632_v40  ;;  %v5820_v35 = vrot.slane %v5788_v34, %v14718_v45  ;;  %v5912_v44 = vrot.slane %v5872_v32, %v14718_v45 }
 0x478   : >> { %v5735_v43 = vsel %vm5643_vm1, %v5724_v59, 0.0  ;;  %v5743_v23 = vsel %vm5651_vm2, %v5724_v59, 0.0  ;;  %v5563_v24 = vadd.f32 %v5547_v63, %v5375_v22  ;;  %v5571_v0 = vadd.f32 %v5555_v39, %v5383_v20 }
 0x479   : >> { %v5976_v25 = vrot.slane %v14760_v28, %v14718_v45  ;;  %v6060_v4 = vrot.slane %v14761_v17, %v14718_v45  ;;  %vm5831_vm3 = vcmp.eq.s32.totalorder %v12354_v48, %v5820_v35  ;;  %vm5839_vm4 = vcmp.eq.s32.totalorder %v12357_v8, %v5820_v35 }
 0x47a   : >> { %v5751_v16 = vadd.f32 %v5735_v43, %v5563_v24  ;;  %v5759_v11 = vadd.f32 %v5743_v23, %v5571_v0  ;;  %v5923_v3 = vsel %vm5831_vm3, %v5912_v44, 0.0  ;;  %v5931_v40 = vsel %vm5839_vm4, %v5912_v44, 0.0  ;;  %v14762_v43 = vld [vmem:[#allocation88_spill] sm:$0xff] }
 0x47b   : >> { %v6008_v59 = vrot.slane %v5976_v25, %v14718_v45  ;;  %v6100_v34 = vrot.slane %v6060_v4, %v14718_v45  ;;  %v14763_v45 = vld [vmem:[#allocation87_spill] sm:$0xff]  ;;  %v14764_v25 = vld [vmem:[#allocation86_spill] sm:$0xff]  ;;  %v6469_v18 = vmul.f32 (%p4617_p13), 15.0, %v14778_v30  ;;  %v6470_v26 = vmul.f32 (%p4617_p13), 15.0, %v14779_v38 }
 0x47c   : >> { %v5939_v32 = vadd.f32 %v5923_v3, %v5751_v16  ;;  %v5947_v14 = vadd.f32 %v5931_v40, %v5759_v11  ;;  %v14766_v3 = vld [vmem:[#allocation84_spill] sm:$0xff]  ;;  %v6471_v15 = vmul.f32 (%p4617_p13), 15.0, %v14780_v57  ;;  %v6472_v47 = vmul.f32 (%p4617_p13), 15.0, %v14781_v29 }
 0x47d   : >> { %vm6019_vm5 = vcmp.eq.s32.totalorder %v12354_v48, %v6008_v59  ;;  %vm6027_vm6 = vcmp.eq.s32.totalorder %v12357_v8, %v6008_v59  ;;  %v14765_v8 = vld [vmem:[#allocation85_spill] sm:$0xff]  ;;  %v6473_v31 = vfloor.f32 (%p4617_p13), %v6469_v18  ;;  %v6474_v55 = vfloor.f32 (%p4617_p13), %v6470_v26 }
 0x47e   : >> { %v6111_v50 = vsel %vm6019_vm5, %v6100_v34, 0.0  ;;  %v6119_v63 = vsel %vm6027_vm6, %v6100_v34, 0.0  ;;  %v14767_v34 = vld [vmem:[#allocation83_spill] sm:$0xff]  ;;  %v6475_v60 = vfloor.f32 (%p4617_p13), %v6471_v15  ;;  %v6476_v9 = vfloor.f32 (%p4617_p13), %v6472_v47 }
 0x47f   : >> { %v6127_v39 = vadd.f32 %v6111_v50, %v5939_v32  ;;  %v6135_v22 = vadd.f32 %v6119_v63, %v5947_v14  ;;  %v6477_v36 = vceil.f32 (%p4617_p13), %v6469_v18  ;;  %v6478_v58 = vceil.f32 (%p4617_p13), %v6470_v26 }
 0x480   : > { %v6479_v52 = vceil.f32 (%p4617_p13), %v6471_v15  ;;  %v6480_v37 = vceil.f32 (%p4617_p13), %v6472_v47  ;;  %v8944_v12 = vtrunc.f32 (%p4617_p13), %v6473_v31  ;;  %v8946_v46 = vtrunc.f32 (%p4617_p13), %v6474_v55 }
 0x481   : >> { %v8870_v20 = vpack.c.bf16 %v6135_v22, %v6127_v39  ;;  %v14769_v39 = vld [vmem:[#allocation81_spill] sm:$0xff]  ;;  %v8948_v51 = vtrunc.f32 (%p4617_p13), %v6475_v60  ;;  %v8950_v21 = vtrunc.f32 (%p4617_p13), %v6476_v9  ;;  %v8936_v54 = vtrunc.f32 (%p4617_p13), %v6477_v36 }
 0x482   : > { %v8938_v49 = vtrunc.f32 (%p4617_p13), %v6478_v58  ;;  %v8940_v5 = vtrunc.f32 (%p4617_p13), %v6479_v52  ;;  %v8942_v19 = vtrunc.f32 (%p4617_p13), %v6480_v37  ;;  %v12925_v27 = vcvt.f32.s32 (%p4617_p13), %v8944_v12 }
 0x483   : >> { %8871 = vmatpush1.bf16.msra.mxu1 %v8870_v20  ;;  %v12927_v2 = vcvt.f32.s32 (%p4617_p13), %v8946_v46  ;;  %v12929_v62 = vcvt.f32.s32 (%p4617_p13), %v8936_v54  ;;  %v12937_v33 = vsub.f32 (%p4617_p13), %v6469_v18, %v6473_v31  ;;  %v12939_v53 = vsub.f32 (%p4617_p13), %v6470_v26, %v6474_v55 }
 0x484   : > { %v12931_v61 = vcvt.f32.s32 (%p4617_p13), %v8938_v49  ;;  %v12933_v1 = vcvt.f32.s32 (%p4617_p13), %v8940_v5  ;;  %v12935_v7 = vcvt.f32.s32 (%p4617_p13), %v8942_v19  ;;  %v12941_v10 = vsub.f32 (%p4617_p13), %v6471_v15, %v6475_v60 }
 0x485   : > { %v12943_v41 = vsub.f32 (%p4617_p13), %v6472_v47, %v6476_v9  ;;  %v12945_v13 = vcvt.f32.s32 (%p4617_p13), %v8948_v51  ;;  %v12947_v56 = vcvt.f32.s32 (%p4617_p13), %v8950_v21  ;;  %v6497_v6 = vmul.u32 (%p4617_p13), 2654435761, %v12929_v62 }
 0x486   : >> { %8810 = vmatmul.mubr.msk.f32.vlgmr.msra.gmra.mrb[2].mxu1 %vm1937_vm14, %v12593_v42  ;;  %v14768_v42 = vld [vmem:[#allocation82_spill] sm:$0xff]  ;;  %v6498_v28 = vmul.u32 (%p4617_p13), 2654435761, %v12931_v61  ;;  %v12952_v17 = vsub.f32 (%p4617_p13), 1.0, %v12937_v33 }
 0x487   : > { %v13009_v12 = vrot.slane (%p4617_p13), %v6497_v6, 5 }
 0x488   : > { %v6537_v57 = vrot.slane (%p4617_p13), %v12952_v17, 5  ;;  %v13011_v46 = vrot.slane (%p4617_p13), %v6498_v28, 5 }
 0x48a   : > { %v6538_v60 = vrot.slane (%p4617_p13), %v6537_v57, 4 }
 0x48c   : > { %v13014_v51 = vmul.f32 (%p4617_p13), %v6538_v60, %v12937_v33  ;;  %v13020_v54 = vmul.f32 (%p4617_p13), %v6538_v60, %v12952_v17  ;;  %v6589_v60 = vrot.slane (%p4617_p13), %v12937_v33, 6 }
 0x48e   : > { %v6590_v26 = vrot.slane (%p4617_p13), %v6589_v60, 4 }
 0x4fc   : >> { %v6211_v0 = vpop.f32.mrb[0].mxu0 }
 0x4fd   : >> { %v6429_v23 = vadd.f32 %v14762_v43, %v6211_v0   ;;  %v6213_v35 = vpop.f32.mrb[1].mxu0 }
 0x4fe   : >> { %v6430_v44 = vadd.f32 %v14763_v45, %v6213_v35  }
 0x4ff   : >> { %v14777_v43 = vmov %v6429_v23  ;;  %v6445_v20 = vrot.slane (%p4617_p13), %v6429_v23, 4  ;;  %v12955_v23 = vsub.f32 (%p4617_p13), 1.0, %v12939_v53 }
 0x500   : > { %v6446_v0 = vrot.slane (%p4617_p13), %v6430_v44, 4 }
 0x501   : > { %6461 = vst [vmem:[%s10154_s28] sm:$0x30] (%p4617_p13), %v6445_v20  ;;  %v6539_v15 = vrot.slane (%p4617_p13), %v12955_v23, 5 }
 0x502   : > { %6462 = vst [vmem:[%s10154_s28 + $0x8] sm:$0x30] (%p4617_p13), %v6446_v0 }
 0x503   : > { %v6540_v9 = vrot.slane (%p4617_p13), %v6539_v15, 4 }
 0x505   : > { %v13017_v21 = vmul.f32 (%p4617_p13), %v6540_v9, %v12939_v53  ;;  %v13023_v49 = vmul.f32 (%p4617_p13), %v6540_v9, %v12955_v23  ;;  %v6591_v9 = vrot.slane (%p4617_p13), %v12939_v53, 6 }
 0x507   : > { %14782 = vst [vmem:[#allocation60_spill] sm:$0xff] (%p4617_p13), %v13023_v49 }
 0x508   : >> { %v6282_v24 = vpop.f32.mrb[0].mxu1 }
 0x509   : >> { %v6431_v48 = vadd.f32 %v14764_v25, %v6282_v24   ;;  %v6284_v4 = vpop.f32.mrb[1].mxu1 }
 0x50a   : >> { %v6432_v11 = vadd.f32 %v14765_v8, %v6284_v4  }
 0x50b   : >> { %v14775_v25 = vmov %v6431_v48  ;;  %v6447_v43 = vrot.slane (%p4617_p13), %v6431_v48, 4  ;;  %v6500_v48 = vmul.u32 (%p4617_p13), 2654435761, %v12935_v7 }
 0x50c   : > { %v6448_v35 = vrot.slane (%p4617_p13), %v6432_v11, 4  ;;  %v6499_v25 = vmul.u32 (%p4617_p13), 2654435761, %v12933_v1 }
 0x50d   : > { %6463 = vst [vmem:[%s10154_s28 + $0x10] sm:$0x30] (%p4617_p13), %v6447_v43  ;;  %v6507_v43 = vmul.u32 (%p4617_p13), 805459861, %v12933_v1 }
 0x50e   : > { %6464 = vst [vmem:[%s10154_s28 + $0x18] sm:$0x30] (%p4617_p13), %v6448_v35  ;;  %v6508_v35 = vmul.u32 (%p4617_p13), 805459861, %v12935_v7 }
 0x545   : >> { %v6353_v16 = vpop.f32.mrb[2].mxu0 }
 0x546   : >> { %v6433_v40 = vadd.f32 %v14766_v3, %v6353_v16   ;;  %v6355_v59 = vpop.f32.mrb[3].mxu0  ;;  %v14774_v16 = vmov %v6432_v11  ;;  %v6519_v11 = vrot.slane (%p4617_p13), %v12939_v53, 5 }
 0x547   : >> { %v6434_v32 = vadd.f32 %v14767_v34, %v6355_v59   ;;  %v14776_v59 = vmov %v6430_v44  ;;  %v12961_v44 = vsub.f32 (%p4617_p13), 1.0, %v12943_v41  ;;  %v6501_v16 = vmul.u32 (%p4617_p13), 2654435761, %v12925_v27 }
 0x548   : >> { %v14773_v4 = vmov %v6433_v40  ;;  %v6449_v24 = vrot.slane (%p4617_p13), %v6433_v40, 4  ;;  %v6502_v40 = vmul.u32 (%p4617_p13), 2654435761, %v12927_v2  ;;  %v6521_v59 = vrot.slane (%p4617_p13), %v12941_v10, 5 }
 0x549   : > { %v6450_v8 = vrot.slane (%p4617_p13), %v6434_v32, 4  ;;  %v6517_v4 = vrot.slane (%p4617_p13), %v12937_v33, 5  ;;  %v6543_v47 = vrot.slane (%p4617_p13), %v12961_v44, 5 }
 0x54a   : > { %6465 = vst [vmem:[%s10154_s28 + $0x20] sm:$0x30] (%p4617_p13), %v6449_v24  ;;  %v6522_v20 = vrot.slane (%p4617_p13), %v6521_v59, 4  ;;  %v13039_v59 = vrot.slane (%p4617_p13), %v6499_v25, 5 }
 0x54b   : > { %6466 = vst [vmem:[%s10154_s28 + $0x28] sm:$0x30] (%p4617_p13), %v6450_v8  ;;  %v6544_v37 = vrot.slane (%p4617_p13), %v6543_v47, 4 }
 0x54c   : > { %v12986_v30 = vmul.f32 (%p4617_p13), %v6522_v20, %v12941_v10  ;;  %v14247_v57 = vrot.slane (%p4617_p13), %v13039_v59, 4 }
 0x54d   : > { %v13029_v19 = vmul.f32 (%p4617_p13), %v6544_v37, %v12943_v41  ;;  %v13035_v28 = vmul.f32 (%p4617_p13), %v6544_v37, %v12961_v44 }
 0x557   : > { %4619 = sbr.rel (!%p4617_p13) target bundleno = 980 (0x3d4), region = 117 }
 0x559   : >> { %v6424_v14 = vpop.f32.mrb[2].mxu1 }
 0x55a   : >> { %v6435_v63 = vadd.f32 %v14768_v42, %v6424_v14   ;;  %v6426_v50 = vpop.f32.mrb[3].mxu1  ;;  %v6504_v42 = vmul.u32 (%p4617_p13), 2654435761, %v12947_v56 }
 0x55b   : >> { %v6436_v22 = vadd.f32 %v14769_v39, %v6426_v50   ;;  %v14772_v50 = vmov %v6434_v32  ;;  %v6503_v32 = vmul.u32 (%p4617_p13), 2654435761, %v12945_v13  ;;  %v6505_v39 = vmul.u32 (%p4617_p13), 805459861, %v12929_v62 }
 0x55c   : >> { %v14771_v34 = vmov %v6435_v63  ;;  %v6451_v3 = vrot.slane (%p4617_p13), %v6435_v63, 4  ;;  %v6518_v63 = vrot.slane (%p4617_p13), %v6517_v4, 4  ;;  %v6520_v50 = vrot.slane (%p4617_p13), %v6519_v11, 4 }
 0x55d   : >> { %v14770_v45 = vmov %v6436_v22  ;;  %v6452_v14 = vrot.slane (%p4617_p13), %v6436_v22, 4  ;;  %v6523_v34 = vrot.slane (%p4617_p13), %v12943_v41, 5  ;;  %v6506_v22 = vmul.u32 (%p4617_p13), 805459861, %v12931_v61 }
 0x55e   : > { %6467 = vst [vmem:[%s10154_s28 + $0x30] sm:$0x30] %v6451_v3  ;;  %v12958_v45 = vsub.f32 1.0, %v12941_v10  ;;  %v12978_v24 = vmul.f32 %v6518_v63, %v12937_v33  ;;  %v12981_v8 = vmul.f32 %v6520_v50, %v12939_v53  ;;  %v12998_v31 = vmul.f32 %v6518_v63, %v12952_v17 }
 0x55f   : > { %6468 = vst [vmem:[%s10154_s28 + $0x38] sm:$0x30] %v6452_v14  ;;  %v6524_v0 = vrot.slane %v6523_v34, 4  ;;  %v13001_v55 = vmul.f32 %v6520_v50, %v12955_v23  ;;  %v14249_v4 = vrot.slane %v13009_v12, 4  ;;  %v14248_v11 = vrot.slane %v13011_v46, 4 }
 0x560   : > { %v6541_v29 = vrot.slane %v12958_v45, 5  ;;  %v13004_v36 = vmul.f32 %v6522_v20, %v12958_v45  ;;  %v13041_v34 = vrot.slane %v6500_v48, 5  ;;  %v6573_v63 = vrot.slane %v6505_v39, 6 }
 0x561   : > { %v12989_v18 = vmul.f32 %v6524_v0, %v12943_v41  ;;  %v13007_v58 = vmul.f32 %v6524_v0, %v12961_v44  ;;  %v6575_v50 = vrot.slane %v6506_v22, 6  ;;  %v6577_v20 = vrot.slane %v6507_v43, 6 }
 0x562   : > { %v6542_v52 = vrot.slane %v6541_v29, 4  ;;  %v6579_v0 = vrot.slane %v6508_v35, 6  ;;  %v14246_v15 = vrot.slane %v13041_v34, 4  ;;  %v13048_v29 = vxor.u32 %v12929_v62, %v14249_v4 }
 0x563   : > { %v13053_v25 = vxor.u32 %v12931_v61, %v14248_v11  ;;  %v13055_v48 = vrot.slane %v6573_v63, 4  ;;  %v13057_v39 = vrot.slane %v6575_v50, 4  ;;  %v13059_v22 = vrot.slane %v6577_v20, 4 }
 0x564   : > { %v13026_v5 = vmul.f32 %v6542_v52, %v12941_v10  ;;  %v13032_v6 = vmul.f32 %v6542_v52, %v12958_v45  ;;  %v13061_v43 = vrot.slane %v6579_v0, 4  ;;  %v13066_v35 = vxor.u32 %v12933_v1, %v14247_v57 }
 0x565   : > { %v13071_v47 = vxor.u32 %v12935_v7, %v14246_v15  ;;  %v6581_v52 = vxor.u32 %v13055_v48, %v13048_v29  ;;  %v6582_v37 = vxor.u32 %v13057_v39, %v13053_v25  ;;  %v6593_v63 = vrot.slane %v12941_v10, 6 }
 0x566   : > { %v6595_v50 = vrot.slane %v12943_v41, 6  ;;  %v6583_v20 = vxor.u32 %v13059_v22, %v13066_v35  ;;  %v6592_v33 = vrot.slane %v6591_v9, 4  ;;  %v13094_v10 = vmul.f32 %v6590_v26, %v12978_v24 }
 0x567   : > { %v6584_v0 = vxor.u32 %v13061_v43, %v13071_v47  ;;  %v13085_v38 = vand.u32 255, %v6581_v52  ;;  %v13087_v53 = vand.u32 255, %v6582_v37  ;;  %v6594_v14 = vrot.slane %v6593_v63, 4 }
 0x568   : > { %v6596_v3 = vrot.slane %v6595_v50, 4  ;;  %v13089_v15 = vand.u32 255, %v6583_v20  ;;  %14787 = vst [vmem:[#allocation15_spill] sm:$0xff] %v13094_v10  ;;  %v13097_v41 = vmul.f32 %v6592_v33, %v12981_v8  ;;  %v6605_v9 = vrot.slane %v6501_v16, 5 }
 0x569   : > { %14783 = vst [vmem:[#allocation11_spill] sm:$0xff] %v13085_v38  ;;  %14784 = vst [vmem:[#allocation12_spill] sm:$0xff] %v13087_v53  ;;  %v13091_v57 = vand.u32 255, %v6584_v0  ;;  %v13100_v11 = vmul.f32 %v6594_v14, %v12986_v30  ;;  %v6607_v52 = vrot.slane %v6502_v40, 5  ;;  %v6609_v37 = vrot.slane %v6503_v32, 5 }
 0x56a   : > { %14785 = vst [vmem:[#allocation13_spill] sm:$0xff] %v13089_v15  ;;  %14788 = vst [vmem:[#allocation16_spill] sm:$0xff] %v13097_v41  ;;  %v13103_v60 = vmul.f32 %v6596_v3, %v12989_v18  ;;  %v6611_v63 = vrot.slane %v6504_v42, 5  ;;  %v13114_v50 = vmul.f32 %v6590_v26, %v13014_v51  ;;  %v13117_v20 = vmul.f32 %v6592_v33, %v13017_v21 }
 0x56b   : > { %14786 = vst [vmem:[#allocation14_spill] sm:$0xff] %v13091_v57  ;;  %14789 = vst [vmem:[#allocation17_spill] sm:$0xff] %v13100_v11  ;;  %v6606_v0 = vrot.slane %v6605_v9, 4  ;;  %v6608_v4 = vrot.slane %v6607_v52, 4  ;;  %v13123_v16 = vmul.f32 %v6596_v3, %v13029_v19  ;;  %v6610_v40 = vrot.slane %v6609_v37, 4 }
 0x56c   : > { %14790 = vst [vmem:[#allocation18_spill] sm:$0xff] %v13103_v60  ;;  %14791 = vst [vmem:[#allocation19_spill] sm:$0xff] %v13114_v50  ;;  %v13120_v60 = vmul.f32 %v6594_v14, %v13026_v5  ;;  %v6612_v57 = vrot.slane %v6611_v63, 4  ;;  %v13126_v32 = vmul.f32 %v6590_v26, %v13020_v54  ;;  %v13129_v42 = vmul.f32 %v6592_v33, %v13023_v49 }
 0x56d   : > { %14792 = vst [vmem:[#allocation20_spill] sm:$0xff] %v13117_v20  ;;  %14794 = vst [vmem:[#allocation22_spill] sm:$0xff] %v13123_v16  ;;  %v13132_v11 = vxor.u32 %v12929_v62, %v6606_v0  ;;  %v13135_v9 = vxor.u32 %v12931_v61, %v6608_v4  ;;  %v13138_v52 = vxor.u32 %v12925_v27, %v6606_v0 }
 0x56e   : > { %14793 = vst [vmem:[#allocation21_spill] sm:$0xff] %v13120_v60  ;;  %14795 = vst [vmem:[#allocation23_spill] sm:$0xff] %v13126_v32  ;;  %v13141_v60 = vxor.u32 %v12927_v2, %v6608_v4  ;;  %v13144_v37 = vxor.u32 %v12933_v1, %v6610_v40  ;;  %v13147_v63 = vxor.u32 %v12935_v7, %v6612_v57 }
 0x56f   : > { %14796 = vst [vmem:[#allocation24_spill] sm:$0xff] %v13129_v42  ;;  %v13150_v16 = vxor.u32 %v12945_v13, %v6610_v40  ;;  %v13153_v62 = vxor.u32 %v12947_v56, %v6612_v57  ;;  %v6617_v61 = vxor.u32 %v13132_v11, %v13055_v48  ;;  %v6618_v0 = vxor.u32 %v13135_v9, %v13057_v39 }
 0x570   : > { %v6633_v4 = vxor.u32 %v13138_v52, %v13055_v48  ;;  %v6634_v1 = vxor.u32 %v13141_v60, %v13057_v39  ;;  %v6619_v7 = vxor.u32 %v13144_v37, %v13059_v22  ;;  %v6620_v40 = vxor.u32 %v13147_v63, %v13061_v43 }
 0x571   : > { %v6635_v57 = vxor.u32 %v13150_v16, %v13059_v22  ;;  %v6636_v15 = vxor.u32 %v13153_v62, %v13061_v43  ;;  %v13171_v42 = vand.u32 255, %v6617_v61  ;;  %v13173_v20 = vand.u32 255, %v6618_v0 }
 0x572   : > { %v13175_v41 = vand.u32 255, %v6633_v4  ;;  %v13177_v53 = vand.u32 255, %v6634_v1  ;;  %v13179_v32 = vand.u32 255, %v6619_v7  ;;  %v13181_v50 = vand.u32 255, %v6620_v40 }
 0x573   : > { %14797 = vst [vmem:[#allocation25_spill] sm:$0xff] %v13171_v42  ;;  %14798 = vst [vmem:[#allocation26_spill] sm:$0xff] %v13173_v20  ;;  %v13183_v10 = vand.u32 255, %v6635_v57  ;;  %v13185_v38 = vand.u32 255, %v6636_v15  ;;  %v13188_v49 = vmul.f32 %v6594_v14, %v13032_v6  ;;  %v13191_v61 = vmul.f32 %v6596_v3, %v13035_v28 }
 0x574   : > { %14799 = vst [vmem:[#allocation27_spill] sm:$0xff] %v13175_v41  ;;  %14800 = vst [vmem:[#allocation28_spill] sm:$0xff] %v13181_v50  ;;  %v14805_v0 = vrot.slane %v13009_v12, 4  ;;  %v14806_v1 = vrot.slane %v13011_v46, 4  ;;  %v14807_v40 = vrot.slane %v13039_v59, 4  ;;  %v14808_v57 = vrot.slane %v13041_v34, 4 }
 0x575   : > { %14801 = vst [vmem:[#allocation29_spill] sm:$0xff] %v13183_v10  ;;  %14802 = vst [vmem:[#allocation30_spill] sm:$0xff] %v13185_v38  ;;  %v13214_v12 = vmul.f32 %v6590_v26, %v12998_v31  ;;  %v13227_v34 = vmul.f32 %v6596_v3, %v13007_v58 }
 0x576   : > { %14803 = vst [vmem:[#allocation31_spill] sm:$0xff] %v13188_v49  ;;  %14804 = vst [vmem:[#allocation32_spill] sm:$0xff] %v13191_v61  ;;  %v13196_v4 = vxor.u32 %v12925_v27, %v14805_v0  ;;  %v13201_v7 = vxor.u32 %v12927_v2, %v14806_v1  ;;  %v13206_v15 = vxor.u32 %v12945_v13, %v14807_v40 }
 0x577   : > { %v13211_v38 = vxor.u32 %v12947_v56, %v14808_v57  ;;  %14809 = vst [vmem:[#allocation33_spill] sm:$0xff] %v13214_v12  ;;  %v13217_v0 = vmul.f32 %v6592_v33, %v13001_v55  ;;  %v13224_v1 = vmul.f32 %v6594_v14, %v13004_v36  ;;  %14812 = vst [vmem:[#allocation36_spill] sm:$0xff] %v13227_v34  ;;  %v14813_v33 = vmul.u32 805459861, %v12925_v27 }
 0x578   : > { %v6649_v46 = vxor.u32 %v13196_v4, %v13055_v48  ;;  %v6650_v59 = vxor.u32 %v13201_v7, %v13057_v39  ;;  %v6651_v40 = vxor.u32 %v13206_v15, %v13059_v22  ;;  %v14814_v48 = vmul.u32 805459861, %v12927_v2 }
 0x579   : > { %14810 = vst [vmem:[#allocation34_spill] sm:$0xff] %v13217_v0  ;;  %14811 = vst [vmem:[#allocation35_spill] sm:$0xff] %v13224_v1  ;;  %v6652_v26 = vxor.u32 %v13211_v38, %v13061_v43  ;;  %v6661_v57 = vrot.slane %v14813_v33, 6  ;;  %v14816_v14 = vmul.u32 805459861, %v12945_v13  ;;  %v6677_v2 = vrot.slane %v12952_v17, 6 }
 0x57a   : > { %v6663_v61 = vrot.slane %v14814_v48, 6  ;;  %v13237_v50 = vand.u32 255, %v6649_v46  ;;  %v13239_v39 = vand.u32 255, %v6650_v59  ;;  %v14817_v34 = vmul.u32 805459861, %v12947_v56 }
 0x57b   : > { %v6665_v3 = vrot.slane %v14816_v14, 6  ;;  %v13245_v22 = vand.u32 255, %v6651_v40  ;;  %v13247_v49 = vand.u32 255, %v6652_v26  ;;  %v6662_v43 = vrot.slane %v6661_v57, 4 }
 0x57c   : > { %14815 = vst [vmem:[#allocation37_spill] sm:$0xff] %v13239_v39  ;;  %v6667_v1 = vrot.slane %v14817_v34, 6  ;;  %v6664_v27 = vrot.slane %v6663_v61, 4  ;;  %v6679_v46 = vrot.slane %v12955_v23, 6  ;;  %v6681_v48 = vrot.slane %v12958_v45, 6 }
 0x57d   : > { %14818 = vst [vmem:[#allocation38_spill] sm:$0xff] %v13247_v49  ;;  %v6666_v33 = vrot.slane %v6665_v3, 4  ;;  %v6669_v59 = vxor.u32 %v6662_v43, %v13048_v29  ;;  %v6683_v56 = vrot.slane %v12961_v44, 6  ;;  %v6678_v26 = vrot.slane %v6677_v2, 4 }
 0x57e   : > { %v6668_v10 = vrot.slane %v6667_v1, 4  ;;  %v6670_v13 = vxor.u32 %v6664_v27, %v13053_v25  ;;  %v6680_v61 = vrot.slane %v6679_v46, 4  ;;  %v6682_v17 = vrot.slane %v6681_v48, 4 }
 0x57f   : > { %v6671_v34 = vxor.u32 %v6666_v33, %v13066_v35  ;;  %v13257_v57 = vand.u32 255, %v6669_v59  ;;  %v6684_v23 = vrot.slane %v6683_v56, 4  ;;  %v13266_v45 = vmul.f32 %v6678_v26, %v12978_v24 }
 0x580   : > { %v6672_v40 = vxor.u32 %v6668_v10, %v13071_v47  ;;  %v13259_v1 = vand.u32 255, %v6670_v13  ;;  %v13269_v44 = vmul.f32 %v6680_v61, %v12981_v8  ;;  %v13272_v25 = vmul.f32 %v6682_v17, %v12986_v30 }
 0x581   : > { %v13261_v14 = vand.u32 255, %v6671_v34  ;;  %14821 = vst [vmem:[#allocation41_spill] sm:$0xff] %v13266_v45  ;;  %v13275_v35 = vmul.f32 %v6684_v23, %v12989_v18  ;;  %v6693_v47 = vxor.u32 %v6662_v43, %v13132_v11  ;;  %v6694_v3 = vxor.u32 %v6664_v27, %v13135_v9 }
 0x582   : > { %14819 = vst [vmem:[#allocation39_spill] sm:$0xff] %v13259_v1  ;;  %v13263_v29 = vand.u32 255, %v6672_v40  ;;  %14822 = vst [vmem:[#allocation42_spill] sm:$0xff] %v13269_v44  ;;  %v6695_v2 = vxor.u32 %v6666_v33, %v13144_v37  ;;  %v6696_v46 = vxor.u32 %v6668_v10, %v13147_v63  ;;  %v13282_v24 = vmul.f32 %v6678_v26, %v13014_v51 }
 0x583   : > { %14823 = vst [vmem:[#allocation43_spill] sm:$0xff] %v13275_v35  ;;  %v13285_v8 = vmul.f32 %v6680_v61, %v13017_v21  ;;  %v13287_v59 = vand.u32 255, %v6693_v47  ;;  %v13289_v30 = vand.u32 255, %v6694_v3  ;;  %v13292_v18 = vmul.f32 %v6682_v17, %v13026_v5  ;;  %v14829_v5 = vld [vmem:[#allocation60_spill] sm:$0xff] }
 0x584   : > { %14820 = vst [vmem:[#allocation40_spill] sm:$0xff] %v13263_v29  ;;  %14824 = vst [vmem:[#allocation44_spill] sm:$0xff] %v13282_v24  ;;  %v13295_v11 = vmul.f32 %v6684_v23, %v13029_v19  ;;  %v13297_v9 = vand.u32 255, %v6695_v2  ;;  %v13299_v37 = vand.u32 255, %v6696_v46  ;;  %v6705_v51 = vxor.u32 %v6662_v43, %v13138_v52 }
 0x585   : > { %14825 = vst [vmem:[#allocation45_spill] sm:$0xff] %v13285_v8  ;;  %14826 = vst [vmem:[#allocation46_spill] sm:$0xff] %v13289_v30  ;;  %v6706_v63 = vxor.u32 %v6664_v27, %v13141_v60  ;;  %v6707_v21 = vxor.u32 %v6666_v33, %v13150_v16  ;;  %v6708_v13 = vxor.u32 %v6668_v10, %v13153_v62 }
 0x586   : > { %14827 = vst [vmem:[#allocation47_spill] sm:$0xff] %v13295_v11  ;;  %14828 = vst [vmem:[#allocation48_spill] sm:$0xff] %v13299_v37  ;;  %v13306_v48 = vmul.f32 %v6678_v26, %v13020_v54  ;;  %v13309_v56 = vmul.f32 %v6680_v61, %v14829_v5  ;;  %v13311_v19 = vand.u32 255, %v6705_v51  ;;  %v13316_v40 = vmul.f32 %v6682_v17, %v13032_v6 }
 0x587   : > { %v13313_v34 = vand.u32 255, %v6706_v63  ;;  %v13319_v52 = vmul.f32 %v6684_v23, %v13035_v28  ;;  %v13321_v60 = vand.u32 255, %v6707_v21  ;;  %v13323_v16 = vand.u32 255, %v6708_v13 }
 0x588   : > { %14830 = vst [vmem:[#allocation49_spill] sm:$0xff] %v13311_v19  ;;  %14832 = vst [vmem:[#allocation51_spill] sm:$0xff] %v13316_v40  ;;  %v6717_v54 = vxor.u32 %v6662_v43, %v13196_v4  ;;  %v6718_v62 = vxor.u32 %v6664_v27, %v13201_v7  ;;  %v6719_v47 = vxor.u32 %v6666_v33, %v13206_v15  ;;  %v13357_v43 = vmov 0.0  }
 0x589   : > { %14831 = vst [vmem:[#allocation50_spill] sm:$0xff] %v13313_v34  ;;  %14833 = vst [vmem:[#allocation52_spill] sm:$0xff] %v13319_v52  ;;  %v6720_v3 = vxor.u32 %v6668_v10, %v13211_v38  ;;  %v13330_v2 = vmul.f32 %v6678_v26, %v12998_v31  ;;  %v13333_v6 = vmul.f32 %v6680_v61, %v13001_v55  ;;  %v13349_v38 = vmov 0.0  }
 0x58a   : > { %14834 = vst [vmem:[#allocation53_spill] sm:$0xff] %v13323_v16  ;;  %v13335_v28 = vand.u32 255, %v6717_v54  ;;  %v13337_v46 = vand.u32 255, %v6718_v62  ;;  %v13340_v51 = vmul.f32 %v6682_v17, %v13004_v36  ;;  %v13343_v4 = vmul.f32 %v6684_v23, %v13007_v58 }
 0x58b   : > { %14835 = vst [vmem:[#allocation54_spill] sm:$0xff] %v13330_v2  ;;  %14836 = vst [vmem:[#allocation55_spill] sm:$0xff] %v13333_v6  ;;  %v13345_v7 = vand.u32 255, %v6719_v47  ;;  %v13347_v15 = vand.u32 255, %v6720_v3  ;;  %v13351_v31 = vmov 0.0   ;;  %v13353_v55 = vmov 0.0  }
 0x58c   : > { %14837 = vst [vmem:[#allocation56_spill] sm:$0xff] %v13335_v28  ;;  %14838 = vst [vmem:[#allocation57_spill] sm:$0xff] %v13340_v51  ;;  %v13355_v10 = vmov 0.0   ;;  %v13359_v27 = vmov 0.0   ;;  %v13361_v36 = vmov 0.0   ;;  %v13363_v58 = vmov 0.0  }
 0x58d   : > { %14839 = vst [vmem:[#allocation58_spill] sm:$0xff] %v13343_v4  ;;  %14840 = vst [vmem:[#allocation59_spill] sm:$0xff] %v13345_v7 }
 0x58e   : > { %14841 = vst [vmem:[#allocation61_spill] sm:$0xff] %v13347_v15 }
 0x58f LB: >> { %v14842_v45 = vld [vmem:[#allocation41_spill] sm:$0xff]  ;;  %v14843_v44 = vld [vmem:[#allocation42_spill] sm:$0xff]  ;;  %v14845_v41 = vld [vmem:[#allocation27_spill] sm:$0xff]  ;;  %14859 = vst [vmem:[#allocation89_spill] sm:$0xff] %v9601_v38  ;;  %s8811_s3 = sshll.u32 %s9633_s30, 4  ;;  %s8812_s4 = sshll.u32 %s9633_s30, 1  ;;  %v9629_v58 = vphi %v13363_v58, %v14931_v58   ;;  %v9625_v36 = vphi %v13361_v36, %v14930_v36   ;;  %v9621_v27 = vphi %v13359_v27, %v14929_v27   ;;  %v9617_v43 = vphi %v13357_v43, %v14928_v43   ;;  %v9613_v10 = vphi %v13355_v10, %v14927_v10   ;;  %v9609_v55 = vphi %v13353_v55, %v14926_v55   ;;  %v9605_v31 = vphi %v13351_v31, %v14925_v31   ;;  %v9601_v38 = vphi %v13349_v38, %v14924_v38   ;;  %s9633_s30 = sphi %s13365_s30, %s6734_s30  }
 0x590   : >> { %v14844_v42 = vld [vmem:[#allocation25_spill] sm:$0xff]  ;;  %v14847_v34 = vld [vmem:[#allocation50_spill] sm:$0xff]  ;;  %v14850_v24 = vld [vmem:[#allocation44_spill] sm:$0xff]  ;;  %14860 = vst [vmem:[#allocation90_spill] sm:$0xff] %v9605_v31  ;;  %s8637_s7 = scalar_lea.vmem %s14036_s1, %s8812_s4  ;;  %s6734_s30 = sadd.s32 1, %s9633_s30  }
 0x591   : >> { %v14846_v39 = vld [vmem:[#allocation37_spill] sm:$0xff]  ;;  %v14848_v30 = vld [vmem:[#allocation46_spill] sm:$0xff]  ;;  %v14857_v1 = vld [vmem:[#allocation39_spill] sm:$0xff]  ;;  %14861 = vst [vmem:[#allocation91_spill] sm:$0xff] %v9609_v55  ;;  %p6731_p0 = scmp.ge.s32.totalorder %s6734_s30, 16  }
 0x592   : >> { %v14851_v20 = vld [vmem:[#allocation26_spill] sm:$0xff]  ;;  %v14852_v19 = vld [vmem:[#allocation49_spill] sm:$0xff]  ;;  %v14855_v6 = vld [vmem:[#allocation55_spill] sm:$0xff]  ;;  %14862 = vst [vmem:[#allocation92_spill] sm:$0xff] %v9613_v10  ;;  %s8823_s8 = sshll.u32 (%p6731_p0), %s9676_s13, 10  ;;  %s8598_s22 = sshll.u32 (%p6731_p0), %s10154_s28, 4  ;;  %s13989_s22 = int_to_ptr.vmem [resolvable:$true] %s8598_s22 }
 0x593   : >> { %v14849_v28 = vld [vmem:[#allocation56_spill] sm:$0xff]  ;;  %v14853_v12 = vld [vmem:[#allocation33_spill] sm:$0xff]  ;;  %v14856_v2 = vld [vmem:[#allocation54_spill] sm:$0xff]  ;;  %14863 = vst [vmem:[#allocation93_spill] sm:$0xff] %v9617_v43  ;;  %s13982_s17 = scalar_lea.hbm (%p6731_p0), %s14037_s2, %s8823_s8  ;;  %s8584_s13 = scalar_lea.sflag (%p6731_p0), [#allocation3], %s135_s21 }
 0x594   : >> { %v14854_v8 = vld [vmem:[#allocation45_spill] sm:$0xff]  ;;  %v14858_v0 = vld [vmem:[#allocation34_spill] sm:$0xff]  ;;  %14864 = vst [vmem:[#allocation94_spill] sm:$0xff] %v9621_v27  ;;  %14865 = vst [vmem:[#allocation95_spill] sm:$0xff] %v9625_v36  ;;  %v6744_v27 = vstv %s8811_s3  ;;  %s9283_s23 = scalar_lea.vmem (%p6731_p0), %s13989_s22, 1024  ;;  %s9639_s24 = smov (%p6731_p0), [#allocation2]  }
 0x595   : >> { %14866 = vst [vmem:[#allocation96_spill] sm:$0xff] %v9629_v58  ;;  %v14867_v33 = vld [vmem:[#allocation72_spill] sm:$0xff]  ;;  %v14868_v26 = vld [vmem:[#allocation11_spill] sm:$0xff]  ;;  %v14873_v15 = vld [vmem:[#allocation5_spill] sm:$0xff]  ;;  %p9284_p1 = scmp.ne.s32.totalorder (%p6731_p0), %s13989_s22, %s9283_s23  ;;  %s9287_s25 = sshll.u32 (%p6731_p0), %s9639_s24, 4  ;;  %s9288_s25 = int_to_ptr.vmem [resolvable:$false] %s9287_s25 }
 0x596   : >> { %v6754_v61 = vrot.slane %v14868_v26, %v14867_v33  ;;  %v14869_v17 = vld [vmem:[#allocation15_spill] sm:$0xff]  ;;  %v6942_v63 = vrot.slane %v14844_v42, %v14867_v33  ;;  %v7130_v5 = vrot.slane %v14845_v41, %v14867_v33  ;;  %v7318_v47 = vrot.slane %v13237_v50, %v14867_v33  ;;  %v14874_v16 = vld [vmem:[#allocation6_spill] sm:$0xff]  ;;  %s9289_s26 = scalar_lea.vmem (%p6731_p0), %s9288_s25, 2048  ;;  %p9290_p4 = scmp.lt.s32.totalorder (%p6731_p0), %s13989_s22, %s9288_s25 }
 0x597   : >> { %v6838_v23 = vrot.slane %v14869_v17, %v14867_v33  ;;  %v14870_v21 = vld [vmem:[#allocation19_spill] sm:$0xff]  ;;  %v7402_v3 = vrot.slane %v14853_v12, %v14867_v33  ;;  %v13419_v52 = vadd.s32 %v6744_v27, %v14873_v15  ;;  %v13422_v11 = vadd.s32 %v6744_v27, %v14874_v16  ;;  %p9285_p2 = pnand (%p6731_p0), %p9284_p1, %p9693_p5  ;;  %p9291_p7 = scmp.lt.s32.totalorder (%p6731_p0), %s9289_s26, %s9283_s23 }
 0x598   : >> { %v7026_v13 = vrot.slane %v14870_v21, %v14867_v33  ;;  %v14871_v54 = vld [vmem:[#allocation23_spill] sm:$0xff]  ;;  %v7882_v15 = vrot.slane %v14852_v19, %v14867_v33 }
 0x599   : >> { %v7214_v62 = vrot.slane %v14871_v54, %v14867_v33  ;;  %v14872_v38 = vld [vmem:[#allocation71_spill] sm:$0xff]  ;;  %p9286_p3 = pneg (%p6731_p0), %p9285_p2  ;;  %p9292_p8 = por (%p6731_p0), %p9291_p7, %p9290_p4 }
 0x59a   : >> { %v6786_v31 = vrot.slane %v6754_v61, %v14872_v38  ;;  %v6878_v55 = vrot.slane %v6838_v23, %v14872_v38  ;;  %v6974_v10 = vrot.slane %v6942_v63, %v14872_v38  ;;  %v7066_v43 = vrot.slane %v7026_v13, %v14872_v38 }
 0x59b   : >> { %v7162_v36 = vrot.slane %v7130_v5, %v14872_v38  ;;  %v7254_v58 = vrot.slane %v7214_v62, %v14872_v38  ;;  %v7350_v4 = vrot.slane %v7318_v47, %v14872_v38  ;;  %v7442_v61 = vrot.slane %v7402_v3, %v14872_v38  ;;  %p9293_p9 = pnand (%p6731_p0), %p9292_p8, %p9286_p3 }
 0x59c   : >> { %v7506_v23 = vrot.slane %v13257_v57, %v14867_v33  ;;  %v7590_v63 = vrot.slane %v14842_v45, %v14867_v33  ;;  %v7694_v13 = vrot.slane %v13287_v59, %v14867_v33  ;;  %v7778_v5 = vrot.slane %v14850_v24, %v14867_v33 }
 0x59d   : >> { %vm6812_vm7 = vcmp.eq.s32.totalorder %v13419_v52, %v6786_v31  ;;  %vm6820_vm8 = vcmp.eq.s32.totalorder %v13422_v11, %v6786_v31  ;;  %vm7000_vm9 = vcmp.eq.s32.totalorder %v13419_v52, %v6974_v10  ;;  %vm7008_vm10 = vcmp.eq.s32.totalorder %v13422_v11, %v6974_v10 }
 0x59e   : >> { %v6904_v16 = vsel %vm6812_vm7, %v6878_v55, 0.0  ;;  %v6912_v27 = vsel %vm6820_vm8, %v6878_v55, 0.0  ;;  %v7092_v62 = vsel %vm7000_vm9, %v7066_v43, 0.0  ;;  %v7100_v47 = vsel %vm7008_vm10, %v7066_v43, 0.0 }
 0x59f   : >> { %v7108_v3 = vadd.f32 %v7092_v62, %v6904_v16  ;;  %v7116_v37 = vadd.f32 %v7100_v47, %v6912_v27  ;;  %vm7188_vm11 = vcmp.eq.s32.totalorder %v13419_v52, %v7162_v36  ;;  %vm7196_vm12 = vcmp.eq.s32.totalorder %v13422_v11, %v7162_v36 }
 0x5a0   : >> { %v7280_v35 = vsel %vm7188_vm11, %v7254_v58, 0.0  ;;  %v7288_v29 = vsel %vm7196_vm12, %v7254_v58, 0.0  ;;  %vm7376_vm13 = vcmp.eq.s32.totalorder %v13419_v52, %v7350_v4  ;;  %vm7384_vm15 = vcmp.eq.s32.totalorder %v13422_v11, %v7350_v4 }
 0x5a1   : >> { %v7296_v31 = vadd.f32 %v7280_v35, %v7108_v3  ;;  %v7304_v49 = vadd.f32 %v7288_v29, %v7116_v37  ;;  %v7468_v51 = vsel %vm7376_vm13, %v7442_v61, 0.0  ;;  %v7476_v10 = vsel %vm7384_vm15, %v7442_v61, 0.0 }
 0x5a2   : >> { %v7538_v55 = vrot.slane %v7506_v23, %v14872_v38  ;;  %v7630_v43 = vrot.slane %v7590_v63, %v14872_v38  ;;  %v7726_v16 = vrot.slane %v7694_v13, %v14872_v38  ;;  %v7818_v27 = vrot.slane %v7778_v5, %v14872_v38  ;;  %v14875_v13 = vld [vmem:[#allocation12_spill] sm:$0xff] }
 0x5a3   : >> { %v7484_v62 = vadd.f32 %v7468_v51, %v7296_v31  ;;  %v7492_v36 = vadd.f32 %v7476_v10, %v7304_v49  ;;  %v7914_v58 = vrot.slane %v7882_v15, %v14872_v38  ;;  %v7966_v47 = vrot.slane %v13306_v48, %v14867_v33  ;;  %v14876_v31 = vld [vmem:[#allocation16_spill] sm:$0xff] }
 0x5a4   : >> { %vm7564_vm0 = vcmp.eq.s32.totalorder %v13419_v52, %v7538_v55  ;;  %vm7572_vm1 = vcmp.eq.s32.totalorder %v13422_v11, %v7538_v55  ;;  %vm7752_vm2 = vcmp.eq.s32.totalorder %v13419_v52, %v7726_v16  ;;  %vm7760_vm3 = vcmp.eq.s32.totalorder %v13422_v11, %v7726_v16 }
 0x5a5   : >> { %v7656_v29 = vsel %vm7564_vm0, %v7630_v43, 0.0  ;;  %v7664_v35 = vsel %vm7572_vm1, %v7630_v43, 0.0  ;;  %v7844_v37 = vsel %vm7752_vm2, %v7818_v27, 0.0  ;;  %v7852_v4 = vsel %vm7760_vm3, %v7818_v27, 0.0 }
 0x5a6   : >> { %v7672_v61 = vadd.f32 %v7656_v29, %v7484_v62  ;;  %v7680_v51 = vadd.f32 %v7664_v35, %v7492_v36  ;;  %vm7940_vm4 = vcmp.eq.s32.totalorder %v13419_v52, %v7914_v58  ;;  %vm7948_vm5 = vcmp.eq.s32.totalorder %v13422_v11, %v7914_v58 }
 0x5a7   : >> { %v8006_v49 = vrot.slane %v7966_v47, %v14872_v38  ;;  %v8070_v23 = vrot.slane %v14849_v28, %v14867_v33  ;;  %v8154_v63 = vrot.slane %v14856_v2, %v14867_v33  ;;  %v6762_v5 = vrot.slane %v14875_v13, %v14867_v33 }
 0x5a8   : >> { %v7860_v15 = vadd.f32 %v7844_v37, %v7672_v61  ;;  %v7868_v3 = vadd.f32 %v7852_v4, %v7680_v51  ;;  %v14877_v16 = vmov %v14876_v31  ;;  %v6846_v10 = vrot.slane %v14876_v31, %v14867_v33  ;;  %v14878_v4 = vld [vmem:[#allocation20_spill] sm:$0xff] }
 0x5a9   : >> { %v6950_v55 = vrot.slane %v14851_v20, %v14867_v33  ;;  %v8032_v43 = vsel %vm7940_vm4, %v8006_v49, 0.0  ;;  %v8040_v27 = vsel %vm7948_vm5, %v8006_v49, 0.0  ;;  %v8102_v62 = vrot.slane %v8070_v23, %v14872_v38 }
 0x5aa   : >> { %v8194_v36 = vrot.slane %v8154_v63, %v14872_v38  ;;  %v8048_v58 = vadd.f32 %v8032_v43, %v7860_v15  ;;  %v8056_v47 = vadd.f32 %v8040_v27, %v7868_v3  ;;  %v6794_v29 = vrot.slane %v6762_v5, %v14872_v38 }
 0x5ab   : >> { %v6886_v35 = vrot.slane %v6846_v10, %v14872_v38  ;;  %vm8128_vm6 = vcmp.eq.s32.totalorder %v13419_v52, %v8102_v62  ;;  %vm8136_vm7 = vcmp.eq.s32.totalorder %v13422_v11, %v8102_v62  ;;  %v6982_v37 = vrot.slane %v6950_v55, %v14872_v38  ;;  %v14879_v55 = vld [vmem:[#allocation24_spill] sm:$0xff] }
 0x5ac   : >> { %v7034_v61 = vrot.slane %v14878_v4, %v14867_v33  ;;  %v8220_v51 = vsel %vm8128_vm6, %v8194_v36, 0.0  ;;  %v8228_v49 = vsel %vm8136_vm7, %v8194_v36, 0.0  ;;  %vm6814_vm8 = vcmp.eq.s32.totalorder %v13419_v52, %v6794_v29 }
 0x5ad   : >> { %vm6822_vm9 = vcmp.eq.s32.totalorder %v13422_v11, %v6794_v29  ;;  %v8236_v23 = vadd.f32 %v8220_v51, %v8048_v58  ;;  %v8244_v63 = vadd.f32 %v8228_v49, %v8056_v47  ;;  %v6906_v5 = vsel %vm6814_vm8, %v6886_v35, 0.0 }
 0x5ae   : >> { %v6914_v15 = vsel %vm6822_vm9, %v6886_v35, 0.0  ;;  %vm7002_vm10 = vcmp.eq.s32.totalorder %v13419_v52, %v6982_v37  ;;  %vm7010_vm11 = vcmp.eq.s32.totalorder %v13422_v11, %v6982_v37  ;;  %v7074_v3 = vrot.slane %v7034_v61, %v14872_v38 }
 0x5af   : >> { %v7138_v31 = vrot.slane %v13177_v53, %v14867_v33  ;;  %v8872_v10 = vpack.c.bf16 %v8244_v63, %v8236_v23  ;;  %v14880_v62 = vmov %v14879_v55  ;;  %v7222_v43 = vrot.slane %v14879_v55, %v14867_v33 }
 0x5b0   : >> { %v7326_v27 = vrot.slane %v14846_v39, %v14867_v33  ;;  %v7410_v36 = vrot.slane %v14858_v0, %v14867_v33  ;;  %v7094_v58 = vsel %vm7002_vm10, %v7074_v3, 0.0  ;;  %v7102_v47 = vsel %vm7010_vm11, %v7074_v3, 0.0 }
 0x5b1   : >> { %v7170_v29 = vrot.slane %v7138_v31, %v14872_v38  ;;  %v7514_v35 = vrot.slane %v14857_v1, %v14867_v33  ;;  %8873 = vmatprep.subr.bf16.mxu0 %v8872_v10  ;;  %v7110_v37 = vadd.f32 %v7094_v58, %v6906_v5  ;;  %v7118_v61 = vadd.f32 %v7102_v47, %v6914_v15 }
 0x5b2   : >> { %v7262_v51 = vrot.slane %v7222_v43, %v14872_v38  ;;  %v7358_v49 = vrot.slane %v7326_v27, %v14872_v38  ;;  %v7450_v23 = vrot.slane %v7410_v36, %v14872_v38  ;;  %v7598_v43 = vrot.slane %v14843_v44, %v14867_v33 }
 0x5b3   : >> { %vm7190_vm12 = vcmp.eq.s32.totalorder %v13419_v52, %v7170_v29  ;;  %vm7198_vm13 = vcmp.eq.s32.totalorder %v13422_v11, %v7170_v29  ;;  %v7546_v63 = vrot.slane %v7514_v35, %v14872_v38  ;;  %v7702_v27 = vrot.slane %v14848_v30, %v14867_v33 }
 0x5b4   : >> { %v7282_v3 = vsel %vm7190_vm12, %v7262_v51, 0.0  ;;  %v7290_v31 = vsel %vm7198_vm13, %v7262_v51, 0.0  ;;  %vm7378_vm15 = vcmp.eq.s32.totalorder %v13419_v52, %v7358_v49  ;;  %vm7386_vm0 = vcmp.eq.s32.totalorder %v13422_v11, %v7358_v49 }
 0x5b5   : >> { %v7298_v5 = vadd.f32 %v7282_v3, %v7110_v37  ;;  %v7306_v15 = vadd.f32 %v7290_v31, %v7118_v61  ;;  %v7470_v10 = vsel %vm7378_vm15, %v7450_v23, 0.0  ;;  %v7478_v55 = vsel %vm7386_vm0, %v7450_v23, 0.0 }
 0x5b6   : >> { %vm7566_vm1 = vcmp.eq.s32.totalorder %v13419_v52, %v7546_v63  ;;  %vm7574_vm2 = vcmp.eq.s32.totalorder %v13422_v11, %v7546_v63  ;;  %v7786_v47 = vrot.slane %v14854_v8, %v14867_v33  ;;  %v7890_v29 = vrot.slane %v14847_v34, %v14867_v33 }
 0x5b7   : >> { %v7486_v36 = vadd.f32 %v7470_v10, %v7298_v5  ;;  %v7494_v58 = vadd.f32 %v7478_v55, %v7306_v15  ;;  %v7638_v35 = vrot.slane %v7598_v43, %v14872_v38  ;;  %v7734_v37 = vrot.slane %v7702_v27, %v14872_v38 }
 0x5b8   : >> { %v7974_v61 = vrot.slane %v13309_v56, %v14867_v33  ;;  %v8078_v51 = vrot.slane %v13337_v46, %v14867_v33  ;;  %v7826_v49 = vrot.slane %v7786_v47, %v14872_v38  ;;  %v7922_v23 = vrot.slane %v7890_v29, %v14872_v38 }
 0x5b9   : >> { %v8162_v3 = vrot.slane %v14855_v6, %v14867_v33  ;;  %v6750_v31 = vrot.slane %v14868_v26, %v14872_v38  ;;  %v7658_v5 = vsel %vm7566_vm1, %v7638_v35, 0.0  ;;  %v7666_v15 = vsel %vm7574_vm2, %v7638_v35, 0.0 }
 0x5ba   : >> { %vm7754_vm3 = vcmp.eq.s32.totalorder %v13419_v52, %v7734_v37  ;;  %vm7762_vm4 = vcmp.eq.s32.totalorder %v13422_v11, %v7734_v37  ;;  %v7674_v10 = vadd.f32 %v7658_v5, %v7486_v36  ;;  %v7682_v55 = vadd.f32 %v7666_v15, %v7494_v58 }
 0x5bb   : >> { %v7846_v43 = vsel %vm7754_vm3, %v7826_v49, 0.0  ;;  %v7854_v27 = vsel %vm7762_vm4, %v7826_v49, 0.0  ;;  %vm7942_vm5 = vcmp.eq.s32.totalorder %v13419_v52, %v7922_v23  ;;  %vm7950_vm6 = vcmp.eq.s32.totalorder %v13422_v11, %v7922_v23 }
 0x5bc   : >> { %v8014_v47 = vrot.slane %v7974_v61, %v14872_v38  ;;  %v8110_v29 = vrot.slane %v8078_v51, %v14872_v38  ;;  %v7862_v26 = vadd.f32 %v7846_v43, %v7674_v10  ;;  %v7870_v7 = vadd.f32 %v7854_v27, %v7682_v55 }
 0x5bd   : >> { %v8202_v63 = vrot.slane %v8162_v3, %v14872_v38  ;;  %v6782_v35 = vrot.slane %v6750_v31, %v14872_v38  ;;  %v6834_v61 = vrot.slane %v14869_v17, %v14872_v38  ;;  %v6938_v51 = vrot.slane %v14844_v42, %v14872_v38  ;;  %v14913_v42 = vld [vmem:[#allocation52_spill] sm:$0xff] }
 0x5be   : >> { %v8034_v40 = vsel %vm7942_vm5, %v8014_v47, 0.0  ;;  %v8042_v37 = vsel %vm7950_vm6, %v8014_v47, 0.0  ;;  %vm8130_vm7 = vcmp.eq.s32.totalorder %v13419_v52, %v8110_v29  ;;  %vm8138_vm8 = vcmp.eq.s32.totalorder %v13422_v11, %v8110_v29 }
 0x5bf   : >> { %v8050_v36 = vadd.f32 %v8034_v40, %v7862_v26  ;;  %v8058_v58 = vadd.f32 %v8042_v37, %v7870_v7  ;;  %v8222_v49 = vsel %vm8130_vm7, %v8202_v63, 0.0  ;;  %v8230_v23 = vsel %vm8138_vm8, %v8202_v63, 0.0 }
 0x5c0   : >> { %vm6811_vm9 = vcmp.eq.s32.totalorder %v13419_v52, %v6782_v35  ;;  %vm6819_vm10 = vcmp.eq.s32.totalorder %v13422_v11, %v6782_v35  ;;  %v7022_v5 = vrot.slane %v14870_v21, %v14872_v38  ;;  %v7126_v40 = vrot.slane %v14845_v41, %v14872_v38  ;;  %v14904_v21 = vld [vmem:[#allocation38_spill] sm:$0xff] }
 0x5c1   : >> { %v8238_v3 = vadd.f32 %v8222_v49, %v8050_v36  ;;  %v8246_v31 = vadd.f32 %v8230_v23, %v8058_v58  ;;  %v6874_v7 = vrot.slane %v6834_v61, %v14872_v38  ;;  %v6970_v26 = vrot.slane %v6938_v51, %v14872_v38 }
 0x5c2   : >> { %v7210_v15 = vrot.slane %v14871_v54, %v14872_v38  ;;  %v7314_v10 = vrot.slane %v13237_v50, %v14872_v38  ;;  %v7062_v43 = vrot.slane %v7022_v5, %v14872_v38  ;;  %v7158_v27 = vrot.slane %v7126_v40, %v14872_v38 }
 0x5c3   : >> { %v8876_v55 = vpack.c.bf16 %v8246_v31, %v8238_v3  ;;  %v7398_v47 = vrot.slane %v14853_v12, %v14872_v38  ;;  %v6903_v29 = vsel %vm6811_vm9, %v6874_v7, 0.0  ;;  %v6911_v63 = vsel %vm6819_vm10, %v6874_v7, 0.0  ;;  %v14895_v12 = vld [vmem:[#allocation14_spill] sm:$0xff] }
 0x5c4   : >> { %vm6999_vm11 = vcmp.eq.s32.totalorder %v13419_v52, %v6970_v26  ;;  %vm7007_vm12 = vcmp.eq.s32.totalorder %v13422_v11, %v6970_v26  ;;  %vm7187_vm13 = vcmp.eq.s32.totalorder %v13419_v52, %v7158_v27  ;;  %vm7195_vm15 = vcmp.eq.s32.totalorder %v13422_v11, %v7158_v27 }
 0x5c5   : >> { %8877 = vmatprep.subr.bf16.mxu1 %v8876_v55  ;;  %v7091_v37 = vsel %vm6999_vm11, %v7062_v43, 0.0  ;;  %v7099_v36 = vsel %vm7007_vm12, %v7062_v43, 0.0  ;;  %v7250_v23 = vrot.slane %v7210_v15, %v14872_v38  ;;  %v7346_v61 = vrot.slane %v7314_v10, %v14872_v38 }
 0x5c6   : >> { %v7107_v58 = vadd.f32 %v7091_v37, %v6903_v29  ;;  %v7115_v49 = vadd.f32 %v7099_v36, %v6911_v63  ;;  %v7438_v35 = vrot.slane %v7398_v47, %v14872_v38  ;;  %v7502_v51 = vrot.slane %v13257_v57, %v14872_v38 }
 0x5c7   : >> { %v7586_v3 = vrot.slane %v14842_v45, %v14872_v38  ;;  %v7690_v31 = vrot.slane %v13287_v59, %v14872_v38  ;;  %v7279_v5 = vsel %vm7187_vm13, %v7250_v23, 0.0  ;;  %v7287_v40 = vsel %vm7195_vm15, %v7250_v23, 0.0 }
 0x5c8   : >> { %vm7375_vm0 = vcmp.eq.s32.totalorder %v13419_v52, %v7346_v61  ;;  %vm7383_vm1 = vcmp.eq.s32.totalorder %v13422_v11, %v7346_v61  ;;  %v7295_v7 = vadd.f32 %v7279_v5, %v7107_v58  ;;  %v7303_v26 = vadd.f32 %v7287_v40, %v7115_v49 }
 0x5c9   : >> { %v7467_v15 = vsel %vm7375_vm0, %v7438_v35, 0.0  ;;  %v7475_v10 = vsel %vm7383_vm1, %v7438_v35, 0.0  ;;  %v7534_v55 = vrot.slane %v7502_v51, %v14872_v38  ;;  %v7626_v43 = vrot.slane %v7586_v3, %v14872_v38 }
 0x5ca   : >> { %v7722_v27 = vrot.slane %v7690_v31, %v14872_v38  ;;  %v7774_v47 = vrot.slane %v14850_v24, %v14872_v38  ;;  %v7483_v29 = vadd.f32 %v7467_v15, %v7295_v7  ;;  %v7491_v63 = vadd.f32 %v7475_v10, %v7303_v26 }
 0x5cb   : >> { %v7878_v37 = vrot.slane %v14852_v19, %v14872_v38  ;;  %v7962_v36 = vrot.slane %v13306_v48, %v14872_v38  ;;  %vm7563_vm2 = vcmp.eq.s32.totalorder %v13419_v52, %v7534_v55  ;;  %vm7571_vm3 = vcmp.eq.s32.totalorder %v13422_v11, %v7534_v55 }
 0x5cc   : >> { %vm7751_vm4 = vcmp.eq.s32.totalorder %v13419_v52, %v7722_v27  ;;  %vm7759_vm5 = vcmp.eq.s32.totalorder %v13422_v11, %v7722_v27  ;;  %v7655_v58 = vsel %vm7563_vm2, %v7626_v43, 0.0  ;;  %v7663_v49 = vsel %vm7571_vm3, %v7626_v43, 0.0 }
 0x5cd   : >> { %v7814_v23 = vrot.slane %v7774_v47, %v14872_v38  ;;  %v7910_v61 = vrot.slane %v7878_v37, %v14872_v38  ;;  %v7671_v35 = vadd.f32 %v7655_v58, %v7483_v29  ;;  %v7679_v51 = vadd.f32 %v7663_v49, %v7491_v63 }
 0x5ce   : >> { %v8002_v3 = vrot.slane %v7962_v36, %v14872_v38  ;;  %v8066_v31 = vrot.slane %v14849_v28, %v14872_v38  ;;  %v8150_v43 = vrot.slane %v14856_v2, %v14872_v38  ;;  %v6758_v27 = vrot.slane %v14875_v13, %v14872_v38 }
 0x5cf   : >> { %v7843_v5 = vsel %vm7751_vm4, %v7814_v23, 0.0  ;;  %v7851_v40 = vsel %vm7759_vm5, %v7814_v23, 0.0  ;;  %vm7939_vm6 = vcmp.eq.s32.totalorder %v13419_v52, %v7910_v61  ;;  %vm7947_vm7 = vcmp.eq.s32.totalorder %v13422_v11, %v7910_v61 }
 0x5d0   : >> { %v7859_v7 = vadd.f32 %v7843_v5, %v7671_v35  ;;  %v7867_v26 = vadd.f32 %v7851_v40, %v7679_v51  ;;  %v8031_v15 = vsel %vm7939_vm6, %v8002_v3, 0.0  ;;  %v8039_v10 = vsel %vm7947_vm7, %v8002_v3, 0.0 }
 0x5d1   : >> { %v8098_v55 = vrot.slane %v8066_v31, %v14872_v38  ;;  %v6842_v47 = vrot.slane %v14877_v16, %v14872_v38  ;;  %v6946_v37 = vrot.slane %v14851_v20, %v14872_v38  ;;  %v7030_v36 = vrot.slane %v14878_v4, %v14872_v38 }
 0x5d2   : >> { %v8047_v29 = vadd.f32 %v8031_v15, %v7859_v7  ;;  %v8055_v63 = vadd.f32 %v8039_v10, %v7867_v26  ;;  %v8190_v58 = vrot.slane %v8150_v43, %v14872_v38  ;;  %v6790_v49 = vrot.slane %v6758_v27, %v14872_v38 }
 0x5d3   : >> { %vm8127_vm8 = vcmp.eq.s32.totalorder %v13419_v52, %v8098_v55  ;;  %vm8135_vm9 = vcmp.eq.s32.totalorder %v13422_v11, %v8098_v55  ;;  %v6882_v23 = vrot.slane %v6842_v47, %v14872_v38  ;;  %v6978_v61 = vrot.slane %v6946_v37, %v14872_v38 }
 0x5d4   : >> { %v7070_v35 = vrot.slane %v7030_v36, %v14872_v38  ;;  %v7134_v51 = vrot.slane %v13177_v53, %v14872_v38  ;;  %v8219_v3 = vsel %vm8127_vm8, %v8190_v58, 0.0  ;;  %v8227_v31 = vsel %vm8135_vm9, %v8190_v58, 0.0 }
 0x5d5   : >> { %vm6813_vm10 = vcmp.eq.s32.totalorder %v13419_v52, %v6790_v49  ;;  %vm6821_vm11 = vcmp.eq.s32.totalorder %v13422_v11, %v6790_v49  ;;  %v8235_v5 = vadd.f32 %v8219_v3, %v8047_v29  ;;  %v8243_v40 = vadd.f32 %v8227_v31, %v8055_v63 }
 0x5d6   : >> { %v6905_v7 = vsel %vm6813_vm10, %v6882_v23, 0.0  ;;  %v6913_v26 = vsel %vm6821_vm11, %v6882_v23, 0.0  ;;  %vm7001_vm12 = vcmp.eq.s32.totalorder %v13419_v52, %v6978_v61  ;;  %vm7009_vm13 = vcmp.eq.s32.totalorder %v13422_v11, %v6978_v61 }
 0x5d7   : >> { %v7166_v15 = vrot.slane %v7134_v51, %v14872_v38  ;;  %v7218_v10 = vrot.slane %v14880_v62, %v14872_v38  ;;  %v8874_v55 = vpack.c.bf16 %v8243_v40, %v8235_v5  ;;  %v7093_v43 = vsel %vm7001_vm12, %v7070_v35, 0.0 }
 0x5d8   : >> { %v7101_v27 = vsel %vm7009_vm13, %v7070_v35, 0.0  ;;  %v7322_v47 = vrot.slane %v14846_v39, %v14872_v38  ;;  %v7109_v37 = vadd.f32 %v7093_v43, %v6905_v7  ;;  %v7406_v58 = vrot.slane %v14858_v0, %v14872_v38 }
 0x5d9   : >> { %v7117_v29 = vadd.f32 %v7101_v27, %v6913_v26  ;;  %vm7189_vm15 = vcmp.eq.s32.totalorder %v13419_v52, %v7166_v15  ;;  %vm7197_vm0 = vcmp.eq.s32.totalorder %v13422_v11, %v7166_v15  ;;  %8875 = vmatpush1.bf16.msra.mxu0 %v8874_v55  ;;  %v7258_v63 = vrot.slane %v7218_v10, %v14872_v38 }
 0x5da   : >> { %v7354_v36 = vrot.slane %v7322_v47, %v14872_v38  ;;  %v7510_v49 = vrot.slane %v14857_v1, %v14872_v38  ;;  %v7594_v23 = vrot.slane %v14843_v44, %v14872_v38  ;;  %v7698_v61 = vrot.slane %v14848_v30, %v14872_v38 }
 0x5db   : >> { %v7782_v35 = vrot.slane %v14854_v8, %v14872_v38  ;;  %v7886_v51 = vrot.slane %v14847_v34, %v14872_v38  ;;  %v7281_v3 = vsel %vm7189_vm15, %v7258_v63, 0.0  ;;  %v7289_v31 = vsel %vm7197_vm0, %v7258_v63, 0.0 }
 0x5dc   : >> { %vm7377_vm1 = vcmp.eq.s32.totalorder %v13419_v52, %v7354_v36  ;;  %vm7385_vm2 = vcmp.eq.s32.totalorder %v13422_v11, %v7354_v36  ;;  %v7297_v5 = vadd.f32 %v7281_v3, %v7109_v37  ;;  %v7305_v40 = vadd.f32 %v7289_v31, %v7117_v29 }
 0x5dd   : >> { %v7446_v7 = vrot.slane %v7406_v58, %v14872_v38  ;;  %v7542_v26 = vrot.slane %v7510_v49, %v14872_v38  ;;  %v7634_v15 = vrot.slane %v7594_v23, %v14872_v38  ;;  %v7730_v10 = vrot.slane %v7698_v61, %v14872_v38 }
 0x5de   : >> { %v7822_v55 = vrot.slane %v7782_v35, %v14872_v38  ;;  %v7918_v43 = vrot.slane %v7886_v51, %v14872_v38  ;;  %v13658_v35 = vld [vmem:[%s8637_s7 + $0x60] sm:$0x3]  ;;  %v7970_v51 = vrot.slane %v13309_v56, %v14872_v38  ;;  %v8074_v3 = vrot.slane %v13337_v46, %v14872_v38 }
 0x5df   : >> { %v7469_v27 = vsel %vm7377_vm1, %v7446_v7, 0.0  ;;  %v7477_v47 = vsel %vm7385_vm2, %v7446_v7, 0.0  ;;  %vm7565_vm3 = vcmp.eq.s32.totalorder %v13419_v52, %v7542_v26  ;;  %vm7573_vm4 = vcmp.eq.s32.totalorder %v13422_v11, %v7542_v26  ;;  %v14881_v26 = vld [vmem:[#allocation13_spill] sm:$0xff] }
 0x5e0   : >> { %v7485_v37 = vadd.f32 %v7469_v27, %v7297_v5  ;;  %v7493_v29 = vadd.f32 %v7477_v47, %v7305_v40  ;;  %v7657_v63 = vsel %vm7565_vm3, %v7634_v15, 0.0  ;;  %v7665_v36 = vsel %vm7573_vm4, %v7634_v15, 0.0  ;;  %v14882_v47 = vld [vmem:[#allocation17_spill] sm:$0xff] }
 0x5e1   : >> { %vm7753_vm5 = vcmp.eq.s32.totalorder %v13419_v52, %v7730_v10  ;;  %vm7761_vm6 = vcmp.eq.s32.totalorder %v13422_v11, %v7730_v10  ;;  %vm7941_vm7 = vcmp.eq.s32.totalorder %v13419_v52, %v7918_v43  ;;  %vm7949_vm8 = vcmp.eq.s32.totalorder %v13422_v11, %v7918_v43 }
 0x5e2   : >> { %v7673_v58 = vadd.f32 %v7657_v63, %v7485_v37  ;;  %v7681_v49 = vadd.f32 %v7665_v36, %v7493_v29  ;;  %v7845_v23 = vsel %vm7753_vm5, %v7822_v55, 0.0  ;;  %v7853_v61 = vsel %vm7761_vm6, %v7822_v55, 0.0  ;;  %v14883_v36 = vld [vmem:[#allocation21_spill] sm:$0xff] }
 0x5e3   : >> { %v8158_v31 = vrot.slane %v14855_v6, %v14872_v38  ;;  %v14287_v7 = vmov 0.0   ;;  %v6770_v15 = vrot.slane %v14881_v26, %v14867_v33  ;;  %v8010_v10 = vrot.slane %v7970_v51, %v14872_v38 }
 0x5e4   : >> { %v7861_v5 = vadd.f32 %v7845_v23, %v7673_v58  ;;  %v7869_v40 = vadd.f32 %v7853_v61, %v7681_v49  ;;  %8323 = vmatprep.mubr.f32.mxu0 %v14287_v7  ;;  %8394 = vmatprep.mubr.f32.mxu1 %v14287_v7  ;;  %v8106_v55 = vrot.slane %v8074_v3, %v14872_v38  ;;  %v14885_v23 = vld [vmem:[#allocation29_spill] sm:$0xff] }
 0x5e5   : >> { %v8198_v27 = vrot.slane %v8158_v31, %v14872_v38  ;;  %8814 = vmatmul.mubr.msk.f32.vlgmr.msra.gmra.mrb[0].mxu0 %vm1937_vm14, %v13658_v35  ;;  %v6854_v37 = vrot.slane %v14882_v47, %v14867_v33  ;;  %v6802_v29 = vrot.slane %v6770_v15, %v14872_v38  ;;  %v6958_v63 = vrot.slane %v13179_v32, %v14867_v33 }
 0x5e6   : >> { %v14884_v49 = vmov %v14883_v36  ;;  %v7042_v58 = vrot.slane %v14883_v36, %v14867_v33  ;;  %v7146_v61 = vrot.slane %v14885_v23, %v14867_v33  ;;  %8465 = vmatprep.mubr.f32.mxu0 %v14287_v7  ;;  %v8033_v51 = vsel %vm7941_vm7, %v8010_v10, 0.0 }
 0x5e7   : >> { %v8041_v3 = vsel %vm7949_vm8, %v8010_v10, 0.0  ;;  %vm8129_vm9 = vcmp.eq.s32.totalorder %v13419_v52, %v8106_v55  ;;  %vm8137_vm10 = vcmp.eq.s32.totalorder %v13422_v11, %v8106_v55  ;;  %v8049_v31 = vadd.f32 %v8033_v51, %v7861_v5 }
 0x5e8   : >> { %v8057_v15 = vadd.f32 %v8041_v3, %v7869_v40  ;;  %v8221_v0 = vsel %vm8129_vm9, %v8198_v27, 0.0  ;;  %v8229_v1 = vsel %vm8137_vm10, %v8198_v27, 0.0  ;;  %vm6816_vm11 = vcmp.eq.s32.totalorder %v13419_v52, %v6802_v29 }
 0x5e9   : >> { %vm6824_vm12 = vcmp.eq.s32.totalorder %v13422_v11, %v6802_v29  ;;  %v6894_v36 = vrot.slane %v6854_v37, %v14872_v38  ;;  %v6990_v7 = vrot.slane %v6958_v63, %v14872_v38  ;;  %v8237_v2 = vadd.f32 %v8221_v0, %v8049_v31  ;;  %v14886_v0 = vld [vmem:[#allocation31_spill] sm:$0xff] }
 0x5ea   : >> { %v8245_v4 = vadd.f32 %v8229_v1, %v8057_v15  ;;  %v7082_v43 = vrot.slane %v7042_v58, %v14872_v38  ;;  %v7178_v10 = vrot.slane %v7146_v61, %v14872_v38  ;;  %v7230_v1 = vrot.slane %v14886_v0, %v14867_v33  ;;  %v14887_v58 = vld [vmem:[#allocation35_spill] sm:$0xff] }
 0x5eb   : >> { %v6908_v6 = vsel %vm6816_vm11, %v6894_v36, 0.0  ;;  %v6916_v55 = vsel %vm6824_vm12, %v6894_v36, 0.0  ;;  %vm7004_vm13 = vcmp.eq.s32.totalorder %v13419_v52, %v6990_v7  ;;  %vm7012_vm15 = vcmp.eq.s32.totalorder %v13422_v11, %v6990_v7 }
 0x5ec   : >> { %v8878_v5 = vpack.c.bf16 %v8245_v4, %v8237_v2  ;;  %v7096_v40 = vsel %vm7004_vm13, %v7082_v43, 0.0  ;;  %v7104_v27 = vsel %vm7012_vm15, %v7082_v43, 0.0  ;;  %vm7192_vm0 = vcmp.eq.s32.totalorder %v13419_v52, %v7178_v10 }
 0x5ed   : >> { %v7112_v37 = vadd.f32 %v7096_v40, %v6908_v6  ;;  %v7120_v29 = vadd.f32 %v7104_v27, %v6916_v55  ;;  %vm7200_vm1 = vcmp.eq.s32.totalorder %v13422_v11, %v7178_v10  ;;  %v7334_v63 = vrot.slane %v13245_v22, %v14867_v33 }
 0x5ee   : >> { %8879 = vmatpush1.bf16.msra.mxu1 %v8878_v5  ;;  %v14888_v61 = vmov %v14887_v58  ;;  %v7418_v51 = vrot.slane %v14887_v58, %v14867_v33  ;;  %v7522_v2 = vrot.slane %v13261_v14, %v14867_v33  ;;  %v7606_v4 = vrot.slane %v13272_v25, %v14867_v33 }
 0x5ef   : >> { %v7270_v6 = vrot.slane %v7230_v1, %v14872_v38  ;;  %v7710_v7 = vrot.slane %v13297_v9, %v14867_v33  ;;  %v7794_v3 = vrot.slane %v13292_v18, %v14867_v33  ;;  %v7898_v31 = vrot.slane %v13321_v60, %v14867_v33 }
 0x5f0   : >> { %v7366_v15 = vrot.slane %v7334_v63, %v14872_v38  ;;  %v7458_v36 = vrot.slane %v7418_v51, %v14872_v38  ;;  %v7554_v43 = vrot.slane %v7522_v2, %v14872_v38  ;;  %v7646_v55 = vrot.slane %v7606_v4, %v14872_v38 }
 0x5f1   : >> { %8815 = vmatmul.mubr.msk.f32.vlgmr.msra.gmra.mrb[0].mxu1 %vm1937_vm14, %v13658_v35  ;;  %v7284_v5 = vsel %vm7192_vm0, %v7270_v6, 0.0  ;;  %v7292_v40 = vsel %vm7200_vm1, %v7270_v6, 0.0  ;;  %v7742_v27 = vrot.slane %v7710_v7, %v14872_v38  ;;  %v7834_v1 = vrot.slane %v7794_v3, %v14872_v38 }
 0x5f2   : >> { %v7300_v63 = vadd.f32 %v7284_v5, %v7112_v37  ;;  %v7308_v58 = vadd.f32 %v7292_v40, %v7120_v29  ;;  %vm7380_vm2 = vcmp.eq.s32.totalorder %v13419_v52, %v7366_v15  ;;  %vm7388_vm3 = vcmp.eq.s32.totalorder %v13422_v11, %v7366_v15  ;;  %v14890_v29 = vld [vmem:[#allocation51_spill] sm:$0xff] }
 0x5f3   : >> { %v14889_v51 = vmov 0.0   ;;  %v7472_v2 = vsel %vm7380_vm2, %v7458_v36, 0.0  ;;  %v7480_v4 = vsel %vm7388_vm3, %v7458_v36, 0.0  ;;  %vm7568_vm4 = vcmp.eq.s32.totalorder %v13419_v52, %v7554_v43 }
 0x5f4   : >> { %8536 = vmatprep.mubr.f32.mxu1 %v14889_v51  ;;  %vm7576_vm5 = vcmp.eq.s32.totalorder %v13422_v11, %v7554_v43  ;;  %v7488_v10 = vadd.f32 %v7472_v2, %v7300_v63  ;;  %v7496_v6 = vadd.f32 %v7480_v4, %v7308_v58  ;;  %v7660_v8 = vsel %vm7568_vm4, %v7646_v55, 0.0 }
 0x5f5   : >> { %v7668_v7 = vsel %vm7576_vm5, %v7646_v55, 0.0  ;;  %vm7756_vm6 = vcmp.eq.s32.totalorder %v13419_v52, %v7742_v27  ;;  %vm7764_vm7 = vcmp.eq.s32.totalorder %v13422_v11, %v7742_v27  ;;  %v7930_v37 = vrot.slane %v7898_v31, %v14872_v38  ;;  %v14891_v55 = vld [vmem:[#allocation59_spill] sm:$0xff]  ;;  %v14893_v31 = vld [vmem:[#allocation57_spill] sm:$0xff] }
 0x5f6   : >> { %v7982_v3 = vrot.slane %v14890_v29, %v14867_v33  ;;  %v7676_v15 = vadd.f32 %v7660_v8, %v7488_v10  ;;  %v7684_v5 = vadd.f32 %v7668_v7, %v7496_v6  ;;  %v7848_v36 = vsel %vm7756_vm6, %v7834_v1, 0.0  ;;  %v14896_v7 = vld [vmem:[#allocation18_spill] sm:$0xff] }
 0x5f7   : >> { %v7856_v40 = vsel %vm7764_vm7, %v7834_v1, 0.0  ;;  %vm7944_vm8 = vcmp.eq.s32.totalorder %v13419_v52, %v7930_v37  ;;  %vm7952_vm9 = vcmp.eq.s32.totalorder %v13422_v11, %v7930_v37  ;;  %v14892_v63 = vmov %v14891_v55 }
 0x5f8   : >> { %v8022_v43 = vrot.slane %v7982_v3, %v14872_v38  ;;  %v8086_v58 = vrot.slane %v14891_v55, %v14867_v33  ;;  %v7864_v51 = vadd.f32 %v7848_v36, %v7676_v15  ;;  %v7872_v27 = vadd.f32 %v7856_v40, %v7684_v5  ;;  %v14897_v36 = vld [vmem:[#allocation28_spill] sm:$0xff] }
 0x5f9   : >> { %v14894_v2 = vmov %v14893_v31  ;;  %v8170_v4 = vrot.slane %v14893_v31, %v14867_v33  ;;  %v6778_v8 = vrot.slane %v14895_v12, %v14867_v33  ;;  %v6862_v37 = vrot.slane %v14896_v7, %v14867_v33 }
 0x5fa   : >> { %v8036_v10 = vsel %vm7944_vm8, %v8022_v43, 0.0  ;;  %v8044_v6 = vsel %vm7952_vm9, %v8022_v43, 0.0  ;;  %v8118_v1 = vrot.slane %v8086_v58, %v14872_v38  ;;  %v14898_v40 = vmov %v14897_v36 }
 0x5fb   : >> { %v8052_v13 = vadd.f32 %v8036_v10, %v7864_v51  ;;  %v8060_v3 = vadd.f32 %v8044_v6, %v7872_v27  ;;  %v8210_v16 = vrot.slane %v8170_v4, %v14872_v38  ;;  %v6810_v15 = vrot.slane %v6778_v8, %v14872_v38  ;;  %v14899_v10 = vld [vmem:[#allocation22_spill] sm:$0xff] }
 0x5fc   : >> { %vm8132_vm10 = vcmp.eq.s32.totalorder %v13419_v52, %v8118_v1  ;;  %vm8140_vm11 = vcmp.eq.s32.totalorder %v13422_v11, %v8118_v1  ;;  %v6902_v5 = vrot.slane %v6862_v37, %v14872_v38  ;;  %v6966_v43 = vrot.slane %v14897_v36, %v14867_v33  ;;  %v14901_v37 = vld [vmem:[#allocation30_spill] sm:$0xff]  ;;  %v14902_v36 = vld [vmem:[#allocation32_spill] sm:$0xff] }
 0x5fd   : >> { %v8224_v55 = vsel %vm8132_vm10, %v8210_v16, 0.0  ;;  %v8232_v58 = vsel %vm8140_vm11, %v8210_v16, 0.0  ;;  %vm6818_vm12 = vcmp.eq.s32.totalorder %v13419_v52, %v6810_v15  ;;  %vm6826_vm13 = vcmp.eq.s32.totalorder %v13422_v11, %v6810_v15  ;;  %v14906_v15 = vld [vmem:[#allocation40_spill] sm:$0xff] }
 0x5fe   : >> { %v8240_v51 = vadd.f32 %v8224_v55, %v8052_v13  ;;  %v8248_v27 = vadd.f32 %v8232_v58, %v8060_v3  ;;  %v6910_v31 = vsel %vm6818_vm12, %v6902_v5, 0.0  ;;  %v6918_v4 = vsel %vm6826_vm13, %v6902_v5, 0.0  ;;  %v14905_v13 = vld [vmem:[#allocation36_spill] sm:$0xff] }
 0x5ff   : >> { %v6998_v8 = vrot.slane %v6966_v43, %v14872_v38  ;;  %v14900_v6 = vmov %v14899_v10  ;;  %v7050_v1 = vrot.slane %v14899_v10, %v14867_v33  ;;  %v7154_v17 = vrot.slane %v14901_v37, %v14867_v33 }
 0x600   : >> { %v14903_v19 = vmov %v14902_v36  ;;  %v7238_v20 = vrot.slane %v14902_v36, %v14867_v33  ;;  %v8880_v16 = vpack.c.bf16 %v8248_v27, %v8240_v51  ;;  %v7342_v24 = vrot.slane %v14904_v21, %v14867_v33 }
 0x601   : >> { %v7426_v3 = vrot.slane %v14905_v13, %v14867_v33  ;;  %v7530_v5 = vrot.slane %v14906_v15, %v14867_v33  ;;  %vm7006_vm15 = vcmp.eq.s32.totalorder %v13419_v52, %v6998_v8  ;;  %vm7014_vm0 = vcmp.eq.s32.totalorder %v13422_v11, %v6998_v8 }
 0x602   : >> { %v7090_v43 = vrot.slane %v7050_v1, %v14872_v38  ;;  %v7186_v55 = vrot.slane %v7154_v17, %v14872_v38  ;;  %8881 = vmatprep.subr.bf16.mxu0 %v8880_v16  ;;  %v7278_v58 = vrot.slane %v7238_v20, %v14872_v38  ;;  %v7374_v51 = vrot.slane %v7342_v24, %v14872_v38 }
 0x603   : >> { %v7466_v27 = vrot.slane %v7426_v3, %v14872_v38  ;;  %v7562_v10 = vrot.slane %v7530_v5, %v14872_v38  ;;  %v14907_v3 = vld [vmem:[#allocation43_spill] sm:$0xff] }
 0x604   : >> { %v7098_v36 = vsel %vm7006_vm15, %v7090_v43, 0.0  ;;  %v7106_v28 = vsel %vm7014_vm0, %v7090_v43, 0.0  ;;  %vm7194_vm1 = vcmp.eq.s32.totalorder %v13419_v52, %v7186_v55  ;;  %vm7202_vm2 = vcmp.eq.s32.totalorder %v13422_v11, %v7186_v55  ;;  %v14911_v55 = vld [vmem:[#allocation53_spill] sm:$0xff] }
 0x605   : >> { %v7114_v8 = vadd.f32 %v7098_v36, %v6910_v31  ;;  %v7122_v30 = vadd.f32 %v7106_v28, %v6918_v4  ;;  %v7286_v1 = vsel %vm7194_vm1, %v7278_v58, 0.0  ;;  %v7294_v34 = vsel %vm7202_vm2, %v7278_v58, 0.0  ;;  %v14908_v31 = vld [vmem:[#allocation48_spill] sm:$0xff]  ;;  %v14910_v4 = vld [vmem:[#allocation47_spill] sm:$0xff] }
 0x606   : >> { %vm7382_vm3 = vcmp.eq.s32.totalorder %v13419_v52, %v7374_v51  ;;  %vm7390_vm4 = vcmp.eq.s32.totalorder %v13422_v11, %v7374_v51  ;;  %vm7570_vm5 = vcmp.eq.s32.totalorder %v13419_v52, %v7562_v10  ;;  %vm7578_vm6 = vcmp.eq.s32.totalorder %v13422_v11, %v7562_v10 }
 0x607   : >> { %v7302_v20 = vadd.f32 %v7286_v1, %v7114_v8  ;;  %v7310_v24 = vadd.f32 %v7294_v34, %v7122_v30  ;;  %v7474_v17 = vsel %vm7382_vm3, %v7466_v27, 0.0  ;;  %v7482_v16 = vsel %vm7390_vm4, %v7466_v27, 0.0  ;;  %v14914_v30 = vld [vmem:[#allocation61_spill] sm:$0xff] }
 0x608   : >> { %v7614_v5 = vrot.slane %v14907_v3, %v14867_v33  ;;  %v14909_v39 = vmov %v14908_v31  ;;  %v7718_v28 = vrot.slane %v14908_v31, %v14867_v33  ;;  %v7802_v43 = vrot.slane %v14910_v4, %v14867_v33 }
 0x609   : >> { %v14912_v41 = vmov %v14911_v55  ;;  %v7906_v58 = vrot.slane %v14911_v55, %v14867_v33  ;;  %v7490_v51 = vadd.f32 %v7474_v17, %v7302_v20  ;;  %v7498_v36 = vadd.f32 %v7482_v16, %v7310_v24  ;;  %v14915_v20 = vld [vmem:[#allocation58_spill] sm:$0xff] }
 0x60a   : >> { %v7990_v8 = vrot.slane %v14913_v42, %v14867_v33  ;;  %v8094_v34 = vrot.slane %v14914_v30, %v14867_v33  ;;  %v7654_v27 = vrot.slane %v7614_v5, %v14872_v38  ;;  %v7750_v1 = vrot.slane %v7718_v28, %v14872_v38 }
 0x60b   : >> { %v7842_v31 = vrot.slane %v7802_v43, %v14872_v38  ;;  %v7938_v44 = vrot.slane %v7906_v58, %v14872_v38  ;;  %v8178_v24 = vrot.slane %v14915_v20, %v14867_v33  ;;  %v6766_v17 = vrot.slane %v14881_v26, %v14872_v38 }
 0x60c   : >> { %v8030_v45 = vrot.slane %v7990_v8, %v14872_v38  ;;  %v8126_v55 = vrot.slane %v8094_v34, %v14872_v38  ;;  %v7662_v16 = vsel %vm7570_vm5, %v7654_v27, 0.0  ;;  %v7670_v5 = vsel %vm7578_vm6, %v7654_v27, 0.0 }
 0x60d   : >> { %vm7758_vm7 = vcmp.eq.s32.totalorder %v13419_v52, %v7750_v1  ;;  %vm7766_vm8 = vcmp.eq.s32.totalorder %v13422_v11, %v7750_v1  ;;  %v7678_v28 = vadd.f32 %v7662_v16, %v7490_v51  ;;  %v7686_v43 = vadd.f32 %v7670_v5, %v7498_v36 }
 0x60e   : >> { %v7850_v58 = vsel %vm7758_vm7, %v7842_v31, 0.0  ;;  %v7858_v8 = vsel %vm7766_vm8, %v7842_v31, 0.0  ;;  %vm7946_vm9 = vcmp.eq.s32.totalorder %v13419_v52, %v7938_v44  ;;  %vm7954_vm10 = vcmp.eq.s32.totalorder %v13422_v11, %v7938_v44 }
 0x60f   : >> { %vm8134_vm11 = vcmp.eq.s32.totalorder %v13419_v52, %v8126_v55  ;;  %vm8142_vm12 = vcmp.eq.s32.totalorder %v13422_v11, %v8126_v55  ;;  %v7866_v33 = vadd.f32 %v7850_v58, %v7678_v28  ;;  %v7874_v34 = vadd.f32 %v7858_v8, %v7686_v43 }
 0x610   : >> { %v8038_v10 = vsel %vm7946_vm9, %v8030_v45, 0.0  ;;  %v8046_v27 = vsel %vm7954_vm10, %v8030_v45, 0.0  ;;  %v8218_v26 = vrot.slane %v8178_v24, %v14872_v38  ;;  %v6798_v1 = vrot.slane %v6766_v17, %v14872_v38 }
 0x611   : >> { %v6850_v51 = vrot.slane %v14882_v47, %v14872_v38  ;;  %v6954_v36 = vrot.slane %v13179_v32, %v14872_v38  ;;  %v8054_v31 = vadd.f32 %v8038_v10, %v7866_v33  ;;  %v8062_v44 = vadd.f32 %v8046_v27, %v7874_v34 }
 0x612   : >> { %v7038_v16 = vrot.slane %v14884_v49, %v14872_v38  ;;  %v7142_v55 = vrot.slane %v14885_v23, %v14872_v38  ;;  %v8226_v5 = vsel %vm8134_vm11, %v8218_v26, 0.0  ;;  %v8234_v45 = vsel %vm8142_vm12, %v8218_v26, 0.0 }
 0x613   : >> { %vm6815_vm13 = vcmp.eq.s32.totalorder %v13419_v52, %v6798_v1  ;;  %vm6823_vm15 = vcmp.eq.s32.totalorder %v13422_v11, %v6798_v1  ;;  %v8242_v24 = vadd.f32 %v8226_v5, %v8054_v31  ;;  %v8250_v17 = vadd.f32 %v8234_v45, %v8062_v44 }
 0x614   : >> { %v6890_v28 = vrot.slane %v6850_v51, %v14872_v38  ;;  %v6986_v43 = vrot.slane %v6954_v36, %v14872_v38  ;;  %v7078_v58 = vrot.slane %v7038_v16, %v14872_v38  ;;  %v7174_v8 = vrot.slane %v7142_v55, %v14872_v38 }
 0x615   : >> { %v7226_v33 = vrot.slane %v14886_v0, %v14872_v38  ;;  %v7330_v26 = vrot.slane %v13245_v22, %v14872_v38  ;;  %v8884_v34 = vpack.c.bf16 %v8250_v17, %v8242_v24  ;;  %v7414_v55 = vrot.slane %v14888_v61, %v14872_v38 }
 0x616   : >> { %v6907_v10 = vsel %vm6815_vm13, %v6890_v28, 0.0  ;;  %v6915_v27 = vsel %vm6823_vm15, %v6890_v28, 0.0  ;;  %vm7003_vm0 = vcmp.eq.s32.totalorder %v13419_v52, %v6986_v43  ;;  %vm7011_vm1 = vcmp.eq.s32.totalorder %v13422_v11, %v6986_v43 }
 0x617   : >> { %v7095_v1 = vsel %vm7003_vm0, %v7078_v58, 0.0  ;;  %vm7191_vm2 = vcmp.eq.s32.totalorder %v13419_v52, %v7174_v8  ;;  %vm7199_vm3 = vcmp.eq.s32.totalorder %v13422_v11, %v7174_v8  ;;  %8885 = vmatprep.subr.bf16.mxu1 %v8884_v34  ;;  %v7103_v51 = vsel %vm7011_vm1, %v7078_v58, 0.0 }
 0x618   : >> { %v7111_v36 = vadd.f32 %v7095_v1, %v6907_v10  ;;  %v7266_v31 = vrot.slane %v7226_v33, %v14872_v38  ;;  %v7362_v44 = vrot.slane %v7330_v26, %v14872_v38  ;;  %v7119_v16 = vadd.f32 %v7103_v51, %v6915_v27 }
 0x619   : >> { %v7518_v5 = vrot.slane %v13261_v14, %v14872_v38  ;;  %v7602_v45 = vrot.slane %v13272_v25, %v14872_v38  ;;  %v7454_v58 = vrot.slane %v7414_v55, %v14872_v38  ;;  %v7706_v26 = vrot.slane %v13297_v9, %v14872_v38 }
 0x61a   : >> { %v7283_v24 = vsel %vm7191_vm2, %v7266_v31, 0.0  ;;  %v7291_v17 = vsel %vm7199_vm3, %v7266_v31, 0.0  ;;  %vm7379_vm4 = vcmp.eq.s32.totalorder %v13419_v52, %v7362_v44  ;;  %vm7387_vm5 = vcmp.eq.s32.totalorder %v13422_v11, %v7362_v44 }
 0x61b   : >> { %v7299_v28 = vadd.f32 %v7283_v24, %v7111_v36  ;;  %v7307_v43 = vadd.f32 %v7291_v17, %v7119_v16  ;;  %v7550_v8 = vrot.slane %v7518_v5, %v14872_v38  ;;  %v7642_v33 = vrot.slane %v7602_v45, %v14872_v38 }
 0x61c   : >> { %v7790_v34 = vrot.slane %v13292_v18, %v14872_v38  ;;  %v7894_v10 = vrot.slane %v13321_v60, %v14872_v38  ;;  %v7471_v27 = vsel %vm7379_vm4, %v7454_v58, 0.0  ;;  %v7479_v1 = vsel %vm7387_vm5, %v7454_v58, 0.0 }
 0x61d   : >> { %vm7567_vm6 = vcmp.eq.s32.totalorder %v13419_v52, %v7550_v8  ;;  %vm7575_vm7 = vcmp.eq.s32.totalorder %v13422_v11, %v7550_v8  ;;  %v7487_v51 = vadd.f32 %v7471_v27, %v7299_v28  ;;  %v7495_v36 = vadd.f32 %v7479_v1, %v7307_v43 }
 0x61e   : >> { %v7659_v31 = vsel %vm7567_vm6, %v7642_v33, 0.0  ;;  %v7667_v44 = vsel %vm7575_vm7, %v7642_v33, 0.0  ;;  %v7738_v16 = vrot.slane %v7706_v26, %v14872_v38  ;;  %v7830_v55 = vrot.slane %v7790_v34, %v14872_v38 }
 0x61f   : >> { %v7926_v5 = vrot.slane %v7894_v10, %v14872_v38  ;;  %v7978_v45 = vrot.slane %v14890_v29, %v14872_v38  ;;  %v7675_v24 = vadd.f32 %v7659_v31, %v7487_v51  ;;  %v7683_v17 = vadd.f32 %v7667_v44, %v7495_v36 }
 0x620   : >> { %v8082_v58 = vrot.slane %v14892_v63, %v14872_v38  ;;  %v8166_v28 = vrot.slane %v14894_v2, %v14872_v38  ;;  %vm7755_vm8 = vcmp.eq.s32.totalorder %v13419_v52, %v7738_v16  ;;  %vm7763_vm9 = vcmp.eq.s32.totalorder %v13422_v11, %v7738_v16 }
 0x621   : >> { %vm7943_vm10 = vcmp.eq.s32.totalorder %v13419_v52, %v7926_v5  ;;  %vm7951_vm11 = vcmp.eq.s32.totalorder %v13422_v11, %v7926_v5  ;;  %v7847_v43 = vsel %vm7755_vm8, %v7830_v55, 0.0  ;;  %v7855_v8 = vsel %vm7763_vm9, %v7830_v55, 0.0 }
 0x622   : >> { %v8018_v33 = vrot.slane %v7978_v45, %v14872_v38  ;;  %v8114_v26 = vrot.slane %v8082_v58, %v14872_v38  ;;  %v7863_v34 = vadd.f32 %v7847_v43, %v7675_v24  ;;  %v7871_v10 = vadd.f32 %v7855_v8, %v7683_v17 }
 0x623   : >> { %v8206_v27 = vrot.slane %v8166_v28, %v14872_v38  ;;  %v6774_v1 = vrot.slane %v14895_v12, %v14872_v38  ;;  %v6858_v45 = vrot.slane %v14896_v7, %v14872_v38  ;;  %v6962_v24 = vrot.slane %v14898_v40, %v14872_v38 }
 0x624   : >> { %v8035_v51 = vsel %vm7943_vm10, %v8018_v33, 0.0  ;;  %v8043_v36 = vsel %vm7951_vm11, %v8018_v33, 0.0  ;;  %vm8131_vm12 = vcmp.eq.s32.totalorder %v13419_v52, %v8114_v26  ;;  %vm8139_vm13 = vcmp.eq.s32.totalorder %v13422_v11, %v8114_v26 }
 0x625   : >> { %v8051_v31 = vadd.f32 %v8035_v51, %v7863_v34  ;;  %v8059_v44 = vadd.f32 %v8043_v36, %v7871_v10  ;;  %v8223_v16 = vsel %vm8131_vm12, %v8206_v27, 0.0  ;;  %v8231_v55 = vsel %vm8139_vm13, %v8206_v27, 0.0 }
 0x626   : >> { %v6806_v5 = vrot.slane %v6774_v1, %v14872_v38  ;;  %v7046_v17 = vrot.slane %v14900_v6, %v14872_v38  ;;  %v7150_v43 = vrot.slane %v14901_v37, %v14872_v38  ;;  %v7234_v8 = vrot.slane %v14903_v19, %v14872_v38 }
 0x627   : >> { %v8239_v58 = vadd.f32 %v8223_v16, %v8051_v31  ;;  %v8247_v28 = vadd.f32 %v8231_v55, %v8059_v44  ;;  %v6898_v33 = vrot.slane %v6858_v45, %v14872_v38  ;;  %v6994_v26 = vrot.slane %v6962_v24, %v14872_v38 }
 0x628   : >> { %vm6817_vm15 = vcmp.eq.s32.totalorder %v13419_v52, %v6806_v5  ;;  %vm6825_vm0 = vcmp.eq.s32.totalorder %v13422_v11, %v6806_v5  ;;  %v7086_v10 = vrot.slane %v7046_v17, %v14872_v38  ;;  %v7182_v27 = vrot.slane %v7150_v43, %v14872_v38 }
 0x629   : >> { %v8882_v34 = vpack.c.bf16 %v8247_v28, %v8239_v58  ;;  %v7274_v1 = vrot.slane %v7234_v8, %v14872_v38  ;;  %v6909_v51 = vsel %vm6817_vm15, %v6898_v33, 0.0  ;;  %v6917_v36 = vsel %vm6825_vm0, %v6898_v33, 0.0 }
 0x62a   : >> { %vm7005_vm1 = vcmp.eq.s32.totalorder %v13419_v52, %v6994_v26  ;;  %vm7013_vm2 = vcmp.eq.s32.totalorder %v13422_v11, %v6994_v26  ;;  %vm7193_vm3 = vcmp.eq.s32.totalorder %v13419_v52, %v7182_v27  ;;  %vm7201_vm4 = vcmp.eq.s32.totalorder %v13422_v11, %v7182_v27 }
 0x62b   : >> { %8883 = vmatpush1.bf16.msra.mxu0 %v8882_v34  ;;  %v7097_v31 = vsel %vm7005_vm1, %v7086_v10, 0.0  ;;  %v7105_v44 = vsel %vm7013_vm2, %v7086_v10, 0.0  ;;  %v7285_v5 = vsel %vm7193_vm3, %v7274_v1, 0.0  ;;  %v7293_v45 = vsel %vm7201_vm4, %v7274_v1, 0.0 }
 0x62c   : >> { %v7113_v16 = vadd.f32 %v7097_v31, %v6909_v51  ;;  %v7121_v55 = vadd.f32 %v7105_v44, %v6917_v36  ;;  %v7338_v24 = vrot.slane %v14904_v21, %v14872_v38  ;;  %v7422_v17 = vrot.slane %v14905_v13, %v14872_v38 }
 0x62d   : >> { %v7526_v58 = vrot.slane %v14906_v15, %v14872_v38  ;;  %v7610_v28 = vrot.slane %v14907_v3, %v14872_v38  ;;  %v7714_v33 = vrot.slane %v14909_v39, %v14872_v38  ;;  %v7798_v26 = vrot.slane %v14910_v4, %v14872_v38 }
 0x62e   : >> { %v7301_v43 = vadd.f32 %v7285_v5, %v7113_v16  ;;  %v7309_v8 = vadd.f32 %v7293_v45, %v7121_v55  ;;  %8816 = vmatmul.mubr.msk.f32.vlgmr.msra.gmra.mrb[2].mxu0 %vm1937_vm14, %v13658_v35  ;;  %v7370_v34 = vrot.slane %v7338_v24, %v14872_v38  ;;  %v7462_v10 = vrot.slane %v7422_v17, %v14872_v38 }
 0x62f   : >> { %v7558_v27 = vrot.slane %v7526_v58, %v14872_v38  ;;  %v7650_v1 = vrot.slane %v7610_v28, %v14872_v38  ;;  %v7746_v51 = vrot.slane %v7714_v33, %v14872_v38  ;;  %v7838_v36 = vrot.slane %v7798_v26, %v14872_v38 }
 0x630   : >> { %v7902_v31 = vrot.slane %v14912_v41, %v14872_v38  ;;  %v7986_v44 = vrot.slane %v14913_v42, %v14872_v38  ;;  %vm7381_vm5 = vcmp.eq.s32.totalorder %v13419_v52, %v7370_v34  ;;  %vm7389_vm6 = vcmp.eq.s32.totalorder %v13422_v11, %v7370_v34 }
 0x631   : >> { %vm7569_vm7 = vcmp.eq.s32.totalorder %v13419_v52, %v7558_v27  ;;  %vm7577_vm8 = vcmp.eq.s32.totalorder %v13422_v11, %v7558_v27  ;;  %v7473_v16 = vsel %vm7381_vm5, %v7462_v10, 0.0  ;;  %v7481_v55 = vsel %vm7389_vm6, %v7462_v10, 0.0 }
 0x632   : >> { %v7661_v5 = vsel %vm7569_vm7, %v7650_v1, 0.0  ;;  %v7669_v45 = vsel %vm7577_vm8, %v7650_v1, 0.0  ;;  %v7489_v24 = vadd.f32 %v7473_v16, %v7301_v43  ;;  %v7497_v17 = vadd.f32 %v7481_v55, %v7309_v8 }
 0x633   : >> { %vm7757_vm9 = vcmp.eq.s32.totalorder %v13419_v52, %v7746_v51  ;;  %vm7765_vm10 = vcmp.eq.s32.totalorder %v13422_v11, %v7746_v51  ;;  %v7934_v33 = vrot.slane %v7902_v31, %v14872_v38  ;;  %v8026_v26 = vrot.slane %v7986_v44, %v14872_v38 }
 0x634   : >> { %v7849_v58 = vsel %vm7757_vm9, %v7838_v36, 0.0  ;;  %v7857_v28 = vsel %vm7765_vm10, %v7838_v36, 0.0  ;;  %v7677_v34 = vadd.f32 %v7661_v5, %v7489_v24  ;;  %v7685_v0 = vadd.f32 %v7669_v45, %v7497_v17 }
 0x635   : >> { %v8090_v27 = vrot.slane %v14914_v30, %v14872_v38  ;;  %v8174_v10 = vrot.slane %v14915_v20, %v14872_v38  ;;  %vm7945_vm11 = vcmp.eq.s32.totalorder %v13419_v52, %v7934_v33  ;;  %vm7953_vm12 = vcmp.eq.s32.totalorder %v13422_v11, %v7934_v33 }
 0x636   : >> { %v7865_v43 = vadd.f32 %v7849_v58, %v7677_v34  ;;  %v7873_v8 = vadd.f32 %v7857_v28, %v7685_v0  ;;  %v8037_v1 = vsel %vm7945_vm11, %v8026_v26, 0.0  ;;  %v8045_v51 = vsel %vm7953_vm12, %v8026_v26, 0.0  ;;  %v14916_v58 = vld [vmem:[#allocation96_spill] sm:$0xff] }
 0x637   : >> { %v8122_v36 = vrot.slane %v8090_v27, %v14872_v38  ;;  %v8214_v31 = vrot.slane %v8174_v10, %v14872_v38  ;;  %v14917_v38 = vld [vmem:[#allocation95_spill] sm:$0xff]  ;;  %v14918_v27 = vld [vmem:[#allocation94_spill] sm:$0xff] }
 0x638   : >> { %v8053_v44 = vadd.f32 %v8037_v1, %v7865_v43  ;;  %v8061_v16 = vadd.f32 %v8045_v51, %v7873_v8  ;;  %v14920_v1 = vld [vmem:[#allocation92_spill] sm:$0xff] }
 0x639   : >> { %vm8133_vm13 = vcmp.eq.s32.totalorder %v13419_v52, %v8122_v36  ;;  %vm8141_vm15 = vcmp.eq.s32.totalorder %v13422_v11, %v8122_v36  ;;  %v14919_v11 = vld [vmem:[#allocation93_spill] sm:$0xff] }
 0x63a   : >> { %v8225_v55 = vsel %vm8133_vm13, %v8214_v31, 0.0  ;;  %v8233_v5 = vsel %vm8141_vm15, %v8214_v31, 0.0  ;;  %v14921_v31 = vld [vmem:[#allocation91_spill] sm:$0xff] }
 0x63b   : >> { %v8241_v45 = vadd.f32 %v8225_v55, %v8053_v44  ;;  %v8249_v24 = vadd.f32 %v8233_v5, %v8061_v16 }
 0x63d   : >> { %v8886_v17 = vpack.c.bf16 %v8249_v24, %v8241_v45  ;;  %v14923_v45 = vld [vmem:[#allocation89_spill] sm:$0xff] }
 0x63f   : >> { %8887 = vmatpush1.bf16.msra.mxu1 %v8886_v17 }
 0x642   : >> { %8817 = vmatmul.mubr.msk.f32.vlgmr.msra.gmra.mrb[2].mxu1 %vm1937_vm14, %v13658_v35  ;;  %v14922_v35 = vld [vmem:[#allocation90_spill] sm:$0xff] }
 0x6b8   : >> { %v8325_v0 = vpop.f32.mrb[0].mxu0 }
 0x6b9   : >> { %v8543_v28 = vadd.f32 %v14916_v58, %v8325_v0   ;;  %v8327_v33 = vpop.f32.mrb[1].mxu0 }
 0x6ba   : >> { %v8544_v26 = vadd.f32 %v14917_v38, %v8327_v33  }
 0x6bb   : >> { %v14931_v58 = vmov %v8543_v28  ;;  %v8559_v17 = vrot.slane (%p6731_p0), %v8543_v28, 2 }
 0x6bc   : > { %v8560_v0 = vrot.slane (%p6731_p0), %v8544_v26, 2 }
 0x6bd   : > { %8575 = vst [vmem:[%s10154_s28] sm:$0xc0] (%p6731_p0), %v8559_v17 }
 0x6be   : > { %8576 = vst [vmem:[%s10154_s28 + $0x8] sm:$0xc0] (%p6731_p0), %v8560_v0 }
 0x6c4   : >> { %v8396_v34 = vpop.f32.mrb[0].mxu1 }
 0x6c5   : >> { %v8545_v52 = vadd.f32 %v14918_v27, %v8396_v34   ;;  %v8398_v10 = vpop.f32.mrb[1].mxu1 }
 0x6c6   : >> { %v8546_v8 = vadd.f32 %v14919_v11, %v8398_v10  }
 0x6c7   : >> { %v14929_v27 = vmov %v8545_v52  ;;  %v8561_v58 = vrot.slane (%p6731_p0), %v8545_v52, 2 }
 0x6c8   : > { %v8562_v33 = vrot.slane (%p6731_p0), %v8546_v8, 2 }
 0x6c9   : > { %8577 = vst [vmem:[%s10154_s28 + $0x10] sm:$0xc0] (%p6731_p0), %v8561_v58 }
 0x6ca   : > { %8578 = vst [vmem:[%s10154_s28 + $0x18] sm:$0xc0] (%p6731_p0), %v8562_v33 }
 0x701   : >> { %v8467_v43 = vpop.f32.mrb[2].mxu0 }
 0x702   : >> { %v8547_v51 = vadd.f32 %v14920_v1, %v8467_v43   ;;  %v8469_v36 = vpop.f32.mrb[3].mxu0  ;;  %v14928_v43 = vmov %v8546_v8 }
 0x703   : >> { %v8548_v44 = vadd.f32 %v14921_v31, %v8469_v36   ;;  %v14930_v36 = vmov %v8544_v26 }
 0x704   : >> { %v14927_v10 = vmov %v8547_v51  ;;  %v8563_v34 = vrot.slane (%p6731_p0), %v8547_v51, 2 }
 0x705   : > { %v8564_v11 = vrot.slane (%p6731_p0), %v8548_v44, 2 }
 0x706   : > { %8579 = vst [vmem:[%s10154_s28 + $0x20] sm:$0xc0] (%p6731_p0), %v8563_v34 }
 0x707   : > { %8580 = vst [vmem:[%s10154_s28 + $0x28] sm:$0xc0] (%p6731_p0), %v8564_v11 }
 0x713   : > { %6733 = sbr.rel (!%p6731_p0) target bundleno = 1423 (0x58f), region = 128 }
 0x715   : >> { %v8538_v16 = vpop.f32.mrb[2].mxu1 }
 0x716   : >> { %v8549_v5 = vadd.f32 %v14922_v35, %v8538_v16   ;;  %v8540_v55 = vpop.f32.mrb[3].mxu1 }
 0x717   : >> { %v8550_v24 = vadd.f32 %v14923_v45, %v8540_v55   ;;  %v14926_v55 = vmov %v8548_v44 }
 0x718   : >> { %v14925_v31 = vmov %v8549_v5  ;;  %v8565_v1 = vrot.slane (%p6731_p0), %v8549_v5, 2 }
 0x719   : >> { %v14924_v38 = vmov %v8550_v24  ;;  %v8566_v53 = vrot.slane (%p6731_p0), %v8550_v24, 2 }
 0x71a   : > { %8581 = vst [vmem:[%s10154_s28 + $0x30] sm:$0xc0] %v8565_v1 }
 0x71b   : > { %8582 = vst [vmem:[%s10154_s28 + $0x38] sm:$0xc0] %v8566_v53 }
 0x71c   : > { %9296 = shalt.err (!%p9293_p9)
}
 0x71d   : > { %s9297_s21 = scalar_lea.hbm %s13982_s17, 1024  ;;  %s9301_s29 = scalar_lea.hbm %s14037_s2, 2048 }
 0x71e   : > { %p9298_p10 = scmp.ne.s32.totalorder %s13982_s17, %s9297_s21  ;;  %p9302_p13 = scmp.lt.u32.totalorder %s13982_s17, %s14037_s2 }
 0x71f   : > { %p9303_p0 = scmp.lt.u32.totalorder %s9301_s29, %s9297_s21  ;;  %p9305_p2 = scmp.lt.u32.totalorder %s9297_s21, %s13982_s17 }
 0x720   : > { %p9299_p11 = pnand %p9298_p10, %p9693_p5 }
 0x721   : > { %p9304_p1 = por %p9303_p0, %p9302_p13 }
 0x722   : > { %p9300_p12 = pneg %p9299_p11 }
 0x723   : > { %p9306_p3 = por %p9305_p2, %p9304_p1 }
 0x725   : > { %p9307_p4 = pnand %p9306_p3, %p9300_p12 }
 0x727   : > { %9310 = shalt.err (!%p9307_p4)
}
 0x728   : > { %8952 = dma.vmem_to_hbm [thread:$0]  (%p9693_p5), %s13989_s22, 1024, %s13982_s17, %s8584_s13  }
 0x729 PF: > { %p8958_p7 = scmp.ge.s32.totalorder %s9489_s12, 2  ;;  %s8610_s4 = sand.u32 1, %s9477_s9  }
 0x72a   : > { %s8611_s5 = scalar_lea.sflag [#allocation3], %s8610_s4 }
 0x72b   : > { %p8955_p8 = pnand %p8958_p7, %p9697_p6 }
 0x72d   : > { %9472 = dma.done.wait (!%p8955_p8), %s8611_s5, 1024  }
 0x72e   : > { %9474 = vsyncadd (!%p8955_p8), %s8611_s5, 4294966272  ;;  %p12_p9 = scmp.ge.s32.totalorder %s9680_s15, 4   ;;  %s14932_s9 = smov %s9481_s10 }
 0x72f   : > { %s14933_s10 = smov %s9485_s11  ;;  %s14934_s11 = smov %s9691_s18 }
 0x730   : > { %s14935_s12 = smov %s9680_s15  ;;  %14 = sbr.rel (!%p12_p9) target bundleno = 3 (0x3), region = 139 }
 0x737   :  { %8616 = vsyncpa [#allocation3], 1 }
 0x738   :  { %8618 = vsyncpa [#allocation3 + $0x1], 1 }

</bundles_post_ra>
